<compile_context>
chip_gen: v6e
topology: v6e:2x2x1
jax: 0.10.0
libtpu: 0.0.40
codegen_flags: <defaults>
</compile_context>

<pallas_src>
import functools

import jax
import jax.numpy as jnp
from jax import lax
from jax.experimental import pallas as pl
from jax.experimental.pallas import tpu as pltpu

BN_EPS = 1e-5
# Sublane-aligned placement offset of the image inside the padded VMEM scratch:
# the interior store starts at sublane offset 8 (aligned/unmasked); the 3x3 taps
# read shifted windows at offsets _PADL-1 .. _PADL+1 (unaligned reads are cheap).
_PADL = 8


def _round_up(v, m):
    return (v + m - 1) // m * m


def _padded_cols(W):
    # Image at column offset _PADL; only one halo column needed on the right;
    # total rounded to a sublane tile so the slab reshape stays layout-preserving.
    return _PADL + _round_up(W + 1, 8)


# ---------------------------------------------------------------------------
# In-kernel helpers
# ---------------------------------------------------------------------------
def _fill_padded(pad_ref, img, H, W):
    """Place `img` (H, W, C) in the scratch interior and zero only the halo
    strips the 3x3 taps read.  Columns outside [_PADL-1, _PADL+W] are never
    accumulated into the output, so they may hold stale data."""
    Wp, C = pad_ref.shape[1], pad_ref.shape[2]
    dt = pad_ref.dtype
    zrow = jnp.zeros((1, Wp, C), dt)
    pad_ref[0:1, :, :] = zrow                                   # top halo row
    pad_ref[H + 1:H + 2, :, :] = zrow                           # bottom halo row
    zcol = jnp.zeros((H, 1, C), dt)
    pad_ref[1:H + 1, _PADL - 1:_PADL, :] = zcol                 # left halo col
    pad_ref[1:H + 1, _PADL + W:_PADL + W + 1, :] = zcol         # right halo col
    pad_ref[1:H + 1, _PADL:_PADL + W, :] = img.astype(dt)       # interior


def _conv3x3_from_scratch(pad_ref, w_ref, H, W, Wp):
    """3x3 conv (stride 1, pad 1) over the padded VMEM scratch -> (H, W, Cout) f32.

    Per kh, the full padded row slab is matmul'd (the (H, Wp, Cin)->(H*Wp, Cin)
    reshape is layout-preserving since Wp % 8 == 0) and the three kw taps are
    combined with sublane-shifted elementwise adds — no per-tap relayout copies.
    """
    cin = pad_ref.shape[-1]
    cout = w_ref.shape[-1]
    acc = jnp.zeros((H, W, cout), jnp.float32)
    for kh in range(3):
        slab = pad_ref[kh:kh + H]                    # (H, Wp, Cin), leading-dim slice
        lhs = slab.reshape(H * Wp, cin)              # layout-preserving
        for kw in range(3):
            y = jnp.dot(lhs, w_ref[kh, kw], preferred_element_type=jnp.float32)
            y = y.reshape(H, Wp, cout)               # layout-preserving
            off = _PADL - 1 + kw
            acc = acc + y[:, off:off + W, :]         # cheap sublane-shifted read
    return acc


# ---------------------------------------------------------------------------
# Kernels
# ---------------------------------------------------------------------------
def _stage1_kernel(x_ref, w1_ref, w2_ref,
                   a1_ref, s1_ref, q1_ref, s3_ref, q3_ref,
                   xpad_ref, *, H, W, Wp):
    """3x3 conv (main path, pre-BN) + 1x1 conv stats (shortcut never hits HBM)."""
    cin = x_ref.shape[-1]
    x = x_ref[...]                                           # (H, W, Cin)

    _fill_padded(xpad_ref, x, H, W)
    a1 = _conv3x3_from_scratch(xpad_ref, w1_ref, H, W, Wp)   # (H, W, Cout) f32
    a1f = a1.reshape(H * W, a1.shape[-1])

    # 1x1 shortcut: only its per-image BN statistics are needed here.
    p3 = jnp.dot(x.reshape(H * W, cin), w2_ref[...],
                 preferred_element_type=jnp.float32)

    a1_ref[...] = a1f.astype(a1_ref.dtype)
    # Stats from the f32 accumulators (stay f32 even when activations are bf16).
    s1_ref[...] = jnp.sum(a1f, axis=0, keepdims=True)
    q1_ref[...] = jnp.sum(a1f * a1f, axis=0, keepdims=True)
    s3_ref[...] = jnp.sum(p3, axis=0, keepdims=True)
    q3_ref[...] = jnp.sum(p3 * p3, axis=0, keepdims=True)


def _stage2_kernel(a1_ref, sc1_ref, sh1_ref, w_ref,
                   p2_ref, s2_ref, q2_ref,
                   hpad_ref, *, H, W, Wp):
    """BN1 (folded, f32) + ReLU on the fly + 3x3 conv + BN2 partial stats."""
    c1 = a1_ref.shape[-1]
    h1 = jnp.maximum(a1_ref[...].astype(jnp.float32) * sc1_ref[...] + sh1_ref[...],
                     0.0)                                    # (H*W, C1) f32
    _fill_padded(hpad_ref, h1.reshape(H, W, c1), H, W)       # downcast at the store

    p2 = _conv3x3_from_scratch(hpad_ref, w_ref, H, W, Wp)
    p2f = p2.reshape(H * W, p2.shape[-1])
    p2_ref[...] = p2f.astype(p2_ref.dtype)
    s2_ref[...] = jnp.sum(p2f, axis=0, keepdims=True)
    q2_ref[...] = jnp.sum(p2f * p2f, axis=0, keepdims=True)


def _stage3_kernel(x_ref, w2_ref, p2_ref, sc2_ref, sc3_ref, sh_ref, o_ref):
    """1x1 shortcut recompute + BN2/BN3 apply + residual add + final ReLU.

    Stores channels-major (Cout, H*W): fuses the NHWC->NCHW transpose and keeps
    the output store lane-dense (H*W on lanes) even for small Cout."""
    cin = x_ref.shape[-1]
    hw = p2_ref.shape[0]
    p3 = jnp.dot(x_ref[...].reshape(hw, cin), w2_ref[...],
                 preferred_element_type=jnp.float32)         # (H*W, Cout) f32
    val = jnp.maximum(
        p2_ref[...].astype(jnp.float32) * sc2_ref[...] + p3 * sc3_ref[...] + sh_ref[...],
        0.0)
    o_ref[...] = jnp.transpose(val).astype(o_ref.dtype)      # (Cout, H*W)


# ---------------------------------------------------------------------------
# Wrappers
# ---------------------------------------------------------------------------
def _compiler_params():
    # "parallel" lets megacore parts (v7x: 2 TCs) split the batch grid.
    return pltpu.CompilerParams(dimension_semantics=("parallel",))


def _stage1(x_nhwc, w1a, w2):
    N, H, W, cin = x_nhwc.shape
    cout = w1a.shape[-1]
    HW, Wp = H * W, _padded_cols(W)
    cd, f32 = x_nhwc.dtype, jnp.float32
    row3 = lambda n: (n, 0, 0)
    out_shape = (
        jax.ShapeDtypeStruct((N, HW, cout), cd),    # a1 (pre-BN main path)
        jax.ShapeDtypeStruct((N, 1, cout), f32),    # sum(a1)
        jax.ShapeDtypeStruct((N, 1, cout), f32),    # sum(a1^2)
        jax.ShapeDtypeStruct((N, 1, cout), f32),    # sum(p3)
        jax.ShapeDtypeStruct((N, 1, cout), f32),    # sum(p3^2)
    )
    return pl.pallas_call(
        functools.partial(_stage1_kernel, H=H, W=W, Wp=Wp),
        out_shape=out_shape,
        grid=(N,),
        in_specs=[
            pl.BlockSpec((None, H, W, cin), lambda n: (n, 0, 0, 0)),
            pl.BlockSpec((3, 3, cin, cout), lambda n: (0, 0, 0, 0)),
            pl.BlockSpec((cin, cout), lambda n: (0, 0)),        # w2 is 2-D here
        ],
        out_specs=[
            pl.BlockSpec((None, HW, cout), row3),
            pl.BlockSpec((None, 1, cout), row3),
            pl.BlockSpec((None, 1, cout), row3),
            pl.BlockSpec((None, 1, cout), row3),
            pl.BlockSpec((None, 1, cout), row3),
        ],
        scratch_shapes=[pltpu.VMEM((H + 2, Wp, cin), cd)],
        compiler_params=_compiler_params(),
    )(x_nhwc, w1a, w2)


def _stage2(a1, scale1, shift1, w1b, H, W):
    N, HW, c1 = a1.shape
    cout = w1b.shape[-1]
    Wp = _padded_cols(W)
    cd, f32 = a1.dtype, jnp.float32
    row3 = lambda n: (n, 0, 0)
    vec = lambda n: (0, 0)
    out_shape = (
        jax.ShapeDtypeStruct((N, HW, cout), cd),    # pre2 (pre-BN)
        jax.ShapeDtypeStruct((N, 1, cout), f32),    # sum(pre2)
        jax.ShapeDtypeStruct((N, 1, cout), f32),    # sum(pre2^2)
    )
    return pl.pallas_call(
        functools.partial(_stage2_kernel, H=H, W=W, Wp=Wp),
        out_shape=out_shape,
        grid=(N,),
        in_specs=[
            pl.BlockSpec((None, HW, c1), row3),
            pl.BlockSpec((1, c1), vec),
            pl.BlockSpec((1, c1), vec),
            pl.BlockSpec((3, 3, c1, cout), lambda n: (0, 0, 0, 0)),
        ],
        out_specs=[
            pl.BlockSpec((None, HW, cout), row3),
            pl.BlockSpec((None, 1, cout), row3),
            pl.BlockSpec((None, 1, cout), row3),
        ],
        scratch_shapes=[pltpu.VMEM((H + 2, Wp, c1), cd)],
        compiler_params=_compiler_params(),
    )(a1, scale1, shift1, w1b)


def _stage3(x_nhwc, w2, pre2, scale2, scale3, shift23):
    N, H, W, cin = x_nhwc.shape
    HW = H * W
    cout = w2.shape[-1]
    row3 = lambda n: (n, 0, 0)
    vec = lambda n: (0, 0)
    return pl.pallas_call(
        _stage3_kernel,
        out_shape=jax.ShapeDtypeStruct((N, cout, HW), jnp.float32),
        grid=(N,),
        in_specs=[
            pl.BlockSpec((None, H, W, cin), lambda n: (n, 0, 0, 0)),
            pl.BlockSpec((cin, cout), lambda n: (0, 0)),
            pl.BlockSpec((None, HW, cout), row3),
            pl.BlockSpec((1, cout), vec),
            pl.BlockSpec((1, cout), vec),
            pl.BlockSpec((1, cout), vec),
        ],
        out_specs=pl.BlockSpec((None, cout, HW), row3),
        compiler_params=_compiler_params(),
    )(x_nhwc, w2, pre2, scale2, scale3, shift23)


def _bn_fold(s, q, count, gamma, beta):
    """Fold full-batch BN (train-mode, biased var) into per-channel scale/shift."""
    mean = jnp.sum(s, axis=0) / count                 # (1, C)
    var = jnp.sum(q, axis=0) / count - mean * mean
    var = jnp.maximum(var, 0.0)                       # guard E[x^2]-E[x]^2 cancellation
    scale = gamma * lax.rsqrt(var + BN_EPS)
    shift = beta - mean * scale
    return scale, shift


def residual_block_forward(x_nchw, p, compute_dtype=jnp.float32):
    """x_nchw: (N, Cin, H, W) f32 -> (N, Cout, H, W) f32 (train-mode BN semantics).

    compute_dtype=jnp.bfloat16 halves activation/weight HBM bytes and doubles
    MXU rate on v6e/v7x; stats / BN / ReLU / accumulation stay f32."""
    N, cin, H, W = x_nchw.shape
    cout = p["w1a"].shape[-1]
    cd = compute_dtype

    # TODO(synk): read NCHW directly and transpose on-chip to drop this XLA pass.
    x = jnp.transpose(x_nchw, (0, 2, 3, 1)).astype(cd)        # NCHW -> NHWC
    w1a = p["w1a"].astype(cd)
    w1b = p["w1b"].astype(cd)
    w2 = p["w2"].reshape(cin, cout).astype(cd)                 # 1x1 weight as (Cin, Cout)

    a1, s1, q1, s3, q3 = _stage1(x, w1a, w2)
    cnt = float(N * H * W)
    scale1, shift1 = _bn_fold(s1, q1, cnt, p["g1a"], p["be1a"])
    scale3, shift3 = _bn_fold(s3, q3, cnt, p["g2"], p["be2"])

    pre2, s2, q2 = _stage2(a1, scale1, shift1, w1b, H, W)
    scale2, shift2 = _bn_fold(s2, q2, cnt, p["g1b"], p["be1b"])

    out = _stage3(x, w2, pre2, scale2, scale3, shift2 + shift3)  # (N, Cout, H*W)
    return out.reshape(N, cout, H, W)                            # free metadata reshape


# ---------------------------------------------------------------------------
# Deterministic parameter init (shapes from the module's __init__)
# ---------------------------------------------------------------------------
def init_params(key, in_c, out_c):
    ks = jax.random.split(key, 6)

    def conv_w(k, kh, kw, cin, cout):
        bound = 1.0 / (kh * kw * cin) ** 0.5          # PyTorch-style uniform bound
        return jax.random.uniform(k, (kh, kw, cin, cout), jnp.float32, -bound, bound)

    def conv_b(k, kh, kw, cin, cout):
        bound = 1.0 / (kh * kw * cin) ** 0.5
        return jax.random.uniform(k, (1, cout), jnp.float32, -bound, bound)

    ones = lambda c: jnp.ones((1, c), jnp.float32)    # BN gamma default
    zeros = lambda c: jnp.zeros((1, c), jnp.float32)  # BN beta default

    return {
        # conv1, block A: 3x3, in_c -> out_c
        "w1a": conv_w(ks[0], 3, 3, in_c, out_c),
        # Conv biases kept for module parity but NOT consumed by the kernels:
        # a per-channel constant is cancelled by train-mode BN mean subtraction.
        "b1a": conv_b(ks[1], 3, 3, in_c, out_c),
        "g1a": ones(out_c), "be1a": zeros(out_c),
        # conv1, block B: 3x3, out_c -> out_c (no act)
        "w1b": conv_w(ks[2], 3, 3, out_c, out_c),
        "b1b": conv_b(ks[3], 3, 3, out_c, out_c),
        "g1b": ones(out_c), "be1b": zeros(out_c),
        # conv2 (shortcut): 1x1, in_c -> out_c (no act)
        "w2": conv_w(ks[4], 1, 1, in_c, out_c),
        "b2": conv_b(ks[5], 1, 1, in_c, out_c),
        "g2": ones(out_c), "be2": zeros(out_c),
    }


# ---------------------------------------------------------------------------
# Pure-XLA reference (exact PyTorch forward semantics, train-mode BN, with biases)
# ---------------------------------------------------------------------------
def _reference_forward(x, p):
    dn = ("NCHW", "HWIO", "NCHW")

    def conv(v, w, b):
        y = lax.conv_general_dilated(v, w, window_strides=(1, 1), padding="SAME",
                                      dimension_numbers=dn)
        return y + b.reshape(1, -1, 1, 1)

    def bn(v, g, be):
        mean = jnp.mean(v, axis=(0, 2, 3), keepdims=True)
        var = jnp.mean(jnp.square(v - mean), axis=(0, 2, 3), keepdims=True)
        return ((v - mean) * lax.rsqrt(var + BN_EPS) * g.reshape(1, -1, 1, 1)
                + be.reshape(1, -1, 1, 1))

    h = jax.nn.relu(bn(conv(x, p["w1a"], p["b1a"]), p["g1a"], p["be1a"]))
    x1 = bn(conv(h, p["w1b"], p["b1b"]), p["g1b"], p["be1b"])
    x2 = bn(conv(x, p["w2"], p["b2"]), p["g2"], p["be2"])
    return jax.nn.relu(x1 + x2)


if __name__ == "__main__":
    key = jax.random.PRNGKey(0)
    kx, kp = jax.random.split(key)

    N, in_c, out_c, H, W = 2, 4, 8, 16, 16
    x = jax.random.normal(kx, (N, in_c, H, W), jnp.float32)   # NCHW, like PyTorch
    params = init_params(kp, in_c, out_c)

    fwd = jax.jit(residual_block_forward)
    y = jax.block_until_ready(fwd(x, params))
    assert y.shape == (N, out_c, H, W)
    assert bool(jnp.all(jnp.isfinite(y))) and bool(jnp.all(y >= 0.0))

    ref = jax.block_until_ready(jax.jit(_reference_forward)(x, params))
    err = float(jnp.max(jnp.abs(y - ref)))
    assert err < 2e-3, f"mismatch vs XLA reference: max|diff|={err:.3e}"
    print("KERNEL_OK")
</pallas_src>

<mosaic_0001>
module attributes {stable_mosaic.version = 11 : i64} {
  func.func @_stage1_kernel(%arg0: i32, %arg1: memref<1x16x16x4xf32, #tpu.memory_space<vmem>>, %arg2: memref<3x3x4x8xf32, #tpu.memory_space<vmem>>, %arg3: memref<4x8xf32, #tpu.memory_space<vmem>>, %arg4: memref<1x256x8xf32, #tpu.memory_space<vmem>>, %arg5: memref<1x1x8xf32, #tpu.memory_space<vmem>>, %arg6: memref<1x1x8xf32, #tpu.memory_space<vmem>>, %arg7: memref<1x1x8xf32, #tpu.memory_space<vmem>>, %arg8: memref<1x1x8xf32, #tpu.memory_space<vmem>>, %arg9: memref<18x32x4xf32, #tpu.memory_space<vmem>>) attributes {dimension_semantics = [#tpu.dimension_semantics<parallel>], iteration_bounds = array<i64: 2>, scalar_prefetch = 0 : i64, scratch_operands = 1 : i64, tpu.core_type = #tpu.core_type<tc>, window_params = [{transform_indices = @transform_0, window_bounds = array<i64: 1, 16, 16, 4>}, {pipeline_mode = #tpu.pipeline_mode<synchronous>, transform_indices = @transform_1, window_bounds = array<i64: 3, 3, 4, 8>}, {pipeline_mode = #tpu.pipeline_mode<synchronous>, transform_indices = @transform_2, window_bounds = array<i64: 4, 8>}, {transform_indices = @transform_3, window_bounds = array<i64: 1, 256, 8>}, {transform_indices = @transform_4, window_bounds = array<i64: 1, 1, 8>}, {transform_indices = @transform_5, window_bounds = array<i64: 1, 1, 8>}, {transform_indices = @transform_6, window_bounds = array<i64: 1, 1, 8>}, {transform_indices = @transform_7, window_bounds = array<i64: 1, 1, 8>}]} {
    %c0 = arith.constant 0 : index
    %c0_0 = arith.constant 0 : index
    %c0_1 = arith.constant 0 : index
    %c0_2 = arith.constant 0 : index
    %0 = vector.load %arg1[%c0, %c0_0, %c0_1, %c0_2] : memref<1x16x16x4xf32, #tpu.memory_space<vmem>>, vector<1x16x16x4xf32>
    %1 = vector.shape_cast %0 : vector<1x16x16x4xf32> to vector<16x16x4xf32>
    %cst = arith.constant 0.000000e+00 : f32
    %2 = vector.broadcast %cst : f32 to vector<1x32x4xf32>
    %c0_3 = arith.constant 0 : index
    %c0_4 = arith.constant 0 : index
    %c0_5 = arith.constant 0 : index
    %3 = vector.load %arg9[%c0_3, %c0_4, %c0_5] : memref<18x32x4xf32, #tpu.memory_space<vmem>>, vector<1x32x4xf32>
    tpu.vector_store %arg9[%c0_3, %c0_4, %c0_5], %2 {strides = array<i32>} : memref<18x32x4xf32, #tpu.memory_space<vmem>>, vector<1x32x4xf32>,
    %c17 = arith.constant 17 : index
    %c0_6 = arith.constant 0 : index
    %c0_7 = arith.constant 0 : index
    %4 = vector.load %arg9[%c17, %c0_6, %c0_7] : memref<18x32x4xf32, #tpu.memory_space<vmem>>, vector<1x32x4xf32>
    tpu.vector_store %arg9[%c17, %c0_6, %c0_7], %2 {strides = array<i32>} : memref<18x32x4xf32, #tpu.memory_space<vmem>>, vector<1x32x4xf32>,
    %cst_8 = arith.constant 0.000000e+00 : f32
    %5 = vector.broadcast %cst_8 : f32 to vector<16x1x4xf32>
    %c1 = arith.constant 1 : index
    %c7 = arith.constant 7 : index
    %c0_9 = arith.constant 0 : index
    %6 = vector.load %arg9[%c1, %c7, %c0_9] : memref<18x32x4xf32, #tpu.memory_space<vmem>>, vector<16x1x4xf32>
    tpu.vector_store %arg9[%c1, %c7, %c0_9], %5 {strides = array<i32>} : memref<18x32x4xf32, #tpu.memory_space<vmem>>, vector<16x1x4xf32>,
    %c1_10 = arith.constant 1 : index
    %c24 = arith.constant 24 : index
    %c0_11 = arith.constant 0 : index
    %7 = vector.load %arg9[%c1_10, %c24, %c0_11] : memref<18x32x4xf32, #tpu.memory_space<vmem>>, vector<16x1x4xf32>
    tpu.vector_store %arg9[%c1_10, %c24, %c0_11], %5 {strides = array<i32>} : memref<18x32x4xf32, #tpu.memory_space<vmem>>, vector<16x1x4xf32>,
    %c1_12 = arith.constant 1 : index
    %c8 = arith.constant 8 : index
    %c0_13 = arith.constant 0 : index
    %8 = vector.load %arg9[%c1_12, %c8, %c0_13] : memref<18x32x4xf32, #tpu.memory_space<vmem>>, vector<16x16x4xf32>
    tpu.vector_store %arg9[%c1_12, %c8, %c0_13], %1 {strides = array<i32>} : memref<18x32x4xf32, #tpu.memory_space<vmem>>, vector<16x16x4xf32>,
    %cst_14 = arith.constant 0.000000e+00 : f32
    %9 = vector.broadcast %cst_14 : f32 to vector<16x16x8xf32>
    %c0_15 = arith.constant 0 : index
    %c0_16 = arith.constant 0 : index
    %c0_17 = arith.constant 0 : index
    %10 = vector.load %arg9[%c0_15, %c0_16, %c0_17] : memref<18x32x4xf32, #tpu.memory_space<vmem>>, vector<16x32x4xf32>
    %11 = vector.shape_cast %10 : vector<16x32x4xf32> to vector<512x4xf32>
    %c0_18 = arith.constant 0 : index
    %c0_19 = arith.constant 0 : index
    %c0_20 = arith.constant 0 : index
    %c0_21 = arith.constant 0 : index
    %12 = vector.load %arg2[%c0_18, %c0_19, %c0_20, %c0_21] : memref<3x3x4x8xf32, #tpu.memory_space<vmem>>, vector<1x1x4x8xf32>
    %13 = vector.shape_cast %12 : vector<1x1x4x8xf32> to vector<4x8xf32>
    %cst_22 = arith.constant dense<0.000000e+00> : vector<512x8xf32>
    %14 = tpu.matmul %11, %13, %cst_22 {dimension_numbers = #tpu.dot_dimension_numbers<[1], [0], [0], [1], [0, 0, 1, 1], [], []>} : vector<512x4xf32>, vector<4x8xf32>, vector<512x8xf32> -> vector<512x8xf32>
    %15 = vector.shape_cast %14 : vector<512x8xf32> to vector<16x32x8xf32>
    %16 = vector.extract_strided_slice %15 {offsets = [0, 7, 0], sizes = [16, 16, 8], strides = [1, 1, 1]} : vector<16x32x8xf32> to vector<16x16x8xf32>
    %17 = arith.addf %9, %16 : vector<16x16x8xf32>
    %c0_23 = arith.constant 0 : index
    %c1_24 = arith.constant 1 : index
    %c0_25 = arith.constant 0 : index
    %c0_26 = arith.constant 0 : index
    %18 = vector.load %arg2[%c0_23, %c1_24, %c0_25, %c0_26] : memref<3x3x4x8xf32, #tpu.memory_space<vmem>>, vector<1x1x4x8xf32>
    %19 = vector.shape_cast %18 : vector<1x1x4x8xf32> to vector<4x8xf32>
    %cst_27 = arith.constant dense<0.000000e+00> : vector<512x8xf32>
    %20 = tpu.matmul %11, %19, %cst_27 {dimension_numbers = #tpu.dot_dimension_numbers<[1], [0], [0], [1], [0, 0, 1, 1], [], []>} : vector<512x4xf32>, vector<4x8xf32>, vector<512x8xf32> -> vector<512x8xf32>
    %21 = vector.shape_cast %20 : vector<512x8xf32> to vector<16x32x8xf32>
    %22 = vector.extract_strided_slice %21 {offsets = [0, 8, 0], sizes = [16, 16, 8], strides = [1, 1, 1]} : vector<16x32x8xf32> to vector<16x16x8xf32>
    %23 = arith.addf %17, %22 : vector<16x16x8xf32>
    %c0_28 = arith.constant 0 : index
    %c2 = arith.constant 2 : index
    %c0_29 = arith.constant 0 : index
    %c0_30 = arith.constant 0 : index
    %24 = vector.load %arg2[%c0_28, %c2, %c0_29, %c0_30] : memref<3x3x4x8xf32, #tpu.memory_space<vmem>>, vector<1x1x4x8xf32>
    %25 = vector.shape_cast %24 : vector<1x1x4x8xf32> to vector<4x8xf32>
    %cst_31 = arith.constant dense<0.000000e+00> : vector<512x8xf32>
    %26 = tpu.matmul %11, %25, %cst_31 {dimension_numbers = #tpu.dot_dimension_numbers<[1], [0], [0], [1], [0, 0, 1, 1], [], []>} : vector<512x4xf32>, vector<4x8xf32>, vector<512x8xf32> -> vector<512x8xf32>
    %27 = vector.shape_cast %26 : vector<512x8xf32> to vector<16x32x8xf32>
    %28 = vector.extract_strided_slice %27 {offsets = [0, 9, 0], sizes = [16, 16, 8], strides = [1, 1, 1]} : vector<16x32x8xf32> to vector<16x16x8xf32>
    %29 = arith.addf %23, %28 : vector<16x16x8xf32>
    %c1_32 = arith.constant 1 : index
    %c0_33 = arith.constant 0 : index
    %c0_34 = arith.constant 0 : index
    %30 = vector.load %arg9[%c1_32, %c0_33, %c0_34] : memref<18x32x4xf32, #tpu.memory_space<vmem>>, vector<16x32x4xf32>
    %31 = vector.shape_cast %30 : vector<16x32x4xf32> to vector<512x4xf32>
    %c1_35 = arith.constant 1 : index
    %c0_36 = arith.constant 0 : index
    %c0_37 = arith.constant 0 : index
    %c0_38 = arith.constant 0 : index
    %32 = vector.load %arg2[%c1_35, %c0_36, %c0_37, %c0_38] : memref<3x3x4x8xf32, #tpu.memory_space<vmem>>, vector<1x1x4x8xf32>
    %33 = vector.shape_cast %32 : vector<1x1x4x8xf32> to vector<4x8xf32>
    %cst_39 = arith.constant dense<0.000000e+00> : vector<512x8xf32>
    %34 = tpu.matmul %31, %33, %cst_39 {dimension_numbers = #tpu.dot_dimension_numbers<[1], [0], [0], [1], [0, 0, 1, 1], [], []>} : vector<512x4xf32>, vector<4x8xf32>, vector<512x8xf32> -> vector<512x8xf32>
    %35 = vector.shape_cast %34 : vector<512x8xf32> to vector<16x32x8xf32>
    %36 = vector.extract_strided_slice %35 {offsets = [0, 7, 0], sizes = [16, 16, 8], strides = [1, 1, 1]} : vector<16x32x8xf32> to vector<16x16x8xf32>
    %37 = arith.addf %29, %36 : vector<16x16x8xf32>
    %c1_40 = arith.constant 1 : index
    %c1_41 = arith.constant 1 : index
    %c0_42 = arith.constant 0 : index
    %c0_43 = arith.constant 0 : index
    %38 = vector.load %arg2[%c1_40, %c1_41, %c0_42, %c0_43] : memref<3x3x4x8xf32, #tpu.memory_space<vmem>>, vector<1x1x4x8xf32>
    %39 = vector.shape_cast %38 : vector<1x1x4x8xf32> to vector<4x8xf32>
    %cst_44 = arith.constant dense<0.000000e+00> : vector<512x8xf32>
    %40 = tpu.matmul %31, %39, %cst_44 {dimension_numbers = #tpu.dot_dimension_numbers<[1], [0], [0], [1], [0, 0, 1, 1], [], []>} : vector<512x4xf32>, vector<4x8xf32>, vector<512x8xf32> -> vector<512x8xf32>
    %41 = vector.shape_cast %40 : vector<512x8xf32> to vector<16x32x8xf32>
    %42 = vector.extract_strided_slice %41 {offsets = [0, 8, 0], sizes = [16, 16, 8], strides = [1, 1, 1]} : vector<16x32x8xf32> to vector<16x16x8xf32>
    %43 = arith.addf %37, %42 : vector<16x16x8xf32>
    %c1_45 = arith.constant 1 : index
    %c2_46 = arith.constant 2 : index
    %c0_47 = arith.constant 0 : index
    %c0_48 = arith.constant 0 : index
    %44 = vector.load %arg2[%c1_45, %c2_46, %c0_47, %c0_48] : memref<3x3x4x8xf32, #tpu.memory_space<vmem>>, vector<1x1x4x8xf32>
    %45 = vector.shape_cast %44 : vector<1x1x4x8xf32> to vector<4x8xf32>
    %cst_49 = arith.constant dense<0.000000e+00> : vector<512x8xf32>
    %46 = tpu.matmul %31, %45, %cst_49 {dimension_numbers = #tpu.dot_dimension_numbers<[1], [0], [0], [1], [0, 0, 1, 1], [], []>} : vector<512x4xf32>, vector<4x8xf32>, vector<512x8xf32> -> vector<512x8xf32>
    %47 = vector.shape_cast %46 : vector<512x8xf32> to vector<16x32x8xf32>
    %48 = vector.extract_strided_slice %47 {offsets = [0, 9, 0], sizes = [16, 16, 8], strides = [1, 1, 1]} : vector<16x32x8xf32> to vector<16x16x8xf32>
    %49 = arith.addf %43, %48 : vector<16x16x8xf32>
    %c2_50 = arith.constant 2 : index
    %c0_51 = arith.constant 0 : index
    %c0_52 = arith.constant 0 : index
    %50 = vector.load %arg9[%c2_50, %c0_51, %c0_52] : memref<18x32x4xf32, #tpu.memory_space<vmem>>, vector<16x32x4xf32>
    %51 = vector.shape_cast %50 : vector<16x32x4xf32> to vector<512x4xf32>
    %c2_53 = arith.constant 2 : index
    %c0_54 = arith.constant 0 : index
    %c0_55 = arith.constant 0 : index
    %c0_56 = arith.constant 0 : index
    %52 = vector.load %arg2[%c2_53, %c0_54, %c0_55, %c0_56] : memref<3x3x4x8xf32, #tpu.memory_space<vmem>>, vector<1x1x4x8xf32>
    %53 = vector.shape_cast %52 : vector<1x1x4x8xf32> to vector<4x8xf32>
    %cst_57 = arith.constant dense<0.000000e+00> : vector<512x8xf32>
    %54 = tpu.matmul %51, %53, %cst_57 {dimension_numbers = #tpu.dot_dimension_numbers<[1], [0], [0], [1], [0, 0, 1, 1], [], []>} : vector<512x4xf32>, vector<4x8xf32>, vector<512x8xf32> -> vector<512x8xf32>
    %55 = vector.shape_cast %54 : vector<512x8xf32> to vector<16x32x8xf32>
    %56 = vector.extract_strided_slice %55 {offsets = [0, 7, 0], sizes = [16, 16, 8], strides = [1, 1, 1]} : vector<16x32x8xf32> to vector<16x16x8xf32>
    %57 = arith.addf %49, %56 : vector<16x16x8xf32>
    %c2_58 = arith.constant 2 : index
    %c1_59 = arith.constant 1 : index
    %c0_60 = arith.constant 0 : index
    %c0_61 = arith.constant 0 : index
    %58 = vector.load %arg2[%c2_58, %c1_59, %c0_60, %c0_61] : memref<3x3x4x8xf32, #tpu.memory_space<vmem>>, vector<1x1x4x8xf32>
    %59 = vector.shape_cast %58 : vector<1x1x4x8xf32> to vector<4x8xf32>
    %cst_62 = arith.constant dense<0.000000e+00> : vector<512x8xf32>
    %60 = tpu.matmul %51, %59, %cst_62 {dimension_numbers = #tpu.dot_dimension_numbers<[1], [0], [0], [1], [0, 0, 1, 1], [], []>} : vector<512x4xf32>, vector<4x8xf32>, vector<512x8xf32> -> vector<512x8xf32>
    %61 = vector.shape_cast %60 : vector<512x8xf32> to vector<16x32x8xf32>
    %62 = vector.extract_strided_slice %61 {offsets = [0, 8, 0], sizes = [16, 16, 8], strides = [1, 1, 1]} : vector<16x32x8xf32> to vector<16x16x8xf32>
    %63 = arith.addf %57, %62 : vector<16x16x8xf32>
    %c2_63 = arith.constant 2 : index
    %c2_64 = arith.constant 2 : index
    %c0_65 = arith.constant 0 : index
    %c0_66 = arith.constant 0 : index
    %64 = vector.load %arg2[%c2_63, %c2_64, %c0_65, %c0_66] : memref<3x3x4x8xf32, #tpu.memory_space<vmem>>, vector<1x1x4x8xf32>
    %65 = vector.shape_cast %64 : vector<1x1x4x8xf32> to vector<4x8xf32>
    %cst_67 = arith.constant dense<0.000000e+00> : vector<512x8xf32>
    %66 = tpu.matmul %51, %65, %cst_67 {dimension_numbers = #tpu.dot_dimension_numbers<[1], [0], [0], [1], [0, 0, 1, 1], [], []>} : vector<512x4xf32>, vector<4x8xf32>, vector<512x8xf32> -> vector<512x8xf32>
    %67 = vector.shape_cast %66 : vector<512x8xf32> to vector<16x32x8xf32>
    %68 = vector.extract_strided_slice %67 {offsets = [0, 9, 0], sizes = [16, 16, 8], strides = [1, 1, 1]} : vector<16x32x8xf32> to vector<16x16x8xf32>
    %69 = arith.addf %63, %68 : vector<16x16x8xf32>
    %70 = vector.shape_cast %69 : vector<16x16x8xf32> to vector<256x8xf32>
    %71 = vector.shape_cast %1 : vector<16x16x4xf32> to vector<256x4xf32>
    %c0_68 = arith.constant 0 : index
    %c0_69 = arith.constant 0 : index
    %72 = vector.load %arg3[%c0_68, %c0_69] : memref<4x8xf32, #tpu.memory_space<vmem>>, vector<4x8xf32>
    %cst_70 = arith.constant dense<0.000000e+00> : vector<256x8xf32>
    %73 = tpu.matmul %71, %72, %cst_70 {dimension_numbers = #tpu.dot_dimension_numbers<[1], [0], [0], [1], [0, 0, 1, 1], [], []>} : vector<256x4xf32>, vector<4x8xf32>, vector<256x8xf32> -> vector<256x8xf32>
    %c0_71 = arith.constant 0 : index
    %c0_72 = arith.constant 0 : index
    %c0_73 = arith.constant 0 : index
    %74 = vector.load %arg4[%c0_71, %c0_72, %c0_73] : memref<1x256x8xf32, #tpu.memory_space<vmem>>, vector<1x256x8xf32>
    %75 = vector.shape_cast %74 : vector<1x256x8xf32> to vector<256x8xf32>
    %76 = vector.shape_cast %70 : vector<256x8xf32> to vector<1x256x8xf32>
    tpu.vector_store %arg4[%c0_71, %c0_72, %c0_73], %76 {strides = array<i32>} : memref<1x256x8xf32, #tpu.memory_space<vmem>>, vector<1x256x8xf32>,
    %cst_74 = arith.constant dense<0.000000e+00> : vector<8xf32>
    %77 = vector.multi_reduction <add>, %70, %cst_74 [0] : vector<256x8xf32> to vector<8xf32>
    %78 = vector.shape_cast %77 : vector<8xf32> to vector<1x8xf32>
    %c0_75 = arith.constant 0 : index
    %c0_76 = arith.constant 0 : index
    %c0_77 = arith.constant 0 : index
    %79 = vector.load %arg5[%c0_75, %c0_76, %c0_77] : memref<1x1x8xf32, #tpu.memory_space<vmem>>, vector<1x1x8xf32>
    %80 = vector.shape_cast %79 : vector<1x1x8xf32> to vector<1x8xf32>
    %81 = vector.shape_cast %78 : vector<1x8xf32> to vector<1x1x8xf32>
    tpu.vector_store %arg5[%c0_75, %c0_76, %c0_77], %81 {strides = array<i32>} : memref<1x1x8xf32, #tpu.memory_space<vmem>>, vector<1x1x8xf32>,
    %82 = arith.mulf %70, %70 : vector<256x8xf32>
    %cst_78 = arith.constant dense<0.000000e+00> : vector<8xf32>
    %83 = vector.multi_reduction <add>, %82, %cst_78 [0] : vector<256x8xf32> to vector<8xf32>
    %84 = vector.shape_cast %83 : vector<8xf32> to vector<1x8xf32>
    %c0_79 = arith.constant 0 : index
    %c0_80 = arith.constant 0 : index
    %c0_81 = arith.constant 0 : index
    %85 = vector.load %arg6[%c0_79, %c0_80, %c0_81] : memref<1x1x8xf32, #tpu.memory_space<vmem>>, vector<1x1x8xf32>
    %86 = vector.shape_cast %85 : vector<1x1x8xf32> to vector<1x8xf32>
    %87 = vector.shape_cast %84 : vector<1x8xf32> to vector<1x1x8xf32>
    tpu.vector_store %arg6[%c0_79, %c0_80, %c0_81], %87 {strides = array<i32>} : memref<1x1x8xf32, #tpu.memory_space<vmem>>, vector<1x1x8xf32>,
    %cst_82 = arith.constant dense<0.000000e+00> : vector<8xf32>
    %88 = vector.multi_reduction <add>, %73, %cst_82 [0] : vector<256x8xf32> to vector<8xf32>
    %89 = vector.shape_cast %88 : vector<8xf32> to vector<1x8xf32>
    %c0_83 = arith.constant 0 : index
    %c0_84 = arith.constant 0 : index
    %c0_85 = arith.constant 0 : index
    %90 = vector.load %arg7[%c0_83, %c0_84, %c0_85] : memref<1x1x8xf32, #tpu.memory_space<vmem>>, vector<1x1x8xf32>
    %91 = vector.shape_cast %90 : vector<1x1x8xf32> to vector<1x8xf32>
    %92 = vector.shape_cast %89 : vector<1x8xf32> to vector<1x1x8xf32>
    tpu.vector_store %arg7[%c0_83, %c0_84, %c0_85], %92 {strides = array<i32>} : memref<1x1x8xf32, #tpu.memory_space<vmem>>, vector<1x1x8xf32>,
    %93 = arith.mulf %73, %73 : vector<256x8xf32>
    %cst_86 = arith.constant dense<0.000000e+00> : vector<8xf32>
    %94 = vector.multi_reduction <add>, %93, %cst_86 [0] : vector<256x8xf32> to vector<8xf32>
    %95 = vector.shape_cast %94 : vector<8xf32> to vector<1x8xf32>
    %c0_87 = arith.constant 0 : index
    %c0_88 = arith.constant 0 : index
    %c0_89 = arith.constant 0 : index
    %96 = vector.load %arg8[%c0_87, %c0_88, %c0_89] : memref<1x1x8xf32, #tpu.memory_space<vmem>>, vector<1x1x8xf32>
    %97 = vector.shape_cast %96 : vector<1x1x8xf32> to vector<1x8xf32>
    %98 = vector.shape_cast %95 : vector<1x8xf32> to vector<1x1x8xf32>
    tpu.vector_store %arg8[%c0_87, %c0_88, %c0_89], %98 {strides = array<i32>} : memref<1x1x8xf32, #tpu.memory_space<vmem>>, vector<1x1x8xf32>,
    return
  }
  func.func @transform_0(%arg0: i32) -> (i32, i32, i32, i32) {
    %c0_i32 = arith.constant 0 : i32
    %c0_i32_0 = arith.constant 0 : i32
    %c0_i32_1 = arith.constant 0 : i32
    %c0_i32_2 = arith.constant 0 : i32
    return %arg0, %c0_i32, %c0_i32_0, %c0_i32_1 : i32, i32, i32, i32
  }
  func.func @transform_1(%arg0: i32) -> (i32, i32, i32, i32) {
    %c0_i32 = arith.constant 0 : i32
    %c0_i32_0 = arith.constant 0 : i32
    %c0_i32_1 = arith.constant 0 : i32
    %c0_i32_2 = arith.constant 0 : i32
    %c0_i32_3 = arith.constant 0 : i32
    return %c0_i32, %c0_i32_0, %c0_i32_1, %c0_i32_2 : i32, i32, i32, i32
  }
  func.func @transform_2(%arg0: i32) -> (i32, i32) {
    %c0_i32 = arith.constant 0 : i32
    %c0_i32_0 = arith.constant 0 : i32
    %c0_i32_1 = arith.constant 0 : i32
    return %c0_i32, %c0_i32_0 : i32, i32
  }
  func.func @transform_3(%arg0: i32) -> (i32, i32, i32) {
    %c0_i32 = arith.constant 0 : i32
    %c0_i32_0 = arith.constant 0 : i32
    %c0_i32_1 = arith.constant 0 : i32
    return %arg0, %c0_i32, %c0_i32_0 : i32, i32, i32
  }
  func.func @transform_4(%arg0: i32) -> (i32, i32, i32) {
    %c0_i32 = arith.constant 0 : i32
    %c0_i32_0 = arith.constant 0 : i32
    %c0_i32_1 = arith.constant 0 : i32
    return %arg0, %c0_i32, %c0_i32_0 : i32, i32, i32
  }
  func.func @transform_5(%arg0: i32) -> (i32, i32, i32) {
    %c0_i32 = arith.constant 0 : i32
    %c0_i32_0 = arith.constant 0 : i32
    %c0_i32_1 = arith.constant 0 : i32
    return %arg0, %c0_i32, %c0_i32_0 : i32, i32, i32
  }
  func.func @transform_6(%arg0: i32) -> (i32, i32, i32) {
    %c0_i32 = arith.constant 0 : i32
    %c0_i32_0 = arith.constant 0 : i32
    %c0_i32_1 = arith.constant 0 : i32
    return %arg0, %c0_i32, %c0_i32_0 : i32, i32, i32
  }
  func.func @transform_7(%arg0: i32) -> (i32, i32, i32) {
    %c0_i32 = arith.constant 0 : i32
    %c0_i32_0 = arith.constant 0 : i32
    %c0_i32_1 = arith.constant 0 : i32
    return %arg0, %c0_i32, %c0_i32_0 : i32, i32, i32
  }
}

module attributes {stable_mosaic.version = 11 : i64} {
  func.func @_stage3_kernel(%arg0: i32, %arg1: memref<1x16x16x4xf32, #tpu.memory_space<vmem>>, %arg2: memref<4x8xf32, #tpu.memory_space<vmem>>, %arg3: memref<1x256x8xf32, #tpu.memory_space<vmem>>, %arg4: memref<1x8xf32, #tpu.memory_space<vmem>>, %arg5: memref<1x8xf32, #tpu.memory_space<vmem>>, %arg6: memref<1x8xf32, #tpu.memory_space<vmem>>, %arg7: memref<1x8x256xf32, #tpu.memory_space<vmem>>) attributes {dimension_semantics = [#tpu.dimension_semantics<parallel>], iteration_bounds = array<i64: 2>, scalar_prefetch = 0 : i64, scratch_operands = 0 : i64, tpu.core_type = #tpu.core_type<tc>, window_params = [{transform_indices = @transform_0, window_bounds = array<i64: 1, 16, 16, 4>}, {pipeline_mode = #tpu.pipeline_mode<synchronous>, transform_indices = @transform_1, window_bounds = array<i64: 4, 8>}, {transform_indices = @transform_2, window_bounds = array<i64: 1, 256, 8>}, {pipeline_mode = #tpu.pipeline_mode<synchronous>, transform_indices = @transform_3, window_bounds = array<i64: 1, 8>}, {pipeline_mode = #tpu.pipeline_mode<synchronous>, transform_indices = @transform_4, window_bounds = array<i64: 1, 8>}, {pipeline_mode = #tpu.pipeline_mode<synchronous>, transform_indices = @transform_5, window_bounds = array<i64: 1, 8>}, {transform_indices = @transform_6, window_bounds = array<i64: 1, 8, 256>}]} {
    %c0 = arith.constant 0 : index
    %c0_0 = arith.constant 0 : index
    %c0_1 = arith.constant 0 : index
    %c0_2 = arith.constant 0 : index
    %0 = vector.load %arg1[%c0, %c0_0, %c0_1, %c0_2] : memref<1x16x16x4xf32, #tpu.memory_space<vmem>>, vector<1x16x16x4xf32>
    %1 = vector.shape_cast %0 : vector<1x16x16x4xf32> to vector<16x16x4xf32>
    %2 = vector.shape_cast %1 : vector<16x16x4xf32> to vector<256x4xf32>
    %c0_3 = arith.constant 0 : index
    %c0_4 = arith.constant 0 : index
    %3 = vector.load %arg2[%c0_3, %c0_4] : memref<4x8xf32, #tpu.memory_space<vmem>>, vector<4x8xf32>
    %cst = arith.constant dense<0.000000e+00> : vector<256x8xf32>
    %4 = tpu.matmul %2, %3, %cst {dimension_numbers = #tpu.dot_dimension_numbers<[1], [0], [0], [1], [0, 0, 1, 1], [], []>} : vector<256x4xf32>, vector<4x8xf32>, vector<256x8xf32> -> vector<256x8xf32>
    %c0_5 = arith.constant 0 : index
    %c0_6 = arith.constant 0 : index
    %c0_7 = arith.constant 0 : index
    %5 = vector.load %arg3[%c0_5, %c0_6, %c0_7] : memref<1x256x8xf32, #tpu.memory_space<vmem>>, vector<1x256x8xf32>
    %6 = vector.shape_cast %5 : vector<1x256x8xf32> to vector<256x8xf32>
    %c0_8 = arith.constant 0 : index
    %c0_9 = arith.constant 0 : index
    %7 = vector.load %arg4[%c0_8, %c0_9] : memref<1x8xf32, #tpu.memory_space<vmem>>, vector<1x8xf32>
    %8 = vector.broadcast %7 : vector<1x8xf32> to vector<256x8xf32>
    %9 = arith.mulf %6, %8 : vector<256x8xf32>
    %c0_10 = arith.constant 0 : index
    %c0_11 = arith.constant 0 : index
    %10 = vector.load %arg5[%c0_10, %c0_11] : memref<1x8xf32, #tpu.memory_space<vmem>>, vector<1x8xf32>
    %11 = vector.broadcast %10 : vector<1x8xf32> to vector<256x8xf32>
    %12 = arith.mulf %4, %11 : vector<256x8xf32>
    %13 = arith.addf %9, %12 : vector<256x8xf32>
    %c0_12 = arith.constant 0 : index
    %c0_13 = arith.constant 0 : index
    %14 = vector.load %arg6[%c0_12, %c0_13] : memref<1x8xf32, #tpu.memory_space<vmem>>, vector<1x8xf32>
    %15 = vector.broadcast %14 : vector<1x8xf32> to vector<256x8xf32>
    %16 = arith.addf %13, %15 : vector<256x8xf32>
    %cst_14 = arith.constant 0.000000e+00 : f32
    %17 = vector.broadcast %cst_14 : f32 to vector<256x8xf32>
    %18 = arith.maximumf %16, %17 : vector<256x8xf32>
    %19 = tpu.transpose %18, [1, 0] : vector<256x8xf32> -> vector<8x256xf32>
    %c0_15 = arith.constant 0 : index
    %c0_16 = arith.constant 0 : index
    %c0_17 = arith.constant 0 : index
    %20 = vector.load %arg7[%c0_15, %c0_16, %c0_17] : memref<1x8x256xf32, #tpu.memory_space<vmem>>, vector<1x8x256xf32>
    %21 = vector.shape_cast %20 : vector<1x8x256xf32> to vector<8x256xf32>
    %22 = vector.shape_cast %19 : vector<8x256xf32> to vector<1x8x256xf32>
    tpu.vector_store %arg7[%c0_15, %c0_16, %c0_17], %22 {strides = array<i32>} : memref<1x8x256xf32, #tpu.memory_space<vmem>>, vector<1x8x256xf32>,
    return
  }
  func.func @transform_0(%arg0: i32) -> (i32, i32, i32, i32) {
    %c0_i32 = arith.constant 0 : i32
    %c0_i32_0 = arith.constant 0 : i32
    %c0_i32_1 = arith.constant 0 : i32
    %c0_i32_2 = arith.constant 0 : i32
    return %arg0, %c0_i32, %c0_i32_0, %c0_i32_1 : i32, i32, i32, i32
  }
  func.func @transform_1(%arg0: i32) -> (i32, i32) {
    %c0_i32 = arith.constant 0 : i32
    %c0_i32_0 = arith.constant 0 : i32
    %c0_i32_1 = arith.constant 0 : i32
    return %c0_i32, %c0_i32_0 : i32, i32
  }
  func.func @transform_2(%arg0: i32) -> (i32, i32, i32) {
    %c0_i32 = arith.constant 0 : i32
    %c0_i32_0 = arith.constant 0 : i32
    %c0_i32_1 = arith.constant 0 : i32
    return %arg0, %c0_i32, %c0_i32_0 : i32, i32, i32
  }
  func.func @transform_3(%arg0: i32) -> (i32, i32) {
    %c0_i32 = arith.constant 0 : i32
    %c0_i32_0 = arith.constant 0 : i32
    %c0_i32_1 = arith.constant 0 : i32
    return %c0_i32, %c0_i32_0 : i32, i32
  }
  func.func @transform_4(%arg0: i32) -> (i32, i32) {
    %c0_i32 = arith.constant 0 : i32
    %c0_i32_0 = arith.constant 0 : i32
    %c0_i32_1 = arith.constant 0 : i32
    return %c0_i32, %c0_i32_0 : i32, i32
  }
  func.func @transform_5(%arg0: i32) -> (i32, i32) {
    %c0_i32 = arith.constant 0 : i32
    %c0_i32_0 = arith.constant 0 : i32
    %c0_i32_1 = arith.constant 0 : i32
    return %c0_i32, %c0_i32_0 : i32, i32
  }
  func.func @transform_6(%arg0: i32) -> (i32, i32, i32) {
    %c0_i32 = arith.constant 0 : i32
    %c0_i32_0 = arith.constant 0 : i32
    %c0_i32_1 = arith.constant 0 : i32
    return %arg0, %c0_i32, %c0_i32_0 : i32, i32, i32
  }
}

module attributes {stable_mosaic.version = 11 : i64} {
  func.func @_stage2_kernel(%arg0: i32, %arg1: memref<1x256x8xf32, #tpu.memory_space<vmem>>, %arg2: memref<1x8xf32, #tpu.memory_space<vmem>>, %arg3: memref<1x8xf32, #tpu.memory_space<vmem>>, %arg4: memref<3x3x8x8xf32, #tpu.memory_space<vmem>>, %arg5: memref<1x256x8xf32, #tpu.memory_space<vmem>>, %arg6: memref<1x1x8xf32, #tpu.memory_space<vmem>>, %arg7: memref<1x1x8xf32, #tpu.memory_space<vmem>>, %arg8: memref<18x32x8xf32, #tpu.memory_space<vmem>>) attributes {dimension_semantics = [#tpu.dimension_semantics<parallel>], iteration_bounds = array<i64: 2>, scalar_prefetch = 0 : i64, scratch_operands = 1 : i64, tpu.core_type = #tpu.core_type<tc>, window_params = [{transform_indices = @transform_0, window_bounds = array<i64: 1, 256, 8>}, {pipeline_mode = #tpu.pipeline_mode<synchronous>, transform_indices = @transform_1, window_bounds = array<i64: 1, 8>}, {pipeline_mode = #tpu.pipeline_mode<synchronous>, transform_indices = @transform_2, window_bounds = array<i64: 1, 8>}, {pipeline_mode = #tpu.pipeline_mode<synchronous>, transform_indices = @transform_3, window_bounds = array<i64: 3, 3, 8, 8>}, {transform_indices = @transform_4, window_bounds = array<i64: 1, 256, 8>}, {transform_indices = @transform_5, window_bounds = array<i64: 1, 1, 8>}, {transform_indices = @transform_6, window_bounds = array<i64: 1, 1, 8>}]} {
    %c0 = arith.constant 0 : index
    %c0_0 = arith.constant 0 : index
    %c0_1 = arith.constant 0 : index
    %0 = vector.load %arg1[%c0, %c0_0, %c0_1] : memref<1x256x8xf32, #tpu.memory_space<vmem>>, vector<1x256x8xf32>
    %1 = vector.shape_cast %0 : vector<1x256x8xf32> to vector<256x8xf32>
    %c0_2 = arith.constant 0 : index
    %c0_3 = arith.constant 0 : index
    %2 = vector.load %arg2[%c0_2, %c0_3] : memref<1x8xf32, #tpu.memory_space<vmem>>, vector<1x8xf32>
    %3 = vector.broadcast %2 : vector<1x8xf32> to vector<256x8xf32>
    %4 = arith.mulf %1, %3 : vector<256x8xf32>
    %c0_4 = arith.constant 0 : index
    %c0_5 = arith.constant 0 : index
    %5 = vector.load %arg3[%c0_4, %c0_5] : memref<1x8xf32, #tpu.memory_space<vmem>>, vector<1x8xf32>
    %6 = vector.broadcast %5 : vector<1x8xf32> to vector<256x8xf32>
    %7 = arith.addf %4, %6 : vector<256x8xf32>
    %cst = arith.constant 0.000000e+00 : f32
    %8 = vector.broadcast %cst : f32 to vector<256x8xf32>
    %9 = arith.maximumf %7, %8 : vector<256x8xf32>
    %10 = vector.shape_cast %9 : vector<256x8xf32> to vector<16x16x8xf32>
    %cst_6 = arith.constant 0.000000e+00 : f32
    %11 = vector.broadcast %cst_6 : f32 to vector<1x32x8xf32>
    %c0_7 = arith.constant 0 : index
    %c0_8 = arith.constant 0 : index
    %c0_9 = arith.constant 0 : index
    %12 = vector.load %arg8[%c0_7, %c0_8, %c0_9] : memref<18x32x8xf32, #tpu.memory_space<vmem>>, vector<1x32x8xf32>
    tpu.vector_store %arg8[%c0_7, %c0_8, %c0_9], %11 {strides = array<i32>} : memref<18x32x8xf32, #tpu.memory_space<vmem>>, vector<1x32x8xf32>,
    %c17 = arith.constant 17 : index
    %c0_10 = arith.constant 0 : index
    %c0_11 = arith.constant 0 : index
    %13 = vector.load %arg8[%c17, %c0_10, %c0_11] : memref<18x32x8xf32, #tpu.memory_space<vmem>>, vector<1x32x8xf32>
    tpu.vector_store %arg8[%c17, %c0_10, %c0_11], %11 {strides = array<i32>} : memref<18x32x8xf32, #tpu.memory_space<vmem>>, vector<1x32x8xf32>,
    %cst_12 = arith.constant 0.000000e+00 : f32
    %14 = vector.broadcast %cst_12 : f32 to vector<16x1x8xf32>
    %c1 = arith.constant 1 : index
    %c7 = arith.constant 7 : index
    %c0_13 = arith.constant 0 : index
    %15 = vector.load %arg8[%c1, %c7, %c0_13] : memref<18x32x8xf32, #tpu.memory_space<vmem>>, vector<16x1x8xf32>
    tpu.vector_store %arg8[%c1, %c7, %c0_13], %14 {strides = array<i32>} : memref<18x32x8xf32, #tpu.memory_space<vmem>>, vector<16x1x8xf32>,
    %c1_14 = arith.constant 1 : index
    %c24 = arith.constant 24 : index
    %c0_15 = arith.constant 0 : index
    %16 = vector.load %arg8[%c1_14, %c24, %c0_15] : memref<18x32x8xf32, #tpu.memory_space<vmem>>, vector<16x1x8xf32>
    tpu.vector_store %arg8[%c1_14, %c24, %c0_15], %14 {strides = array<i32>} : memref<18x32x8xf32, #tpu.memory_space<vmem>>, vector<16x1x8xf32>,
    %c1_16 = arith.constant 1 : index
    %c8 = arith.constant 8 : index
    %c0_17 = arith.constant 0 : index
    %17 = vector.load %arg8[%c1_16, %c8, %c0_17] : memref<18x32x8xf32, #tpu.memory_space<vmem>>, vector<16x16x8xf32>
    tpu.vector_store %arg8[%c1_16, %c8, %c0_17], %10 {strides = array<i32>} : memref<18x32x8xf32, #tpu.memory_space<vmem>>, vector<16x16x8xf32>,
    %cst_18 = arith.constant 0.000000e+00 : f32
    %18 = vector.broadcast %cst_18 : f32 to vector<16x16x8xf32>
    %c0_19 = arith.constant 0 : index
    %c0_20 = arith.constant 0 : index
    %c0_21 = arith.constant 0 : index
    %19 = vector.load %arg8[%c0_19, %c0_20, %c0_21] : memref<18x32x8xf32, #tpu.memory_space<vmem>>, vector<16x32x8xf32>
    %20 = vector.shape_cast %19 : vector<16x32x8xf32> to vector<512x8xf32>
    %c0_22 = arith.constant 0 : index
    %c0_23 = arith.constant 0 : index
    %c0_24 = arith.constant 0 : index
    %c0_25 = arith.constant 0 : index
    %21 = vector.load %arg4[%c0_22, %c0_23, %c0_24, %c0_25] : memref<3x3x8x8xf32, #tpu.memory_space<vmem>>, vector<1x1x8x8xf32>
    %22 = vector.shape_cast %21 : vector<1x1x8x8xf32> to vector<8x8xf32>
    %cst_26 = arith.constant dense<0.000000e+00> : vector<512x8xf32>
    %23 = tpu.matmul %20, %22, %cst_26 {dimension_numbers = #tpu.dot_dimension_numbers<[1], [0], [0], [1], [0, 0, 1, 1], [], []>} : vector<512x8xf32>, vector<8x8xf32>, vector<512x8xf32> -> vector<512x8xf32>
    %24 = vector.shape_cast %23 : vector<512x8xf32> to vector<16x32x8xf32>
    %25 = vector.extract_strided_slice %24 {offsets = [0, 7, 0], sizes = [16, 16, 8], strides = [1, 1, 1]} : vector<16x32x8xf32> to vector<16x16x8xf32>
    %26 = arith.addf %18, %25 : vector<16x16x8xf32>
    %c0_27 = arith.constant 0 : index
    %c1_28 = arith.constant 1 : index
    %c0_29 = arith.constant 0 : index
    %c0_30 = arith.constant 0 : index
    %27 = vector.load %arg4[%c0_27, %c1_28, %c0_29, %c0_30] : memref<3x3x8x8xf32, #tpu.memory_space<vmem>>, vector<1x1x8x8xf32>
    %28 = vector.shape_cast %27 : vector<1x1x8x8xf32> to vector<8x8xf32>
    %cst_31 = arith.constant dense<0.000000e+00> : vector<512x8xf32>
    %29 = tpu.matmul %20, %28, %cst_31 {dimension_numbers = #tpu.dot_dimension_numbers<[1], [0], [0], [1], [0, 0, 1, 1], [], []>} : vector<512x8xf32>, vector<8x8xf32>, vector<512x8xf32> -> vector<512x8xf32>
    %30 = vector.shape_cast %29 : vector<512x8xf32> to vector<16x32x8xf32>
    %31 = vector.extract_strided_slice %30 {offsets = [0, 8, 0], sizes = [16, 16, 8], strides = [1, 1, 1]} : vector<16x32x8xf32> to vector<16x16x8xf32>
    %32 = arith.addf %26, %31 : vector<16x16x8xf32>
    %c0_32 = arith.constant 0 : index
    %c2 = arith.constant 2 : index
    %c0_33 = arith.constant 0 : index
    %c0_34 = arith.constant 0 : index
    %33 = vector.load %arg4[%c0_32, %c2, %c0_33, %c0_34] : memref<3x3x8x8xf32, #tpu.memory_space<vmem>>, vector<1x1x8x8xf32>
    %34 = vector.shape_cast %33 : vector<1x1x8x8xf32> to vector<8x8xf32>
    %cst_35 = arith.constant dense<0.000000e+00> : vector<512x8xf32>
    %35 = tpu.matmul %20, %34, %cst_35 {dimension_numbers = #tpu.dot_dimension_numbers<[1], [0], [0], [1], [0, 0, 1, 1], [], []>} : vector<512x8xf32>, vector<8x8xf32>, vector<512x8xf32> -> vector<512x8xf32>
    %36 = vector.shape_cast %35 : vector<512x8xf32> to vector<16x32x8xf32>
    %37 = vector.extract_strided_slice %36 {offsets = [0, 9, 0], sizes = [16, 16, 8], strides = [1, 1, 1]} : vector<16x32x8xf32> to vector<16x16x8xf32>
    %38 = arith.addf %32, %37 : vector<16x16x8xf32>
    %c1_36 = arith.constant 1 : index
    %c0_37 = arith.constant 0 : index
    %c0_38 = arith.constant 0 : index
    %39 = vector.load %arg8[%c1_36, %c0_37, %c0_38] : memref<18x32x8xf32, #tpu.memory_space<vmem>>, vector<16x32x8xf32>
    %40 = vector.shape_cast %39 : vector<16x32x8xf32> to vector<512x8xf32>
    %c1_39 = arith.constant 1 : index
    %c0_40 = arith.constant 0 : index
    %c0_41 = arith.constant 0 : index
    %c0_42 = arith.constant 0 : index
    %41 = vector.load %arg4[%c1_39, %c0_40, %c0_41, %c0_42] : memref<3x3x8x8xf32, #tpu.memory_space<vmem>>, vector<1x1x8x8xf32>
    %42 = vector.shape_cast %41 : vector<1x1x8x8xf32> to vector<8x8xf32>
    %cst_43 = arith.constant dense<0.000000e+00> : vector<512x8xf32>
    %43 = tpu.matmul %40, %42, %cst_43 {dimension_numbers = #tpu.dot_dimension_numbers<[1], [0], [0], [1], [0, 0, 1, 1], [], []>} : vector<512x8xf32>, vector<8x8xf32>, vector<512x8xf32> -> vector<512x8xf32>
    %44 = vector.shape_cast %43 : vector<512x8xf32> to vector<16x32x8xf32>
    %45 = vector.extract_strided_slice %44 {offsets = [0, 7, 0], sizes = [16, 16, 8], strides = [1, 1, 1]} : vector<16x32x8xf32> to vector<16x16x8xf32>
    %46 = arith.addf %38, %45 : vector<16x16x8xf32>
    %c1_44 = arith.constant 1 : index
    %c1_45 = arith.constant 1 : index
    %c0_46 = arith.constant 0 : index
    %c0_47 = arith.constant 0 : index
    %47 = vector.load %arg4[%c1_44, %c1_45, %c0_46, %c0_47] : memref<3x3x8x8xf32, #tpu.memory_space<vmem>>, vector<1x1x8x8xf32>
    %48 = vector.shape_cast %47 : vector<1x1x8x8xf32> to vector<8x8xf32>
    %cst_48 = arith.constant dense<0.000000e+00> : vector<512x8xf32>
    %49 = tpu.matmul %40, %48, %cst_48 {dimension_numbers = #tpu.dot_dimension_numbers<[1], [0], [0], [1], [0, 0, 1, 1], [], []>} : vector<512x8xf32>, vector<8x8xf32>, vector<512x8xf32> -> vector<512x8xf32>
    %50 = vector.shape_cast %49 : vector<512x8xf32> to vector<16x32x8xf32>
    %51 = vector.extract_strided_slice %50 {offsets = [0, 8, 0], sizes = [16, 16, 8], strides = [1, 1, 1]} : vector<16x32x8xf32> to vector<16x16x8xf32>
    %52 = arith.addf %46, %51 : vector<16x16x8xf32>
    %c1_49 = arith.constant 1 : index
    %c2_50 = arith.constant 2 : index
    %c0_51 = arith.constant 0 : index
    %c0_52 = arith.constant 0 : index
    %53 = vector.load %arg4[%c1_49, %c2_50, %c0_51, %c0_52] : memref<3x3x8x8xf32, #tpu.memory_space<vmem>>, vector<1x1x8x8xf32>
    %54 = vector.shape_cast %53 : vector<1x1x8x8xf32> to vector<8x8xf32>
    %cst_53 = arith.constant dense<0.000000e+00> : vector<512x8xf32>
    %55 = tpu.matmul %40, %54, %cst_53 {dimension_numbers = #tpu.dot_dimension_numbers<[1], [0], [0], [1], [0, 0, 1, 1], [], []>} : vector<512x8xf32>, vector<8x8xf32>, vector<512x8xf32> -> vector<512x8xf32>
    %56 = vector.shape_cast %55 : vector<512x8xf32> to vector<16x32x8xf32>
    %57 = vector.extract_strided_slice %56 {offsets = [0, 9, 0], sizes = [16, 16, 8], strides = [1, 1, 1]} : vector<16x32x8xf32> to vector<16x16x8xf32>
    %58 = arith.addf %52, %57 : vector<16x16x8xf32>
    %c2_54 = arith.constant 2 : index
    %c0_55 = arith.constant 0 : index
    %c0_56 = arith.constant 0 : index
    %59 = vector.load %arg8[%c2_54, %c0_55, %c0_56] : memref<18x32x8xf32, #tpu.memory_space<vmem>>, vector<16x32x8xf32>
    %60 = vector.shape_cast %59 : vector<16x32x8xf32> to vector<512x8xf32>
    %c2_57 = arith.constant 2 : index
    %c0_58 = arith.constant 0 : index
    %c0_59 = arith.constant 0 : index
    %c0_60 = arith.constant 0 : index
    %61 = vector.load %arg4[%c2_57, %c0_58, %c0_59, %c0_60] : memref<3x3x8x8xf32, #tpu.memory_space<vmem>>, vector<1x1x8x8xf32>
    %62 = vector.shape_cast %61 : vector<1x1x8x8xf32> to vector<8x8xf32>
    %cst_61 = arith.constant dense<0.000000e+00> : vector<512x8xf32>
    %63 = tpu.matmul %60, %62, %cst_61 {dimension_numbers = #tpu.dot_dimension_numbers<[1], [0], [0], [1], [0, 0, 1, 1], [], []>} : vector<512x8xf32>, vector<8x8xf32>, vector<512x8xf32> -> vector<512x8xf32>
    %64 = vector.shape_cast %63 : vector<512x8xf32> to vector<16x32x8xf32>
    %65 = vector.extract_strided_slice %64 {offsets = [0, 7, 0], sizes = [16, 16, 8], strides = [1, 1, 1]} : vector<16x32x8xf32> to vector<16x16x8xf32>
    %66 = arith.addf %58, %65 : vector<16x16x8xf32>
    %c2_62 = arith.constant 2 : index
    %c1_63 = arith.constant 1 : index
    %c0_64 = arith.constant 0 : index
    %c0_65 = arith.constant 0 : index
    %67 = vector.load %arg4[%c2_62, %c1_63, %c0_64, %c0_65] : memref<3x3x8x8xf32, #tpu.memory_space<vmem>>, vector<1x1x8x8xf32>
    %68 = vector.shape_cast %67 : vector<1x1x8x8xf32> to vector<8x8xf32>
    %cst_66 = arith.constant dense<0.000000e+00> : vector<512x8xf32>
    %69 = tpu.matmul %60, %68, %cst_66 {dimension_numbers = #tpu.dot_dimension_numbers<[1], [0], [0], [1], [0, 0, 1, 1], [], []>} : vector<512x8xf32>, vector<8x8xf32>, vector<512x8xf32> -> vector<512x8xf32>
    %70 = vector.shape_cast %69 : vector<512x8xf32> to vector<16x32x8xf32>
    %71 = vector.extract_strided_slice %70 {offsets = [0, 8, 0], sizes = [16, 16, 8], strides = [1, 1, 1]} : vector<16x32x8xf32> to vector<16x16x8xf32>
    %72 = arith.addf %66, %71 : vector<16x16x8xf32>
    %c2_67 = arith.constant 2 : index
    %c2_68 = arith.constant 2 : index
    %c0_69 = arith.constant 0 : index
    %c0_70 = arith.constant 0 : index
    %73 = vector.load %arg4[%c2_67, %c2_68, %c0_69, %c0_70] : memref<3x3x8x8xf32, #tpu.memory_space<vmem>>, vector<1x1x8x8xf32>
    %74 = vector.shape_cast %73 : vector<1x1x8x8xf32> to vector<8x8xf32>
    %cst_71 = arith.constant dense<0.000000e+00> : vector<512x8xf32>
    %75 = tpu.matmul %60, %74, %cst_71 {dimension_numbers = #tpu.dot_dimension_numbers<[1], [0], [0], [1], [0, 0, 1, 1], [], []>} : vector<512x8xf32>, vector<8x8xf32>, vector<512x8xf32> -> vector<512x8xf32>
    %76 = vector.shape_cast %75 : vector<512x8xf32> to vector<16x32x8xf32>
    %77 = vector.extract_strided_slice %76 {offsets = [0, 9, 0], sizes = [16, 16, 8], strides = [1, 1, 1]} : vector<16x32x8xf32> to vector<16x16x8xf32>
    %78 = arith.addf %72, %77 : vector<16x16x8xf32>
    %79 = vector.shape_cast %78 : vector<16x16x8xf32> to vector<256x8xf32>
    %c0_72 = arith.constant 0 : index
    %c0_73 = arith.constant 0 : index
    %c0_74 = arith.constant 0 : index
    %80 = vector.load %arg5[%c0_72, %c0_73, %c0_74] : memref<1x256x8xf32, #tpu.memory_space<vmem>>, vector<1x256x8xf32>
    %81 = vector.shape_cast %80 : vector<1x256x8xf32> to vector<256x8xf32>
    %82 = vector.shape_cast %79 : vector<256x8xf32> to vector<1x256x8xf32>
    tpu.vector_store %arg5[%c0_72, %c0_73, %c0_74], %82 {strides = array<i32>} : memref<1x256x8xf32, #tpu.memory_space<vmem>>, vector<1x256x8xf32>,
    %cst_75 = arith.constant dense<0.000000e+00> : vector<8xf32>
    %83 = vector.multi_reduction <add>, %79, %cst_75 [0] : vector<256x8xf32> to vector<8xf32>
    %84 = vector.shape_cast %83 : vector<8xf32> to vector<1x8xf32>
    %c0_76 = arith.constant 0 : index
    %c0_77 = arith.constant 0 : index
    %c0_78 = arith.constant 0 : index
    %85 = vector.load %arg6[%c0_76, %c0_77, %c0_78] : memref<1x1x8xf32, #tpu.memory_space<vmem>>, vector<1x1x8xf32>
    %86 = vector.shape_cast %85 : vector<1x1x8xf32> to vector<1x8xf32>
    %87 = vector.shape_cast %84 : vector<1x8xf32> to vector<1x1x8xf32>
    tpu.vector_store %arg6[%c0_76, %c0_77, %c0_78], %87 {strides = array<i32>} : memref<1x1x8xf32, #tpu.memory_space<vmem>>, vector<1x1x8xf32>,
    %88 = arith.mulf %79, %79 : vector<256x8xf32>
    %cst_79 = arith.constant dense<0.000000e+00> : vector<8xf32>
    %89 = vector.multi_reduction <add>, %88, %cst_79 [0] : vector<256x8xf32> to vector<8xf32>
    %90 = vector.shape_cast %89 : vector<8xf32> to vector<1x8xf32>
    %c0_80 = arith.constant 0 : index
    %c0_81 = arith.constant 0 : index
    %c0_82 = arith.constant 0 : index
    %91 = vector.load %arg7[%c0_80, %c0_81, %c0_82] : memref<1x1x8xf32, #tpu.memory_space<vmem>>, vector<1x1x8xf32>
    %92 = vector.shape_cast %91 : vector<1x1x8xf32> to vector<1x8xf32>
    %93 = vector.shape_cast %90 : vector<1x8xf32> to vector<1x1x8xf32>
    tpu.vector_store %arg7[%c0_80, %c0_81, %c0_82], %93 {strides = array<i32>} : memref<1x1x8xf32, #tpu.memory_space<vmem>>, vector<1x1x8xf32>,
    return
  }
  func.func @transform_0(%arg0: i32) -> (i32, i32, i32) {
    %c0_i32 = arith.constant 0 : i32
    %c0_i32_0 = arith.constant 0 : i32
    %c0_i32_1 = arith.constant 0 : i32
    return %arg0, %c0_i32, %c0_i32_0 : i32, i32, i32
  }
  func.func @transform_1(%arg0: i32) -> (i32, i32) {
    %c0_i32 = arith.constant 0 : i32
    %c0_i32_0 = arith.constant 0 : i32
    %c0_i32_1 = arith.constant 0 : i32
    return %c0_i32, %c0_i32_0 : i32, i32
  }
  func.func @transform_2(%arg0: i32) -> (i32, i32) {
    %c0_i32 = arith.constant 0 : i32
    %c0_i32_0 = arith.constant 0 : i32
    %c0_i32_1 = arith.constant 0 : i32
    return %c0_i32, %c0_i32_0 : i32, i32
  }
  func.func @transform_3(%arg0: i32) -> (i32, i32, i32, i32) {
    %c0_i32 = arith.constant 0 : i32
    %c0_i32_0 = arith.constant 0 : i32
    %c0_i32_1 = arith.constant 0 : i32
    %c0_i32_2 = arith.constant 0 : i32
    %c0_i32_3 = arith.constant 0 : i32
    return %c0_i32, %c0_i32_0, %c0_i32_1, %c0_i32_2 : i32, i32, i32, i32
  }
  func.func @transform_4(%arg0: i32) -> (i32, i32, i32) {
    %c0_i32 = arith.constant 0 : i32
    %c0_i32_0 = arith.constant 0 : i32
    %c0_i32_1 = arith.constant 0 : i32
    return %arg0, %c0_i32, %c0_i32_0 : i32, i32, i32
  }
  func.func @transform_5(%arg0: i32) -> (i32, i32, i32) {
    %c0_i32 = arith.constant 0 : i32
    %c0_i32_0 = arith.constant 0 : i32
    %c0_i32_1 = arith.constant 0 : i32
    return %arg0, %c0_i32, %c0_i32_0 : i32, i32, i32
  }
  func.func @transform_6(%arg0: i32) -> (i32, i32, i32) {
    %c0_i32 = arith.constant 0 : i32
    %c0_i32_0 = arith.constant 0 : i32
    %c0_i32_1 = arith.constant 0 : i32
    return %arg0, %c0_i32, %c0_i32_0 : i32, i32, i32
  }
}

</mosaic_0001>

<bundles_post_ra>
// kernel: residual_block_forward.5
= control target key start
LH: loop header
LB: loop body
LE: loop exit
PB: predicated region body
PF: predicated region fallthrough
CT: control target
= control target key end

     0   :  { %s1165_s21 = smov 0   ;;  %s1407_s0 = inlined_call_operand.vmem [shape: f32[2,16,16,4], index: 0, kind: input, shape index: {}]   ;;  %s1408_s1 = inlined_call_operand.vmem [shape: f32[4,8], index: 1, kind: input, shape index: {}]   ;;  %s1409_s2 = inlined_call_operand.vmem [shape: f32[2,256,8], index: 2, kind: input, shape index: {}]   ;;  %s1410_s3 = inlined_call_operand.vmem [shape: f32[1,8], index: 3, kind: input, shape index: {}]   ;;  %s1411_s4 = inlined_call_operand.vmem [shape: f32[1,8], index: 4, kind: input, shape index: {}]   ;;  %s1412_s5 = inlined_call_operand.vmem [shape: f32[1,8], index: 5, kind: input, shape index: {}]   ;;  %s1413_s6 = inlined_call_operand.vmem [shape: f32[2,8,256], index: 6, kind: output, shape index: {}]  }
   0x1 LB: > { %s977_s22 = sadd.s32 4294967295, %s1128_s21   ;;  %p981_p0 = scmp.ge.s32.totalorder %s1128_s21, 1  ;;  %s1128_s21 = sphi %s1165_s21, %s16_s21  }
   0x2   : > { %p222_p1 = scmp.lt.s32.totalorder %s1128_s21, 3 }
   0x4   : > { %p223_p2 = pnand %p981_p0, %p222_p1 }
   0x5   : > { %p257_p3 = scmp.lt.s32.totalorder (!%p223_p2), %s977_s22, 1 }
   0x6   : > { %226 = sbr.rel (%p223_p2) target bundleno = 346 (0x15a), region = 44 }
   0xb   : > { %v304_v0 = vld [vmem:[%s1408_s1] sm:$0xf]  ;;  %vm402_vm0 = vcmask 1043456   ;;  %s1415_s22 = smov (!%p257_p3, %s977_s22), 1  ;;  %vm305_vm1 = vcmask 31744  }
   0xc   : > { %1062 = vmatprep.subr.msk.mxu0 %vm402_vm0, %v304_v0  ;;  %1112 = vmatprep.subr.msk.mxu1 %vm402_vm0, %v304_v0  ;;  %s1026_s25 = sshll.u32 %s1415_s22, 8  ;;  %v1261_v34 = vld [vmem:[%s1410_s3] ss:$0 sm:$0xff]  ;;  %s1028_s14 = sshll.u32 %s1415_s22, 4 }
   0xd   : > { %1063 = vmatpush3.msk.msra.mxu0 %vm402_vm0, %v304_v0  ;;  %1113 = vmatpush3.msk.msra.mxu1 %vm402_vm0, %v304_v0  ;;  %s1184_s28 = scalar_lea.vmem %s1407_s0, %s1026_s25  ;;  %s1255_s7 = scalar_lea.vmem %s1409_s2, %s1026_s25  ;;  %v1267_v36 = vld [vmem:[%s1411_s4] ss:$0 sm:$0xff] }
   0xe   : > { %v272_v1 = vld [vmem:[%s1184_s28] sm:$0xff]  ;;  %v273_v3 = vld [vmem:[%s1184_s28 + $0x8] sm:$0xff]  ;;  %v274_v5 = vld [vmem:[%s1184_s28 + $0x10] sm:$0xff]  ;;  %s271_s17 = scalar_lea.vmem %s1413_s6, %s1028_s14 }
   0xf   : > { %v288_v2 = vld [vmem:[%s1184_s28 + $0x80] sm:$0xff]  ;;  %1064 = vmatprep.mubr.msk.f32.mxu0 %vm305_vm1, %v272_v1  ;;  %v289_v4 = vld [vmem:[%s1184_s28 + $0x88] sm:$0xff]  ;;  %v290_v6 = vld [vmem:[%s1184_s28 + $0x90] sm:$0xff] }
  0x10   : > { %1088 = vmatprep.mubr.msk.f32.mxu1 %vm305_vm1, %v288_v2  ;;  %1065 = vmatmul.mubr.msk.f32.vlgmr.msra.gmra.mxu0 %vm305_vm1, %v273_v3  ;;  %v275_v7 = vld [vmem:[%s1184_s28 + $0x18] sm:$0xff]  ;;  %v276_v9 = vld [vmem:[%s1184_s28 + $0x20] sm:$0xff]  ;;  %v277_v11 = vld [vmem:[%s1184_s28 + $0x28] sm:$0xff] }
  0x11   : > { %1089 = vmatmul.mubr.msk.f32.vlgmr.msra.gmra.mxu1 %vm305_vm1, %v289_v4  ;;  %1067 = vmatprep.mubr.msk.f32.mxu0 %vm305_vm1, %v274_v5  ;;  %v291_v8 = vld [vmem:[%s1184_s28 + $0x98] sm:$0xff]  ;;  %v292_v10 = vld [vmem:[%s1184_s28 + $0xa0] sm:$0xff]  ;;  %v293_v12 = vld [vmem:[%s1184_s28 + $0xa8] sm:$0xff] }
  0x12   : > { %1091 = vmatprep.mubr.msk.f32.mxu1 %vm305_vm1, %v290_v6  ;;  %v278_v13 = vld [vmem:[%s1184_s28 + $0x30] sm:$0xff]  ;;  %v279_v15 = vld [vmem:[%s1184_s28 + $0x38] sm:$0xff]  ;;  %v280_v17 = vld [vmem:[%s1184_s28 + $0x40] sm:$0xff] }
  0x13   : > { %v294_v14 = vld [vmem:[%s1184_s28 + $0xb0] sm:$0xff]  ;;  %v295_v16 = vld [vmem:[%s1184_s28 + $0xb8] sm:$0xff]  ;;  %v296_v18 = vld [vmem:[%s1184_s28 + $0xc0] sm:$0xff] }
  0x14   : > { %1068 = vmatmul.mubr.msk.f32.gmra.mxu0 %vm305_vm1, %v275_v7  ;;  %v281_v19 = vld [vmem:[%s1184_s28 + $0x48] sm:$0xff]  ;;  %v282_v21 = vld [vmem:[%s1184_s28 + $0x50] sm:$0xff]  ;;  %v283_v23 = vld [vmem:[%s1184_s28 + $0x58] sm:$0xff] }
  0x15   : > { %1092 = vmatmul.mubr.msk.f32.gmra.mxu1 %vm305_vm1, %v291_v8  ;;  %1070 = vmatprep.mubr.msk.f32.mxu0 %vm305_vm1, %v276_v9  ;;  %v297_v20 = vld [vmem:[%s1184_s28 + $0xc8] sm:$0xff]  ;;  %v298_v22 = vld [vmem:[%s1184_s28 + $0xd0] sm:$0xff]  ;;  %v299_v24 = vld [vmem:[%s1184_s28 + $0xd8] sm:$0xff] }
  0x16   : > { %1094 = vmatprep.mubr.msk.f32.mxu1 %vm305_vm1, %v292_v10  ;;  %v284_v25 = vld [vmem:[%s1184_s28 + $0x60] sm:$0xff]  ;;  %v285_v27 = vld [vmem:[%s1184_s28 + $0x68] sm:$0xff]  ;;  %v286_v29 = vld [vmem:[%s1184_s28 + $0x70] sm:$0xff] }
  0x17   : > { %v300_v26 = vld [vmem:[%s1184_s28 + $0xe0] sm:$0xff]  ;;  %v301_v28 = vld [vmem:[%s1184_s28 + $0xe8] sm:$0xff]  ;;  %v302_v30 = vld [vmem:[%s1184_s28 + $0xf0] sm:$0xff] }
  0x18   : > { %1071 = vmatmul.mubr.msk.f32.gmra.mxu0 %vm305_vm1, %v277_v11  ;;  %v287_v31 = vld [vmem:[%s1184_s28 + $0x78] sm:$0xff]  ;;  %v632_v33 = vld [vmem:[%s1255_s7 + $0x8] sm:$0xff]  ;;  %v647_v37 = vld [vmem:[%s1255_s7 + $0x80] sm:$0xff] }
  0x19   : > { %1095 = vmatmul.mubr.msk.f32.gmra.mxu1 %vm305_vm1, %v293_v12  ;;  %1073 = vmatprep.mubr.msk.f32.mxu0 %vm305_vm1, %v278_v13  ;;  %v303_v32 = vld [vmem:[%s1184_s28 + $0xf8] sm:$0xff]  ;;  %v648_v35 = vld [vmem:[%s1255_s7 + $0x88] sm:$0xff]  ;;  %v631_v38 = vld [vmem:[%s1255_s7] sm:$0xff]  ;;  %v671_v40 = vmul.f32 %v1261_v34, %v632_v33  ;;  %v686_v45 = vmul.f32 %v1261_v34, %v647_v37 }
  0x1a   : > { %1097 = vmatprep.mubr.msk.f32.mxu1 %vm305_vm1, %v294_v14  ;;  %v687_v42 = vmul.f32 %v1261_v34, %v648_v35  ;;  %v670_v46 = vmul.f32 %v1261_v34, %v631_v38  ;;  %v633_v51 = vld [vmem:[%s1255_s7 + $0x10] sm:$0xff]  ;;  %v634_v57 = vld [vmem:[%s1255_s7 + $0x18] sm:$0xff]  ;;  %v1288_v1 = vld [vmem:[%s1412_s5] ss:$0 sm:$0xff] }
  0x1b   : > { %v649_v52 = vld [vmem:[%s1255_s7 + $0x90] sm:$0xff]  ;;  %v650_v58 = vld [vmem:[%s1255_s7 + $0x98] sm:$0xff]  ;;  %v672_v62 = vmul.f32 %v1261_v34, %v633_v51  ;;  %v673_v4 = vmul.f32 %v1261_v34, %v634_v57  ;;  %v635_v14 = vld [vmem:[%s1255_s7 + $0x20] sm:$0xff] }
  0x1c   : > { %1074 = vmatmul.mubr.msk.f32.gmra.mxu0 %vm305_vm1, %v279_v15  ;;  %v688_v0 = vmul.f32 %v1261_v34, %v649_v52  ;;  %v689_v5 = vmul.f32 %v1261_v34, %v650_v58  ;;  %v651_v15 = vld [vmem:[%s1255_s7 + $0xa0] sm:$0xff]  ;;  %v654_v57 = vld [vmem:[%s1255_s7 + $0xb8] sm:$0xff] }
  0x1d   : > { %1098 = vmatmul.mubr.msk.f32.gmra.mxu1 %vm305_vm1, %v295_v16  ;;  %1076 = vmatprep.mubr.msk.f32.mxu0 %vm305_vm1, %v280_v17 }
  0x1e   : > { %1100 = vmatprep.mubr.msk.f32.mxu1 %vm305_vm1, %v296_v18 }
  0x20   : > { %1077 = vmatmul.mubr.msk.f32.gmra.mxu0 %vm305_vm1, %v281_v19 }
  0x21   : > { %1101 = vmatmul.mubr.msk.f32.gmra.mxu1 %vm305_vm1, %v297_v20  ;;  %1079 = vmatprep.mubr.msk.f32.mxu0 %vm305_vm1, %v282_v21 }
  0x22   : > { %1103 = vmatprep.mubr.msk.f32.mxu1 %vm305_vm1, %v298_v22  ;;  %v674_v22 = vmul.f32 %v1261_v34, %v635_v14 }
  0x24   : > { %1080 = vmatmul.mubr.msk.f32.gmra.mxu0 %vm305_vm1, %v283_v23  ;;  %v690_v23 = vmul.f32 %v1261_v34, %v651_v15 }
  0x25   : > { %1104 = vmatmul.mubr.msk.f32.gmra.mxu1 %vm305_vm1, %v299_v24  ;;  %1082 = vmatprep.mubr.msk.f32.mxu0 %vm305_vm1, %v284_v25 }
  0x26   : > { %1106 = vmatprep.mubr.msk.f32.mxu1 %vm305_vm1, %v300_v26  ;;  %v636_v26 = vld [vmem:[%s1255_s7 + $0x28] sm:$0xff] }
  0x27   : > { %v675_v38 = vmul.f32 %v1261_v34, %v636_v26 }
  0x28   : > { %1083 = vmatmul.mubr.msk.f32.gmra.mxu0 %vm305_vm1, %v285_v27  ;;  %v652_v27 = vld [vmem:[%s1255_s7 + $0xa8] sm:$0xff] }
  0x29   : > { %1107 = vmatmul.mubr.msk.f32.gmra.mxu1 %vm305_vm1, %v301_v28  ;;  %1085 = vmatprep.mubr.msk.f32.mxu0 %vm305_vm1, %v286_v29 }
  0x2a   : > { %1109 = vmatprep.mubr.msk.f32.mxu1 %vm305_vm1, %v302_v30 }
  0x2c   : > { %1086 = vmatmul.mubr.msk.f32.gmra.mxu0 %vm305_vm1, %v287_v31 }
  0x2d   : > { %1110 = vmatmul.mubr.msk.f32.gmra.mxu1 %vm305_vm1, %v303_v32 }
  0xd0   : > { %v1066_v39 = vpop.f32.mrf.mxu0 }
  0xd1   : > { %v1090_v41 = vpop.f32.mrf.mxu1  ;;  %v710_v43 = vmul.f32 %v1066_v39, %v1267_v36  ;;  %v691_v39 = vmul.f32 %v1261_v34, %v652_v27 }
  0xd2   : > { %v726_v44 = vmul.f32 %v1090_v41, %v1267_v36  ;;  %v472_v47 = vpop.f32.mrf.mxu0 }
  0xd3   : > { %v552_v48 = vpop.f32.mrf.mxu1  ;;  %v709_v49 = vmul.f32 %v1267_v36, %v472_v47  ;;  %v742_v55 = vadd.f32 %v710_v43, %v671_v40 }
  0xd4   : > { %v725_v50 = vmul.f32 %v1267_v36, %v552_v48  ;;  %v1069_v53 = vpop.f32.mrf.mxu0  ;;  %v758_v56 = vadd.f32 %v726_v44, %v687_v42  ;;  %v637_v44 = vld [vmem:[%s1255_s7 + $0x30] sm:$0xff] }
  0xd5   : > { %v1093_v54 = vpop.f32.mrf.mxu1  ;;  %v741_v60 = vadd.f32 %v709_v49, %v670_v46  ;;  %v712_v10 = vmul.f32 %v1069_v53, %v1267_v36  ;;  %v781_v13 = vadd.f32 %v1288_v1, %v742_v55  ;;  %v676_v52 = vmul.f32 %v1261_v34, %v637_v44 }
  0xd6   : > { %v757_v59 = vadd.f32 %v725_v50, %v686_v45  ;;  %v482_v61 = vpop.f32.mrf.mxu0  ;;  %v728_v11 = vmul.f32 %v1093_v54, %v1267_v36  ;;  %v797_v12 = vadd.f32 %v1288_v1, %v758_v56  ;;  %v653_v45 = vld [vmem:[%s1255_s7 + $0xb0] sm:$0xff]  ;;  %v638_v56 = vld [vmem:[%s1255_s7 + $0x38] sm:$0xff] }
  0xd7   : > { %v562_v63 = vpop.f32.mrf.mxu1  ;;  %v711_v2 = vmul.f32 %v1267_v36, %v482_v61  ;;  %v780_v7 = vadd.f32 %v1288_v1, %v741_v60  ;;  %v744_v24 = vadd.f32 %v712_v10, %v673_v4  ;;  %v813_v29 = vmax.f32 %v781_v13, 0.0  ;;  %v655_v10 = vld [vmem:[%s1255_s7 + $0xc0] sm:$0xff] }
  0xd8   : > { %v727_v3 = vmul.f32 %v1267_v36, %v562_v63  ;;  %v796_v6 = vadd.f32 %v1288_v1, %v757_v59  ;;  %v1072_v8 = vpop.f32.mrf.mxu0  ;;  %v760_v25 = vadd.f32 %v728_v11, %v689_v5  ;;  %v829_v28 = vmax.f32 %v797_v12, 0.0 }
  0xd9   : > { %v1096_v9 = vpop.f32.mrf.mxu1  ;;  %v743_v16 = vadd.f32 %v711_v2, %v672_v62  ;;  %v812_v19 = vmax.f32 %v780_v7, 0.0  ;;  %v714_v40 = vmul.f32 %v1072_v8, %v1267_v36  ;;  %v783_v43 = vadd.f32 %v1288_v1, %v744_v24 }
  0xda   : > { %v759_v17 = vadd.f32 %v727_v3, %v688_v0  ;;  %v828_v18 = vmax.f32 %v796_v6, 0.0  ;;  %v492_v20 = vpop.f32.mrf.mxu0  ;;  %v730_v41 = vmul.f32 %v1096_v9, %v1267_v36  ;;  %v799_v42 = vadd.f32 %v1288_v1, %v760_v25  ;;  %v639_v9 = vld [vmem:[%s1255_s7 + $0x40] sm:$0xff] }
  0xdb   : > { %v572_v21 = vpop.f32.mrf.mxu1  ;;  %844 = vxpose.xlu0.b32.start [1/16] (narrow) %v812_v19, 8  ;;  %v713_v30 = vmul.f32 %v1267_v36, %v492_v20  ;;  %v782_v33 = vadd.f32 %v1288_v1, %v743_v16  ;;  %v692_v53 = vmul.f32 %v1261_v34, %v653_v45  ;;  %v746_v54 = vadd.f32 %v714_v40, %v675_v38  ;;  %v657_v40 = vld [vmem:[%s1255_s7 + $0xd0] sm:$0xff] }
  0xdc   : > { %876 = vxpose.xlu1.b32.start [1/16] (narrow) %v828_v18, 8  ;;  %v729_v31 = vmul.f32 %v1267_v36, %v572_v21  ;;  %v798_v32 = vadd.f32 %v1288_v1, %v759_v17  ;;  %v1075_v35 = vpop.f32.mrf.mxu0  ;;  %v762_v55 = vadd.f32 %v730_v41, %v691_v39  ;;  %v831_v58 = vmax.f32 %v799_v42, 0.0  ;;  %v640_v21 = vld [vmem:[%s1255_s7 + $0x48] sm:$0xff]  ;;  %v641_v39 = vld [vmem:[%s1255_s7 + $0x50] sm:$0xff] }
  0xdd   : > { %v1099_v37 = vpop.f32.mrf.mxu1  ;;  %v745_v46 = vadd.f32 %v713_v30, %v674_v22  ;;  %v814_v49 = vmax.f32 %v782_v33, 0.0  ;;  %v815_v59 = vmax.f32 %v783_v43, 0.0  ;;  %v677_v3 = vmul.f32 %v1261_v34, %v638_v56  ;;  %v656_v22 = vld [vmem:[%s1255_s7 + $0xc8] sm:$0xff] }
  0xde   : > { %v761_v47 = vadd.f32 %v729_v31, %v690_v23  ;;  %v830_v48 = vmax.f32 %v798_v32, 0.0  ;;  %v502_v50 = vpop.f32.mrf.mxu0  ;;  %v693_v4 = vmul.f32 %v1261_v34, %v654_v57  ;;  %v716_v5 = vmul.f32 %v1075_v35, %v1267_v36 }
  0xdf   : > { %845 = vxpose.xlu0.b32.cont [2/16] (narrow) %v813_v29, 8  ;;  %v582_v51 = vpop.f32.mrf.mxu1  ;;  %v715_v60 = vmul.f32 %v1267_v36, %v502_v50  ;;  %v784_v63 = vadd.f32 %v1288_v1, %v745_v46  ;;  %v732_v6 = vmul.f32 %v1099_v37, %v1267_v36  ;;  %v801_v7 = vadd.f32 %v1288_v1, %v762_v55 }
  0xe0   : > { %877 = vxpose.xlu1.b32.cont [2/16] (narrow) %v829_v28, 8  ;;  %v731_v61 = vmul.f32 %v1267_v36, %v582_v51  ;;  %v800_v62 = vadd.f32 %v1288_v1, %v761_v47  ;;  %v1078_v0 = vpop.f32.mrf.mxu0  ;;  %v785_v8 = vadd.f32 %v1288_v1, %v746_v54  ;;  %v678_v17 = vmul.f32 %v1261_v34, %v639_v9  ;;  %v642_v51 = vld [vmem:[%s1255_s7 + $0x58] sm:$0xff] }
  0xe1   : > { %v1102_v2 = vpop.f32.mrf.mxu1  ;;  %v747_v11 = vadd.f32 %v715_v60, %v676_v52  ;;  %v816_v14 = vmax.f32 %v784_v63, 0.0  ;;  %v694_v18 = vmul.f32 %v1261_v34, %v655_v10  ;;  %v748_v19 = vadd.f32 %v716_v5, %v677_v3  ;;  %v658_v52 = vld [vmem:[%s1255_s7 + $0xd8] sm:$0xff]  ;;  %v659_v5 = vld [vmem:[%s1255_s7 + $0xe0] sm:$0xff] }
  0xe2   : > { %v763_v12 = vadd.f32 %v731_v61, %v692_v53  ;;  %v832_v13 = vmax.f32 %v800_v62, 0.0  ;;  %v512_v15 = vpop.f32.mrf.mxu0  ;;  %v764_v20 = vadd.f32 %v732_v6, %v693_v4  ;;  %v833_v23 = vmax.f32 %v801_v7, 0.0  ;;  %v643_v4 = vld [vmem:[%s1255_s7 + $0x60] sm:$0xff] }
  0xe3   : > { %846 = vxpose.xlu0.b32.cont [3/16] (narrow) %v814_v49, 8  ;;  %v592_v16 = vpop.f32.mrf.mxu1  ;;  %v817_v24 = vmax.f32 %v785_v8, 0.0  ;;  %v717_v25 = vmul.f32 %v1267_v36, %v512_v15  ;;  %v786_v28 = vadd.f32 %v1288_v1, %v747_v11  ;;  %v679_v31 = vmul.f32 %v1261_v34, %v640_v21 }
  0xe4   : > { %878 = vxpose.xlu1.b32.cont [3/16] (narrow) %v830_v48, 8  ;;  %v733_v26 = vmul.f32 %v1267_v36, %v592_v16  ;;  %v802_v27 = vadd.f32 %v1288_v1, %v763_v12  ;;  %v1081_v29 = vpop.f32.mrf.mxu0  ;;  %v695_v32 = vmul.f32 %v1261_v34, %v656_v22  ;;  %v718_v33 = vmul.f32 %v1078_v0, %v1267_v36  ;;  %v644_v16 = vld [vmem:[%s1255_s7 + $0x68] sm:$0xff] }
  0xe5   : > { %v1105_v30 = vpop.f32.mrf.mxu1  ;;  %v734_v35 = vmul.f32 %v1102_v2, %v1267_v36  ;;  %v803_v37 = vadd.f32 %v1288_v1, %v764_v20  ;;  %v787_v38 = vadd.f32 %v1288_v1, %v748_v19  ;;  %v749_v41 = vadd.f32 %v717_v25, %v678_v17  ;;  %v660_v17 = vld [vmem:[%s1255_s7 + $0xe8] sm:$0xff] }
  0xe6   : > { %v765_v42 = vadd.f32 %v733_v26, %v694_v18  ;;  %v834_v43 = vmax.f32 %v802_v27, 0.0  ;;  %v818_v44 = vmax.f32 %v786_v28, 0.0  ;;  %v522_v45 = vpop.f32.mrf.mxu0  ;;  %v680_v47 = vmul.f32 %v1261_v34, %v641_v39 }
  0xe7   : > { %847 = vxpose.xlu0.b32.cont [4/16] (narrow) %v815_v59, 8  ;;  %v602_v46 = vpop.f32.mrf.mxu1  ;;  %v696_v48 = vmul.f32 %v1261_v34, %v657_v40  ;;  %v750_v49 = vadd.f32 %v718_v33, %v679_v31  ;;  %v766_v50 = vadd.f32 %v734_v35, %v695_v32  ;;  %v835_v53 = vmax.f32 %v803_v37, 0.0  ;;  %v645_v32 = vld [vmem:[%s1255_s7 + $0x70] sm:$0xff] }
  0xe8   : > { %879 = vxpose.xlu1.b32.cont [4/16] (narrow) %v831_v58, 8  ;;  %v819_v54 = vmax.f32 %v787_v38, 0.0  ;;  %v719_v55 = vmul.f32 %v1267_v36, %v522_v45  ;;  %v735_v56 = vmul.f32 %v1267_v36, %v602_v46  ;;  %v804_v57 = vadd.f32 %v1288_v1, %v765_v42  ;;  %v1084_v59 = vpop.f32.mrf.mxu0  ;;  %v661_v33 = vld [vmem:[%s1255_s7 + $0xf0] sm:$0xff]  ;;  %v646_v46 = vld [vmem:[%s1255_s7 + $0x78] sm:$0xff] }
  0xe9   : > { %v788_v58 = vadd.f32 %v1288_v1, %v749_v41  ;;  %v1108_v60 = vpop.f32.mrf.mxu1  ;;  %v681_v61 = vmul.f32 %v1261_v34, %v642_v51  ;;  %v697_v62 = vmul.f32 %v1261_v34, %v658_v52  ;;  %v720_v63 = vmul.f32 %v1081_v29, %v1267_v36 }
  0xea   : > { %v736_v0 = vmul.f32 %v1105_v30, %v1267_v36  ;;  %v805_v2 = vadd.f32 %v1288_v1, %v766_v50  ;;  %v789_v3 = vadd.f32 %v1288_v1, %v750_v49  ;;  %v751_v6 = vadd.f32 %v719_v55, %v680_v47  ;;  %v532_v10 = vpop.f32.mrf.mxu0  ;;  %v662_v47 = vld [vmem:[%s1255_s7 + $0xf8] sm:$0xff] }
  0xeb   : > { %848 = vxpose.xlu0.b32.cont [5/16] (narrow) %v816_v14, 8  ;;  %v767_v7 = vadd.f32 %v735_v56, %v696_v48  ;;  %v836_v8 = vmax.f32 %v804_v57, 0.0  ;;  %v820_v9 = vmax.f32 %v788_v58, 0.0  ;;  %v612_v11 = vpop.f32.mrf.mxu1  ;;  %v682_v12 = vmul.f32 %v1261_v34, %v643_v4 }
  0xec   : > { %880 = vxpose.xlu1.b32.cont [5/16] (narrow) %v832_v13, 8  ;;  %v698_v13 = vmul.f32 %v1261_v34, %v659_v5  ;;  %v752_v14 = vadd.f32 %v720_v63, %v681_v61  ;;  %v768_v15 = vadd.f32 %v736_v0, %v697_v62  ;;  %v837_v18 = vmax.f32 %v805_v2, 0.0 }
  0xed   : > { %v821_v19 = vmax.f32 %v789_v3, 0.0  ;;  %v721_v20 = vmul.f32 %v1267_v36, %v532_v10  ;;  %v737_v21 = vmul.f32 %v1267_v36, %v612_v11  ;;  %v806_v22 = vadd.f32 %v1288_v1, %v767_v7  ;;  %v1111_v25 = vpop.f32.mrf.mxu1 }
  0xee   : > { %v683_v26 = vmul.f32 %v1261_v34, %v644_v16  ;;  %v699_v27 = vmul.f32 %v1261_v34, %v660_v17  ;;  %v722_v28 = vmul.f32 %v1084_v59, %v1267_v36  ;;  %v738_v29 = vmul.f32 %v1108_v60, %v1267_v36 }
  0xef   : > { %849 = vxpose.xlu0.b32.cont [6/16] (narrow) %v817_v24, 8  ;;  %v1087_v24 = vpop.f32.mrf.mxu0  ;;  %v807_v30 = vadd.f32 %v1288_v1, %v768_v15  ;;  %v791_v31 = vadd.f32 %v1288_v1, %v752_v14  ;;  %v753_v35 = vadd.f32 %v721_v20, %v682_v12  ;;  %v769_v37 = vadd.f32 %v737_v21, %v698_v13  ;;  %v622_v41 = vpop.f32.mrf.mxu1 }
  0xf0   : > { %881 = vxpose.xlu1.b32.cont [6/16] (narrow) %v833_v23, 8  ;;  %v790_v23 = vadd.f32 %v1288_v1, %v751_v6  ;;  %v838_v38 = vmax.f32 %v806_v22, 0.0  ;;  %v684_v42 = vmul.f32 %v1261_v34, %v645_v32  ;;  %v770_v45 = vadd.f32 %v738_v29, %v699_v27 }
  0xf1   : > { %v542_v40 = vpop.f32.mrf.mxu0  ;;  %v839_v48 = vmax.f32 %v807_v30, 0.0  ;;  %v823_v49 = vmax.f32 %v791_v31, 0.0  ;;  %v739_v51 = vmul.f32 %v1267_v36, %v622_v41  ;;  %v808_v52 = vadd.f32 %v1288_v1, %v769_v37 }
  0xf2   : > { %v822_v39 = vmax.f32 %v790_v23, 0.0  ;;  %v723_v50 = vmul.f32 %v1267_v36, %v542_v40  ;;  %v701_v55 = vmul.f32 %v1261_v34, %v662_v47  ;;  %v724_v56 = vmul.f32 %v1087_v24, %v1267_v36 }
  0xf3   : > { %850 = vxpose.xlu0.b32.cont [7/16] (narrow) %v818_v44, 8  ;;  %v754_v44 = vadd.f32 %v722_v28, %v683_v26  ;;  %v740_v57 = vmul.f32 %v1111_v25, %v1267_v36  ;;  %v809_v58 = vadd.f32 %v1288_v1, %v770_v45  ;;  %v840_v62 = vmax.f32 %v808_v52, 0.0 }
  0xf4   : > { %882 = vxpose.xlu1.b32.cont [7/16] (narrow) %v834_v43, 8  ;;  %v700_v43 = vmul.f32 %v1261_v34, %v661_v33  ;;  %v755_v60 = vadd.f32 %v723_v50, %v684_v42 }
  0xf5   : > { %v793_v59 = vadd.f32 %v1288_v1, %v754_v44  ;;  %v772_v2 = vadd.f32 %v740_v57, %v701_v55  ;;  %v841_v3 = vmax.f32 %v809_v58, 0.0 }
  0xf6   : > { %v771_v61 = vadd.f32 %v739_v51, %v700_v43  ;;  %v794_v5 = vadd.f32 %v1288_v1, %v755_v60 }
  0xf7   : > { %851 = vxpose.xlu0.b32.cont [8/16] (narrow) %v819_v54, 8  ;;  %v685_v54 = vmul.f32 %v1261_v34, %v646_v46  ;;  %v825_v34 = vmax.f32 %v793_v59, 0.0  ;;  %v811_v7 = vadd.f32 %v1288_v1, %v772_v2 }
  0xf8   : > { %883 = vxpose.xlu1.b32.cont [8/16] (narrow) %v835_v53, 8  ;;  %v792_v53 = vadd.f32 %v1288_v1, %v753_v35  ;;  %v810_v4 = vadd.f32 %v1288_v1, %v771_v61  ;;  %v826_v6 = vmax.f32 %v794_v5, 0.0 }
  0xf9   : > { %v756_v0 = vadd.f32 %v724_v56, %v685_v54 }
  0xfa   : > { %v824_v63 = vmax.f32 %v792_v53, 0.0  ;;  %v842_v36 = vmax.f32 %v810_v4, 0.0 }
  0xfb   : > { %852 = vxpose.xlu0.b32.cont [9/16] (narrow) %v820_v9, 8  ;;  %v843_v9 = vmax.f32 %v811_v7, 0.0 }
  0xfc   : > { %884 = vxpose.xlu1.b32.cont [9/16] (narrow) %v836_v8, 8  ;;  %v795_v8 = vadd.f32 %v1288_v1, %v756_v0 }
  0xfe   : > { %v827_v10 = vmax.f32 %v795_v8, 0.0 }
  0xff   : > { %853 = vxpose.xlu0.b32.cont [10/16] (narrow) %v821_v19, 8 }
 0x100   : > { %885 = vxpose.xlu1.b32.cont [10/16] (narrow) %v837_v18, 8 }
 0x103   : > { %854 = vxpose.xlu0.b32.cont [11/16] (narrow) %v822_v39, 8 }
 0x104   : > { %886 = vxpose.xlu1.b32.cont [11/16] (narrow) %v838_v38, 8 }
 0x107   : > { %855 = vxpose.xlu0.b32.cont [12/16] (narrow) %v823_v49, 8 }
 0x108   : > { %887 = vxpose.xlu1.b32.cont [12/16] (narrow) %v839_v48, 8 }
 0x10b   : > { %856 = vxpose.xlu0.b32.cont [13/16] (narrow) %v824_v63, 8 }
 0x10c   : > { %888 = vxpose.xlu1.b32.cont [13/16] (narrow) %v840_v62, 8 }
 0x10f   : > { %857 = vxpose.xlu0.b32.cont [14/16] (narrow) %v825_v34, 8 }
 0x110   : > { %889 = vxpose.xlu1.b32.cont [14/16] (narrow) %v841_v3, 8 }
 0x113   : > { %858 = vxpose.xlu0.b32.cont [15/16] (narrow) %v826_v6, 8 }
 0x114   : > { %890 = vxpose.xlu1.b32.cont [15/16] (narrow) %v842_v36, 8 }
 0x117   : > { %859 = vxpose.xlu0.b32.end [16/16] (narrow) %v827_v10, 8 }
 0x118   : > { %891 = vxpose.xlu1.b32.end [16/16] (narrow) %v843_v9, 8 }
 0x157   : > { %v860_v12 = vpop.trf.xlu0 }
 0x158   : > { %v892_v11 = vpop.trf.xlu1  ;;  %908 = vst [vmem:[%s271_s17] sm:$0xff] %v860_v12 }
 0x159   : > { %909 = vst [vmem:[%s271_s17 + $0x8] sm:$0xff] %v892_v11 }
 0x15a PF: > { %s16_s21 = sadd.s32 1, %s1128_s21  }
 0x15b   : > { %p13_p4 = scmp.ge.s32.totalorder %s16_s21, 4  }
 0x15d   :  { %15 = sbr.rel (!%p13_p4) target bundleno = 1 (0x1), region = 77 }

// kernel: residual_block_forward.3
= control target key start
LH: loop header
LB: loop body
LE: loop exit
PB: predicated region body
PF: predicated region fallthrough
CT: control target
= control target key end

     0   :  { %s9180_s24 = smov 0   ;;  %s12663_s0 = inlined_call_operand.vmem [shape: f32[2,16,16,4], index: 0, kind: input, shape index: {}]   ;;  %s12664_s1 = inlined_call_operand.vmem [shape: f32[3,3,4,8], index: 1, kind: input, shape index: {}]   ;;  %s12665_s2 = inlined_call_operand.vmem [shape: f32[4,8], index: 2, kind: input, shape index: {}]   ;;  %s12666_s3 = inlined_call_operand.vmem [shape: f32[2,256,8], index: 3, kind: output, shape index: {0}]   ;;  %s12667_s4 = inlined_call_operand.vmem [shape: f32[2,1,8], index: 4, kind: output, shape index: {1}]   ;;  %s12668_s5 = inlined_call_operand.vmem [shape: f32[2,1,8], index: 5, kind: output, shape index: {2}]   ;;  %s12669_s6 = inlined_call_operand.vmem [shape: f32[2,1,8], index: 6, kind: output, shape index: {3}]   ;;  %s12670_s7 = inlined_call_operand.vmem [shape: f32[2,1,8], index: 7, kind: output, shape index: {4}]  }
   0x1 LB: > { %s6872_s25 = sadd.s32 4294967295, %s9137_s24   ;;  %p6876_p0 = scmp.ge.s32.totalorder %s9137_s24, 1  ;;  %s9137_s24 = sphi %s9180_s24, %s18_s24  }
   0x2   : > { %p246_p1 = scmp.lt.s32.totalorder %s9137_s24, 3 }
   0x4   : > { %p247_p2 = pnand %p6876_p0, %p246_p1 }
   0x6   : > { %250 = sbr.rel (%p247_p2) target bundleno = 884 (0x374), region = 32 }
   0xb   : > { %v484_v0 = vld [vmem:[%s12664_s1] sm:$0xf]  ;;  %vm677_vm0 = vcmask 1043456   ;;  %vm344_vm1 = vcmask 31744   ;;  %vm355_vm2 = vcmask 24576   ;;  %v9139_v1 = vmov 0.0  }
   0xc   : > { %8129 = vmatprep.subr.msk.mxu0 %vm677_vm0, %v484_v0  ;;  %345 = vst.msk [vmem:[#allocation2] sm:$0xff] %vm344_vm1, %v9139_v1  ;;  %346 = vst.msk [vmem:[#allocation2 + $0x8] sm:$0xff] %vm344_vm1, %v9139_v1  ;;  %v7012_v2 = vld [vmem:[%s12664_s1 + $0x8] sm:$0xf]  ;;  %9061 = vmatprep.subr.msk.mxu1 %vm677_vm0, %v484_v0  ;;  %p290_p3 = scmp.lt.s32.totalorder %s6872_s25, 1  ;;  %vm1488_vm3 = vcmask 1046528  }
   0xd   : > { %347 = vst.msk [vmem:[#allocation2 + $0x10] sm:$0xff] %vm344_vm1, %v9139_v1  ;;  %348 = vst.msk [vmem:[#allocation2 + $0x18] sm:$0xff] %vm344_vm1, %v9139_v1  ;;  %v6946_v3 = vld [vmem:[%s12664_s1 + $0x4] sm:$0xf]  ;;  %8130 = vmatpush3.msk.msra.mxu0 %vm677_vm0, %v484_v0  ;;  %9062 = vmatpush3.msk.msra.mxu1 %vm677_vm0, %v484_v0  ;;  %v9285_v11 = vld [vmem:[%s12664_s1 + $0x10] sm:$0xf] }
   0xe   : > { %350 = vst.msk [vmem:[#allocation2 + $0x220] sm:$0xff] %vm344_vm1, %v9139_v1  ;;  %351 = vst.msk [vmem:[#allocation2 + $0x228] sm:$0xff] %vm344_vm1, %v9139_v1  ;;  %8325 = vmatprep.subr.msk.mxu0 %vm677_vm0, %v7012_v2  ;;  %s13292_s25 = smov (!%p290_p3, %s6872_s25), 1  ;;  %8227 = vmatprep.subr.msk.mxu1 %vm677_vm0, %v6946_v3  ;;  %v9336_v21 = vld [vmem:[%s12664_s1 + $0xc] sm:$0xf]  ;;  %vm2055_vm4 = vcmask 1045504  }
   0xf   : > { %352 = vst.msk [vmem:[#allocation2 + $0x230] sm:$0xff] %vm344_vm1, %v9139_v1  ;;  %353 = vst.msk [vmem:[#allocation2 + $0x238] sm:$0xff] %vm344_vm1, %v9139_v1  ;;  %s7509_s9 = sshll.u32 %s13292_s25, 8  ;;  %vm5901_vm5 = vcmask 1040384   ;;  %vm6339_vm6 = vcmask 64512   ;;  %s308_s11 = scalar_lea.vmem %s12669_s6, %s13292_s25  ;;  %vm6441_vm7 = vcmask 57344  }
  0x10   : > { %367 = vst.msk [vmem:[#allocation2 + $0x187] sm:$0x1] %vm355_vm2, %v9139_v1  ;;  %356 = vst.msk [vmem:[#allocation2 + $0x27] sm:$0x1] %vm355_vm2, %v9139_v1  ;;  %s9255_s12 = scalar_lea.vmem %s12663_s0, %s7509_s9  ;;  %s12134_s8 = scalar_lea.vmem %s12666_s3, %s7509_s9 }
  0x11   : > { %357 = vst.msk [vmem:[#allocation2 + $0x47] sm:$0x1] %vm355_vm2, %v9139_v1  ;;  %358 = vst.msk [vmem:[#allocation2 + $0x67] sm:$0x1] %vm355_vm2, %v9139_v1  ;;  %v9258_v4 = vld [vmem:[%s9255_s12 + $0xb0] sm:$0xff]  ;;  %v9261_v5 = vld [vmem:[%s9255_s12] sm:$0xff]  ;;  %s311_s14 = scalar_lea.vmem %s12670_s7, %s13292_s25  ;;  %s302_s17 = scalar_lea.vmem %s12667_s4, %s13292_s25 }
  0x12   : > { %359 = vst.msk [vmem:[#allocation2 + $0x87] sm:$0x1] %vm355_vm2, %v9139_v1  ;;  %360 = vst.msk [vmem:[#allocation2 + $0xa7] sm:$0x1] %vm355_vm2, %v9139_v1  ;;  %v9264_v6 = vld [vmem:[%s9255_s12 + $0xb8] sm:$0xff]  ;;  %v9292_v12 = vld [vmem:[%s9255_s12 + $0x8] sm:$0xff]  ;;  %s305_s20 = scalar_lea.vmem %s12668_s5, %s13292_s25 }
  0x13   : > { %361 = vst.msk [vmem:[#allocation2 + $0xc7] sm:$0x1] %vm355_vm2, %v9139_v1  ;;  %362 = vst.msk [vmem:[#allocation2 + $0xe7] sm:$0x1] %vm355_vm2, %v9139_v1  ;;  %v9266_v7 = vld [vmem:[#allocation2] sm:$0xff]  ;;  %v9268_v8 = vld [vmem:[#allocation2 + $0x8] sm:$0xff] }
  0x14   : > { %363 = vst.msk [vmem:[#allocation2 + $0x107] sm:$0x1] %vm355_vm2, %v9139_v1  ;;  %364 = vst.msk [vmem:[#allocation2 + $0x127] sm:$0x1] %vm355_vm2, %v9139_v1  ;;  %v9270_v9 = vld [vmem:[#allocation2 + $0x10] sm:$0xff]  ;;  %8131 = vmatprep.mubr.msk.f32.mxu0 %vm344_vm1, %v9266_v7  ;;  %v9297_v13 = vld [vmem:[#allocation2 + $0x18] sm:$0xff] }
  0x15   : > { %365 = vst.msk [vmem:[#allocation2 + $0x147] sm:$0x1] %vm355_vm2, %v9139_v1  ;;  %366 = vst.msk [vmem:[#allocation2 + $0x167] sm:$0x1] %vm355_vm2, %v9139_v1  ;;  %8132 = vmatmul.mubr.msk.f32.vlgmr.msra.gmra.mxu0 %vm344_vm1, %v9268_v8  ;;  %v9302_v14 = vld [vmem:[%s9255_s12 + $0xc0] sm:$0xff]  ;;  %v9309_v16 = vld [vmem:[%s9255_s12 + $0x10] sm:$0xff] }
  0x16   : > { %368 = vst.msk [vmem:[#allocation2 + $0x1a7] sm:$0x1] %vm355_vm2, %v9139_v1  ;;  %369 = vst.msk [vmem:[#allocation2 + $0x1c7] sm:$0x1] %vm355_vm2, %v9139_v1  ;;  %8326 = vmatpush3.msk.msra.mxu0 %vm677_vm0, %v7012_v2  ;;  %8134 = vmatprep.mubr.msk.f32.mxu0 %vm344_vm1, %v9270_v9  ;;  %v9312_v17 = vld [vmem:[%s9255_s12 + $0xc8] sm:$0xff]  ;;  %v9321_v18 = vld [vmem:[%s9255_s12 + $0x18] sm:$0xff] }
  0x17   : > { %370 = vst.msk [vmem:[#allocation2 + $0x1e7] sm:$0x1] %vm355_vm2, %v9139_v1  ;;  %371 = vst.msk [vmem:[#allocation2 + $0x207] sm:$0x1] %vm355_vm2, %v9139_v1  ;;  %v9280_v10 = vld [vmem:[#allocation2 + $0x180] sm:$0xff]  ;;  %8521 = vmatprep.subr.msk.mxu0 %vm677_vm0, %v9285_v11  ;;  %v9328_v19 = vld [vmem:[%s9255_s12 + $0xd0] sm:$0xff] }
  0x18   : > { %372 = vst.msk [vmem:[#allocation2 + $0x38] sm:$0x1] %vm355_vm2, %v9139_v1  ;;  %373 = vst.msk [vmem:[#allocation2 + $0x58] sm:$0x1] %vm355_vm2, %v9139_v1  ;;  %8203 = vmatprep.mubr.msk.f32.mxu1 %vm344_vm1, %v9280_v10  ;;  %v9304_v15 = vld [vmem:[#allocation2 + $0x20] sm:$0xff]  ;;  %v9353_v25 = vld [vmem:[%s9255_s12 + $0xd8] sm:$0xff] }
  0x19   : > { %374 = vst.msk [vmem:[#allocation2 + $0x78] sm:$0x1] %vm355_vm2, %v9139_v1  ;;  %375 = vst.msk [vmem:[#allocation2 + $0x98] sm:$0x1] %vm355_vm2, %v9139_v1  ;;  %8135 = vmatmul.mubr.msk.f32.gmra.mxu0 %vm344_vm1, %v9297_v13  ;;  %v9331_v20 = vld [vmem:[%s9255_s12 + $0x20] sm:$0xff]  ;;  %v9356_v26 = vld [vmem:[%s9255_s12 + $0x28] sm:$0xff] }
  0x1a   : > { %376 = vst.msk [vmem:[#allocation2 + $0xb8] sm:$0x1] %vm355_vm2, %v9139_v1  ;;  %377 = vst.msk [vmem:[#allocation2 + $0xd8] sm:$0x1] %vm355_vm2, %v9139_v1  ;;  %8137 = vmatprep.mubr.msk.f32.mxu0 %vm344_vm1, %v9304_v15  ;;  %v9368_v28 = vld [vmem:[%s9255_s12 + $0xe0] sm:$0xff]  ;;  %v9379_v31 = vld [vmem:[%s9255_s12 + $0x30] sm:$0xff] }
  0x1b   : > { %378 = vst.msk [vmem:[#allocation2 + $0xf8] sm:$0x1] %vm355_vm2, %v9139_v1  ;;  %379 = vst.msk [vmem:[#allocation2 + $0x118] sm:$0x1] %vm355_vm2, %v9139_v1  ;;  %v9390_v33 = vld [vmem:[%s9255_s12 + $0xe8] sm:$0xff]  ;;  %v9394_v34 = vld [vmem:[#allocation2 + $0x40] sm:$0xff] }
  0x1c   : > { %380 = vst.msk [vmem:[#allocation2 + $0x138] sm:$0x1] %vm355_vm2, %v9139_v1  ;;  %381 = vst.msk [vmem:[#allocation2 + $0x158] sm:$0x1] %vm355_vm2, %v9139_v1  ;;  %v9399_v35 = vld [vmem:[%s9255_s12 + $0x38] sm:$0xff]  ;;  %v9412_v38 = vld [vmem:[%s9255_s12 + $0x40] sm:$0xff] }
  0x1d   : > { %382 = vst.msk [vmem:[#allocation2 + $0x178] sm:$0x1] %vm355_vm2, %v9139_v1  ;;  %383 = vst.msk [vmem:[#allocation2 + $0x198] sm:$0x1] %vm355_vm2, %v9139_v1  ;;  %v9374_v30 = vld [vmem:[#allocation2 + $0x1a0] sm:$0xff]  ;;  %v9421_v40 = vld [vmem:[%s9255_s12 + $0x48] sm:$0xff] }
  0x1e   : > { %384 = vst.msk [vmem:[#allocation2 + $0x1b8] sm:$0x1] %vm355_vm2, %v9139_v1  ;;  %385 = vst.msk [vmem:[#allocation2 + $0x1d8] sm:$0x1] %vm355_vm2, %v9139_v1  ;;  %v9430_v42 = vld [vmem:[%s9255_s12 + $0x50] sm:$0xff]  ;;  %v9439_v44 = vld [vmem:[%s9255_s12 + $0x58] sm:$0xff] }
  0x1f   : > { %386 = vst.msk [vmem:[#allocation2 + $0x1f8] sm:$0x1] %vm355_vm2, %v9139_v1  ;;  %387 = vst.msk [vmem:[#allocation2 + $0x218] sm:$0x1] %vm355_vm2, %v9139_v1  ;;  %v9385_v32 = vld [vmem:[#allocation2 + $0x38] sm:$0xff]  ;;  %v9443_v45 = vld [vmem:[#allocation2 + $0x1c0] sm:$0xff] }
  0x20   : > { %12860 = vst [vmem:[#allocation3_spill] sm:$0xff] %v9258_v4  ;;  %12861 = vst [vmem:[#allocation4_spill] sm:$0xff] %v9261_v5  ;;  %v9448_v46 = vld [vmem:[%s9255_s12 + $0x60] sm:$0xff]  ;;  %v9452_v47 = vld [vmem:[#allocation2 + $0x58] sm:$0xff] }
  0x21   : > { %12862 = vst [vmem:[#allocation5_spill] sm:$0xff] %v9264_v6  ;;  %410 = vst.msk [vmem:[#allocation2 + $0x188] sm:$0xff] %vm344_vm1, %v9258_v4  ;;  %v9457_v48 = vld [vmem:[%s9255_s12 + $0x68] sm:$0xff]  ;;  %v9461_v49 = vld [vmem:[#allocation2 + $0x60] sm:$0xff] }
  0x22   : > { %388 = vst.msk [vmem:[#allocation2 + $0x28] sm:$0xff] %vm344_vm1, %v9261_v5  ;;  %411 = vst.msk [vmem:[#allocation2 + $0x190] sm:$0xff] %vm344_vm1, %v9264_v6  ;;  %v9466_v50 = vld [vmem:[%s9255_s12 + $0x70] sm:$0xff]  ;;  %v9475_v52 = vld [vmem:[%s9255_s12 + $0x78] sm:$0xff] }
  0x23   : > { %12863 = vst [vmem:[#allocation6_spill] sm:$0xff] %v9292_v12  ;;  %389 = vst.msk [vmem:[#allocation2 + $0x30] sm:$0xff] %vm344_vm1, %v9292_v12  ;;  %v9484_v54 = vld [vmem:[%s9255_s12 + $0x80] sm:$0xff]  ;;  %v9487_v55 = vld [vmem:[%s9255_s12 + $0x88] sm:$0xff] }
  0x24   : > { %12864 = vst [vmem:[#allocation7_spill] sm:$0xff] %v9302_v14  ;;  %412 = vst.msk [vmem:[#allocation2 + $0x1a8] sm:$0xff] %vm344_vm1, %v9302_v14  ;;  %v9361_v27 = vld [vmem:[#allocation2 + $0x198] sm:$0xff]  ;;  %v9502_v58 = vld [vmem:[%s9255_s12 + $0x90] sm:$0xff] }
  0x25   : > { %12865 = vst [vmem:[#allocation8_spill] sm:$0xff] %v9309_v16  ;;  %12866 = vst [vmem:[#allocation9_spill] sm:$0xff] %v9312_v17  ;;  %v9434_v43 = vld [vmem:[#allocation2 + $0x1b8] sm:$0xff]  ;;  %v9517_v61 = vld [vmem:[#allocation2 + $0x1e0] sm:$0xff] }
  0x26   : > { %390 = vst.msk [vmem:[#allocation2 + $0x48] sm:$0xff] %vm344_vm1, %v9309_v16  ;;  %413 = vst.msk [vmem:[#allocation2 + $0x1b0] sm:$0xff] %vm344_vm1, %v9312_v17  ;;  %v9505_v59 = vld [vmem:[%s9255_s12 + $0x98] sm:$0xff]  ;;  %v9520_v62 = vld [vmem:[%s9255_s12 + $0xa0] sm:$0xff] }
  0x27   : > { %12867 = vst [vmem:[#allocation10_spill] sm:$0xff] %v9321_v18  ;;  %391 = vst.msk [vmem:[#allocation2 + $0x50] sm:$0xff] %vm344_vm1, %v9321_v18  ;;  %v9509_v60 = vld [vmem:[#allocation2 + $0x1d8] sm:$0xff]  ;;  %v9523_v63 = vld [vmem:[%s9255_s12 + $0xa8] sm:$0xff] }
  0x28   : > { %12868 = vst [vmem:[#allocation11_spill] sm:$0xff] %v9328_v19  ;;  %12869 = vst [vmem:[#allocation12_spill] sm:$0xff] %v9331_v20  ;;  %v9338_v22 = vld [vmem:[#allocation2 + $0x188] sm:$0xff]  ;;  %v9527_v0 = vld [vmem:[#allocation2 + $0x78] sm:$0xff] }
  0x29   : > { %12870 = vst [vmem:[#allocation13_spill] sm:$0xff] %v9338_v22  ;;  %v9342_v23 = vld [vmem:[#allocation2 + $0x28] sm:$0xff]  ;;  %v9344_v24 = vld [vmem:[#allocation2 + $0x190] sm:$0xff]  ;;  %414 = vst.msk [vmem:[#allocation2 + $0x1c8] sm:$0xff] %vm344_vm1, %v9328_v19  ;;  %8204 = vmatmul.mubr.msk.f32.vlgmr.msra.gmra.mxu1 %vm344_vm1, %v9338_v22 }
  0x2a   : > { %12871 = vst [vmem:[#allocation14_spill] sm:$0xff] %v9344_v24  ;;  %392 = vst.msk [vmem:[#allocation2 + $0x68] sm:$0xff] %vm344_vm1, %v9331_v20  ;;  %8206 = vmatprep.mubr.msk.f32.mxu1 %vm344_vm1, %v9344_v24  ;;  %8228 = vmatpush3.msk.msra.mxu1 %vm677_vm0, %v6946_v3  ;;  %v9372_v29 = vld [vmem:[#allocation2 + $0x30] sm:$0xff]  ;;  %v9535_v1 = vld [vmem:[#allocation2 + $0x80] sm:$0xff] }
  0x2b   : > { %12872 = vst [vmem:[#allocation15_spill] sm:$0xff] %v9353_v25  ;;  %12873 = vst [vmem:[#allocation16_spill] sm:$0xff] %v9356_v26  ;;  %8138 = vmatmul.mubr.msk.f32.gmra.mxu0 %vm344_vm1, %v9342_v23  ;;  %8423 = vmatprep.subr.msk.mxu1 %vm677_vm0, %v9336_v21  ;;  %v9403_v36 = vld [vmem:[#allocation2 + $0x1a8] sm:$0xff]  ;;  %v9561_v19 = vld [vmem:[#allocation2 + $0x98] sm:$0xff] }
  0x2c   : > { %415 = vst.msk [vmem:[#allocation2 + $0x1d0] sm:$0xff] %vm344_vm1, %v9353_v25  ;;  %393 = vst.msk [vmem:[#allocation2 + $0x70] sm:$0xff] %vm344_vm1, %v9356_v26  ;;  %8140 = vmatprep.mubr.msk.f32.mxu0 %vm344_vm1, %v9372_v29  ;;  %v9555_v25 = vld [vmem:[#allocation2 + $0x1f8] sm:$0xff]  ;;  %v9565_v17 = vld [vmem:[#allocation2 + $0xa0] sm:$0xff] }
  0x2d   : > { %12874 = vst [vmem:[#allocation17_spill] sm:$0xff] %v9368_v28  ;;  %12875 = vst [vmem:[#allocation18_spill] sm:$0xff] %v9374_v30  ;;  %8207 = vmatmul.mubr.msk.f32.gmra.mxu1 %vm344_vm1, %v9361_v27  ;;  %v9409_v37 = vld [vmem:[#allocation2 + $0x1b0] sm:$0xff]  ;;  %v9416_v39 = vld [vmem:[#allocation2 + $0x48] sm:$0xff] }
  0x2e   : > { %416 = vst.msk [vmem:[#allocation2 + $0x1e8] sm:$0xff] %vm344_vm1, %v9368_v28  ;;  %12876 = vst [vmem:[#allocation19_spill] sm:$0xff] %v9379_v31  ;;  %8209 = vmatprep.mubr.msk.f32.mxu1 %vm344_vm1, %v9374_v30  ;;  %v9425_v41 = vld [vmem:[#allocation2 + $0x50] sm:$0xff]  ;;  %v9694_v26 = vld [vmem:[#allocation2 + $0x140] sm:$0xff] }
  0x2f   : > { %394 = vst.msk [vmem:[#allocation2 + $0x88] sm:$0xff] %vm344_vm1, %v9379_v31  ;;  %12877 = vst [vmem:[#allocation20_spill] sm:$0xff] %v9390_v33  ;;  %8141 = vmatmul.mubr.msk.f32.gmra.mxu0 %vm344_vm1, %v9385_v32  ;;  %v9582_v4 = vld [vmem:[%s12664_s1 + $0x14] sm:$0xf]  ;;  %v9690_v31 = vld [vmem:[#allocation2 + $0x138] sm:$0xff] }
  0x30   : > { %417 = vst.msk [vmem:[#allocation2 + $0x1f0] sm:$0xff] %vm344_vm1, %v9390_v33  ;;  %12878 = vst [vmem:[#allocation21_spill] sm:$0xff] %v9399_v35  ;;  %8143 = vmatprep.mubr.msk.f32.mxu0 %vm344_vm1, %v9394_v34  ;;  %v9470_v51 = vld [vmem:[#allocation2 + $0x1c8] sm:$0xff]  ;;  %v9714_v16 = vld [vmem:[#allocation2 + $0x158] sm:$0xff] }
  0x31   : > { %12879 = vst [vmem:[#allocation22_spill] sm:$0xff] %v9403_v36  ;;  %395 = vst.msk [vmem:[#allocation2 + $0x90] sm:$0xff] %vm344_vm1, %v9399_v35  ;;  %8210 = vmatmul.mubr.msk.f32.gmra.mxu1 %vm344_vm1, %v9403_v36  ;;  %v9491_v56 = vld [vmem:[#allocation2 + $0x68] sm:$0xff]  ;;  %v9718_v12 = vld [vmem:[#allocation2 + $0x160] sm:$0xff] }
  0x32   : > { %12880 = vst [vmem:[#allocation23_spill] sm:$0xff] %v9409_v37  ;;  %12881 = vst [vmem:[#allocation24_spill] sm:$0xff] %v9412_v38  ;;  %8212 = vmatprep.mubr.msk.f32.mxu1 %vm344_vm1, %v9409_v37 }
  0x33   : > { %396 = vst.msk [vmem:[#allocation2 + $0xa8] sm:$0xff] %vm344_vm1, %v9412_v38  ;;  %12882 = vst [vmem:[#allocation25_spill] sm:$0xff] %v9421_v40  ;;  %8144 = vmatmul.mubr.msk.f32.gmra.mxu0 %vm344_vm1, %v9416_v39  ;;  %v9479_v53 = vld [vmem:[#allocation2 + $0x1d0] sm:$0xff] }
  0x34   : > { %397 = vst.msk [vmem:[#allocation2 + $0xb0] sm:$0xff] %vm344_vm1, %v9421_v40  ;;  %12883 = vst [vmem:[#allocation26_spill] sm:$0xff] %v9430_v42  ;;  %8146 = vmatprep.mubr.msk.f32.mxu0 %vm344_vm1, %v9425_v41  ;;  %v9499_v57 = vld [vmem:[#allocation2 + $0x70] sm:$0xff]  ;;  %v9670_v40 = vld [vmem:[#allocation2 + $0x120] sm:$0xff] }
  0x35   : > { %398 = vst.msk [vmem:[#allocation2 + $0xc8] sm:$0xff] %vm344_vm1, %v9430_v42  ;;  %12884 = vst [vmem:[#allocation27_spill] sm:$0xff] %v9439_v44  ;;  %8213 = vmatmul.mubr.msk.f32.gmra.mxu1 %vm344_vm1, %v9434_v43  ;;  %v9539_v2 = vld [vmem:[#allocation2 + $0x1e8] sm:$0xff]  ;;  %v9666_v42 = vld [vmem:[#allocation2 + $0x118] sm:$0xff] }
  0x36   : > { %12885 = vst [vmem:[#allocation28_spill] sm:$0xff] %v9443_v45  ;;  %399 = vst.msk [vmem:[#allocation2 + $0xd0] sm:$0xff] %vm344_vm1, %v9439_v44  ;;  %8215 = vmatprep.mubr.msk.f32.mxu1 %vm344_vm1, %v9443_v45  ;;  %v9547_v33 = vld [vmem:[#allocation2 + $0x88] sm:$0xff] }
  0x37   : > { %12886 = vst [vmem:[#allocation29_spill] sm:$0xff] %v9448_v46  ;;  %400 = vst.msk [vmem:[#allocation2 + $0xe8] sm:$0xff] %vm344_vm1, %v9448_v46  ;;  %8147 = vmatmul.mubr.msk.f32.gmra.mxu0 %vm344_vm1, %v9452_v47  ;;  %v9543_v3 = vld [vmem:[#allocation2 + $0x1f0] sm:$0xff] }
  0x38   : > { %12887 = vst [vmem:[#allocation30_spill] sm:$0xff] %v9457_v48  ;;  %401 = vst.msk [vmem:[#allocation2 + $0xf0] sm:$0xff] %vm344_vm1, %v9457_v48  ;;  %8149 = vmatprep.mubr.msk.f32.mxu0 %vm344_vm1, %v9461_v49  ;;  %v9551_v28 = vld [vmem:[#allocation2 + $0x90] sm:$0xff]  ;;  %v9646_v48 = vld [vmem:[#allocation2 + $0x100] sm:$0xff] }
  0x39   : > { %12888 = vst [vmem:[#allocation31_spill] sm:$0xff] %v9466_v50  ;;  %12889 = vst [vmem:[#allocation32_spill] sm:$0xff] %v9470_v51  ;;  %8216 = vmatmul.mubr.msk.f32.gmra.mxu1 %vm344_vm1, %v9470_v51 }
  0x3a   : > { %402 = vst.msk [vmem:[#allocation2 + $0x108] sm:$0xff] %vm344_vm1, %v9466_v50  ;;  %12890 = vst [vmem:[#allocation33_spill] sm:$0xff] %v9475_v52  ;;  %8218 = vmatprep.mubr.msk.f32.mxu1 %vm344_vm1, %v9479_v53  ;;  %v9573_v14 = vld [vmem:[#allocation2 + $0xa8] sm:$0xff]  ;;  %v9642_v50 = vld [vmem:[#allocation2 + $0xf8] sm:$0xff] }
  0x3b   : > { %12891 = vst [vmem:[#allocation34_spill] sm:$0xff] %v9479_v53  ;;  %403 = vst.msk [vmem:[#allocation2 + $0x110] sm:$0xff] %vm344_vm1, %v9475_v52  ;;  %8150 = vmatmul.mubr.msk.f32.gmra.mxu0 %vm344_vm1, %v9491_v56  ;;  %v9577_v6 = vld [vmem:[#allocation2 + $0xb0] sm:$0xff] }
  0x3c   : > { %12892 = vst [vmem:[#allocation35_spill] sm:$0xff] %v9484_v54  ;;  %12893 = vst [vmem:[#allocation36_spill] sm:$0xff] %v9487_v55  ;;  %8152 = vmatprep.mubr.msk.f32.mxu0 %vm344_vm1, %v9499_v57 }
  0x3d   : > { %404 = vst.msk [vmem:[#allocation2 + $0x128] sm:$0xff] %vm344_vm1, %v9484_v54  ;;  %405 = vst.msk [vmem:[#allocation2 + $0x130] sm:$0xff] %vm344_vm1, %v9487_v55  ;;  %8219 = vmatmul.mubr.msk.f32.gmra.mxu1 %vm344_vm1, %v9509_v60  ;;  %v9622_v55 = vld [vmem:[#allocation2 + $0xe0] sm:$0xff] }
  0x3e   : > { %12894 = vst [vmem:[#allocation37_spill] sm:$0xff] %v9502_v58  ;;  %12895 = vst [vmem:[#allocation38_spill] sm:$0xff] %v9505_v59  ;;  %8221 = vmatprep.mubr.msk.f32.mxu1 %vm344_vm1, %v9517_v61  ;;  %v9630_v54 = vld [vmem:[#allocation2 + $0xe8] sm:$0xff] }
  0x3f   : > { %406 = vst.msk [vmem:[#allocation2 + $0x148] sm:$0xff] %vm344_vm1, %v9502_v58  ;;  %407 = vst.msk [vmem:[#allocation2 + $0x150] sm:$0xff] %vm344_vm1, %v9505_v59  ;;  %8153 = vmatmul.mubr.msk.f32.gmra.mxu0 %vm344_vm1, %v9527_v0  ;;  %v9610_v59 = vld [vmem:[#allocation2 + $0xd0] sm:$0xff]  ;;  %v9618_v58 = vld [vmem:[#allocation2 + $0xd8] sm:$0xff] }
  0x40   : > { %12896 = vst [vmem:[#allocation39_spill] sm:$0xff] %v9517_v61  ;;  %12897 = vst [vmem:[#allocation40_spill] sm:$0xff] %v9520_v62  ;;  %8155 = vmatprep.mubr.msk.f32.mxu0 %vm344_vm1, %v9535_v1  ;;  %v9634_v52 = vld [vmem:[#allocation2 + $0xf0] sm:$0xff] }
  0x41   : > { %12898 = vst [vmem:[#allocation41_spill] sm:$0xff] %v9523_v63  ;;  %408 = vst.msk [vmem:[#allocation2 + $0x168] sm:$0xff] %vm344_vm1, %v9520_v62  ;;  %8222 = vmatmul.mubr.msk.f32.gmra.mxu1 %vm344_vm1, %v9539_v2  ;;  %v9598_v62 = vld [vmem:[#allocation2 + $0xc0] sm:$0xff]  ;;  %v9654_v46 = vld [vmem:[#allocation2 + $0x108] sm:$0xff] }
  0x42   : > { %409 = vst.msk [vmem:[#allocation2 + $0x170] sm:$0xff] %vm344_vm1, %v9523_v63  ;;  %12899 = vst [vmem:[#allocation42_spill] sm:$0xff] %v9539_v2  ;;  %8224 = vmatprep.mubr.msk.f32.mxu1 %vm344_vm1, %v9543_v3  ;;  %v9594_v63 = vld [vmem:[#allocation2 + $0xb8] sm:$0xff]  ;;  %v9658_v44 = vld [vmem:[#allocation2 + $0x110] sm:$0xff] }
  0x43   : > { %12900 = vst [vmem:[#allocation43_spill] sm:$0xff] %v9543_v3  ;;  %12901 = vst [vmem:[#allocation44_spill] sm:$0xff] %v9555_v25  ;;  %8156 = vmatmul.mubr.msk.f32.gmra.mxu0 %vm344_vm1, %v9547_v33  ;;  %v9757_v3 = vld [vmem:[%s12664_s1 + $0x18] sm:$0xf] }
  0x44   : > { %8158 = vmatprep.mubr.msk.f32.mxu0 %vm344_vm1, %v9551_v28  ;;  %12902 = vst [vmem:[#allocation45_spill] sm:$0xff] %v9565_v17  ;;  %12903 = vst [vmem:[#allocation46_spill] sm:$0xff] %v9582_v4  ;;  %v9678_v38 = vld [vmem:[#allocation2 + $0x128] sm:$0xff]  ;;  %v9682_v35 = vld [vmem:[#allocation2 + $0x130] sm:$0xff] }
  0x45   : > { %8225 = vmatmul.mubr.msk.f32.gmra.mxu1 %vm344_vm1, %v9555_v25  ;;  %12904 = vst [vmem:[#allocation47_spill] sm:$0xff] %v9670_v40  ;;  %v9738_v25 = vld [vmem:[#allocation2 + $0x178] sm:$0xff] }
  0x46   : > { %8229 = vmatprep.mubr.msk.f32.mxu1 %vm344_vm1, %v9266_v7  ;;  %v9702_v20 = vld [vmem:[#allocation2 + $0x148] sm:$0xff]  ;;  %v9706_v18 = vld [vmem:[#allocation2 + $0x150] sm:$0xff] }
  0x47   : > { %8159 = vmatmul.mubr.msk.f32.gmra.mxu0 %vm344_vm1, %v9561_v19  ;;  %12905 = vst [vmem:[#allocation48_spill] sm:$0xff] %v9702_v20 }
  0x48   : > { %8161 = vmatprep.mubr.msk.f32.mxu0 %vm344_vm1, %v9565_v17  ;;  %v9726_v5 = vld [vmem:[#allocation2 + $0x168] sm:$0xff] }
  0x49   : > { %8230 = vmatmul.mubr.msk.f32.vlgmr.msra.gmra.mxu1 %vm344_vm1, %v9268_v8 }
  0x4a   : > { %8232 = vmatprep.mubr.msk.f32.mxu1 %vm344_vm1, %v9270_v9  ;;  %8424 = vmatpush3.msk.msra.mxu1 %vm677_vm0, %v9336_v21  ;;  %v9606_v21 = vld [vmem:[#allocation2 + $0xc8] sm:$0xff] }
  0x4b   : > { %8162 = vmatmul.mubr.msk.f32.gmra.mxu0 %vm344_vm1, %v9573_v14  ;;  %8619 = vmatprep.subr.msk.mxu1 %vm677_vm0, %v9582_v4  ;;  %v9730_v4 = vld [vmem:[#allocation2 + $0x170] sm:$0xff] }
  0x4c   : > { %8164 = vmatprep.mubr.msk.f32.mxu0 %vm344_vm1, %v9577_v6 }
  0x4d   : > { %8233 = vmatmul.mubr.msk.f32.gmra.mxu1 %vm344_vm1, %v9297_v13 }
  0x4e   : > { %8235 = vmatprep.mubr.msk.f32.mxu1 %vm344_vm1, %v9304_v15 }
  0x4f   : > { %8165 = vmatmul.mubr.msk.f32.gmra.mxu0 %vm344_vm1, %v9594_v63 }
  0x50   : > { %8167 = vmatprep.mubr.msk.f32.mxu0 %vm344_vm1, %v9598_v62 }
  0x51   : > { %8236 = vmatmul.mubr.msk.f32.gmra.mxu1 %vm344_vm1, %v9342_v23 }
  0x52   : > { %8238 = vmatprep.mubr.msk.f32.mxu1 %vm344_vm1, %v9372_v29 }
  0x53   : > { %8168 = vmatmul.mubr.msk.f32.gmra.mxu0 %vm344_vm1, %v9606_v21 }
  0x54   : > { %8170 = vmatprep.mubr.msk.f32.mxu0 %vm344_vm1, %v9610_v59 }
  0x55   : > { %8239 = vmatmul.mubr.msk.f32.gmra.mxu1 %vm344_vm1, %v9385_v32 }
  0x56   : > { %8241 = vmatprep.mubr.msk.f32.mxu1 %vm344_vm1, %v9394_v34 }
  0x57   : > { %8171 = vmatmul.mubr.msk.f32.gmra.mxu0 %vm344_vm1, %v9618_v58 }
  0x58   : > { %8173 = vmatprep.mubr.msk.f32.mxu0 %vm344_vm1, %v9622_v55 }
  0x59   : > { %8242 = vmatmul.mubr.msk.f32.gmra.mxu1 %vm344_vm1, %v9416_v39 }
  0x5a   : > { %8244 = vmatprep.mubr.msk.f32.mxu1 %vm344_vm1, %v9425_v41 }
  0x5b   : > { %8174 = vmatmul.mubr.msk.f32.gmra.mxu0 %vm344_vm1, %v9630_v54 }
  0x5c   : > { %8176 = vmatprep.mubr.msk.f32.mxu0 %vm344_vm1, %v9634_v52 }
  0x5d   : > { %8245 = vmatmul.mubr.msk.f32.gmra.mxu1 %vm344_vm1, %v9452_v47 }
  0x5e   : > { %8247 = vmatprep.mubr.msk.f32.mxu1 %vm344_vm1, %v9461_v49 }
  0x5f   : > { %8177 = vmatmul.mubr.msk.f32.gmra.mxu0 %vm344_vm1, %v9642_v50 }
  0x60   : > { %8179 = vmatprep.mubr.msk.f32.mxu0 %vm344_vm1, %v9646_v48 }
  0x61   : > { %8248 = vmatmul.mubr.msk.f32.gmra.mxu1 %vm344_vm1, %v9491_v56 }
  0x62   : > { %8250 = vmatprep.mubr.msk.f32.mxu1 %vm344_vm1, %v9499_v57 }
  0x63   : > { %8180 = vmatmul.mubr.msk.f32.gmra.mxu0 %vm344_vm1, %v9654_v46 }
  0x64   : > { %8182 = vmatprep.mubr.msk.f32.mxu0 %vm344_vm1, %v9658_v44 }
  0x65   : > { %8251 = vmatmul.mubr.msk.f32.gmra.mxu1 %vm344_vm1, %v9527_v0 }
  0x66   : > { %8253 = vmatprep.mubr.msk.f32.mxu1 %vm344_vm1, %v9535_v1 }
  0x67   : > { %8183 = vmatmul.mubr.msk.f32.gmra.mxu0 %vm344_vm1, %v9666_v42 }
  0x68   : > { %8185 = vmatprep.mubr.msk.f32.mxu0 %vm344_vm1, %v9670_v40 }
  0x69   : > { %8254 = vmatmul.mubr.msk.f32.gmra.mxu1 %vm344_vm1, %v9547_v33 }
  0x6a   : > { %8256 = vmatprep.mubr.msk.f32.mxu1 %vm344_vm1, %v9551_v28 }
  0x6b   : > { %8186 = vmatmul.mubr.msk.f32.gmra.mxu0 %vm344_vm1, %v9678_v38 }
  0x6c   : > { %8188 = vmatprep.mubr.msk.f32.mxu0 %vm344_vm1, %v9682_v35 }
  0x6d   : > { %8257 = vmatmul.mubr.msk.f32.gmra.mxu1 %vm344_vm1, %v9561_v19 }
  0x6e   : > { %8259 = vmatprep.mubr.msk.f32.mxu1 %vm344_vm1, %v9565_v17 }
  0x6f   : > { %8189 = vmatmul.mubr.msk.f32.gmra.mxu0 %vm344_vm1, %v9690_v31 }
  0x70   : > { %8191 = vmatprep.mubr.msk.f32.mxu0 %vm344_vm1, %v9694_v26 }
  0x71   : > { %8260 = vmatmul.mubr.msk.f32.gmra.mxu1 %vm344_vm1, %v9573_v14 }
  0x72   : > { %8262 = vmatprep.mubr.msk.f32.mxu1 %vm344_vm1, %v9577_v6 }
  0x73   : > { %8192 = vmatmul.mubr.msk.f32.gmra.mxu0 %vm344_vm1, %v9702_v20 }
  0x74   : > { %8194 = vmatprep.mubr.msk.f32.mxu0 %vm344_vm1, %v9706_v18 }
  0x75   : > { %8263 = vmatmul.mubr.msk.f32.gmra.mxu1 %vm344_vm1, %v9594_v63 }
  0x76   : > { %8265 = vmatprep.mubr.msk.f32.mxu1 %vm344_vm1, %v9598_v62 }
  0x77   : > { %8195 = vmatmul.mubr.msk.f32.gmra.mxu0 %vm344_vm1, %v9714_v16 }
  0x78   : > { %8197 = vmatprep.mubr.msk.f32.mxu0 %vm344_vm1, %v9718_v12 }
  0x79   : > { %8266 = vmatmul.mubr.msk.f32.gmra.mxu1 %vm344_vm1, %v9606_v21 }
  0x7a   : > { %8268 = vmatprep.mubr.msk.f32.mxu1 %vm344_vm1, %v9610_v59 }
  0x7b   : > { %8198 = vmatmul.mubr.msk.f32.gmra.mxu0 %vm344_vm1, %v9726_v5 }
  0x7c   : > { %8200 = vmatprep.mubr.msk.f32.mxu0 %vm344_vm1, %v9730_v4 }
  0x7d   : > { %8269 = vmatmul.mubr.msk.f32.gmra.mxu1 %vm344_vm1, %v9618_v58 }
  0x7e   : > { %8271 = vmatprep.mubr.msk.f32.mxu1 %vm344_vm1, %v9622_v55 }
  0x7f   : > { %8201 = vmatmul.mubr.msk.f32.gmra.mxu0 %vm344_vm1, %v9738_v25 }
  0x80   : > { %8327 = vmatprep.mubr.msk.f32.mxu0 %vm344_vm1, %v9266_v7  ;;  %v9870_v7 = vld [vmem:[%s9255_s12 + $0xf0] sm:$0xff] }
  0x81   : > { %8272 = vmatmul.mubr.msk.f32.gmra.mxu1 %vm344_vm1, %v9630_v54  ;;  %12906 = vst [vmem:[#allocation49_spill] sm:$0xff] %v9870_v7  ;;  %418 = vst.msk [vmem:[#allocation2 + $0x208] sm:$0xff] %vm344_vm1, %v9870_v7 }
  0x82   : > { %8274 = vmatprep.mubr.msk.f32.mxu1 %vm344_vm1, %v9634_v52 }
  0x83   : > { %8328 = vmatmul.mubr.msk.f32.vlgmr.msra.gmra.mxu0 %vm344_vm1, %v9268_v8  ;;  %v9881_v8 = vld [vmem:[%s9255_s12 + $0xf8] sm:$0xff] }
  0x84   : > { %8522 = vmatpush3.msk.msra.mxu0 %vm677_vm0, %v9285_v11  ;;  %8330 = vmatprep.mubr.msk.f32.mxu0 %vm344_vm1, %v9270_v9  ;;  %12907 = vst [vmem:[#allocation50_spill] sm:$0xff] %v9881_v8  ;;  %419 = vst.msk [vmem:[#allocation2 + $0x210] sm:$0xff] %vm344_vm1, %v9881_v8  ;;  %v12908_v9 = vld [vmem:[#allocation43_spill] sm:$0xff]  ;;  %v12909_v11 = vld [vmem:[#allocation44_spill] sm:$0xff] }
  0x85   : > { %8275 = vmatmul.mubr.msk.f32.gmra.mxu1 %vm344_vm1, %v9642_v50  ;;  %8717 = vmatprep.subr.msk.mxu0 %vm677_vm0, %v9757_v3  ;;  %v9924_v8 = vld [vmem:[%s12664_s1 + $0x1c] sm:$0xf] }
  0x86   : > { %8277 = vmatprep.mubr.msk.f32.mxu1 %vm344_vm1, %v9646_v48  ;;  %12911 = vst [vmem:[#allocation44_spill] sm:$0xff] %v9924_v8 }
  0x87   : > { %8331 = vmatmul.mubr.msk.f32.gmra.mxu0 %vm344_vm1, %v9297_v13  ;;  %v12910_v13 = vld [vmem:[#allocation46_spill] sm:$0xff] }
  0x88   : > { %8333 = vmatprep.mubr.msk.f32.mxu0 %vm344_vm1, %v9304_v15 }
  0x89   : > { %8278 = vmatmul.mubr.msk.f32.gmra.mxu1 %vm344_vm1, %v9654_v46 }
  0x8a   : > { %8280 = vmatprep.mubr.msk.f32.mxu1 %vm344_vm1, %v9658_v44 }
  0x8b   : > { %8334 = vmatmul.mubr.msk.f32.gmra.mxu0 %vm344_vm1, %v9342_v23 }
  0x8c   : > { %8336 = vmatprep.mubr.msk.f32.mxu0 %vm344_vm1, %v9372_v29 }
  0x8d   : > { %8281 = vmatmul.mubr.msk.f32.gmra.mxu1 %vm344_vm1, %v9666_v42 }
  0x8e   : > { %8283 = vmatprep.mubr.msk.f32.mxu1 %vm344_vm1, %v9670_v40 }
  0x8f   : > { %8337 = vmatmul.mubr.msk.f32.gmra.mxu0 %vm344_vm1, %v9385_v32 }
  0x90   : > { %8339 = vmatprep.mubr.msk.f32.mxu0 %vm344_vm1, %v9394_v34 }
  0x91   : > { %8284 = vmatmul.mubr.msk.f32.gmra.mxu1 %vm344_vm1, %v9678_v38 }
  0x92   : > { %8286 = vmatprep.mubr.msk.f32.mxu1 %vm344_vm1, %v9682_v35 }
  0x93   : > { %8340 = vmatmul.mubr.msk.f32.gmra.mxu0 %vm344_vm1, %v9416_v39 }
  0x94   : > { %8342 = vmatprep.mubr.msk.f32.mxu0 %vm344_vm1, %v9425_v41 }
  0x95   : > { %8287 = vmatmul.mubr.msk.f32.gmra.mxu1 %vm344_vm1, %v9690_v31 }
  0x96   : > { %8289 = vmatprep.mubr.msk.f32.mxu1 %vm344_vm1, %v9694_v26 }
  0x97   : > { %8343 = vmatmul.mubr.msk.f32.gmra.mxu0 %vm344_vm1, %v9452_v47 }
  0x98   : > { %8345 = vmatprep.mubr.msk.f32.mxu0 %vm344_vm1, %v9461_v49 }
  0x99   : > { %8290 = vmatmul.mubr.msk.f32.gmra.mxu1 %vm344_vm1, %v9702_v20 }
  0x9a   : > { %8292 = vmatprep.mubr.msk.f32.mxu1 %vm344_vm1, %v9706_v18 }
  0x9b   : > { %8346 = vmatmul.mubr.msk.f32.gmra.mxu0 %vm344_vm1, %v9491_v56 }
  0x9c   : > { %8348 = vmatprep.mubr.msk.f32.mxu0 %vm344_vm1, %v9499_v57 }
  0x9d   : > { %8293 = vmatmul.mubr.msk.f32.gmra.mxu1 %vm344_vm1, %v9714_v16 }
  0x9e   : > { %8295 = vmatprep.mubr.msk.f32.mxu1 %vm344_vm1, %v9718_v12 }
  0x9f   : > { %8349 = vmatmul.mubr.msk.f32.gmra.mxu0 %vm344_vm1, %v9527_v0 }
  0xa0   : > { %8351 = vmatprep.mubr.msk.f32.mxu0 %vm344_vm1, %v9535_v1 }
  0xa1   : > { %8296 = vmatmul.mubr.msk.f32.gmra.mxu1 %vm344_vm1, %v9726_v5 }
  0xa2   : > { %8298 = vmatprep.mubr.msk.f32.mxu1 %vm344_vm1, %v9730_v4 }
  0xa3   : > { %8352 = vmatmul.mubr.msk.f32.gmra.mxu0 %vm344_vm1, %v9547_v33 }
  0xa4   : > { %8354 = vmatprep.mubr.msk.f32.mxu0 %vm344_vm1, %v9551_v28 }
  0xa5   : > { %8299 = vmatmul.mubr.msk.f32.gmra.mxu1 %vm344_vm1, %v9738_v25 }
  0xa6   : > { %8301 = vmatprep.mubr.msk.f32.mxu1 %vm344_vm1, %v9280_v10 }
  0xa7   : > { %8355 = vmatmul.mubr.msk.f32.gmra.mxu0 %vm344_vm1, %v9561_v19 }
  0xa8   : > { %8357 = vmatprep.mubr.msk.f32.mxu0 %vm344_vm1, %v9565_v17 }
  0xa9   : > { %8302 = vmatmul.mubr.msk.f32.gmra.mxu1 %vm344_vm1, %v9338_v22 }
  0xaa   : > { %8304 = vmatprep.mubr.msk.f32.mxu1 %vm344_vm1, %v9344_v24 }
  0xab   : > { %8358 = vmatmul.mubr.msk.f32.gmra.mxu0 %vm344_vm1, %v9573_v14 }
  0xac   : > { %8360 = vmatprep.mubr.msk.f32.mxu0 %vm344_vm1, %v9577_v6 }
  0xad   : > { %8305 = vmatmul.mubr.msk.f32.gmra.mxu1 %vm344_vm1, %v9361_v27 }
  0xae   : > { %8307 = vmatprep.mubr.msk.f32.mxu1 %vm344_vm1, %v9374_v30 }
  0xaf   : > { %8361 = vmatmul.mubr.msk.f32.gmra.mxu0 %vm344_vm1, %v9594_v63 }
  0xb0   : > { %8363 = vmatprep.mubr.msk.f32.mxu0 %vm344_vm1, %v9598_v62 }
  0xb1   : > { %8308 = vmatmul.mubr.msk.f32.gmra.mxu1 %vm344_vm1, %v9403_v36 }
  0xb2   : > { %8310 = vmatprep.mubr.msk.f32.mxu1 %vm344_vm1, %v9409_v37 }
  0xb3   : > { %8364 = vmatmul.mubr.msk.f32.gmra.mxu0 %vm344_vm1, %v9606_v21 }
  0xb4   : > { %8366 = vmatprep.mubr.msk.f32.mxu0 %vm344_vm1, %v9610_v59 }
  0xb5   : > { %8311 = vmatmul.mubr.msk.f32.gmra.mxu1 %vm344_vm1, %v9434_v43 }
  0xb6   : > { %8313 = vmatprep.mubr.msk.f32.mxu1 %vm344_vm1, %v9443_v45 }
  0xb7   : > { %8367 = vmatmul.mubr.msk.f32.gmra.mxu0 %vm344_vm1, %v9618_v58 }
  0xb8   : > { %8369 = vmatprep.mubr.msk.f32.mxu0 %vm344_vm1, %v9622_v55 }
  0xb9   : > { %8314 = vmatmul.mubr.msk.f32.gmra.mxu1 %vm344_vm1, %v9470_v51 }
  0xba   : > { %8316 = vmatprep.mubr.msk.f32.mxu1 %vm344_vm1, %v9479_v53 }
  0xbb   : > { %8370 = vmatmul.mubr.msk.f32.gmra.mxu0 %vm344_vm1, %v9630_v54 }
  0xbc   : > { %8372 = vmatprep.mubr.msk.f32.mxu0 %vm344_vm1, %v9634_v52 }
  0xbd   : > { %8317 = vmatmul.mubr.msk.f32.gmra.mxu1 %vm344_vm1, %v9509_v60 }
  0xbe   : > { %8319 = vmatprep.mubr.msk.f32.mxu1 %vm344_vm1, %v9517_v61 }
  0xbf   : > { %8373 = vmatmul.mubr.msk.f32.gmra.mxu0 %vm344_vm1, %v9642_v50 }
  0xc0   : > { %8375 = vmatprep.mubr.msk.f32.mxu0 %vm344_vm1, %v9646_v48 }
  0xc1   : > { %8320 = vmatmul.mubr.msk.f32.gmra.mxu1 %vm344_vm1, %v9539_v2 }
  0xc2   : > { %8322 = vmatprep.mubr.msk.f32.mxu1 %vm344_vm1, %v12908_v9 }
  0xc3   : > { %8376 = vmatmul.mubr.msk.f32.gmra.mxu0 %vm344_vm1, %v9654_v46 }
  0xc4   : > { %8378 = vmatprep.mubr.msk.f32.mxu0 %vm344_vm1, %v9658_v44 }
  0xc5   : > { %8323 = vmatmul.mubr.msk.f32.gmra.mxu1 %vm344_vm1, %v12909_v11 }
  0xc6   : > { %8425 = vmatprep.mubr.msk.f32.mxu1 %vm344_vm1, %v9304_v15 }
  0xc7   : > { %8379 = vmatmul.mubr.msk.f32.gmra.mxu0 %vm344_vm1, %v9666_v42 }
  0xc8   : > { %8381 = vmatprep.mubr.msk.f32.mxu0 %vm344_vm1, %v9670_v40 }
  0xc9   : > { %8426 = vmatmul.mubr.msk.f32.vlgmr.msra.gmra.mxu1 %vm344_vm1, %v9342_v23 }
  0xca   : > { %8428 = vmatprep.mubr.msk.f32.mxu1 %vm344_vm1, %v9372_v29  ;;  %8620 = vmatpush3.msk.msra.mxu1 %vm677_vm0, %v12910_v13 }
  0xcb   : > { %8382 = vmatmul.mubr.msk.f32.gmra.mxu0 %vm344_vm1, %v9678_v38  ;;  %8815 = vmatprep.subr.msk.mxu1 %vm677_vm0, %v9924_v8 }
  0xcc   : > { %8384 = vmatprep.mubr.msk.f32.mxu0 %vm344_vm1, %v9682_v35 }
  0xcd   : > { %8429 = vmatmul.mubr.msk.f32.gmra.mxu1 %vm344_vm1, %v9385_v32 }
  0xce   : > { %8431 = vmatprep.mubr.msk.f32.mxu1 %vm344_vm1, %v9394_v34 }
  0xcf   : > { %8385 = vmatmul.mubr.msk.f32.gmra.mxu0 %vm344_vm1, %v9690_v31 }
  0xd0   : > { %8387 = vmatprep.mubr.msk.f32.mxu0 %vm344_vm1, %v9694_v26 }
  0xd1   : > { %8432 = vmatmul.mubr.msk.f32.gmra.mxu1 %vm344_vm1, %v9416_v39 }
  0xd2   : > { %8434 = vmatprep.mubr.msk.f32.mxu1 %vm344_vm1, %v9425_v41 }
  0xd3   : > { %8388 = vmatmul.mubr.msk.f32.gmra.mxu0 %vm344_vm1, %v9702_v20 }
  0xd4   : > { %8390 = vmatprep.mubr.msk.f32.mxu0 %vm344_vm1, %v9706_v18 }
  0xd5   : > { %8435 = vmatmul.mubr.msk.f32.gmra.mxu1 %vm344_vm1, %v9452_v47  ;;  %v9972_v13 = vpop.f32.mrf.mxu0 }
  0xd6   : > { %8437 = vmatprep.mubr.msk.f32.mxu1 %vm344_vm1, %v9461_v49 }
  0xd7   : > { %8391 = vmatmul.mubr.msk.f32.gmra.mxu0 %vm344_vm1, %v9714_v16  ;;  %v9980_v7 = vpop.f32.mrf.mxu0 }
  0xd8   : > { %8393 = vmatprep.mubr.msk.f32.mxu0 %vm344_vm1, %v9718_v12 }
  0xd9   : > { %8438 = vmatmul.mubr.msk.f32.gmra.mxu1 %vm344_vm1, %v9491_v56 }
  0xda   : > { %8440 = vmatprep.mubr.msk.f32.mxu1 %vm344_vm1, %v9499_v57 }
  0xdb   : > { %8394 = vmatmul.mubr.msk.f32.gmra.mxu0 %vm344_vm1, %v9726_v5 }
  0xdc   : > { %8396 = vmatprep.mubr.msk.f32.mxu0 %vm344_vm1, %v9730_v4 }
  0xdd   : > { %8441 = vmatmul.mubr.msk.f32.gmra.mxu1 %vm344_vm1, %v9527_v0 }
  0xde   : > { %8443 = vmatprep.mubr.msk.f32.mxu1 %vm344_vm1, %v9535_v1 }
  0xdf   : > { %8397 = vmatmul.mubr.msk.f32.gmra.mxu0 %vm344_vm1, %v9738_v25 }
  0xe0   : > { %8399 = vmatprep.mubr.msk.f32.mxu0 %vm344_vm1, %v9280_v10  ;;  %v8136_v10 = vpop.f32.mrf.mxu0 }
  0xe1   : > { %8444 = vmatmul.mubr.msk.f32.gmra.mxu1 %vm344_vm1, %v9547_v33 }
  0xe2   : > { %8446 = vmatprep.mubr.msk.f32.mxu1 %vm344_vm1, %v9551_v28 }
  0xe3   : > { %8400 = vmatmul.mubr.msk.f32.gmra.mxu0 %vm344_vm1, %v9338_v22 }
  0xe4   : > { %8402 = vmatprep.mubr.msk.f32.mxu0 %vm344_vm1, %v9344_v24  ;;  %v9992_v24 = vpop.f32.mrf.mxu0 }
  0xe5   : > { %8447 = vmatmul.mubr.msk.f32.gmra.mxu1 %vm344_vm1, %v9561_v19 }
  0xe6   : > { %8449 = vmatprep.mubr.msk.f32.mxu1 %vm344_vm1, %v9565_v17 }
  0xe7   : > { %8403 = vmatmul.mubr.msk.f32.gmra.mxu0 %vm344_vm1, %v9361_v27 }
  0xe8   : > { %8405 = vmatprep.mubr.msk.f32.mxu0 %vm344_vm1, %v9374_v30 }
  0xe9   : > { %v9988_v8 = vpop.f32.mrf.mxu1  ;;  %8450 = vmatmul.mubr.msk.f32.gmra.mxu1 %vm344_vm1, %v9573_v14 }
  0xea   : > { %12912 = vst [vmem:[#allocation46_spill] sm:$0xff] %v9988_v8  ;;  %8452 = vmatprep.mubr.msk.f32.mxu1 %vm344_vm1, %v9577_v6 }
  0xeb   : > { %v9996_v22 = vpop.f32.mrf.mxu1  ;;  %v9998_v17 = vpop.f32.mrf.mxu0  ;;  %8406 = vmatmul.mubr.msk.f32.gmra.mxu0 %vm344_vm1, %v9403_v36 }
  0xec   : > { %12913 = vst [vmem:[#allocation51_spill] sm:$0xff] %v9996_v22  ;;  %8408 = vmatprep.mubr.msk.f32.mxu0 %vm344_vm1, %v9409_v37 }
  0xed   : > { %v8208_v10 = vpop.f32.mrf.mxu1  ;;  %8453 = vmatmul.mubr.msk.f32.gmra.mxu1 %vm344_vm1, %v9594_v63  ;;  %v10006_v8 = vpop.f32.mrf.mxu0 }
  0xee   : > { %8455 = vmatprep.mubr.msk.f32.mxu1 %vm344_vm1, %v9598_v62 }
  0xef   : > { %v10010_v30 = vpop.f32.mrf.mxu1  ;;  %v8142_v22 = vpop.f32.mrf.mxu0  ;;  %8409 = vmatmul.mubr.msk.f32.gmra.mxu0 %vm344_vm1, %v9434_v43 }
  0xf0   : > { %12914 = vst [vmem:[#allocation52_spill] sm:$0xff] %v10010_v30  ;;  %8411 = vmatprep.mubr.msk.f32.mxu0 %vm344_vm1, %v9443_v45 }
  0xf1   : > { %v10016_v36 = vpop.f32.mrf.mxu1  ;;  %8456 = vmatmul.mubr.msk.f32.gmra.mxu1 %vm344_vm1, %v9606_v21  ;;  %v10020_v10 = vpop.f32.mrf.mxu0 }
  0xf2   : > { %12915 = vst [vmem:[#allocation53_spill] sm:$0xff] %v10016_v36  ;;  %8458 = vmatprep.mubr.msk.f32.mxu1 %vm344_vm1, %v9610_v59 }
  0xf3   : > { %v10024_v37 = vpop.f32.mrf.mxu1  ;;  %v10026_v30 = vpop.f32.mrf.mxu0  ;;  %8412 = vmatmul.mubr.msk.f32.gmra.mxu0 %vm344_vm1, %v9470_v51 }
  0xf4   : > { %12916 = vst [vmem:[#allocation54_spill] sm:$0xff] %v10024_v37  ;;  %8414 = vmatprep.mubr.msk.f32.mxu0 %vm344_vm1, %v9479_v53 }
  0xf5   : > { %v8214_v22 = vpop.f32.mrf.mxu1  ;;  %8459 = vmatmul.mubr.msk.f32.gmra.mxu1 %vm344_vm1, %v9618_v58  ;;  %v10034_v36 = vpop.f32.mrf.mxu0 }
  0xf6   : > { %8461 = vmatprep.mubr.msk.f32.mxu1 %vm344_vm1, %v9622_v55 }
  0xf7   : > { %v10038_v45 = vpop.f32.mrf.mxu1  ;;  %v8148_v37 = vpop.f32.mrf.mxu0  ;;  %8415 = vmatmul.mubr.msk.f32.gmra.mxu0 %vm344_vm1, %v9509_v60 }
  0xf8   : > { %12917 = vst [vmem:[#allocation55_spill] sm:$0xff] %v10038_v45  ;;  %8417 = vmatprep.mubr.msk.f32.mxu0 %vm344_vm1, %v9517_v61 }
  0xf9   : > { %v10044_v51 = vpop.f32.mrf.mxu1  ;;  %8462 = vmatmul.mubr.msk.f32.gmra.mxu1 %vm344_vm1, %v9630_v54  ;;  %v10048_v22 = vpop.f32.mrf.mxu0 }
  0xfa   : > { %12918 = vst [vmem:[#allocation56_spill] sm:$0xff] %v10044_v51  ;;  %8464 = vmatprep.mubr.msk.f32.mxu1 %vm344_vm1, %v9634_v52 }
  0xfb   : > { %v10052_v53 = vpop.f32.mrf.mxu1  ;;  %v10054_v45 = vpop.f32.mrf.mxu0  ;;  %8418 = vmatmul.mubr.msk.f32.gmra.mxu0 %vm344_vm1, %v9539_v2 }
  0xfc   : > { %12919 = vst [vmem:[#allocation57_spill] sm:$0xff] %v10052_v53  ;;  %8420 = vmatprep.mubr.msk.f32.mxu0 %vm344_vm1, %v12908_v9 }
  0xfd   : > { %v8220_v37 = vpop.f32.mrf.mxu1  ;;  %8465 = vmatmul.mubr.msk.f32.gmra.mxu1 %vm344_vm1, %v9642_v50  ;;  %v10062_v51 = vpop.f32.mrf.mxu0 }
  0xfe   : > { %8467 = vmatprep.mubr.msk.f32.mxu1 %vm344_vm1, %v9646_v48 }
  0xff   : > { %v10066_v61 = vpop.f32.mrf.mxu1  ;;  %v8154_v53 = vpop.f32.mrf.mxu0  ;;  %8421 = vmatmul.mubr.msk.f32.gmra.mxu0 %vm344_vm1, %v12909_v11 }
 0x100   : > { %12920 = vst [vmem:[#allocation58_spill] sm:$0xff] %v10066_v61  ;;  %8523 = vmatprep.mubr.msk.f32.mxu0 %vm344_vm1, %v9304_v15  ;;  %v10093_v15 = vld [vmem:[%s12664_s1 + $0x20] sm:$0xf] }
 0x101   : > { %v10072_v2 = vpop.f32.mrf.mxu1  ;;  %8468 = vmatmul.mubr.msk.f32.gmra.mxu1 %vm344_vm1, %v9654_v46  ;;  %v10076_v37 = vpop.f32.mrf.mxu0  ;;  %12923 = vst [vmem:[#allocation61_spill] sm:$0xff] %v10093_v15 }
 0x102   : > { %12921 = vst [vmem:[#allocation59_spill] sm:$0xff] %v10072_v2  ;;  %8470 = vmatprep.mubr.msk.f32.mxu1 %vm344_vm1, %v9658_v44 }
 0x103   : > { %v10080_v9 = vpop.f32.mrf.mxu1  ;;  %v10082_v61 = vpop.f32.mrf.mxu0  ;;  %8524 = vmatmul.mubr.msk.f32.vlgmr.msra.gmra.mxu0 %vm344_vm1, %v9342_v23 }
 0x104   : > { %12922 = vst [vmem:[#allocation60_spill] sm:$0xff] %v10080_v9  ;;  %8718 = vmatpush3.msk.msra.mxu0 %vm677_vm0, %v9757_v3  ;;  %8526 = vmatprep.mubr.msk.f32.mxu0 %vm344_vm1, %v9372_v29 }
 0x105   : > { %v8226_v53 = vpop.f32.mrf.mxu1  ;;  %8471 = vmatmul.mubr.msk.f32.gmra.mxu1 %vm344_vm1, %v9666_v42  ;;  %v10097_v2 = vpop.f32.mrf.mxu0  ;;  %8913 = vmatprep.subr.msk.mxu0 %vm677_vm0, %v10093_v15 }
 0x106   : > { %8473 = vmatprep.mubr.msk.f32.mxu1 %vm344_vm1, %v9670_v40 }
 0x107   : > { %v10103_v23 = vpop.f32.mrf.mxu1  ;;  %v8160_v29 = vpop.f32.mrf.mxu0  ;;  %8527 = vmatmul.mubr.msk.f32.gmra.mxu0 %vm344_vm1, %v9385_v32 }
 0x108   : > { %12924 = vst [vmem:[#allocation62_spill] sm:$0xff] %v10103_v23  ;;  %8529 = vmatprep.mubr.msk.f32.mxu0 %vm344_vm1, %v9394_v34 }
 0x109   : > { %v8231_v3 = vpop.f32.mrf.mxu1  ;;  %8474 = vmatmul.mubr.msk.f32.gmra.mxu1 %vm344_vm1, %v9678_v38  ;;  %v10111_v53 = vpop.f32.mrf.mxu0 }
 0x10a   : > { %v1489_v9 = vrot.slane %v8231_v3, 1  ;;  %8476 = vmatprep.mubr.msk.f32.mxu1 %vm344_vm1, %v9682_v35 }
 0x10b   : > { %v1169_v15 = vpop.f32.mrf.mxu1  ;;  %v10115_v40 = vpop.f32.mrf.mxu0  ;;  %8530 = vmatmul.mubr.msk.f32.gmra.mxu0 %vm344_vm1, %v9416_v39 }
 0x10c   : > { %v10120_v32 = vadd.f32 %v1489_v9, %v9980_v7  ;;  %8532 = vmatprep.mubr.msk.f32.mxu0 %vm344_vm1, %v9425_v41 }
 0x10d   : > { %v8234_v34 = vpop.f32.mrf.mxu1  ;;  %8477 = vmatmul.mubr.msk.f32.gmra.mxu1 %vm344_vm1, %v9690_v31  ;;  %v10126_v29 = vpop.f32.mrf.mxu0 }
 0x10e   : > { %8479 = vmatprep.mubr.msk.f32.mxu1 %vm344_vm1, %v9694_v26 }
 0x10f   : > { %v1178_v15 = vpop.f32.mrf.mxu1  ;;  %v8166_v3 = vpop.f32.mrf.mxu0  ;;  %8533 = vmatmul.mubr.msk.f32.gmra.mxu0 %vm344_vm1, %v9452_v47 }
 0x110   : > { %v1490_v39 = vrot.slane %v1178_v15, 1  ;;  %8535 = vmatprep.mubr.msk.f32.mxu0 %vm344_vm1, %v9461_v49 }
 0x111   : > { %v8237_v41 = vpop.f32.mrf.mxu1  ;;  %8480 = vmatmul.mubr.msk.f32.gmra.mxu1 %vm344_vm1, %v9702_v20  ;;  %v10136_v7 = vpop.f32.mrf.mxu0 }
 0x112   : > { %v10139_v34 = vadd.f32 %v1490_v39, %v9992_v24  ;;  %v1492_v23 = vrot.slane %v8237_v41, 1  ;;  %8482 = vmatprep.mubr.msk.f32.mxu1 %vm344_vm1, %v9706_v18  ;;  %v1491_v47 = vsel %vm1488_vm3, %v1489_v9, %v1490_v39 }
 0x113   : > { %v1187_v3 = vpop.f32.mrf.mxu1  ;;  %v10144_v15 = vpop.f32.mrf.mxu0  ;;  %8536 = vmatmul.mubr.msk.f32.gmra.mxu0 %vm344_vm1, %v9491_v56  ;;  %v10149_v49 = vadd.f32 %v9972_v13, %v1491_v47 }
 0x114   : > { %v10152_v20 = vadd.f32 %v1492_v23, %v10006_v8  ;;  %8538 = vmatprep.mubr.msk.f32.mxu0 %vm344_vm1, %v9499_v57 }
 0x115   : > { %v8240_v24 = vpop.f32.mrf.mxu1  ;;  %8483 = vmatmul.mubr.msk.f32.gmra.mxu1 %vm344_vm1, %v9714_v16  ;;  %v10158_v9 = vpop.f32.mrf.mxu0 }
 0x116   : > { %8485 = vmatprep.mubr.msk.f32.mxu1 %vm344_vm1, %v9718_v12 }
 0x117   : > { %v1196_v39 = vpop.f32.mrf.mxu1  ;;  %v8172_v56 = vpop.f32.mrf.mxu0  ;;  %8539 = vmatmul.mubr.msk.f32.gmra.mxu0 %vm344_vm1, %v9527_v0 }
 0x118   : > { %v1493_v13 = vrot.slane %v1196_v39, 1  ;;  %8541 = vmatprep.mubr.msk.f32.mxu0 %vm344_vm1, %v9535_v1  ;;  %v10180_v1 = vld [vmem:[#allocation2 + $0x180] sm:$0xff] }
 0x119   : > { %v8243_v8 = vpop.f32.mrf.mxu1  ;;  %8486 = vmatmul.mubr.msk.f32.gmra.mxu1 %vm344_vm1, %v9726_v5  ;;  %v10168_v57 = vpop.f32.mrf.mxu0  ;;  %12925 = vst [vmem:[#allocation63_spill] sm:$0xff] %v10180_v1 }
 0x11a   : > { %v10171_v41 = vadd.f32 %v1493_v13, %v10020_v10  ;;  %v1495_v47 = vrot.slane %v8243_v8, 1  ;;  %8488 = vmatprep.mubr.msk.f32.mxu1 %vm344_vm1, %v9730_v4  ;;  %v1494_v3 = vsel %vm1488_vm3, %v1492_v23, %v1493_v13 }
 0x11b   : > { %v1205_v0 = vpop.f32.mrf.mxu1  ;;  %v10176_v24 = vpop.f32.mrf.mxu0  ;;  %8542 = vmatmul.mubr.msk.f32.gmra.mxu0 %vm344_vm1, %v9547_v33  ;;  %v10183_v39 = vadd.f32 %v9998_v17, %v1494_v3 }
 0x11c   : > { %v10186_v10 = vadd.f32 %v1495_v47, %v10034_v36  ;;  %8544 = vmatprep.mubr.msk.f32.mxu0 %vm344_vm1, %v9551_v28  ;;  %v12926_v36 = vld [vmem:[#allocation45_spill] sm:$0xff] }
 0x11d   : > { %v8246_v56 = vpop.f32.mrf.mxu1  ;;  %8489 = vmatmul.mubr.msk.f32.gmra.mxu1 %vm344_vm1, %v9738_v25  ;;  %v10192_v23 = vpop.f32.mrf.mxu0  ;;  %v12927_v28 = vld [vmem:[#allocation13_spill] sm:$0xff] }
 0x11e   : > { %8491 = vmatprep.mubr.msk.f32.mxu1 %vm344_vm1, %v10180_v1  ;;  %v12928_v1 = vld [vmem:[#allocation14_spill] sm:$0xff] }
 0x11f   : > { %v1214_v33 = vpop.f32.mrf.mxu1  ;;  %v8178_v13 = vpop.f32.mrf.mxu0  ;;  %8545 = vmatmul.mubr.msk.f32.gmra.mxu0 %vm344_vm1, %v9561_v19 }
 0x120   : > { %v1496_v17 = vrot.slane %v1214_v33, 1  ;;  %8547 = vmatprep.mubr.msk.f32.mxu0 %vm344_vm1, %v12926_v36 }
 0x121   : > { %v8249_v8 = vpop.f32.mrf.mxu1  ;;  %8492 = vmatmul.mubr.msk.f32.gmra.mxu1 %vm344_vm1, %v12927_v28  ;;  %v10202_v3 = vpop.f32.mrf.mxu0 }
 0x122   : > { %v10205_v0 = vadd.f32 %v1496_v17, %v10048_v22  ;;  %v1498_v56 = vrot.slane %v8249_v8, 1  ;;  %8494 = vmatprep.mubr.msk.f32.mxu1 %vm344_vm1, %v12928_v1  ;;  %v1497_v13 = vsel %vm1488_vm3, %v1495_v47, %v1496_v17  ;;  %v12929_v1 = vld [vmem:[#allocation18_spill] sm:$0xff] }
 0x123   : > { %v1223_v19 = vpop.f32.mrf.mxu1  ;;  %v10210_v33 = vpop.f32.mrf.mxu0  ;;  %8548 = vmatmul.mubr.msk.f32.gmra.mxu0 %vm344_vm1, %v9573_v14  ;;  %v10215_v36 = vadd.f32 %v10026_v30, %v1497_v13 }
 0x124   : > { %v10218_v28 = vadd.f32 %v1498_v56, %v10062_v51  ;;  %8550 = vmatprep.mubr.msk.f32.mxu0 %vm344_vm1, %v9577_v6  ;;  %v12930_v6 = vld [vmem:[#allocation22_spill] sm:$0xff]  ;;  %v12931_v19 = vld [vmem:[#allocation23_spill] sm:$0xff] }
 0x125   : > { %v8252_v22 = vpop.f32.mrf.mxu1  ;;  %8495 = vmatmul.mubr.msk.f32.gmra.mxu1 %vm344_vm1, %v9361_v27  ;;  %v10224_v47 = vpop.f32.mrf.mxu0 }
 0x126   : > { %8497 = vmatprep.mubr.msk.f32.mxu1 %vm344_vm1, %v12929_v1 }
 0x127   : > { %v1232_v17 = vpop.f32.mrf.mxu1  ;;  %v8184_v14 = vpop.f32.mrf.mxu0  ;;  %8551 = vmatmul.mubr.msk.f32.gmra.mxu0 %vm344_vm1, %v9594_v63 }
 0x128   : > { %v1499_v30 = vrot.slane %v1232_v17, 1  ;;  %8553 = vmatprep.mubr.msk.f32.mxu0 %vm344_vm1, %v9598_v62  ;;  %v12932_v14 = vld [vmem:[#allocation28_spill] sm:$0xff] }
 0x129   : > { %v8255_v51 = vpop.f32.mrf.mxu1  ;;  %8498 = vmatmul.mubr.msk.f32.gmra.mxu1 %vm344_vm1, %v12930_v6  ;;  %v10234_v8 = vpop.f32.mrf.mxu0 }
 0x12a   : > { %v10237_v27 = vadd.f32 %v1499_v30, %v10076_v37  ;;  %v1501_v13 = vrot.slane %v8255_v51, 1  ;;  %8500 = vmatprep.mubr.msk.f32.mxu1 %vm344_vm1, %v12931_v19  ;;  %v1500_v22 = vsel %vm1488_vm3, %v1498_v56, %v1499_v30  ;;  %v12934_v19 = vld [vmem:[#allocation34_spill] sm:$0xff] }
 0x12b   : > { %v1241_v63 = vpop.f32.mrf.mxu1  ;;  %v10242_v1 = vpop.f32.mrf.mxu0  ;;  %8554 = vmatmul.mubr.msk.f32.gmra.mxu0 %vm344_vm1, %v9606_v21  ;;  %v10247_v62 = vadd.f32 %v10054_v45, %v1500_v22 }
 0x12c   : > { %v10250_v17 = vadd.f32 %v1501_v13, %v10097_v2  ;;  %8556 = vmatprep.mubr.msk.f32.mxu0 %vm344_vm1, %v9610_v59  ;;  %v12933_v59 = vld [vmem:[#allocation32_spill] sm:$0xff] }
 0x12d   : > { %v8258_v37 = vpop.f32.mrf.mxu1  ;;  %8501 = vmatmul.mubr.msk.f32.gmra.mxu1 %vm344_vm1, %v9434_v43  ;;  %v10256_v56 = vpop.f32.mrf.mxu0 }
 0x12e   : > { %8503 = vmatprep.mubr.msk.f32.mxu1 %vm344_vm1, %v12932_v14  ;;  %v12935_v14 = vld [vmem:[#allocation39_spill] sm:$0xff] }
 0x12f   : > { %v1250_v30 = vpop.f32.mrf.mxu1  ;;  %v8190_v21 = vpop.f32.mrf.mxu0  ;;  %8557 = vmatmul.mubr.msk.f32.gmra.mxu0 %vm344_vm1, %v9618_v58 }
 0x130   : > { %v1502_v45 = vrot.slane %v1250_v30, 1  ;;  %8559 = vmatprep.mubr.msk.f32.mxu0 %vm344_vm1, %v9622_v55 }
 0x131   : > { %v8261_v2 = vpop.f32.mrf.mxu1  ;;  %8504 = vmatmul.mubr.msk.f32.gmra.mxu1 %vm344_vm1, %v12933_v59  ;;  %v10266_v51 = vpop.f32.mrf.mxu0 }
 0x132   : > { %v10269_v43 = vadd.f32 %v1502_v45, %v10111_v53  ;;  %v1504_v6 = vrot.slane %v8261_v2, 1  ;;  %8506 = vmatprep.mubr.msk.f32.mxu1 %vm344_vm1, %v12934_v19  ;;  %v1503_v22 = vsel %vm1488_vm3, %v1501_v13, %v1502_v45  ;;  %v12937_v2 = vld [vmem:[#allocation43_spill] sm:$0xff] }
 0x133   : > { %v1259_v58 = vpop.f32.mrf.mxu1  ;;  %v10274_v63 = vpop.f32.mrf.mxu0  ;;  %8560 = vmatmul.mubr.msk.f32.gmra.mxu0 %vm344_vm1, %v9630_v54  ;;  %v10279_v55 = vadd.f32 %v10082_v61, %v1503_v22 }
 0x134   : > { %v10282_v37 = vadd.f32 %v1504_v6, %v10126_v29  ;;  %8562 = vmatprep.mubr.msk.f32.mxu0 %vm344_vm1, %v9634_v52  ;;  %v12936_v52 = vld [vmem:[#allocation42_spill] sm:$0xff] }
 0x135   : > { %v8264_v53 = vpop.f32.mrf.mxu1  ;;  %8507 = vmatmul.mubr.msk.f32.gmra.mxu1 %vm344_vm1, %v9509_v60  ;;  %v10288_v13 = vpop.f32.mrf.mxu0 }
 0x136   : > { %8509 = vmatprep.mubr.msk.f32.mxu1 %vm344_vm1, %v12935_v14 }
 0x137   : > { %v1268_v30 = vpop.f32.mrf.mxu1  ;;  %v8196_v54 = vpop.f32.mrf.mxu0  ;;  %8563 = vmatmul.mubr.msk.f32.gmra.mxu0 %vm344_vm1, %v9642_v50 }
 0x138   : > { %v1505_v61 = vrot.slane %v1268_v30, 1  ;;  %8565 = vmatprep.mubr.msk.f32.mxu0 %vm344_vm1, %v9646_v48  ;;  %v10310_v48 = vld [vmem:[#allocation2 + $0x200] sm:$0xff] }
 0x139   : > { %v8267_v29 = vpop.f32.mrf.mxu1  ;;  %8510 = vmatmul.mubr.msk.f32.gmra.mxu1 %vm344_vm1, %v12936_v52  ;;  %v10298_v21 = vpop.f32.mrf.mxu0  ;;  %12938 = vst [vmem:[#allocation45_spill] sm:$0xff] %v10310_v48 }
 0x13a   : > { %v10301_v60 = vadd.f32 %v1505_v61, %v10136_v7  ;;  %v1507_v45 = vrot.slane %v8267_v29, 1  ;;  %8512 = vmatprep.mubr.msk.f32.mxu1 %vm344_vm1, %v12937_v2  ;;  %v1506_v59 = vsel %vm1488_vm3, %v1504_v6, %v1505_v61 }
 0x13b   : > { %v1277_v50 = vpop.f32.mrf.mxu1  ;;  %v10306_v19 = vpop.f32.mrf.mxu0  ;;  %8566 = vmatmul.mubr.msk.f32.gmra.mxu0 %vm344_vm1, %v9654_v46  ;;  %v10313_v22 = vadd.f32 %v10115_v40, %v1506_v59  ;;  %v10326_v46 = vld [vmem:[#allocation2 + $0x208] sm:$0xff] }
 0x13c   : > { %v10316_v7 = vadd.f32 %v1507_v45, %v10158_v9  ;;  %8568 = vmatprep.mubr.msk.f32.mxu0 %vm344_vm1, %v9658_v44  ;;  %12939 = vst [vmem:[#allocation13_spill] sm:$0xff] %v10326_v46  ;;  %v10330_v9 = vld [vmem:[#allocation2 + $0x210] sm:$0xff]  ;;  %v12941_v44 = vld [vmem:[#allocation47_spill] sm:$0xff] }
 0x13d   : > { %v8270_v58 = vpop.f32.mrf.mxu1  ;;  %8513 = vmatmul.mubr.msk.f32.gmra.mxu1 %vm344_vm1, %v12909_v11  ;;  %v10322_v6 = vpop.f32.mrf.mxu0  ;;  %12940 = vst [vmem:[#allocation14_spill] sm:$0xff] %v10330_v9 }
 0x13e   : > { %8515 = vmatprep.mubr.msk.f32.mxu1 %vm344_vm1, %v10310_v48 }
 0x13f   : > { %v1286_v53 = vpop.f32.mrf.mxu1  ;;  %v8202_v40 = vpop.f32.mrf.mxu0  ;;  %8569 = vmatmul.mubr.msk.f32.gmra.mxu0 %vm344_vm1, %v9666_v42  ;;  %v10343_v42 = vld [vmem:[#allocation2 + $0x218] sm:$0xff] }
 0x140   : > { %v1508_v14 = vrot.slane %v1286_v53, 1  ;;  %8571 = vmatprep.mubr.msk.f32.mxu0 %vm344_vm1, %v12941_v44  ;;  %12942 = vst [vmem:[#allocation18_spill] sm:$0xff] %v10343_v42  ;;  %v9072_v40 = vld [vmem:[#allocation2 + $0x20] sm:$0xff]  ;;  %v9073_v44 = vld [vmem:[#allocation2 + $0x28] sm:$0xff] }
 0x141   : > { %v8273_v30 = vpop.f32.mrf.mxu1  ;;  %8516 = vmatmul.mubr.msk.f32.gmra.mxu1 %vm344_vm1, %v10326_v46  ;;  %v10336_v11 = vpop.f32.mrf.mxu0 }
 0x142   : > { %v10339_v54 = vadd.f32 %v1508_v14, %v10168_v57  ;;  %v1510_v61 = vrot.slane %v8273_v30, 1  ;;  %8518 = vmatprep.mubr.msk.f32.mxu1 %vm344_vm1, %v10330_v9  ;;  %v1509_v29 = vsel %vm1488_vm3, %v1507_v45, %v1508_v14 }
 0x143   : > { %v1295_v52 = vpop.f32.mrf.mxu1  ;;  %v8329_v2 = vpop.f32.mrf.mxu0  ;;  %8572 = vmatmul.mubr.msk.f32.gmra.mxu0 %vm344_vm1, %v9678_v38  ;;  %v10349_v59 = vadd.f32 %v10144_v15, %v1509_v29 }
 0x144   : > { %v10352_v50 = vadd.f32 %v1510_v61, %v10192_v23  ;;  %v2056_v57 = vrot.slane %v8329_v2, 2  ;;  %8574 = vmatprep.mubr.msk.f32.mxu0 %vm344_vm1, %v9682_v35  ;;  %v9074_v2 = vld [vmem:[#allocation2 + $0x30] sm:$0xff] }
 0x145   : > { %v8276_v58 = vpop.f32.mrf.mxu1  ;;  %8519 = vmatmul.mubr.msk.f32.gmra.mxu1 %vm344_vm1, %v10343_v42  ;;  %v1704_v45 = vpop.f32.mrf.mxu0 }
 0x146   : > { %v10359_v53 = vadd.f32 %v2056_v57, %v10120_v32  ;;  %8621 = vmatprep.mubr.msk.f32.mxu1 %vm344_vm1, %v9072_v40  ;;  %v12944_v40 = vld [vmem:[#allocation48_spill] sm:$0xff] }
 0x147   : > { %v1304_v38 = vpop.f32.mrf.mxu1  ;;  %v8332_v15 = vpop.f32.mrf.mxu0  ;;  %8575 = vmatmul.mubr.msk.f32.gmra.mxu0 %vm344_vm1, %v9690_v31  ;;  %v12943_v31 = vld [vmem:[#allocation44_spill] sm:$0xff] }
 0x148   : > { %v1511_v23 = vrot.slane %v1304_v38, 1  ;;  %8577 = vmatprep.mubr.msk.f32.mxu0 %vm344_vm1, %v9694_v26  ;;  %v2059_v35 = vrot.slane %v8332_v15, 2 }
 0x149   : > { %v8279_v14 = vpop.f32.mrf.mxu1  ;;  %8622 = vmatmul.mubr.msk.f32.vlgmr.msra.gmra.mxu1 %vm344_vm1, %v9073_v44  ;;  %v1713_v30 = vpop.f32.mrf.mxu0 }
 0x14a   : > { %v10368_v32 = vadd.f32 %v1511_v23, %v10202_v3  ;;  %v1513_v29 = vrot.slane %v8279_v14, 1  ;;  %v2057_v52 = vrot.slane %v1713_v30, 2  ;;  %8624 = vmatprep.mubr.msk.f32.mxu1 %vm344_vm1, %v9074_v2  ;;  %8816 = vmatpush3.msk.msra.mxu1 %vm677_vm0, %v12943_v31  ;;  %v1512_v26 = vsel %vm1488_vm3, %v1510_v61, %v1511_v23  ;;  %v10389_v61 = vld [vmem:[%s12665_s2] sm:$0xf]  ;;  %v9075_v30 = vld [vmem:[#allocation2 + $0x38] sm:$0xff] }
 0x14b   : > { %v1313_v58 = vpop.f32.mrf.mxu1  ;;  %v8335_v45 = vpop.f32.mrf.mxu0  ;;  %8578 = vmatmul.mubr.msk.f32.gmra.mxu0 %vm344_vm1, %v12944_v40  ;;  %v10377_v38 = vadd.f32 %v10176_v24, %v1512_v26  ;;  %12945 = vst [vmem:[#allocation22_spill] sm:$0xff] %v10389_v61  ;;  %9011 = vmatprep.subr.msk.mxu1 %vm677_vm0, %v10389_v61  ;;  %v9077_v26 = vld [vmem:[#allocation2 + $0x48] sm:$0xff] }
 0x14c   : > { %v10380_v3 = vadd.f32 %v1513_v29, %v10224_v47  ;;  %v2061_v15 = vrot.slane %v8335_v45, 2  ;;  %8580 = vmatprep.mubr.msk.f32.mxu0 %vm344_vm1, %v9706_v18  ;;  %v2058_v14 = vsel %vm2055_vm4, %v2056_v57, %v2057_v52  ;;  %v2060_v44 = vsel %vm2055_vm4, %v2057_v52, %v2059_v35  ;;  %v9076_v57 = vld [vmem:[#allocation2 + $0x40] sm:$0xff]  ;;  %v10531_v61 = vld [vmem:[#allocation2 + $0x1c8] sm:$0xff] }
 0x14d   : > { %v8282_v23 = vpop.f32.mrf.mxu1  ;;  %8625 = vmatmul.mubr.msk.f32.gmra.mxu1 %vm344_vm1, %v9075_v30  ;;  %v1723_v24 = vpop.f32.mrf.mxu0  ;;  %v10393_v47 = vadd.f32 %v2058_v14, %v10149_v49  ;;  %v10396_v2 = vadd.f32 %v2060_v44, %v10139_v34  ;;  %v9078_v14 = vld [vmem:[#allocation2 + $0x50] sm:$0xff]  ;;  %12948 = vst [vmem:[#allocation28_spill] sm:$0xff] %v10531_v61 }
 0x14e   : > { %v10401_v18 = vadd.f32 %v2061_v15, %v10152_v20  ;;  %8627 = vmatprep.mubr.msk.f32.mxu1 %vm344_vm1, %v9076_v57 }
 0x14f   : > { %v1322_v35 = vpop.f32.mrf.mxu1  ;;  %v8338_v52 = vpop.f32.mrf.mxu0  ;;  %8581 = vmatmul.mubr.msk.f32.gmra.mxu0 %vm344_vm1, %v9714_v16 }
 0x150   : > { %v1514_v31 = vrot.slane %v1322_v35, 1  ;;  %8583 = vmatprep.mubr.msk.f32.mxu0 %vm344_vm1, %v9718_v12  ;;  %v2064_v34 = vrot.slane %v8338_v52, 2  ;;  %v9079_v35 = vld [vmem:[#allocation2 + $0x58] sm:$0xff] }
 0x151   : > { %v8285_v49 = vpop.f32.mrf.mxu1  ;;  %8628 = vmatmul.mubr.msk.f32.gmra.mxu1 %vm344_vm1, %v9077_v26  ;;  %v1732_v58 = vpop.f32.mrf.mxu0 }
 0x152   : > { %v10410_v20 = vadd.f32 %v1514_v31, %v10234_v8  ;;  %v1516_v45 = vrot.slane %v8285_v49, 1  ;;  %v2062_v40 = vrot.slane %v1732_v58, 2  ;;  %8630 = vmatprep.mubr.msk.f32.mxu1 %vm344_vm1, %v9078_v14  ;;  %v1515_v16 = vsel %vm1488_vm3, %v1513_v29, %v1514_v31  ;;  %v9080_v31 = vld [vmem:[#allocation2 + $0x60] sm:$0xff]  ;;  %v9081_v58 = vld [vmem:[#allocation2 + $0x68] sm:$0xff] }
 0x153   : > { %v1331_v44 = vpop.f32.mrf.mxu1  ;;  %v8341_v23 = vpop.f32.mrf.mxu0  ;;  %8584 = vmatmul.mubr.msk.f32.gmra.mxu0 %vm344_vm1, %v9726_v5  ;;  %v10417_v12 = vadd.f32 %v10210_v33, %v1515_v16  ;;  %v12946_v49 = vld [vmem:[#allocation63_spill] sm:$0xff]  ;;  %v9082_v16 = vld [vmem:[#allocation2 + $0x70] sm:$0xff] }
 0x154   : > { %v10420_v30 = vadd.f32 %v1516_v45, %v10256_v56  ;;  %v2066_v8 = vrot.slane %v8341_v23, 2  ;;  %8586 = vmatprep.mubr.msk.f32.mxu0 %vm344_vm1, %v9730_v4  ;;  %v2063_v24 = vsel %vm2055_vm4, %v2061_v15, %v2062_v40  ;;  %v2065_v57 = vsel %vm2055_vm4, %v2062_v40, %v2064_v34 }
 0x155   : > { %v8288_v29 = vpop.f32.mrf.mxu1  ;;  %8631 = vmatmul.mubr.msk.f32.gmra.mxu1 %vm344_vm1, %v9079_v35  ;;  %v1742_v52 = vpop.f32.mrf.mxu0  ;;  %v10428_v5 = vadd.f32 %v2063_v24, %v10183_v39  ;;  %v10431_v33 = vadd.f32 %v2065_v57, %v10171_v41  ;;  %v10447_v24 = vld [vmem:[#allocation2 + $0x188] sm:$0xff]  ;;  %v10457_v35 = vld [vmem:[#allocation2 + $0x190] sm:$0xff] }
 0x156   : > { %v10434_v56 = vadd.f32 %v2066_v8, %v10186_v10  ;;  %8633 = vmatprep.mubr.msk.f32.mxu1 %vm344_vm1, %v9080_v31 }
 0x157   : > { %v1340_v4 = vpop.f32.mrf.mxu1  ;;  %v8344_v15 = vpop.f32.mrf.mxu0  ;;  %8587 = vmatmul.mubr.msk.f32.gmra.mxu0 %vm344_vm1, %v9738_v25 }
 0x158   : > { %v1517_v34 = vrot.slane %v1340_v4, 1  ;;  %8589 = vmatprep.mubr.msk.f32.mxu0 %vm344_vm1, %v12946_v49  ;;  %v2069_v39 = vrot.slane %v8344_v15, 2  ;;  %v9085_v4 = vld [vmem:[#allocation2 + $0x78] sm:$0xff] }
 0x159   : > { %v8291_v26 = vpop.f32.mrf.mxu1  ;;  %8634 = vmatmul.mubr.msk.f32.gmra.mxu1 %vm344_vm1, %v9081_v58  ;;  %v1751_v41 = vpop.f32.mrf.mxu0 }
 0x15a   : > { %v10443_v10 = vadd.f32 %v1517_v34, %v10266_v51  ;;  %v1519_v40 = vrot.slane %v8291_v26, 1  ;;  %v2067_v14 = vrot.slane %v1751_v41, 2  ;;  %8636 = vmatprep.mubr.msk.f32.mxu1 %vm344_vm1, %v9082_v16  ;;  %v1518_v25 = vsel %vm1488_vm3, %v1516_v45, %v1517_v34  ;;  %v9086_v26 = vld [vmem:[#allocation2 + $0x80] sm:$0xff] }
 0x15b   : > { %v1349_v44 = vpop.f32.mrf.mxu1  ;;  %v8347_v23 = vpop.f32.mrf.mxu0  ;;  %8590 = vmatmul.mubr.msk.f32.gmra.mxu0 %vm344_vm1, %v10447_v24  ;;  %v10452_v57 = vadd.f32 %v10242_v1, %v1518_v25 }
 0x15c   : > { %v10455_v51 = vadd.f32 %v1519_v40, %v10288_v13  ;;  %v2071_v29 = vrot.slane %v8347_v23, 2  ;;  %8592 = vmatprep.mubr.msk.f32.mxu0 %vm344_vm1, %v10457_v35  ;;  %v2068_v45 = vsel %vm2055_vm4, %v2066_v8, %v2067_v14  ;;  %v2070_v52 = vsel %vm2055_vm4, %v2067_v14, %v2069_v39  ;;  %v10474_v39 = vld [vmem:[#allocation2 + $0x198] sm:$0xff]  ;;  %v10478_v14 = vld [vmem:[#allocation2 + $0x1a0] sm:$0xff] }
 0x15d   : > { %v8294_v31 = vpop.f32.mrf.mxu1  ;;  %8637 = vmatmul.mubr.msk.f32.gmra.mxu1 %vm344_vm1, %v9085_v4  ;;  %v1761_v15 = vpop.f32.mrf.mxu0  ;;  %v10465_v1 = vadd.f32 %v2068_v45, %v10215_v36  ;;  %v10468_v13 = vadd.f32 %v2070_v52, %v10205_v0  ;;  %v9090_v45 = vld [vmem:[#allocation2 + $0x90] sm:$0xff] }
 0x15e   : > { %v10471_v34 = vadd.f32 %v2071_v29, %v10218_v28  ;;  %8639 = vmatprep.mubr.msk.f32.mxu1 %vm344_vm1, %v9086_v26  ;;  %v9089_v28 = vld [vmem:[#allocation2 + $0x88] sm:$0xff] }
 0x15f   : > { %v1358_v8 = vpop.f32.mrf.mxu1  ;;  %v8350_v58 = vpop.f32.mrf.mxu0  ;;  %8593 = vmatmul.mubr.msk.f32.gmra.mxu0 %vm344_vm1, %v10474_v39  ;;  %v10488_v15 = vld [vmem:[#allocation2 + $0x1a8] sm:$0xff] }
 0x160   : > { %v1520_v41 = vrot.slane %v1358_v8, 1  ;;  %8595 = vmatprep.mubr.msk.f32.mxu0 %vm344_vm1, %v10478_v14  ;;  %v2074_v0 = vrot.slane %v8350_v58, 2  ;;  %v10498_v58 = vld [vmem:[#allocation2 + $0x1b0] sm:$0xff] }
 0x161   : > { %v8297_v36 = vpop.f32.mrf.mxu1  ;;  %8640 = vmatmul.mubr.msk.f32.gmra.mxu1 %vm344_vm1, %v9089_v28  ;;  %v1770_v16 = vpop.f32.mrf.mxu0  ;;  %v9093_v28 = vld [vmem:[#allocation2 + $0x98] sm:$0xff] }
 0x162   : > { %v10484_v25 = vadd.f32 %v1520_v41, %v10298_v21  ;;  %v1522_v44 = vrot.slane %v8297_v36, 1  ;;  %v2072_v23 = vrot.slane %v1770_v16, 2  ;;  %8642 = vmatprep.mubr.msk.f32.mxu1 %vm344_vm1, %v9090_v45  ;;  %v1521_v52 = vsel %vm1488_vm3, %v1519_v40, %v1520_v41 }
 0x163   : > { %v1367_v31 = vpop.f32.mrf.mxu1  ;;  %v8353_v4 = vpop.f32.mrf.mxu0  ;;  %8596 = vmatmul.mubr.msk.f32.gmra.mxu0 %vm344_vm1, %v10488_v15  ;;  %v10493_v26 = vadd.f32 %v10274_v63, %v1521_v52  ;;  %v9094_v52 = vld [vmem:[#allocation2 + $0xa0] sm:$0xff] }
 0x164   : > { %v10496_v21 = vadd.f32 %v1522_v44, %v10322_v6  ;;  %v2076_v8 = vrot.slane %v8353_v4, 2  ;;  %8598 = vmatprep.mubr.msk.f32.mxu0 %vm344_vm1, %v10498_v58  ;;  %v2073_v40 = vsel %vm2055_vm4, %v2071_v29, %v2072_v23  ;;  %v2075_v41 = vsel %vm2055_vm4, %v2072_v23, %v2074_v0  ;;  %v10515_v0 = vld [vmem:[#allocation2 + $0x1b8] sm:$0xff]  ;;  %v10519_v4 = vld [vmem:[#allocation2 + $0x1c0] sm:$0xff] }
 0x165   : > { %v8300_v36 = vpop.f32.mrf.mxu1  ;;  %8643 = vmatmul.mubr.msk.f32.gmra.mxu1 %vm344_vm1, %v9093_v28  ;;  %v1780_v16 = vpop.f32.mrf.mxu0  ;;  %v10506_v63 = vadd.f32 %v2073_v40, %v10247_v62  ;;  %v10509_v6 = vadd.f32 %v2075_v41, %v10237_v27  ;;  %12947 = vst [vmem:[#allocation23_spill] sm:$0xff] %v10519_v4  ;;  %v9097_v62 = vld [vmem:[#allocation2 + $0xa8] sm:$0xff]  ;;  %v9098_v28 = vld [vmem:[#allocation2 + $0xb0] sm:$0xff] }
 0x166   : > { %v10512_v45 = vadd.f32 %v2076_v8, %v10250_v17  ;;  %8645 = vmatprep.mubr.msk.f32.mxu1 %vm344_vm1, %v9094_v52 }
 0x167   : > { %v1376_v29 = vpop.f32.mrf.mxu1  ;;  %v8356_v31 = vpop.f32.mrf.mxu0  ;;  %8599 = vmatmul.mubr.msk.f32.gmra.mxu0 %vm344_vm1, %v10515_v0 }
 0x168   : > { %v1523_v23 = vrot.slane %v1376_v29, 1  ;;  %8601 = vmatprep.mubr.msk.f32.mxu0 %vm344_vm1, %v10519_v4  ;;  %v2079_v41 = vrot.slane %v8356_v31, 2 }
 0x169   : > { %v10523_v27 = vpop.f32.mrf.mxu1  ;;  %8646 = vmatmul.mubr.msk.f32.gmra.mxu1 %vm344_vm1, %v9097_v62  ;;  %v1789_v17 = vpop.f32.mrf.mxu0 }
 0x16a   : > { %v10527_v40 = vadd.f32 %v1523_v23, %v10336_v11  ;;  %v2077_v36 = vrot.slane %v1789_v17, 2  ;;  %8648 = vmatprep.mubr.msk.f32.mxu1 %vm344_vm1, %v9098_v28  ;;  %v1524_v16 = vsel %vm1488_vm3, %v1522_v44, %v1523_v23  ;;  %v10538_v11 = vld [vmem:[#allocation2 + $0x1d0] sm:$0xff]  ;;  %v9101_v17 = vld [vmem:[#allocation2 + $0xb8] sm:$0xff] }
 0x16b   : > { %v1385_v52 = vpop.f32.mrf.mxu1  ;;  %v8359_v29 = vpop.f32.mrf.mxu0  ;;  %8602 = vmatmul.mubr.msk.f32.gmra.mxu0 %vm344_vm1, %v10531_v61  ;;  %v10536_v62 = vadd.f32 %v10306_v19, %v1524_v16  ;;  %12949 = vst [vmem:[#allocation32_spill] sm:$0xff] %v10538_v11 }
 0x16c   : > { %v2081_v4 = vrot.slane %v8359_v29, 2  ;;  %8604 = vmatprep.mubr.msk.f32.mxu0 %vm344_vm1, %v10538_v11  ;;  %v2078_v31 = vsel %vm2055_vm4, %v2076_v8, %v2077_v36  ;;  %v2080_v44 = vsel %vm2055_vm4, %v2077_v36, %v2079_v41  ;;  %v9102_v29 = vld [vmem:[#allocation2 + $0xc0] sm:$0xff]  ;;  %v10557_v36 = vld [vmem:[#allocation2 + $0x1d8] sm:$0xff]  ;;  %v10578_v11 = vld [vmem:[#allocation2 + $0x1e8] sm:$0xff] }
 0x16d   : > { %v8306_v23 = vpop.f32.mrf.mxu1  ;;  %8649 = vmatmul.mubr.msk.f32.gmra.mxu1 %vm344_vm1, %v9101_v17  ;;  %v1799_v28 = vpop.f32.mrf.mxu0  ;;  %v10546_v52 = vadd.f32 %v2078_v31, %v10279_v55  ;;  %v10549_v19 = vadd.f32 %v2080_v44, %v10269_v43  ;;  %12952 = vst [vmem:[#allocation42_spill] sm:$0xff] %v10557_v36  ;;  %v12733_v55 = vrot.slane %v10523_v27, 1  ;;  %v10563_v43 = vld [vmem:[#allocation2 + $0x1e0] sm:$0xff]  ;;  %v9105_v44 = vld [vmem:[#allocation2 + $0xc8] sm:$0xff]  ;;  %12954 = vst [vmem:[#allocation47_spill] sm:$0xff] %v10578_v11 }
 0x16e   : > { %v10552_v16 = vadd.f32 %v2081_v4, %v10282_v37  ;;  %8651 = vmatprep.mubr.msk.f32.mxu1 %vm344_vm1, %v9102_v29  ;;  %12953 = vst [vmem:[#allocation43_spill] sm:$0xff] %v10563_v43  ;;  %v9106_v29 = vld [vmem:[#allocation2 + $0xd0] sm:$0xff] }
 0x16f   : > { %12950 = vst [vmem:[#allocation34_spill] sm:$0xff] %v10549_v19  ;;  %v10555_v8 = vpop.f32.mrf.mxu1  ;;  %v8362_v41 = vpop.f32.mrf.mxu0  ;;  %8605 = vmatmul.mubr.msk.f32.gmra.mxu0 %vm344_vm1, %v10557_v36  ;;  %v9110_v19 = vld [vmem:[#allocation2 + $0xe0] sm:$0xff] }
 0x170   : > { %12951 = vst [vmem:[#allocation39_spill] sm:$0xff] %v10552_v16  ;;  %v12732_v31 = vrot.slane %v10555_v8, 1  ;;  %8607 = vmatprep.mubr.msk.f32.mxu0 %vm344_vm1, %v10563_v43  ;;  %v2084_v17 = vrot.slane %v8362_v41, 2  ;;  %v10582_v41 = vld [vmem:[#allocation2 + $0x1f0] sm:$0xff] }
 0x171   : > { %v10567_v37 = vpop.f32.mrf.mxu1  ;;  %8652 = vmatmul.mubr.msk.f32.gmra.mxu1 %vm344_vm1, %v9105_v44  ;;  %v1808_v23 = vpop.f32.mrf.mxu0  ;;  %12955 = vst [vmem:[#allocation44_spill] sm:$0xff] %v10582_v41 }
 0x172   : > { %v2082_v28 = vrot.slane %v1808_v23, 2  ;;  %8654 = vmatprep.mubr.msk.f32.mxu1 %vm344_vm1, %v9106_v29  ;;  %v10576_v36 = vsel %vm1488_vm3, %v12733_v55, %v12732_v31  ;;  %v9109_v31 = vld [vmem:[#allocation2 + $0xd8] sm:$0xff] }
 0x173   : > { %v1403_v16 = vpop.f32.mrf.mxu1  ;;  %v8365_v43 = vpop.f32.mrf.mxu0  ;;  %8608 = vmatmul.mubr.msk.f32.gmra.mxu0 %vm344_vm1, %v10578_v11 }
 0x174   : > { %v2086_v44 = vrot.slane %v8365_v43, 2  ;;  %8610 = vmatprep.mubr.msk.f32.mxu0 %vm344_vm1, %v10582_v41  ;;  %v2083_v23 = vsel %vm2055_vm4, %v2081_v4, %v2082_v28  ;;  %v2085_v29 = vsel %vm2055_vm4, %v2082_v28, %v2084_v17 }
 0x175   : > { %v8312_v61 = vpop.f32.mrf.mxu1  ;;  %8655 = vmatmul.mubr.msk.f32.gmra.mxu1 %vm344_vm1, %v9109_v31  ;;  %v1818_v16 = vpop.f32.mrf.mxu0  ;;  %v10590_v55 = vadd.f32 %v2083_v23, %v10313_v22  ;;  %v10593_v11 = vadd.f32 %v2085_v29, %v10301_v60  ;;  %v12739_v22 = vrot.slane %v10567_v37, 1  ;;  %v9113_v29 = vld [vmem:[#allocation2 + $0xf0] sm:$0xff] }
 0x176   : > { %v10596_v43 = vadd.f32 %v2086_v44, %v10316_v7  ;;  %8657 = vmatprep.mubr.msk.f32.mxu1 %vm344_vm1, %v9110_v19  ;;  %v10601_v61 = vld [vmem:[#allocation2 + $0x1f8] sm:$0xff]  ;;  %v9112_v7 = vld [vmem:[#allocation2 + $0xe8] sm:$0xff] }
 0x177   : > { %v10599_v4 = vpop.f32.mrf.mxu1  ;;  %v8368_v17 = vpop.f32.mrf.mxu0  ;;  %12957 = vst [vmem:[#allocation63_spill] sm:$0xff] %v10601_v61  ;;  %8611 = vmatmul.mubr.msk.f32.gmra.mxu0 %vm344_vm1, %v10601_v61 }
 0x178   : > { %12956 = vst [vmem:[#allocation48_spill] sm:$0xff] %v10596_v43  ;;  %v12738_v31 = vrot.slane %v10599_v4, 1  ;;  %8613 = vmatprep.mubr.msk.f32.mxu0 %vm344_vm1, %v10310_v48  ;;  %v2089_v28 = vrot.slane %v8368_v17, 2 }
 0x179   : > { %v10609_v60 = vpop.f32.mrf.mxu1  ;;  %8658 = vmatmul.mubr.msk.f32.gmra.mxu1 %vm344_vm1, %v9112_v7  ;;  %v1827_v19 = vpop.f32.mrf.mxu0 }
 0x17a   : > { %v2087_v23 = vrot.slane %v1827_v19, 2  ;;  %8660 = vmatprep.mubr.msk.f32.mxu1 %vm344_vm1, %v9113_v29  ;;  %v10618_v16 = vsel %vm1488_vm3, %v12739_v22, %v12738_v31  ;;  %v9114_v29 = vld [vmem:[#allocation2 + $0xf8] sm:$0xff]  ;;  %v10627_v31 = vld [vmem:[#allocation2 + $0x40] sm:$0xff] }
 0x17b   : > { %v1421_v61 = vpop.f32.mrf.mxu1  ;;  %v8371_v48 = vpop.f32.mrf.mxu0  ;;  %8614 = vmatmul.mubr.msk.f32.gmra.mxu0 %vm344_vm1, %v10326_v46  ;;  %12958 = vst [vmem:[#allocation64_spill] sm:$0xff] %v10627_v31  ;;  %v12963_v46 = vld [vmem:[#allocation61_spill] sm:$0xff] }
 0x17c   : > { %v2091_v43 = vrot.slane %v8371_v48, 2  ;;  %8616 = vmatprep.mubr.msk.f32.mxu0 %vm344_vm1, %v10330_v9  ;;  %v2088_v17 = vsel %vm2055_vm4, %v2086_v44, %v2087_v23  ;;  %v2090_v7 = vsel %vm2055_vm4, %v2087_v23, %v2089_v28  ;;  %v9115_v9 = vld [vmem:[#allocation2 + $0x100] sm:$0xff]  ;;  %v9116_v23 = vld [vmem:[#allocation2 + $0x108] sm:$0xff] }
 0x17d   : > { %v8318_v19 = vpop.f32.mrf.mxu1  ;;  %8661 = vmatmul.mubr.msk.f32.gmra.mxu1 %vm344_vm1, %v9114_v29  ;;  %v1837_v41 = vpop.f32.mrf.mxu0  ;;  %v10630_v61 = vadd.f32 %v2088_v17, %v10349_v59  ;;  %v10633_v22 = vadd.f32 %v2090_v7, %v10339_v54  ;;  %v10647_v54 = vld [vmem:[#allocation2 + $0x48] sm:$0xff]  ;;  %v10652_v17 = vld [vmem:[#allocation2 + $0x50] sm:$0xff] }
 0x17e   : > { %v10636_v48 = vadd.f32 %v2091_v43, %v10352_v50  ;;  %8663 = vmatprep.mubr.msk.f32.mxu1 %vm344_vm1, %v9115_v9  ;;  %v12746_v41 = vrot.slane %v10609_v60, 1  ;;  %12961 = vst [vmem:[#allocation67_spill] sm:$0xff] %v10647_v54  ;;  %12962 = vst [vmem:[#allocation68_spill] sm:$0xff] %v10652_v17  ;;  %v9117_v29 = vld [vmem:[#allocation2 + $0x110] sm:$0xff] }
 0x17f   : > { %12959 = vst [vmem:[#allocation65_spill] sm:$0xff] %v10633_v22  ;;  %v10639_v44 = vpop.f32.mrf.mxu1  ;;  %v8374_v28 = vpop.f32.mrf.mxu0  ;;  %8617 = vmatmul.mubr.msk.f32.gmra.mxu0 %vm344_vm1, %v10343_v42  ;;  %v10673_v22 = vld [vmem:[#allocation2 + $0x60] sm:$0xff] }
 0x180   : > { %12960 = vst [vmem:[#allocation66_spill] sm:$0xff] %v10636_v48  ;;  %v12745_v59 = vrot.slane %v10639_v44, 1  ;;  %8719 = vmatprep.mubr.msk.f32.mxu0 %vm344_vm1, %v10627_v31  ;;  %v2094_v7 = vrot.slane %v8374_v28, 2  ;;  %v10668_v28 = vld [vmem:[#allocation2 + $0x58] sm:$0xff]  ;;  %12965 = vst [vmem:[#allocation69_spill] sm:$0xff] %v10673_v22 }
 0x181   : > { %v10649_v50 = vpop.f32.mrf.mxu1  ;;  %8664 = vmatmul.mubr.msk.f32.gmra.mxu1 %vm344_vm1, %v9116_v23  ;;  %v1846_v9 = vpop.f32.mrf.mxu0  ;;  %12964 = vst [vmem:[#allocation61_spill] sm:$0xff] %v10668_v28 }
 0x182   : > { %v2092_v19 = vrot.slane %v1846_v9, 2  ;;  %8666 = vmatprep.mubr.msk.f32.mxu1 %vm344_vm1, %v9117_v29  ;;  %v10660_v31 = vsel %vm1488_vm3, %v12746_v41, %v12745_v59  ;;  %v9118_v41 = vld [vmem:[#allocation2 + $0x118] sm:$0xff] }
 0x183   : > { %v1439_v42 = vpop.f32.mrf.mxu1  ;;  %v8377_v48 = vpop.f32.mrf.mxu0  ;;  %8720 = vmatmul.mubr.msk.f32.vlgmr.msra.gmra.mxu0 %vm344_vm1, %v10647_v54  ;;  %v9119_v54 = vld [vmem:[#allocation2 + $0x120] sm:$0xff] }
 0x184   : > { %v2096_v23 = vrot.slane %v8377_v48, 2  ;;  %8914 = vmatpush3.msk.msra.mxu0 %vm677_vm0, %v12963_v46  ;;  %8722 = vmatprep.mubr.msk.f32.mxu0 %vm344_vm1, %v10652_v17  ;;  %v2093_v9 = vsel %vm2055_vm4, %v2091_v43, %v2092_v19  ;;  %v2095_v29 = vsel %vm2055_vm4, %v2092_v19, %v2094_v7  ;;  %v9120_v7 = vld [vmem:[#allocation2 + $0x128] sm:$0xff]  ;;  %v10696_v19 = vld [vmem:[#allocation2 + $0x70] sm:$0xff] }
 0x185   : > { %v8324_v59 = vpop.f32.mrf.mxu1  ;;  %8667 = vmatmul.mubr.msk.f32.gmra.mxu1 %vm344_vm1, %v9118_v41  ;;  %v1856_v42 = vpop.f32.mrf.mxu0  ;;  %v10676_v48 = vadd.f32 %v2093_v9, %v10377_v38  ;;  %v10679_v46 = vadd.f32 %v2095_v29, %v10368_v32  ;;  %v10693_v32 = vld [vmem:[#allocation2 + $0x68] sm:$0xff]  ;;  %12968 = vst [vmem:[#allocation72_spill] sm:$0xff] %v10696_v19  ;;  %v9121_v41 = vld [vmem:[#allocation2 + $0x130] sm:$0xff] }
 0x186   : > { %v10682_v17 = vadd.f32 %v2096_v23, %v10380_v3  ;;  %8669 = vmatprep.mubr.msk.f32.mxu1 %vm344_vm1, %v9119_v54 }
 0x187   : > { %12966 = vst [vmem:[#allocation70_spill] sm:$0xff] %v10679_v46  ;;  %v10685_v43 = vpop.f32.mrf.mxu1  ;;  %v8380_v59 = vpop.f32.mrf.mxu0  ;;  %8723 = vmatmul.mubr.msk.f32.gmra.mxu0 %vm344_vm1, %v10668_v28  ;;  %v10721_v46 = vld [vmem:[#allocation2 + $0x80] sm:$0xff] }
 0x188   : > { %12967 = vst [vmem:[#allocation71_spill] sm:$0xff] %v10682_v17  ;;  %v12755_v38 = vrot.slane %v10685_v43, 1  ;;  %8725 = vmatprep.mubr.msk.f32.mxu0 %vm344_vm1, %v10673_v22  ;;  %v2099_v9 = vrot.slane %v8380_v59, 2  ;;  %v12970_v22 = vrot.slane %v10649_v50, 1  ;;  %12972 = vst [vmem:[#allocation75_spill] sm:$0xff] %v10721_v46 }
 0x189   : > { %v8427_v3 = vpop.f32.mrf.mxu1  ;;  %8670 = vmatmul.mubr.msk.f32.gmra.mxu1 %vm344_vm1, %v9120_v7  ;;  %v1865_v54 = vpop.f32.mrf.mxu0 }
 0x18a   : > { %v10699_v29 = vadd.f32 %v8427_v3, %v10393_v47  ;;  %v2097_v42 = vrot.slane %v1865_v54, 2  ;;  %8672 = vmatprep.mubr.msk.f32.mxu1 %vm344_vm1, %v9121_v41  ;;  %v10707_v28 = vsel %vm1488_vm3, %v12970_v22, %v12755_v38  ;;  %v10716_v41 = vld [vmem:[#allocation2 + $0x78] sm:$0xff] }
 0x18b   : > { %v2559_v17 = vpop.f32.mrf.mxu1  ;;  %v8383_v7 = vpop.f32.mrf.mxu0  ;;  %8726 = vmatmul.mubr.msk.f32.gmra.mxu0 %vm344_vm1, %v10693_v32  ;;  %12971 = vst [vmem:[#allocation74_spill] sm:$0xff] %v10716_v41  ;;  %v9122_v38 = vld [vmem:[#allocation2 + $0x138] sm:$0xff] }
 0x18c   : > { %12969 = vst [vmem:[#allocation73_spill] sm:$0xff] %v10699_v29  ;;  %v10712_v59 = vadd.f32 %v2559_v17, %v10359_v53  ;;  %v2101_v47 = vrot.slane %v8383_v7, 2  ;;  %8728 = vmatprep.mubr.msk.f32.mxu0 %vm344_vm1, %v10696_v19  ;;  %v2098_v3 = vsel %vm2055_vm4, %v2096_v23, %v2097_v42  ;;  %v2100_v54 = vsel %vm2055_vm4, %v2097_v42, %v2099_v9  ;;  %v9123_v19 = vld [vmem:[#allocation2 + $0x140] sm:$0xff]  ;;  %v10743_v42 = vld [vmem:[#allocation2 + $0x90] sm:$0xff] }
 0x18d   : > { %v8430_v22 = vpop.f32.mrf.mxu1  ;;  %8673 = vmatmul.mubr.msk.f32.gmra.mxu1 %vm344_vm1, %v9122_v38  ;;  %v1875_v29 = vpop.f32.mrf.mxu0  ;;  %v10724_v53 = vadd.f32 %v2098_v3, %v10417_v12  ;;  %v10727_v17 = vadd.f32 %v2100_v54, %v10410_v20  ;;  %v10740_v12 = vld [vmem:[#allocation2 + $0x88] sm:$0xff]  ;;  %12973 = vst [vmem:[#allocation76_spill] sm:$0xff] %v10743_v42 }
 0x18e   : > { %v10730_v7 = vadd.f32 %v2101_v47, %v10420_v30  ;;  %8675 = vmatprep.mubr.msk.f32.mxu1 %vm344_vm1, %v9123_v19  ;;  %v9124_v29 = vld [vmem:[#allocation2 + $0x148] sm:$0xff]  ;;  %v9125_v22 = vld [vmem:[#allocation2 + $0x150] sm:$0xff] }
 0x18f   : > { %v2569_v23 = vpop.f32.mrf.mxu1  ;;  %v8386_v9 = vpop.f32.mrf.mxu0  ;;  %8729 = vmatmul.mubr.msk.f32.gmra.mxu0 %vm344_vm1, %v10716_v41  ;;  %v10761_v41 = vld [vmem:[#allocation2 + $0xa0] sm:$0xff] }
 0x190   : > { %v10736_v38 = vadd.f32 %v2569_v23, %v10396_v2  ;;  %8731 = vmatprep.mubr.msk.f32.mxu0 %vm344_vm1, %v10721_v46  ;;  %v2104_v19 = vrot.slane %v8386_v9, 2  ;;  %v10756_v9 = vld [vmem:[#allocation2 + $0x98] sm:$0xff]  ;;  %12976 = vst [vmem:[#allocation79_spill] sm:$0xff] %v10761_v41 }
 0x191   : > { %v8433_v20 = vpop.f32.mrf.mxu1  ;;  %8676 = vmatmul.mubr.msk.f32.gmra.mxu1 %vm344_vm1, %v9124_v29  ;;  %v1884_v30 = vpop.f32.mrf.mxu0  ;;  %12975 = vst [vmem:[#allocation78_spill] sm:$0xff] %v10756_v9 }
 0x192   : > { %v10746_v3 = vadd.f32 %v8433_v20, %v10428_v5  ;;  %v2102_v54 = vrot.slane %v1884_v30, 2  ;;  %8678 = vmatprep.mubr.msk.f32.mxu1 %vm344_vm1, %v9125_v22  ;;  %v9126_v22 = vld [vmem:[#allocation2 + $0x158] sm:$0xff] }
 0x193   : > { %v2578_v2 = vpop.f32.mrf.mxu1  ;;  %v8389_v23 = vpop.f32.mrf.mxu0  ;;  %8732 = vmatmul.mubr.msk.f32.gmra.mxu0 %vm344_vm1, %v10740_v12 }
 0x194   : > { %12974 = vst [vmem:[#allocation77_spill] sm:$0xff] %v10746_v3  ;;  %v10752_v46 = vadd.f32 %v2578_v2, %v10401_v18  ;;  %v2106_v29 = vrot.slane %v8389_v23, 2  ;;  %8734 = vmatprep.mubr.msk.f32.mxu0 %vm344_vm1, %v10743_v42  ;;  %v2103_v5 = vsel %vm2055_vm4, %v2101_v47, %v2102_v54  ;;  %v2105_v20 = vsel %vm2055_vm4, %v2102_v54, %v2104_v19  ;;  %v9127_v42 = vld [vmem:[#allocation2 + $0x160] sm:$0xff]  ;;  %v9128_v54 = vld [vmem:[#allocation2 + $0x168] sm:$0xff] }
 0x195   : > { %v8436_v30 = vpop.f32.mrf.mxu1  ;;  %8679 = vmatmul.mubr.msk.f32.gmra.mxu1 %vm344_vm1, %v9126_v22  ;;  %v1894_v3 = vpop.f32.mrf.mxu0  ;;  %v10764_v18 = vadd.f32 %v2103_v5, %v10452_v57  ;;  %v10767_v2 = vadd.f32 %v2105_v20, %v10443_v10  ;;  %v10780_v57 = vld [vmem:[#allocation2 + $0xa8] sm:$0xff]  ;;  %v10783_v5 = vld [vmem:[#allocation2 + $0xb0] sm:$0xff] }
 0x196   : > { %v10770_v23 = vadd.f32 %v2106_v29, %v10455_v51  ;;  %8681 = vmatprep.mubr.msk.f32.mxu1 %vm344_vm1, %v9127_v42  ;;  %v9129_v22 = vld [vmem:[#allocation2 + $0x170] sm:$0xff] }
 0x197   : > { %v2588_v47 = vpop.f32.mrf.mxu1  ;;  %v8392_v19 = vpop.f32.mrf.mxu0  ;;  %8735 = vmatmul.mubr.msk.f32.gmra.mxu0 %vm344_vm1, %v10756_v9  ;;  %v10801_v9 = vld [vmem:[#allocation2 + $0xc0] sm:$0xff] }
 0x198   : > { %v10776_v3 = vadd.f32 %v2588_v47, %v10431_v33  ;;  %8737 = vmatprep.mubr.msk.f32.mxu0 %vm344_vm1, %v10761_v41  ;;  %v2109_v42 = vrot.slane %v8392_v19, 2  ;;  %v10796_v19 = vld [vmem:[#allocation2 + $0xb8] sm:$0xff]  ;;  %12978 = vst [vmem:[#allocation81_spill] sm:$0xff] %v10801_v9 }
 0x199   : > { %v8439_v10 = vpop.f32.mrf.mxu1  ;;  %8682 = vmatmul.mubr.msk.f32.gmra.mxu1 %vm344_vm1, %v9128_v54  ;;  %v1903_v51 = vpop.f32.mrf.mxu0 }
 0x19a   : > { %v10786_v20 = vadd.f32 %v8439_v10, %v10465_v1  ;;  %v2107_v30 = vrot.slane %v1903_v51, 2  ;;  %8684 = vmatprep.mubr.msk.f32.mxu1 %vm344_vm1, %v9129_v22  ;;  %v9130_v22 = vld [vmem:[#allocation2 + $0x178] sm:$0xff] }
 0x19b   : > { %v2597_v33 = vpop.f32.mrf.mxu1  ;;  %v8395_v47 = vpop.f32.mrf.mxu0  ;;  %8738 = vmatmul.mubr.msk.f32.gmra.mxu0 %vm344_vm1, %v10780_v57 }
 0x19c   : > { %12977 = vst [vmem:[#allocation80_spill] sm:$0xff] %v10786_v20  ;;  %v10792_v41 = vadd.f32 %v2597_v33, %v10434_v56  ;;  %v2111_v54 = vrot.slane %v8395_v47, 2  ;;  %8740 = vmatprep.mubr.msk.f32.mxu0 %vm344_vm1, %v10783_v5  ;;  %v2108_v1 = vsel %vm2055_vm4, %v2106_v29, %v2107_v30  ;;  %v2110_v10 = vsel %vm2055_vm4, %v2107_v30, %v2109_v42  ;;  %v10825_v30 = vld [vmem:[#allocation2 + $0xd0] sm:$0xff] }
 0x19d   : > { %v8442_v51 = vpop.f32.mrf.mxu1  ;;  %8685 = vmatmul.mubr.msk.f32.gmra.mxu1 %vm344_vm1, %v9130_v22  ;;  %v1913_v20 = vpop.f32.mrf.mxu0  ;;  %v10804_v56 = vadd.f32 %v2108_v1, %v10493_v26  ;;  %v10807_v33 = vadd.f32 %v2110_v10, %v10484_v25  ;;  %v10821_v26 = vld [vmem:[#allocation2 + $0xc8] sm:$0xff] }
 0x19e   : > { %v10810_v47 = vadd.f32 %v2111_v54, %v10496_v21  ;;  %8687 = vmatprep.mubr.msk.f32.mxu1 %vm344_vm1, %v12946_v49  ;;  %v12980_v51 = vrot.slane %v10523_v27, 1 }
 0x19f   : > { %v2607_v29 = vpop.f32.mrf.mxu1  ;;  %v8398_v42 = vpop.f32.mrf.mxu0  ;;  %8741 = vmatmul.mubr.msk.f32.gmra.mxu0 %vm344_vm1, %v10796_v19 }
 0x1a0   : > { %v10817_v20 = vadd.f32 %v2607_v29, %v10468_v13  ;;  %8743 = vmatprep.mubr.msk.f32.mxu0 %vm344_vm1, %v10801_v9  ;;  %v2114_v49 = vrot.slane %v8398_v42, 2  ;;  %v12979_v13 = vld [vmem:[#allocation51_spill] sm:$0xff] }
 0x1a1   : > { %v8445_v25 = vpop.f32.mrf.mxu1  ;;  %8688 = vmatmul.mubr.msk.f32.gmra.mxu1 %vm344_vm1, %v10447_v24  ;;  %v1922_v21 = vpop.f32.mrf.mxu0  ;;  %v1621_v22 = vadd.f32 %v12980_v51, %v12979_v13  ;;  %v10848_v13 = vld [vmem:[#allocation2 + $0xe0] sm:$0xff] }
 0x1a2   : > { %v10828_v1 = vadd.f32 %v8445_v25, %v10506_v63  ;;  %v2112_v10 = vrot.slane %v1922_v21, 2  ;;  %8690 = vmatprep.mubr.msk.f32.mxu1 %vm344_vm1, %v10457_v35  ;;  %v10842_v63 = vld [vmem:[#allocation2 + $0xd8] sm:$0xff]  ;;  %12982 = vst [vmem:[#allocation82_spill] sm:$0xff] %v10848_v13 }
 0x1a3   : > { %v2616_v29 = vpop.f32.mrf.mxu1  ;;  %v8401_v9 = vpop.f32.mrf.mxu0  ;;  %8744 = vmatmul.mubr.msk.f32.gmra.mxu0 %vm344_vm1, %v10821_v26  ;;  %12981 = vst [vmem:[#allocation51_spill] sm:$0xff] %v10842_v63 }
 0x1a4   : > { %v10838_v24 = vadd.f32 %v2616_v29, %v10471_v34  ;;  %v2116_v42 = vrot.slane %v8401_v9, 2  ;;  %8746 = vmatprep.mubr.msk.f32.mxu0 %vm344_vm1, %v10825_v30  ;;  %v2113_v35 = vsel %vm2055_vm4, %v2111_v54, %v2112_v10  ;;  %v2115_v25 = vsel %vm2055_vm4, %v2112_v10, %v2114_v49 }
 0x1a5   : > { %v8448_v27 = vpop.f32.mrf.mxu1  ;;  %8691 = vmatmul.mubr.msk.f32.gmra.mxu1 %vm344_vm1, %v10474_v39  ;;  %v1932_v21 = vpop.f32.mrf.mxu0  ;;  %v10851_v34 = vadd.f32 %v2113_v35, %v10536_v62  ;;  %v10854_v9 = vadd.f32 %v2115_v25, %v10527_v40  ;;  %v10867_v62 = vld [vmem:[#allocation2 + $0xe8] sm:$0xff]  ;;  %v12985_v25 = vrot.slane %v10555_v8, 1  ;;  %v10893_v8 = vld [vmem:[#allocation2 + $0xf8] sm:$0xff] }
 0x1a6   : > { %v10856_v51 = vadd.f32 %v2116_v42, %v1621_v22  ;;  %8693 = vmatprep.mubr.msk.f32.mxu1 %vm344_vm1, %v10478_v14  ;;  %v10871_v22 = vld [vmem:[#allocation2 + $0xf0] sm:$0xff]  ;;  %v12986_v21 = vld [vmem:[#allocation54_spill] sm:$0xff] }
 0x1a7   : > { %v2626_v54 = vpop.f32.mrf.mxu1  ;;  %v8404_v49 = vpop.f32.mrf.mxu0  ;;  %8747 = vmatmul.mubr.msk.f32.gmra.mxu0 %vm344_vm1, %v10842_v63  ;;  %12983 = vst [vmem:[#allocation83_spill] sm:$0xff] %v10871_v22 }
 0x1a8   : > { %v10863_v39 = vadd.f32 %v2626_v54, %v10509_v6  ;;  %8749 = vmatprep.mubr.msk.f32.mxu0 %vm344_vm1, %v10848_v13  ;;  %v2119_v14 = vrot.slane %v8404_v49, 2  ;;  %v12984_v6 = vld [vmem:[#allocation52_spill] sm:$0xff]  ;;  %v12987_v54 = vrot.slane %v10567_v37, 1 }
 0x1a9   : > { %v8451_v40 = vpop.f32.mrf.mxu1  ;;  %8694 = vmatmul.mubr.msk.f32.gmra.mxu1 %vm344_vm1, %v10488_v15  ;;  %v1941_v10 = vpop.f32.mrf.mxu0  ;;  %v1623_v27 = vadd.f32 %v12985_v25, %v12984_v6  ;;  %12989 = vst [vmem:[#allocation52_spill] sm:$0xff] %v10893_v8 }
 0x1aa   : > { %v10874_v29 = vadd.f32 %v8451_v40, %v10546_v52  ;;  %v2117_v35 = vrot.slane %v1941_v10, 2  ;;  %8696 = vmatprep.mubr.msk.f32.mxu1 %vm344_vm1, %v10498_v58  ;;  %v1624_v13 = vadd.f32 %v12987_v54, %v12986_v21  ;;  %v12988_v52 = vld [vmem:[#allocation46_spill] sm:$0xff]  ;;  %v10899_v21 = vld [vmem:[#allocation2 + $0x100] sm:$0xff] }
 0x1ab   : > { %v2635_v15 = vpop.f32.mrf.mxu1  ;;  %v8407_v63 = vpop.f32.mrf.mxu0  ;;  %8750 = vmatmul.mubr.msk.f32.gmra.mxu0 %vm344_vm1, %v10867_v62  ;;  %v1622_v49 = vadd.f32 %v12988_v52, %v10576_v36  ;;  %12990 = vst [vmem:[#allocation54_spill] sm:$0xff] %v10899_v21  ;;  %v12992_v54 = vld [vmem:[#allocation23_spill] sm:$0xff]  ;;  %v12995_v52 = vld [vmem:[#allocation28_spill] sm:$0xff] }
 0x1ac   : > { %v10889_v40 = vadd.f32 %v2635_v15, %v10512_v45  ;;  %v2121_v58 = vrot.slane %v8407_v63, 2  ;;  %8752 = vmatprep.mubr.msk.f32.mxu0 %vm344_vm1, %v10871_v22  ;;  %v2118_v37 = vsel %vm2055_vm4, %v2116_v42, %v2117_v35  ;;  %v2120_v10 = vsel %vm2055_vm4, %v2117_v35, %v2119_v14  ;;  %v12993_v14 = vld [vmem:[#allocation34_spill] sm:$0xff] }
 0x1ad   : > { %v8454_v6 = vpop.f32.mrf.mxu1  ;;  %8697 = vmatmul.mubr.msk.f32.gmra.mxu1 %vm344_vm1, %v10515_v0  ;;  %v1951_v25 = vpop.f32.mrf.mxu0  ;;  %v10901_v36 = vadd.f32 %v2118_v37, %v1622_v49  ;;  %v10903_v45 = vadd.f32 %v2120_v10, %v1623_v27  ;;  %v10916_v0 = vld [vmem:[#allocation2 + $0x108] sm:$0xff]  ;;  %v10920_v49 = vld [vmem:[#allocation2 + $0x110] sm:$0xff] }
 0x1ae   : > { %v10905_v63 = vadd.f32 %v2121_v58, %v1624_v13  ;;  %8699 = vmatprep.mubr.msk.f32.mxu1 %vm344_vm1, %v12992_v54  ;;  %12994 = vst [vmem:[#allocation23_spill] sm:$0xff] %v10916_v0  ;;  %12996 = vst [vmem:[#allocation34_spill] sm:$0xff] %v10920_v49  ;;  %v12997_v25 = vld [vmem:[#allocation32_spill] sm:$0xff]  ;;  %v12998_v54 = vld [vmem:[#allocation55_spill] sm:$0xff] }
 0x1af   : > { %v2645_v15 = vpop.f32.mrf.mxu1  ;;  %v8410_v42 = vpop.f32.mrf.mxu0  ;;  %8753 = vmatmul.mubr.msk.f32.gmra.mxu0 %vm344_vm1, %v10893_v8  ;;  %v13001_v8 = vrot.slane %v10609_v60, 1 }
 0x1b0   : > { %12991 = vst [vmem:[#allocation46_spill] sm:$0xff] %v10905_v63  ;;  %v10912_v35 = vadd.f32 %v2645_v15, %v12993_v14  ;;  %8755 = vmatprep.mubr.msk.f32.mxu0 %vm344_vm1, %v10899_v21  ;;  %v2124_v37 = vrot.slane %v8410_v42, 2  ;;  %v12999_v15 = vrot.slane %v10599_v4, 1  ;;  %v13000_v21 = vld [vmem:[#allocation57_spill] sm:$0xff]  ;;  %v10942_v4 = vld [vmem:[#allocation2 + $0x118] sm:$0xff] }
 0x1b1   : > { %v8457_v27 = vpop.f32.mrf.mxu1  ;;  %8700 = vmatmul.mubr.msk.f32.gmra.mxu1 %vm344_vm1, %v12995_v52  ;;  %v1960_v13 = vpop.f32.mrf.mxu0  ;;  %v1627_v63 = vadd.f32 %v13001_v8, %v13000_v21  ;;  %13004 = vst [vmem:[#allocation28_spill] sm:$0xff] %v10942_v4 }
 0x1b2   : > { %v10923_v10 = vadd.f32 %v8457_v27, %v10590_v55  ;;  %v2122_v6 = vrot.slane %v1960_v13, 2  ;;  %8702 = vmatprep.mubr.msk.f32.mxu1 %vm344_vm1, %v12997_v25  ;;  %v1626_v14 = vadd.f32 %v12999_v15, %v12998_v54  ;;  %v13002_v55 = vld [vmem:[#allocation53_spill] sm:$0xff]  ;;  %v13003_v27 = vld [vmem:[#allocation39_spill] sm:$0xff]  ;;  %v13005_v54 = vld [vmem:[#allocation42_spill] sm:$0xff] }
 0x1b3   : > { %v2654_v52 = vpop.f32.mrf.mxu1  ;;  %v8413_v22 = vpop.f32.mrf.mxu0  ;;  %8756 = vmatmul.mubr.msk.f32.gmra.mxu0 %vm344_vm1, %v10916_v0  ;;  %v1625_v42 = vadd.f32 %v13002_v55, %v10618_v16  ;;  %v10948_v0 = vld [vmem:[#allocation2 + $0x120] sm:$0xff] }
 0x1b4   : > { %v10938_v13 = vadd.f32 %v2654_v52, %v13003_v27  ;;  %v2126_v25 = vrot.slane %v8413_v22, 2  ;;  %8758 = vmatprep.mubr.msk.f32.mxu0 %vm344_vm1, %v10920_v49  ;;  %v2123_v60 = vsel %vm2055_vm4, %v2121_v58, %v2122_v6  ;;  %v2125_v8 = vsel %vm2055_vm4, %v2122_v6, %v2124_v37  ;;  %13006 = vst [vmem:[#allocation32_spill] sm:$0xff] %v10948_v0  ;;  %v13008_v55 = vld [vmem:[#allocation43_spill] sm:$0xff]  ;;  %v10965_v6 = vld [vmem:[#allocation2 + $0x128] sm:$0xff] }
 0x1b5   : > { %v8460_v21 = vpop.f32.mrf.mxu1  ;;  %8703 = vmatmul.mubr.msk.f32.gmra.mxu1 %vm344_vm1, %v13005_v54  ;;  %v1970_v15 = vpop.f32.mrf.mxu0  ;;  %v10950_v16 = vadd.f32 %v2123_v60, %v1625_v42  ;;  %v10952_v52 = vadd.f32 %v2125_v8, %v1626_v14  ;;  %13009 = vst [vmem:[#allocation57_spill] sm:$0xff] %v10965_v6  ;;  %v13010_v42 = vld [vmem:[#allocation47_spill] sm:$0xff]  ;;  %v10969_v60 = vld [vmem:[#allocation2 + $0x130] sm:$0xff] }
 0x1b6   : > { %v10954_v22 = vadd.f32 %v2126_v25, %v1627_v63  ;;  %8705 = vmatprep.mubr.msk.f32.mxu1 %vm344_vm1, %v13008_v55  ;;  %13011 = vst [vmem:[#allocation53_spill] sm:$0xff] %v10969_v60  ;;  %v13012_v15 = vld [vmem:[#allocation44_spill] sm:$0xff]  ;;  %v13014_v55 = vrot.slane %v10639_v44, 1  ;;  %v10991_v44 = vld [vmem:[#allocation2 + $0x138] sm:$0xff] }
 0x1b7   : > { %v2664_v27 = vpop.f32.mrf.mxu1  ;;  %v8416_v58 = vpop.f32.mrf.mxu0  ;;  %8759 = vmatmul.mubr.msk.f32.gmra.mxu0 %vm344_vm1, %v10942_v4  ;;  %v13016_v4 = vrot.slane %v10649_v50, 1  ;;  %13019 = vst [vmem:[#allocation39_spill] sm:$0xff] %v10991_v44 }
 0x1b8   : > { %13007 = vst [vmem:[#allocation55_spill] sm:$0xff] %v10954_v22  ;;  %v10961_v37 = vadd.f32 %v2664_v27, %v10593_v11  ;;  %8761 = vmatprep.mubr.msk.f32.mxu0 %vm344_vm1, %v10948_v0  ;;  %v2129_v8 = vrot.slane %v8416_v58, 2  ;;  %v13013_v11 = vld [vmem:[#allocation58_spill] sm:$0xff]  ;;  %v13015_v0 = vld [vmem:[#allocation60_spill] sm:$0xff] }
 0x1b9   : > { %v8463_v14 = vpop.f32.mrf.mxu1  ;;  %8706 = vmatmul.mubr.msk.f32.gmra.mxu1 %vm344_vm1, %v13010_v42  ;;  %v1979_v63 = vpop.f32.mrf.mxu0  ;;  %v1629_v27 = vadd.f32 %v13014_v55, %v13013_v11  ;;  %v1630_v22 = vadd.f32 %v13016_v4, %v13015_v0  ;;  %v13020_v11 = vld [vmem:[#allocation63_spill] sm:$0xff] }
 0x1ba   : > { %v10972_v21 = vadd.f32 %v8463_v14, %v10630_v61  ;;  %v2127_v54 = vrot.slane %v1979_v63, 2  ;;  %8708 = vmatprep.mubr.msk.f32.mxu1 %vm344_vm1, %v13012_v15  ;;  %v13017_v61 = vld [vmem:[#allocation56_spill] sm:$0xff] }
 0x1bb   : > { %v2673_v42 = vpop.f32.mrf.mxu1  ;;  %v8419_v49 = vpop.f32.mrf.mxu0  ;;  %8762 = vmatmul.mubr.msk.f32.gmra.mxu0 %vm344_vm1, %v10965_v6  ;;  %v1628_v58 = vadd.f32 %v13017_v61, %v10660_v31  ;;  %v13018_v14 = vld [vmem:[#allocation48_spill] sm:$0xff]  ;;  %v10997_v6 = vld [vmem:[#allocation2 + $0x140] sm:$0xff]  ;;  %v13024_v61 = vld [vmem:[#allocation45_spill] sm:$0xff] }
 0x1bc   : > { %v10987_v63 = vadd.f32 %v2673_v42, %v13018_v14  ;;  %v2131_v15 = vrot.slane %v8419_v49, 2  ;;  %8764 = vmatprep.mubr.msk.f32.mxu0 %vm344_vm1, %v10969_v60  ;;  %v2128_v50 = vsel %vm2055_vm4, %v2126_v25, %v2127_v54  ;;  %v2130_v0 = vsel %vm2055_vm4, %v2127_v54, %v2129_v8  ;;  %13021 = vst [vmem:[#allocation42_spill] sm:$0xff] %v10997_v6  ;;  %v13025_v8 = vld [vmem:[#allocation65_spill] sm:$0xff] }
 0x1bd   : > { %v8466_v4 = vpop.f32.mrf.mxu1  ;;  %8709 = vmatmul.mubr.msk.f32.gmra.mxu1 %vm344_vm1, %v13020_v11  ;;  %v1989_v55 = vpop.f32.mrf.mxu0  ;;  %v10999_v31 = vadd.f32 %v2128_v50, %v1628_v58  ;;  %v11001_v42 = vadd.f32 %v2130_v0, %v1629_v27  ;;  %v11014_v58 = vld [vmem:[#allocation2 + $0x148] sm:$0xff]  ;;  %v13027_v50 = vld [vmem:[#allocation13_spill] sm:$0xff] }
 0x1be   : > { %v11003_v49 = vadd.f32 %v2131_v15, %v1630_v22  ;;  %8711 = vmatprep.mubr.msk.f32.mxu1 %vm344_vm1, %v13024_v61  ;;  %13026 = vst [vmem:[#allocation44_spill] sm:$0xff] %v11014_v58  ;;  %v11018_v0 = vld [vmem:[#allocation2 + $0x150] sm:$0xff]  ;;  %v13029_v61 = vld [vmem:[#allocation14_spill] sm:$0xff] }
 0x1bf   : > { %13022 = vst [vmem:[#allocation43_spill] sm:$0xff] %v11001_v42  ;;  %v2683_v14 = vpop.f32.mrf.mxu1  ;;  %v8422_v25 = vpop.f32.mrf.mxu0  ;;  %8765 = vmatmul.mubr.msk.f32.gmra.mxu0 %vm344_vm1, %v10991_v44  ;;  %13028 = vst [vmem:[#allocation58_spill] sm:$0xff] %v11018_v0 }
 0x1c0   : > { %13023 = vst [vmem:[#allocation47_spill] sm:$0xff] %v11003_v49  ;;  %v11010_v54 = vadd.f32 %v2683_v14, %v13025_v8  ;;  %8767 = vmatprep.mubr.msk.f32.mxu0 %vm344_vm1, %v10997_v6  ;;  %v2134_v4 = vrot.slane %v8422_v25, 2  ;;  %v13030_v14 = vld [vmem:[#allocation62_spill] sm:$0xff]  ;;  %v13031_v8 = vrot.slane %v10685_v43, 1 }
 0x1c1   : > { %v8469_v27 = vpop.f32.mrf.mxu1  ;;  %8712 = vmatmul.mubr.msk.f32.gmra.mxu1 %vm344_vm1, %v13027_v50  ;;  %v1998_v22 = vpop.f32.mrf.mxu0  ;;  %v13032_v50 = vld [vmem:[#allocation59_spill] sm:$0xff]  ;;  %v13033_v25 = vld [vmem:[#allocation66_spill] sm:$0xff] }
 0x1c2   : > { %v11021_v11 = vadd.f32 %v8469_v27, %v10676_v48  ;;  %v2132_v55 = vrot.slane %v1998_v22, 2  ;;  %8714 = vmatprep.mubr.msk.f32.mxu1 %vm344_vm1, %v13029_v61  ;;  %v1632_v6 = vadd.f32 %v13031_v8, %v13030_v14  ;;  %v1631_v60 = vadd.f32 %v13032_v50, %v10707_v28  ;;  %v11037_v27 = vld [vmem:[#allocation2 + $0x158] sm:$0xff]  ;;  %v13038_v50 = vld [vmem:[#allocation64_spill] sm:$0xff] }
 0x1c3   : > { %v2692_v44 = vpop.f32.mrf.mxu1  ;;  %v8525_v49 = vpop.f32.mrf.mxu0  ;;  %8768 = vmatmul.mubr.msk.f32.gmra.mxu0 %vm344_vm1, %v11014_v58  ;;  %13034 = vst [vmem:[#allocation60_spill] sm:$0xff] %v11037_v27  ;;  %v13035_v14 = vld [vmem:[#allocation18_spill] sm:$0xff]  ;;  %v11043_v58 = vld [vmem:[#allocation2 + $0x160] sm:$0xff] }
 0x1c4   : > { %v11033_v42 = vadd.f32 %v2692_v44, %v13033_v25  ;;  %v3300_v48 = vrot.slane %v8525_v49, 1  ;;  %8770 = vmatprep.mubr.msk.f32.mxu0 %vm344_vm1, %v11018_v0  ;;  %v2133_v43 = vsel %vm2055_vm4, %v2131_v15, %v2132_v55  ;;  %v2135_v22 = vsel %vm2055_vm4, %v2132_v55, %v2134_v4  ;;  %13036 = vst [vmem:[#allocation56_spill] sm:$0xff] %v11043_v58  ;;  %v13039_v4 = vld [vmem:[#allocation70_spill] sm:$0xff] }
 0x1c5   : > { %v8472_v61 = vpop.f32.mrf.mxu1  ;;  %8715 = vmatmul.mubr.msk.f32.gmra.mxu1 %vm344_vm1, %v13035_v14  ;;  %v2981_v8 = vpop.f32.mrf.mxu0  ;;  %v11045_v28 = vadd.f32 %v2133_v43, %v1631_v60  ;;  %v11047_v44 = vadd.f32 %v2135_v22, %v1632_v6  ;;  %v11061_v60 = vld [vmem:[#allocation2 + $0x168] sm:$0xff]  ;;  %v13041_v43 = vld [vmem:[#allocation67_spill] sm:$0xff]  ;;  %v11065_v22 = vld [vmem:[#allocation2 + $0x170] sm:$0xff] }
 0x1c6   : > { %v11050_v49 = vadd.f32 %v3300_v48, %v10712_v59  ;;  %8817 = vmatprep.mubr.msk.f32.mxu1 %vm344_vm1, %v13038_v50  ;;  %13040 = vst [vmem:[#allocation63_spill] sm:$0xff] %v11061_v60  ;;  %13042 = vst [vmem:[#allocation45_spill] sm:$0xff] %v11065_v22  ;;  %v13044_v8 = vld [vmem:[#allocation68_spill] sm:$0xff] }
 0x1c7   : > { %v2702_v15 = vpop.f32.mrf.mxu1  ;;  %v8528_v25 = vpop.f32.mrf.mxu0  ;;  %8771 = vmatmul.mubr.msk.f32.gmra.mxu0 %vm344_vm1, %v11037_v27  ;;  %v13047_v27 = vld [vmem:[#allocation71_spill] sm:$0xff] }
 0x1c8   : > { %13037 = vst [vmem:[#allocation48_spill] sm:$0xff] %v11050_v49  ;;  %v11057_v55 = vadd.f32 %v2702_v15, %v13039_v4  ;;  %8773 = vmatprep.mubr.msk.f32.mxu0 %vm344_vm1, %v11043_v58  ;;  %v13045_v15 = vld [vmem:[#allocation22_spill] sm:$0xff] }
 0x1c9   : > { %v8475_v6 = vpop.f32.mrf.mxu1  ;;  %8818 = vmatmul.mubr.msk.f32.vlgmr.msra.gmra.mxu1 %vm344_vm1, %v13041_v43  ;;  %v2990_v59 = vpop.f32.mrf.mxu0 }
 0x1ca   : > { %v11068_v61 = vadd.f32 %v8475_v6, %v10724_v53  ;;  %v3301_v14 = vrot.slane %v2990_v59, 1  ;;  %8820 = vmatprep.mubr.msk.f32.mxu1 %vm344_vm1, %v13044_v8  ;;  %9012 = vmatpush3.msk.msra.mxu1 %vm677_vm0, %v13045_v15  ;;  %v11084_v6 = vld [vmem:[#allocation2 + $0x178] sm:$0xff] }
 0x1cb   : > { %v2711_v25 = vpop.f32.mrf.mxu1  ;;  %v8531_v4 = vpop.f32.mrf.mxu0  ;;  %8774 = vmatmul.mubr.msk.f32.gmra.mxu0 %vm344_vm1, %v11061_v60  ;;  %13048 = vst [vmem:[#allocation14_spill] sm:$0xff] %v11084_v6  ;;  %v11089_v60 = vld [vmem:[#allocation2 + $0x180] sm:$0xff] }
 0x1cc   : > { %13043 = vst [vmem:[#allocation65_spill] sm:$0xff] %v11068_v61  ;;  %v11077_v58 = vadd.f32 %v3301_v14, %v10736_v38  ;;  %v11080_v49 = vadd.f32 %v2711_v25, %v13047_v27  ;;  %v3303_v53 = vrot.slane %v8531_v4, 1  ;;  %8776 = vmatprep.mubr.msk.f32.mxu0 %vm344_vm1, %v11065_v22  ;;  %v3302_v59 = vsel %vm1488_vm3, %v3300_v48, %v3301_v14  ;;  %v13049_v61 = vld [vmem:[#allocation61_spill] sm:$0xff] }
 0x1cd   : > { %v8478_v15 = vpop.f32.mrf.mxu1  ;;  %8821 = vmatmul.mubr.msk.f32.gmra.mxu1 %vm344_vm1, %v13049_v61  ;;  %v2999_v0 = vpop.f32.mrf.mxu0  ;;  %13050 = vst [vmem:[#allocation62_spill] sm:$0xff] %v11089_v60  ;;  %v13051_v38 = vld [vmem:[#allocation73_spill] sm:$0xff] }
 0x1ce   : > { %13046 = vst [vmem:[#allocation13_spill] sm:$0xff] %v11077_v58  ;;  %v11092_v58 = vadd.f32 %v3302_v59, %v13051_v38  ;;  %v11095_v27 = vadd.f32 %v3303_v53, %v10752_v46  ;;  %v13054_v25 = vld [vmem:[#allocation69_spill] sm:$0xff]  ;;  %v11106_v0 = vld [vmem:[#allocation2 + $0x188] sm:$0xff] }
 0x1cf   : > { %8823 = vmatprep.mubr.msk.f32.mxu1 %vm344_vm1, %v13054_v25  ;;  %v2721_v4 = vpop.f32.mrf.mxu1  ;;  %v8534_v22 = vpop.f32.mrf.mxu0  ;;  %8777 = vmatmul.mubr.msk.f32.gmra.mxu0 %vm344_vm1, %v11084_v6  ;;  %13055 = vst [vmem:[#allocation18_spill] sm:$0xff] %v11106_v0  ;;  %v11110_v59 = vld [vmem:[#allocation2 + $0x190] sm:$0xff]  ;;  %v13058_v38 = vld [vmem:[#allocation72_spill] sm:$0xff] }
 0x1d0   : > { %13052 = vst [vmem:[#allocation59_spill] sm:$0xff] %v11092_v58  ;;  %13053 = vst [vmem:[#allocation66_spill] sm:$0xff] %v11095_v27  ;;  %v11102_v48 = vadd.f32 %v2721_v4, %v10727_v17  ;;  %8779 = vmatprep.mubr.msk.f32.mxu0 %vm344_vm1, %v11089_v60 }
 0x1d1   : > { %v8481_v14 = vpop.f32.mrf.mxu1  ;;  %8824 = vmatmul.mubr.msk.f32.gmra.mxu1 %vm344_vm1, %v10693_v32  ;;  %v3008_v46 = vpop.f32.mrf.mxu0  ;;  %13056 = vst [vmem:[#allocation64_spill] sm:$0xff] %v11110_v59 }
 0x1d2   : > { %v11113_v22 = vadd.f32 %v8481_v14, %v10764_v18  ;;  %v3304_v15 = vrot.slane %v3008_v46, 1  ;;  %8826 = vmatprep.mubr.msk.f32.mxu1 %vm344_vm1, %v13058_v38  ;;  %v11127_v18 = vld [vmem:[#allocation2 + $0x198] sm:$0xff] }
 0x1d3   : > { %v2730_v17 = vpop.f32.mrf.mxu1  ;;  %v8537_v4 = vpop.f32.mrf.mxu0  ;;  %8780 = vmatmul.mubr.msk.f32.gmra.mxu0 %vm344_vm1, %v11106_v0  ;;  %13060 = vst [vmem:[#allocation68_spill] sm:$0xff] %v11127_v18  ;;  %v11132_v0 = vld [vmem:[#allocation2 + $0x1a0] sm:$0xff] }
 0x1d4   : > { %13057 = vst [vmem:[#allocation70_spill] sm:$0xff] %v11113_v22  ;;  %v11120_v60 = vadd.f32 %v3304_v15, %v10776_v3  ;;  %v11123_v6 = vadd.f32 %v2730_v17, %v10730_v7  ;;  %v3306_v27 = vrot.slane %v8537_v4, 1  ;;  %8782 = vmatprep.mubr.msk.f32.mxu0 %vm344_vm1, %v11110_v59  ;;  %v3305_v14 = vsel %vm1488_vm3, %v3303_v53, %v3304_v15  ;;  %v13061_v22 = vld [vmem:[#allocation74_spill] sm:$0xff]  ;;  %v13063_v3 = vld [vmem:[#allocation77_spill] sm:$0xff]  ;;  %v13066_v17 = vld [vmem:[#allocation75_spill] sm:$0xff] }
 0x1d5   : > { %v8484_v46 = vpop.f32.mrf.mxu1  ;;  %8827 = vmatmul.mubr.msk.f32.gmra.mxu1 %vm344_vm1, %v13061_v22  ;;  %v3017_v58 = vpop.f32.mrf.mxu0  ;;  %13062 = vst [vmem:[#allocation22_spill] sm:$0xff] %v11132_v0 }
 0x1d6   : > { %13059 = vst [vmem:[#allocation67_spill] sm:$0xff] %v11120_v60  ;;  %v11135_v60 = vadd.f32 %v3305_v14, %v13063_v3  ;;  %v11138_v7 = vadd.f32 %v3306_v27, %v10792_v41  ;;  %8829 = vmatprep.mubr.msk.f32.mxu1 %vm344_vm1, %v13066_v17  ;;  %v11149_v58 = vld [vmem:[#allocation2 + $0x1a8] sm:$0xff]  ;;  %v11153_v14 = vld [vmem:[#allocation2 + $0x1b0] sm:$0xff] }
 0x1d7   : > { %v2740_v4 = vpop.f32.mrf.mxu1  ;;  %v8540_v59 = vpop.f32.mrf.mxu0  ;;  %8783 = vmatmul.mubr.msk.f32.gmra.mxu0 %vm344_vm1, %v11127_v18  ;;  %13067 = vst [vmem:[#allocation73_spill] sm:$0xff] %v11149_v58  ;;  %13068 = vst [vmem:[#allocation69_spill] sm:$0xff] %v11153_v14  ;;  %v13070_v3 = vld [vmem:[#allocation76_spill] sm:$0xff] }
 0x1d8   : > { %13064 = vst [vmem:[#allocation71_spill] sm:$0xff] %v11135_v60  ;;  %13065 = vst [vmem:[#allocation61_spill] sm:$0xff] %v11138_v7  ;;  %v11145_v53 = vadd.f32 %v2740_v4, %v10767_v2  ;;  %8785 = vmatprep.mubr.msk.f32.mxu0 %vm344_vm1, %v11132_v0 }
 0x1d9   : > { %v8487_v15 = vpop.f32.mrf.mxu1  ;;  %8830 = vmatmul.mubr.msk.f32.gmra.mxu1 %vm344_vm1, %v10740_v12  ;;  %v3026_v41 = vpop.f32.mrf.mxu0 }
 0x1da   : > { %v11156_v59 = vadd.f32 %v8487_v15, %v10804_v56  ;;  %v3307_v46 = vrot.slane %v3026_v41, 1  ;;  %8832 = vmatprep.mubr.msk.f32.mxu1 %vm344_vm1, %v13070_v3  ;;  %v11170_v56 = vld [vmem:[#allocation2 + $0x1b8] sm:$0xff] }
 0x1db   : > { %v2749_v2 = vpop.f32.mrf.mxu1  ;;  %v8543_v4 = vpop.f32.mrf.mxu0  ;;  %8786 = vmatmul.mubr.msk.f32.gmra.mxu0 %vm344_vm1, %v11149_v58  ;;  %13072 = vst [vmem:[#allocation77_spill] sm:$0xff] %v11170_v56  ;;  %v11175_v58 = vld [vmem:[#allocation2 + $0x1c0] sm:$0xff] }
 0x1dc   : > { %13069 = vst [vmem:[#allocation72_spill] sm:$0xff] %v11156_v59  ;;  %v11163_v0 = vadd.f32 %v3307_v46, %v10817_v20  ;;  %v11166_v18 = vadd.f32 %v2749_v2, %v10770_v23  ;;  %v3309_v7 = vrot.slane %v8543_v4, 1  ;;  %8788 = vmatprep.mubr.msk.f32.mxu0 %vm344_vm1, %v11153_v14  ;;  %v3308_v15 = vsel %vm1488_vm3, %v3306_v27, %v3307_v46  ;;  %v13073_v59 = vld [vmem:[#allocation78_spill] sm:$0xff]  ;;  %v13075_v20 = vld [vmem:[#allocation80_spill] sm:$0xff]  ;;  %v13076_v2 = vld [vmem:[#allocation79_spill] sm:$0xff] }
 0x1dd   : > { %v8490_v41 = vpop.f32.mrf.mxu1  ;;  %8833 = vmatmul.mubr.msk.f32.gmra.mxu1 %vm344_vm1, %v13073_v59  ;;  %v3035_v60 = vpop.f32.mrf.mxu0  ;;  %13074 = vst [vmem:[#allocation75_spill] sm:$0xff] %v11175_v58 }
 0x1de   : > { %13071 = vst [vmem:[#allocation74_spill] sm:$0xff] %v11163_v0  ;;  %v11178_v0 = vadd.f32 %v3308_v15, %v13075_v20  ;;  %v11181_v23 = vadd.f32 %v3309_v7, %v10838_v24  ;;  %8835 = vmatprep.mubr.msk.f32.mxu1 %vm344_vm1, %v13076_v2  ;;  %v11192_v60 = vld [vmem:[#allocation2 + $0x1c8] sm:$0xff]  ;;  %v11196_v15 = vld [vmem:[#allocation2 + $0x1d0] sm:$0xff] }
 0x1df   : > { %v2759_v4 = vpop.f32.mrf.mxu1  ;;  %v8546_v14 = vpop.f32.mrf.mxu0  ;;  %8789 = vmatmul.mubr.msk.f32.gmra.mxu0 %vm344_vm1, %v11170_v56  ;;  %13077 = vst [vmem:[#allocation76_spill] sm:$0xff] %v11192_v60 }
 0x1e0   : > { %v11188_v27 = vadd.f32 %v2759_v4, %v10807_v33  ;;  %8791 = vmatprep.mubr.msk.f32.mxu0 %vm344_vm1, %v11175_v58 }
 0x1e1   : > { %v8493_v46 = vpop.f32.mrf.mxu1  ;;  %8836 = vmatmul.mubr.msk.f32.gmra.mxu1 %vm344_vm1, %v10780_v57  ;;  %v3044_v24 = vpop.f32.mrf.mxu0 }
 0x1e2   : > { %v11199_v14 = vadd.f32 %v8493_v46, %v10851_v34  ;;  %v3310_v41 = vrot.slane %v3044_v24, 1  ;;  %8838 = vmatprep.mubr.msk.f32.mxu1 %vm344_vm1, %v10783_v5  ;;  %v11213_v34 = vld [vmem:[#allocation2 + $0x1d8] sm:$0xff] }
 0x1e3   : > { %v2768_v33 = vpop.f32.mrf.mxu1  ;;  %v8549_v20 = vpop.f32.mrf.mxu0  ;;  %8792 = vmatmul.mubr.msk.f32.gmra.mxu0 %vm344_vm1, %v11192_v60  ;;  %13080 = vst [vmem:[#allocation79_spill] sm:$0xff] %v11213_v34  ;;  %v11218_v60 = vld [vmem:[#allocation2 + $0x1e0] sm:$0xff] }
 0x1e4   : > { %13078 = vst [vmem:[#allocation78_spill] sm:$0xff] %v11199_v14  ;;  %v11206_v4 = vadd.f32 %v3310_v41, %v10863_v39  ;;  %v11209_v58 = vadd.f32 %v2768_v33, %v10810_v47  ;;  %v3312_v56 = vrot.slane %v8549_v20, 1  ;;  %8794 = vmatprep.mubr.msk.f32.mxu0 %vm344_vm1, %v11196_v15  ;;  %v3311_v46 = vsel %vm1488_vm3, %v3309_v7, %v3310_v41  ;;  %v13083_v33 = vld [vmem:[#allocation81_spill] sm:$0xff] }
 0x1e5   : > { %v8496_v24 = vpop.f32.mrf.mxu1  ;;  %8839 = vmatmul.mubr.msk.f32.gmra.mxu1 %vm344_vm1, %v10796_v19  ;;  %v3053_v14 = vpop.f32.mrf.mxu0  ;;  %13081 = vst [vmem:[#allocation84_spill] sm:$0xff] %v11218_v60  ;;  %v11221_v39 = vadd.f32 %v3311_v46, %v10828_v1  ;;  %v11239_v41 = vld [vmem:[#allocation2 + $0x1f0] sm:$0xff] }
 0x1e6   : > { %13079 = vst [vmem:[#allocation80_spill] sm:$0xff] %v11206_v4  ;;  %v11224_v47 = vadd.f32 %v3312_v56, %v10889_v40  ;;  %8841 = vmatprep.mubr.msk.f32.mxu1 %vm344_vm1, %v13083_v33  ;;  %v11235_v14 = vld [vmem:[#allocation2 + $0x1e8] sm:$0xff]  ;;  %13085 = vst [vmem:[#allocation86_spill] sm:$0xff] %v11239_v41 }
 0x1e7   : > { %v2778_v20 = vpop.f32.mrf.mxu1  ;;  %v8552_v4 = vpop.f32.mrf.mxu0  ;;  %8795 = vmatmul.mubr.msk.f32.gmra.mxu0 %vm344_vm1, %v11213_v34  ;;  %13084 = vst [vmem:[#allocation81_spill] sm:$0xff] %v11235_v14 }
 0x1e8   : > { %13082 = vst [vmem:[#allocation85_spill] sm:$0xff] %v11224_v47  ;;  %v11231_v7 = vadd.f32 %v2778_v20, %v10854_v9  ;;  %8797 = vmatprep.mubr.msk.f32.mxu0 %vm344_vm1, %v11218_v60 }
 0x1e9   : > { %v8499_v1 = vpop.f32.mrf.mxu1  ;;  %8842 = vmatmul.mubr.msk.f32.gmra.mxu1 %vm344_vm1, %v10821_v26  ;;  %v3062_v40 = vpop.f32.mrf.mxu0 }
 0x1ea   : > { %v11242_v4 = vadd.f32 %v8499_v1, %v10901_v36  ;;  %v3313_v46 = vrot.slane %v3062_v40, 1  ;;  %8844 = vmatprep.mubr.msk.f32.mxu1 %vm344_vm1, %v10825_v30  ;;  %v11256_v36 = vld [vmem:[#allocation2 + $0x1f8] sm:$0xff] }
 0x1eb   : > { %v2787_v9 = vpop.f32.mrf.mxu1  ;;  %v8555_v24 = vpop.f32.mrf.mxu0  ;;  %8798 = vmatmul.mubr.msk.f32.gmra.mxu0 %vm344_vm1, %v11235_v14  ;;  %13088 = vst [vmem:[#allocation89_spill] sm:$0xff] %v11256_v36  ;;  %v11261_v14 = vld [vmem:[#allocation2 + $0x200] sm:$0xff] }
 0x1ec   : > { %13086 = vst [vmem:[#allocation87_spill] sm:$0xff] %v11242_v4  ;;  %v11249_v20 = vadd.f32 %v3313_v46, %v10912_v35  ;;  %v11252_v60 = vadd.f32 %v2787_v9, %v10856_v51  ;;  %v3315_v34 = vrot.slane %v8555_v24, 1  ;;  %8800 = vmatprep.mubr.msk.f32.mxu0 %vm344_vm1, %v11239_v41  ;;  %v3314_v1 = vsel %vm1488_vm3, %v3312_v56, %v3313_v46  ;;  %v13089_v4 = vld [vmem:[#allocation51_spill] sm:$0xff]  ;;  %v13093_v9 = vld [vmem:[#allocation82_spill] sm:$0xff]  ;;  %v11282_v46 = vld [vmem:[#allocation2 + $0x210] sm:$0xff] }
 0x1ed   : > { %v8502_v40 = vpop.f32.mrf.mxu1  ;;  %8845 = vmatmul.mubr.msk.f32.gmra.mxu1 %vm344_vm1, %v13089_v4  ;;  %v3071_v47 = vpop.f32.mrf.mxu0  ;;  %13090 = vst [vmem:[#allocation51_spill] sm:$0xff] %v11261_v14  ;;  %v11264_v35 = vadd.f32 %v3314_v1, %v10874_v29  ;;  %13095 = vst [vmem:[#allocation92_spill] sm:$0xff] %v11282_v46 }
 0x1ee   : > { %13087 = vst [vmem:[#allocation88_spill] sm:$0xff] %v11249_v20  ;;  %v11267_v51 = vadd.f32 %v3315_v34, %v10938_v13  ;;  %8847 = vmatprep.mubr.msk.f32.mxu1 %vm344_vm1, %v13093_v9  ;;  %v11278_v47 = vld [vmem:[#allocation2 + $0x208] sm:$0xff]  ;;  %v13097_v40 = vld [vmem:[#allocation83_spill] sm:$0xff] }
 0x1ef   : > { %13091 = vst [vmem:[#allocation90_spill] sm:$0xff] %v11264_v35  ;;  %v2797_v24 = vpop.f32.mrf.mxu1  ;;  %v8558_v20 = vpop.f32.mrf.mxu0  ;;  %8801 = vmatmul.mubr.msk.f32.gmra.mxu0 %vm344_vm1, %v11256_v36  ;;  %13094 = vst [vmem:[#allocation82_spill] sm:$0xff] %v11278_v47  ;;  %v13099_v36 = vld [vmem:[#allocation46_spill] sm:$0xff] }
 0x1f0   : > { %13092 = vst [vmem:[#allocation91_spill] sm:$0xff] %v11267_v51  ;;  %v11274_v56 = vadd.f32 %v2797_v24, %v10903_v45  ;;  %8803 = vmatprep.mubr.msk.f32.mxu0 %vm344_vm1, %v11261_v14 }
 0x1f1   : > { %v8505_v29 = vpop.f32.mrf.mxu1  ;;  %8848 = vmatmul.mubr.msk.f32.gmra.mxu1 %vm344_vm1, %v10867_v62  ;;  %v3080_v13 = vpop.f32.mrf.mxu0 }
 0x1f2   : > { %v11285_v20 = vadd.f32 %v8505_v29, %v10950_v16  ;;  %v3316_v1 = vrot.slane %v3080_v13, 1  ;;  %8850 = vmatprep.mubr.msk.f32.mxu1 %vm344_vm1, %v13097_v40  ;;  %v11299_v16 = vld [vmem:[#allocation2 + $0x218] sm:$0xff] }
 0x1f3   : > { %v2806_v45 = vpop.f32.mrf.mxu1  ;;  %v8561_v24 = vpop.f32.mrf.mxu0  ;;  %8804 = vmatmul.mubr.msk.f32.gmra.mxu0 %vm344_vm1, %v11278_v47  ;;  %13100 = vst [vmem:[#allocation46_spill] sm:$0xff] %v11299_v16  ;;  %v11304_v47 = vld [vmem:[#allocation2 + $0x220] sm:$0xff] }
 0x1f4   : > { %13096 = vst [vmem:[#allocation93_spill] sm:$0xff] %v11285_v20  ;;  %v11292_v14 = vadd.f32 %v3316_v1, %v10961_v37  ;;  %v11295_v51 = vadd.f32 %v2806_v45, %v13099_v36  ;;  %v3318_v35 = vrot.slane %v8561_v24, 1  ;;  %8806 = vmatprep.mubr.msk.f32.mxu0 %vm344_vm1, %v11282_v46  ;;  %v3317_v29 = vsel %vm1488_vm3, %v3315_v34, %v3316_v1  ;;  %v13101_v20 = vld [vmem:[#allocation52_spill] sm:$0xff]  ;;  %v13105_v45 = vld [vmem:[#allocation54_spill] sm:$0xff]  ;;  %v13107_v1 = vld [vmem:[#allocation23_spill] sm:$0xff] }
 0x1f5   : > { %v8508_v13 = vpop.f32.mrf.mxu1  ;;  %8851 = vmatmul.mubr.msk.f32.gmra.mxu1 %vm344_vm1, %v13101_v20  ;;  %v3089_v41 = vpop.f32.mrf.mxu0  ;;  %13102 = vst [vmem:[#allocation52_spill] sm:$0xff] %v11304_v47  ;;  %v11307_v37 = vadd.f32 %v3317_v29, %v10923_v10  ;;  %v11325_v29 = vld [vmem:[#allocation2 + $0x230] sm:$0xff] }
 0x1f6   : > { %13098 = vst [vmem:[#allocation83_spill] sm:$0xff] %v11292_v14  ;;  %v11310_v36 = vadd.f32 %v3318_v35, %v10987_v63  ;;  %8853 = vmatprep.mubr.msk.f32.mxu1 %vm344_vm1, %v13105_v45  ;;  %v11321_v41 = vld [vmem:[#allocation2 + $0x228] sm:$0xff] }
 0x1f7   : > { %13103 = vst [vmem:[#allocation94_spill] sm:$0xff] %v11307_v37  ;;  %v2816_v24 = vpop.f32.mrf.mxu1  ;;  %v8564_v14 = vpop.f32.mrf.mxu0  ;;  %8807 = vmatmul.mubr.msk.f32.gmra.mxu0 %vm344_vm1, %v11299_v16  ;;  %13106 = vst [vmem:[#allocation54_spill] sm:$0xff] %v11321_v41  ;;  %v13109_v16 = vld [vmem:[#allocation34_spill] sm:$0xff] }
 0x1f8   : > { %13104 = vst [vmem:[#allocation95_spill] sm:$0xff] %v11310_v36  ;;  %v11317_v34 = vadd.f32 %v2816_v24, %v10952_v52  ;;  %8809 = vmatprep.mubr.msk.f32.mxu0 %vm344_vm1, %v11304_v47  ;;  %v13111_v36 = vld [vmem:[#allocation55_spill] sm:$0xff] }
 0x1f9   : > { %v8511_v10 = vpop.f32.mrf.mxu1  ;;  %8854 = vmatmul.mubr.msk.f32.gmra.mxu1 %vm344_vm1, %v13107_v1  ;;  %v3098_v63 = vpop.f32.mrf.mxu0 }
 0x1fa   : > { %v11328_v14 = vadd.f32 %v8511_v10, %v10999_v31  ;;  %v3319_v13 = vrot.slane %v3098_v63, 1  ;;  %8856 = vmatprep.mubr.msk.f32.mxu1 %vm344_vm1, %v13109_v16  ;;  %v11342_v31 = vld [vmem:[#allocation2 + $0x238] sm:$0xff] }
 0x1fb   : > { %v2825_v52 = vpop.f32.mrf.mxu1  ;;  %v8567_v24 = vpop.f32.mrf.mxu0  ;;  %8810 = vmatmul.mubr.msk.f32.gmra.mxu0 %vm344_vm1, %v11321_v41  ;;  %13112 = vst [vmem:[#allocation55_spill] sm:$0xff] %v11342_v31 }
 0x1fc   : > { %13108 = vst [vmem:[#allocation23_spill] sm:$0xff] %v11328_v14  ;;  %v11335_v47 = vadd.f32 %v3319_v13, %v11010_v54  ;;  %v11338_v37 = vadd.f32 %v2825_v52, %v13111_v36  ;;  %v3321_v46 = vrot.slane %v8567_v24, 1  ;;  %8812 = vmatprep.mubr.msk.f32.mxu0 %vm344_vm1, %v11325_v29  ;;  %v3320_v10 = vsel %vm1488_vm3, %v3318_v35, %v3319_v13  ;;  %v13113_v14 = vld [vmem:[#allocation28_spill] sm:$0xff]  ;;  %v13117_v35 = vld [vmem:[#allocation43_spill] sm:$0xff] }
 0x1fd   : > { %v8514_v63 = vpop.f32.mrf.mxu1  ;;  %8857 = vmatmul.mubr.msk.f32.gmra.mxu1 %vm344_vm1, %v13113_v14  ;;  %v3107_v16 = vpop.f32.mrf.mxu0  ;;  %v11348_v41 = vadd.f32 %v3320_v10, %v10972_v21  ;;  %v13116_v36 = vld [vmem:[#allocation32_spill] sm:$0xff]  ;;  %v13118_v21 = vld [vmem:[#allocation57_spill] sm:$0xff] }
 0x1fe   : > { %13110 = vst [vmem:[#allocation96_spill] sm:$0xff] %v11335_v47  ;;  %v11351_v54 = vadd.f32 %v3321_v46, %v11033_v42  ;;  %8859 = vmatprep.mubr.msk.f32.mxu1 %vm344_vm1, %v13116_v36 }
 0x1ff   : > { %13114 = vst [vmem:[#allocation28_spill] sm:$0xff] %v11348_v41  ;;  %v2835_v52 = vpop.f32.mrf.mxu1  ;;  %v8570_v24 = vpop.f32.mrf.mxu0  ;;  %8813 = vmatmul.mubr.msk.f32.gmra.mxu0 %vm344_vm1, %v11342_v31 }
 0x200   : > { %13115 = vst [vmem:[#allocation97_spill] sm:$0xff] %v11351_v54  ;;  %v11358_v13 = vadd.f32 %v2835_v52, %v13117_v35  ;;  %8915 = vmatprep.mubr.msk.f32.mxu0 %vm344_vm1, %v13038_v50  ;;  %v13120_v54 = vld [vmem:[#allocation53_spill] sm:$0xff]  ;;  %v13122_v50 = vld [vmem:[#allocation47_spill] sm:$0xff] }
 0x201   : > { %v8517_v16 = vpop.f32.mrf.mxu1  ;;  %8860 = vmatmul.mubr.msk.f32.gmra.mxu1 %vm344_vm1, %v13118_v21  ;;  %v3116_v42 = vpop.f32.mrf.mxu0 }
 0x202   : > { %v11365_v10 = vadd.f32 %v8517_v16, %v11045_v28  ;;  %v3322_v63 = vrot.slane %v3116_v42, 1  ;;  %8862 = vmatprep.mubr.msk.f32.mxu1 %vm344_vm1, %v13120_v54  ;;  %v13123_v42 = vld [vmem:[#allocation39_spill] sm:$0xff] }
 0x203   : > { %v2844_v24 = vpop.f32.mrf.mxu1  ;;  %v8573_v31 = vpop.f32.mrf.mxu0  ;;  %8916 = vmatmul.mubr.msk.f32.vlgmr.msra.gmra.mxu0 %vm344_vm1, %v13041_v43  ;;  %v13126_v43 = vld [vmem:[#allocation42_spill] sm:$0xff] }
 0x204   : > { %13119 = vst [vmem:[#allocation32_spill] sm:$0xff] %v11365_v10  ;;  %v11372_v52 = vadd.f32 %v3322_v63, %v11057_v55  ;;  %v11375_v35 = vadd.f32 %v2844_v24, %v13122_v50  ;;  %v3324_v47 = vrot.slane %v8573_v31, 1  ;;  %8918 = vmatprep.mubr.msk.f32.mxu0 %vm344_vm1, %v13044_v8  ;;  %v3323_v28 = vsel %vm1488_vm3, %v3321_v46, %v3322_v63  ;;  %v13128_v50 = vld [vmem:[#allocation58_spill] sm:$0xff] }
 0x205   : > { %v8520_v16 = vpop.f32.mrf.mxu1  ;;  %8863 = vmatmul.mubr.msk.f32.gmra.mxu1 %vm344_vm1, %v13123_v42  ;;  %v3125_v10 = vpop.f32.mrf.mxu0  ;;  %v11383_v41 = vadd.f32 %v3323_v28, %v11021_v11  ;;  %v13127_v11 = vld [vmem:[#allocation44_spill] sm:$0xff] }
 0x206   : > { %13121 = vst [vmem:[#allocation43_spill] sm:$0xff] %v11372_v52  ;;  %v11386_v55 = vadd.f32 %v3324_v47, %v11080_v49  ;;  %8865 = vmatprep.mubr.msk.f32.mxu1 %vm344_vm1, %v13126_v43 }
 0x207   : > { %13124 = vst [vmem:[#allocation57_spill] sm:$0xff] %v11383_v41  ;;  %v2854_v31 = vpop.f32.mrf.mxu1  ;;  %v8576_v24 = vpop.f32.mrf.mxu0  ;;  %8919 = vmatmul.mubr.msk.f32.gmra.mxu0 %vm344_vm1, %v13049_v61 }
 0x208   : > { %13125 = vst [vmem:[#allocation53_spill] sm:$0xff] %v11386_v55  ;;  %v11393_v8 = vadd.f32 %v2854_v31, %v11047_v44  ;;  %8921 = vmatprep.mubr.msk.f32.mxu0 %vm344_vm1, %v13054_v25  ;;  %v13129_v44 = vld [vmem:[#allocation48_spill] sm:$0xff]  ;;  %v13132_v55 = vld [vmem:[#allocation65_spill] sm:$0xff] }
 0x209   : > { %v8623_v46 = vpop.f32.mrf.mxu1  ;;  %8866 = vmatmul.mubr.msk.f32.gmra.mxu1 %vm344_vm1, %v13127_v11  ;;  %v3134_v49 = vpop.f32.mrf.mxu0 }
 0x20a   : > { %v3866_v10 = vrot.slane %v8623_v46, 2  ;;  %v3325_v63 = vrot.slane %v3134_v49, 1  ;;  %8868 = vmatprep.mubr.msk.f32.mxu1 %vm344_vm1, %v13128_v50  ;;  %v13131_v49 = vld [vmem:[#allocation60_spill] sm:$0xff] }
 0x20b   : > { %v3515_v28 = vpop.f32.mrf.mxu1  ;;  %v8579_v16 = vpop.f32.mrf.mxu0  ;;  %8922 = vmatmul.mubr.msk.f32.gmra.mxu0 %vm344_vm1, %v10693_v32 }
 0x20c   : > { %v11404_v61 = vadd.f32 %v3866_v10, %v13129_v44  ;;  %v11407_v25 = vadd.f32 %v3325_v63, %v11102_v48  ;;  %v3327_v31 = vrot.slane %v8579_v16, 1  ;;  %8924 = vmatprep.mubr.msk.f32.mxu0 %vm344_vm1, %v13058_v38  ;;  %v3326_v24 = vsel %vm1488_vm3, %v3324_v47, %v3325_v63  ;;  %v13135_v48 = vld [vmem:[#allocation56_spill] sm:$0xff]  ;;  %v13136_v63 = vld [vmem:[#allocation63_spill] sm:$0xff] }
 0x20d   : > { %v8626_v46 = vpop.f32.mrf.mxu1  ;;  %8869 = vmatmul.mubr.msk.f32.gmra.mxu1 %vm344_vm1, %v13131_v49  ;;  %v3143_v28 = vpop.f32.mrf.mxu0  ;;  %v11415_v52 = vadd.f32 %v3326_v24, %v13132_v55 }
 0x20e   : > { %13130 = vst [vmem:[#allocation47_spill] sm:$0xff] %v11407_v25  ;;  %v11418_v32 = vadd.f32 %v3327_v31, %v11123_v6  ;;  %v3869_v44 = vrot.slane %v8626_v46, 2  ;;  %8871 = vmatprep.mubr.msk.f32.mxu1 %vm344_vm1, %v13135_v48  ;;  %v13137_v46 = vld [vmem:[#allocation45_spill] sm:$0xff] }
 0x20f   : > { %13133 = vst [vmem:[#allocation39_spill] sm:$0xff] %v11415_v52  ;;  %v3524_v16 = vpop.f32.mrf.mxu1  ;;  %v8582_v25 = vpop.f32.mrf.mxu0  ;;  %8925 = vmatmul.mubr.msk.f32.gmra.mxu0 %vm344_vm1, %v13061_v22  ;;  %v13139_v52 = vld [vmem:[#allocation13_spill] sm:$0xff] }
 0x210   : > { %13134 = vst [vmem:[#allocation42_spill] sm:$0xff] %v11418_v32  ;;  %v3867_v38 = vrot.slane %v3524_v16, 2  ;;  %8927 = vmatprep.mubr.msk.f32.mxu0 %vm344_vm1, %v13066_v17  ;;  %v13138_v17 = vld [vmem:[#allocation59_spill] sm:$0xff] }
 0x211   : > { %v8629_v47 = vpop.f32.mrf.mxu1  ;;  %8872 = vmatmul.mubr.msk.f32.gmra.mxu1 %vm344_vm1, %v13136_v63  ;;  %v3152_v55 = vpop.f32.mrf.mxu0 }
 0x212   : > { %v3871_v6 = vrot.slane %v8629_v47, 2  ;;  %v3328_v24 = vrot.slane %v3152_v55, 1  ;;  %8874 = vmatprep.mubr.msk.f32.mxu1 %vm344_vm1, %v13137_v46  ;;  %v3868_v28 = vsel %vm2055_vm4, %v3866_v10, %v3867_v38  ;;  %v3870_v25 = vsel %vm2055_vm4, %v3867_v38, %v3869_v44  ;;  %v13140_v47 = vld [vmem:[#allocation66_spill] sm:$0xff] }
 0x213   : > { %v3534_v32 = vpop.f32.mrf.mxu1  ;;  %v8585_v22 = vpop.f32.mrf.mxu0  ;;  %8928 = vmatmul.mubr.msk.f32.gmra.mxu0 %vm344_vm1, %v10740_v12  ;;  %v11435_v16 = vadd.f32 %v3868_v28, %v13138_v17  ;;  %v11438_v41 = vadd.f32 %v3870_v25, %v13139_v52  ;;  %v13142_v12 = vld [vmem:[#allocation14_spill] sm:$0xff] }
 0x214   : > { %v11441_v55 = vadd.f32 %v3871_v6, %v13140_v47  ;;  %v11444_v46 = vadd.f32 %v3328_v24, %v11145_v53  ;;  %v3330_v10 = vrot.slane %v8585_v22, 1  ;;  %8930 = vmatprep.mubr.msk.f32.mxu0 %vm344_vm1, %v13070_v3  ;;  %v3329_v32 = vsel %vm1488_vm3, %v3327_v31, %v3328_v24  ;;  %v13143_v28 = vld [vmem:[#allocation70_spill] sm:$0xff] }
 0x215   : > { %v8632_v44 = vpop.f32.mrf.mxu1  ;;  %8875 = vmatmul.mubr.msk.f32.gmra.mxu1 %vm344_vm1, %v13142_v12  ;;  %v3161_v38 = vpop.f32.mrf.mxu0  ;;  %v11452_v52 = vadd.f32 %v3329_v32, %v13143_v28  ;;  %v13146_v53 = vld [vmem:[#allocation62_spill] sm:$0xff] }
 0x216   : > { %13141 = vst [vmem:[#allocation44_spill] sm:$0xff] %v11444_v46  ;;  %v11455_v25 = vadd.f32 %v3330_v10, %v11166_v18  ;;  %v3874_v17 = vrot.slane %v8632_v44, 2  ;;  %8877 = vmatprep.mubr.msk.f32.mxu1 %vm344_vm1, %v13146_v53  ;;  %v13147_v24 = vld [vmem:[#allocation18_spill] sm:$0xff]  ;;  %v13148_v44 = vld [vmem:[#allocation64_spill] sm:$0xff]  ;;  %v13150_v46 = vld [vmem:[#allocation67_spill] sm:$0xff] }
 0x217   : > { %13144 = vst [vmem:[#allocation58_spill] sm:$0xff] %v11452_v52  ;;  %v3543_v22 = vpop.f32.mrf.mxu1  ;;  %v8588_v47 = vpop.f32.mrf.mxu0  ;;  %8931 = vmatmul.mubr.msk.f32.gmra.mxu0 %vm344_vm1, %v13073_v59 }
 0x218   : > { %13145 = vst [vmem:[#allocation48_spill] sm:$0xff] %v11455_v25  ;;  %v3872_v3 = vrot.slane %v3543_v22, 2  ;;  %8933 = vmatprep.mubr.msk.f32.mxu0 %vm344_vm1, %v13076_v2  ;;  %v13149_v2 = vld [vmem:[#allocation71_spill] sm:$0xff] }
 0x219   : > { %v8635_v31 = vpop.f32.mrf.mxu1  ;;  %8878 = vmatmul.mubr.msk.f32.gmra.mxu1 %vm344_vm1, %v13147_v24  ;;  %v3170_v32 = vpop.f32.mrf.mxu0 }
 0x21a   : > { %v3876_v18 = vrot.slane %v8635_v31, 2  ;;  %v3331_v38 = vrot.slane %v3170_v32, 1  ;;  %8880 = vmatprep.mubr.msk.f32.mxu1 %vm344_vm1, %v13148_v44  ;;  %v3873_v28 = vsel %vm2055_vm4, %v3871_v6, %v3872_v3  ;;  %v3875_v47 = vsel %vm2055_vm4, %v3872_v3, %v3874_v17  ;;  %v13151_v31 = vld [vmem:[#allocation61_spill] sm:$0xff] }
 0x21b   : > { %v3553_v25 = vpop.f32.mrf.mxu1  ;;  %v8591_v59 = vpop.f32.mrf.mxu0  ;;  %8934 = vmatmul.mubr.msk.f32.gmra.mxu0 %vm344_vm1, %v10780_v57  ;;  %v11472_v22 = vadd.f32 %v3873_v28, %v13149_v2  ;;  %v11475_v52 = vadd.f32 %v3875_v47, %v13150_v46  ;;  %v13153_v57 = vld [vmem:[#allocation68_spill] sm:$0xff] }
 0x21c   : > { %v11478_v32 = vadd.f32 %v3876_v18, %v13151_v31  ;;  %v11481_v44 = vadd.f32 %v3331_v38, %v11188_v27  ;;  %v3333_v6 = vrot.slane %v8591_v59, 1  ;;  %8936 = vmatprep.mubr.msk.f32.mxu0 %vm344_vm1, %v10783_v5  ;;  %v3332_v25 = vsel %vm1488_vm3, %v3330_v10, %v3331_v38  ;;  %v13154_v28 = vld [vmem:[#allocation72_spill] sm:$0xff]  ;;  %v13156_v27 = vld [vmem:[#allocation22_spill] sm:$0xff]  ;;  %v13157_v38 = vld [vmem:[#allocation73_spill] sm:$0xff] }
 0x21d   : > { %v8638_v17 = vpop.f32.mrf.mxu1  ;;  %8881 = vmatmul.mubr.msk.f32.gmra.mxu1 %vm344_vm1, %v13153_v57  ;;  %v3179_v3 = vpop.f32.mrf.mxu0  ;;  %v11489_v46 = vadd.f32 %v3332_v25, %v13154_v28 }
 0x21e   : > { %13152 = vst [vmem:[#allocation60_spill] sm:$0xff] %v11481_v44  ;;  %v11492_v47 = vadd.f32 %v3333_v6, %v11209_v58  ;;  %v3879_v2 = vrot.slane %v8638_v17, 2  ;;  %8883 = vmatprep.mubr.msk.f32.mxu1 %vm344_vm1, %v13156_v27  ;;  %v13158_v17 = vld [vmem:[#allocation69_spill] sm:$0xff] }
 0x21f   : > { %v3562_v59 = vpop.f32.mrf.mxu1  ;;  %v8594_v31 = vpop.f32.mrf.mxu0  ;;  %8937 = vmatmul.mubr.msk.f32.gmra.mxu0 %vm344_vm1, %v10796_v19 }
 0x220   : > { %13155 = vst [vmem:[#allocation65_spill] sm:$0xff] %v11492_v47  ;;  %v3877_v5 = vrot.slane %v3562_v59, 2  ;;  %8939 = vmatprep.mubr.msk.f32.mxu0 %vm344_vm1, %v13083_v33  ;;  %v13159_v59 = vld [vmem:[#allocation74_spill] sm:$0xff] }
 0x221   : > { %v8641_v10 = vpop.f32.mrf.mxu1  ;;  %8884 = vmatmul.mubr.msk.f32.gmra.mxu1 %vm344_vm1, %v13157_v38  ;;  %v3188_v25 = vpop.f32.mrf.mxu0 }
 0x222   : > { %v3881_v58 = vrot.slane %v8641_v10, 2  ;;  %v3334_v3 = vrot.slane %v3188_v25, 1  ;;  %8886 = vmatprep.mubr.msk.f32.mxu1 %vm344_vm1, %v13158_v17  ;;  %v3878_v28 = vsel %vm2055_vm4, %v3876_v18, %v3877_v5  ;;  %v3880_v31 = vsel %vm2055_vm4, %v3877_v5, %v3879_v2  ;;  %v13162_v5 = vld [vmem:[#allocation78_spill] sm:$0xff] }
 0x223   : > { %v3572_v47 = vpop.f32.mrf.mxu1  ;;  %v8597_v19 = vpop.f32.mrf.mxu0  ;;  %8940 = vmatmul.mubr.msk.f32.gmra.mxu0 %vm344_vm1, %v10821_v26  ;;  %v11509_v33 = vadd.f32 %v3878_v28, %v11178_v0  ;;  %v11512_v44 = vadd.f32 %v3880_v31, %v13159_v59  ;;  %v13161_v26 = vld [vmem:[#allocation77_spill] sm:$0xff] }
 0x224   : > { %v11515_v10 = vadd.f32 %v3881_v58, %v11181_v23  ;;  %v11518_v25 = vadd.f32 %v3334_v3, %v11231_v7  ;;  %v3336_v18 = vrot.slane %v8597_v19, 1  ;;  %8942 = vmatprep.mubr.msk.f32.mxu0 %vm344_vm1, %v10825_v30  ;;  %v3335_v47 = vsel %vm1488_vm3, %v3333_v6, %v3334_v3  ;;  %v13164_v7 = vld [vmem:[#allocation75_spill] sm:$0xff]  ;;  %v13165_v3 = vld [vmem:[#allocation76_spill] sm:$0xff] }
 0x225   : > { %v8644_v2 = vpop.f32.mrf.mxu1  ;;  %8887 = vmatmul.mubr.msk.f32.gmra.mxu1 %vm344_vm1, %v13161_v26  ;;  %v3197_v0 = vpop.f32.mrf.mxu0  ;;  %v11526_v28 = vadd.f32 %v3335_v47, %v13162_v5 }
 0x226   : > { %13160 = vst [vmem:[#allocation56_spill] sm:$0xff] %v11518_v25  ;;  %v11529_v23 = vadd.f32 %v3336_v18, %v11252_v60  ;;  %v3884_v31 = vrot.slane %v8644_v2, 2  ;;  %8889 = vmatprep.mubr.msk.f32.mxu1 %vm344_vm1, %v13164_v7 }
 0x227   : > { %v3581_v19 = vpop.f32.mrf.mxu1  ;;  %v8600_v59 = vpop.f32.mrf.mxu0  ;;  %8943 = vmatmul.mubr.msk.f32.gmra.mxu0 %vm344_vm1, %v13089_v4 }
 0x228   : > { %13163 = vst [vmem:[#allocation63_spill] sm:$0xff] %v11529_v23  ;;  %v3882_v30 = vrot.slane %v3581_v19, 2  ;;  %8945 = vmatprep.mubr.msk.f32.mxu0 %vm344_vm1, %v13093_v9  ;;  %v13166_v19 = vld [vmem:[#allocation80_spill] sm:$0xff] }
 0x229   : > { %v8647_v6 = vpop.f32.mrf.mxu1  ;;  %8890 = vmatmul.mubr.msk.f32.gmra.mxu1 %vm344_vm1, %v13165_v3  ;;  %v3206_v47 = vpop.f32.mrf.mxu0 }
 0x22a   : > { %v3886_v60 = vrot.slane %v8647_v6, 2  ;;  %v3337_v0 = vrot.slane %v3206_v47, 1  ;;  %8892 = vmatprep.mubr.msk.f32.mxu1 %vm344_vm1, %v11196_v15  ;;  %v3883_v2 = vsel %vm2055_vm4, %v3881_v58, %v3882_v30  ;;  %v3885_v5 = vsel %vm2055_vm4, %v3882_v30, %v3884_v31  ;;  %v13168_v58 = vld [vmem:[#allocation85_spill] sm:$0xff] }
 0x22b   : > { %v3591_v59 = vpop.f32.mrf.mxu1  ;;  %v8603_v4 = vpop.f32.mrf.mxu0  ;;  %8946 = vmatmul.mubr.msk.f32.gmra.mxu0 %vm344_vm1, %v10867_v62  ;;  %v11546_v9 = vadd.f32 %v3883_v2, %v11221_v39  ;;  %v11549_v23 = vadd.f32 %v3885_v5, %v13166_v19  ;;  %v13169_v62 = vld [vmem:[#allocation79_spill] sm:$0xff]  ;;  %v13173_v19 = vld [vmem:[#allocation84_spill] sm:$0xff] }
 0x22c   : > { %v11552_v6 = vadd.f32 %v3337_v0, %v11274_v56  ;;  %v3339_v47 = vrot.slane %v8603_v4, 1  ;;  %8948 = vmatprep.mubr.msk.f32.mxu0 %vm344_vm1, %v13097_v40  ;;  %v11557_v31 = vadd.f32 %v3886_v60, %v13168_v58  ;;  %v3338_v30 = vsel %vm1488_vm3, %v3336_v18, %v3337_v0  ;;  %v13170_v2 = vld [vmem:[#allocation87_spill] sm:$0xff] }
 0x22d   : > { %v8650_v59 = vpop.f32.mrf.mxu1  ;;  %8893 = vmatmul.mubr.msk.f32.gmra.mxu1 %vm344_vm1, %v13169_v62  ;;  %v3215_v39 = vpop.f32.mrf.mxu0  ;;  %v11563_v5 = vadd.f32 %v3338_v30, %v13170_v2 }
 0x22e   : > { %13167 = vst [vmem:[#allocation59_spill] sm:$0xff] %v11552_v6  ;;  %v11566_v56 = vadd.f32 %v3339_v47, %v11295_v51  ;;  %v3889_v4 = vrot.slane %v8650_v59, 2  ;;  %8895 = vmatprep.mubr.msk.f32.mxu1 %vm344_vm1, %v13173_v19  ;;  %v13174_v39 = vld [vmem:[#allocation81_spill] sm:$0xff]  ;;  %v13175_v59 = vld [vmem:[#allocation86_spill] sm:$0xff] }
 0x22f   : > { %13171 = vst [vmem:[#allocation13_spill] sm:$0xff] %v11563_v5  ;;  %v3600_v40 = vpop.f32.mrf.mxu1  ;;  %v8606_v58 = vpop.f32.mrf.mxu0  ;;  %8949 = vmatmul.mubr.msk.f32.gmra.mxu0 %vm344_vm1, %v13101_v20  ;;  %v13177_v5 = vld [vmem:[#allocation88_spill] sm:$0xff] }
 0x230   : > { %13172 = vst [vmem:[#allocation66_spill] sm:$0xff] %v11566_v56  ;;  %v3887_v18 = vrot.slane %v3600_v40, 2  ;;  %8951 = vmatprep.mubr.msk.f32.mxu0 %vm344_vm1, %v13105_v45  ;;  %v13176_v45 = vld [vmem:[#allocation90_spill] sm:$0xff] }
 0x231   : > { %v8653_v0 = vpop.f32.mrf.mxu1  ;;  %8896 = vmatmul.mubr.msk.f32.gmra.mxu1 %vm344_vm1, %v13174_v39  ;;  %v3224_v30 = vpop.f32.mrf.mxu0 }
 0x232   : > { %v3891_v51 = vrot.slane %v8653_v0, 2  ;;  %v3340_v2 = vrot.slane %v3224_v30, 1  ;;  %8898 = vmatprep.mubr.msk.f32.mxu1 %vm344_vm1, %v13175_v59  ;;  %v3888_v56 = vsel %vm2055_vm4, %v3886_v60, %v3887_v18  ;;  %v3890_v58 = vsel %vm2055_vm4, %v3887_v18, %v3889_v4  ;;  %v13179_v59 = vld [vmem:[#allocation34_spill] sm:$0xff]  ;;  %v13180_v60 = vld [vmem:[#allocation91_spill] sm:$0xff] }
 0x233   : > { %v3610_v6 = vpop.f32.mrf.mxu1  ;;  %v8609_v20 = vpop.f32.mrf.mxu0  ;;  %8952 = vmatmul.mubr.msk.f32.gmra.mxu0 %vm344_vm1, %v13107_v1  ;;  %v11583_v40 = vadd.f32 %v3888_v56, %v13176_v45  ;;  %v11586_v25 = vadd.f32 %v3890_v58, %v13177_v5  ;;  %v13181_v1 = vld [vmem:[#allocation89_spill] sm:$0xff] }
 0x234   : > { %v11589_v0 = vadd.f32 %v3340_v2, %v11317_v34  ;;  %v3342_v30 = vrot.slane %v8609_v20, 1  ;;  %8954 = vmatprep.mubr.msk.f32.mxu0 %vm344_vm1, %v13179_v59  ;;  %v11594_v4 = vadd.f32 %v3891_v51, %v13180_v60  ;;  %v3341_v6 = vsel %vm1488_vm3, %v3339_v47, %v3340_v2  ;;  %v13182_v45 = vld [vmem:[#allocation93_spill] sm:$0xff]  ;;  %v13185_v20 = vld [vmem:[#allocation51_spill] sm:$0xff] }
 0x235   : > { %v8656_v18 = vpop.f32.mrf.mxu1  ;;  %8899 = vmatmul.mubr.msk.f32.gmra.mxu1 %vm344_vm1, %v13181_v1  ;;  %v3233_v56 = vpop.f32.mrf.mxu0  ;;  %v11600_v5 = vadd.f32 %v3341_v6, %v13182_v45 }
 0x236   : > { %13178 = vst [vmem:[#allocation14_spill] sm:$0xff] %v11589_v0  ;;  %v11603_v34 = vadd.f32 %v3342_v30, %v11338_v37  ;;  %v3894_v58 = vrot.slane %v8656_v18, 2  ;;  %8901 = vmatprep.mubr.msk.f32.mxu1 %vm344_vm1, %v13185_v20  ;;  %v13186_v56 = vld [vmem:[#allocation82_spill] sm:$0xff]  ;;  %v13187_v18 = vld [vmem:[#allocation92_spill] sm:$0xff] }
 0x237   : > { %13183 = vst [vmem:[#allocation70_spill] sm:$0xff] %v11600_v5  ;;  %v3619_v59 = vpop.f32.mrf.mxu1  ;;  %v8612_v60 = vpop.f32.mrf.mxu0  ;;  %8955 = vmatmul.mubr.msk.f32.gmra.mxu0 %vm344_vm1, %v13113_v14  ;;  %v13189_v5 = vld [vmem:[#allocation83_spill] sm:$0xff] }
 0x238   : > { %13184 = vst [vmem:[#allocation62_spill] sm:$0xff] %v11603_v34  ;;  %v3892_v47 = vrot.slane %v3619_v59, 2  ;;  %8957 = vmatprep.mubr.msk.f32.mxu0 %vm344_vm1, %v13116_v36  ;;  %v13188_v36 = vld [vmem:[#allocation94_spill] sm:$0xff] }
 0x239   : > { %v8659_v2 = vpop.f32.mrf.mxu1  ;;  %8902 = vmatmul.mubr.msk.f32.gmra.mxu1 %vm344_vm1, %v13186_v56  ;;  %v3242_v6 = vpop.f32.mrf.mxu0 }
 0x23a   : > { %v3896_v37 = vrot.slane %v8659_v2, 2  ;;  %v3343_v45 = vrot.slane %v3242_v6, 1  ;;  %8904 = vmatprep.mubr.msk.f32.mxu1 %vm344_vm1, %v13187_v18  ;;  %v3893_v34 = vsel %vm2055_vm4, %v3891_v51, %v3892_v47  ;;  %v3895_v60 = vsel %vm2055_vm4, %v3892_v47, %v3894_v58  ;;  %v13191_v51 = vld [vmem:[#allocation95_spill] sm:$0xff] }
 0x23b   : > { %v3629_v0 = vpop.f32.mrf.mxu1  ;;  %v8615_v14 = vpop.f32.mrf.mxu0  ;;  %8958 = vmatmul.mubr.msk.f32.gmra.mxu0 %vm344_vm1, %v13118_v21  ;;  %v11620_v59 = vadd.f32 %v3893_v34, %v13188_v36  ;;  %v11623_v56 = vadd.f32 %v3895_v60, %v13189_v5  ;;  %v13192_v21 = vld [vmem:[#allocation46_spill] sm:$0xff]  ;;  %v13193_v36 = vld [vmem:[#allocation23_spill] sm:$0xff] }
 0x23c   : > { %v11626_v2 = vadd.f32 %v3343_v45, %v11358_v13  ;;  %v3345_v6 = vrot.slane %v8615_v14, 1  ;;  %8960 = vmatprep.mubr.msk.f32.mxu0 %vm344_vm1, %v13120_v54  ;;  %v11631_v58 = vadd.f32 %v3896_v37, %v13191_v51  ;;  %v3344_v0 = vsel %vm1488_vm3, %v3342_v30, %v3343_v45  ;;  %v13196_v14 = vld [vmem:[#allocation52_spill] sm:$0xff] }
 0x23d   : > { %v8662_v47 = vpop.f32.mrf.mxu1  ;;  %8905 = vmatmul.mubr.msk.f32.gmra.mxu1 %vm344_vm1, %v13192_v21  ;;  %v3251_v34 = vpop.f32.mrf.mxu0  ;;  %v11637_v5 = vadd.f32 %v3344_v0, %v13193_v36 }
 0x23e   : > { %13190 = vst [vmem:[#allocation18_spill] sm:$0xff] %v11626_v2  ;;  %v11640_v13 = vadd.f32 %v3345_v6, %v11375_v35  ;;  %v3899_v60 = vrot.slane %v8662_v47, 2  ;;  %8907 = vmatprep.mubr.msk.f32.mxu1 %vm344_vm1, %v13196_v14  ;;  %v13197_v34 = vld [vmem:[#allocation54_spill] sm:$0xff]  ;;  %v13199_v2 = vld [vmem:[#allocation96_spill] sm:$0xff] }
 0x23f   : > { %13194 = vst [vmem:[#allocation71_spill] sm:$0xff] %v11637_v5  ;;  %v3638_v54 = vpop.f32.mrf.mxu1  ;;  %v8618_v51 = vpop.f32.mrf.mxu0  ;;  %8961 = vmatmul.mubr.msk.f32.gmra.mxu0 %vm344_vm1, %v13123_v42 }
 0x240   : > { %13195 = vst [vmem:[#allocation67_spill] sm:$0xff] %v11640_v13  ;;  %v3897_v30 = vrot.slane %v3638_v54, 2  ;;  %8963 = vmatprep.mubr.msk.f32.mxu0 %vm344_vm1, %v13126_v43  ;;  %v13198_v43 = vld [vmem:[#allocation28_spill] sm:$0xff] }
 0x241   : > { %v8665_v45 = vpop.f32.mrf.mxu1  ;;  %8908 = vmatmul.mubr.msk.f32.gmra.mxu1 %vm344_vm1, %v13197_v34  ;;  %v3260_v0 = vpop.f32.mrf.mxu0 }
 0x242   : > { %v3901_v35 = vrot.slane %v8665_v45, 2  ;;  %v3346_v36 = vrot.slane %v3260_v0, 1  ;;  %8910 = vmatprep.mubr.msk.f32.mxu1 %vm344_vm1, %v11325_v29  ;;  %v3898_v47 = vsel %vm2055_vm4, %v3896_v37, %v3897_v30  ;;  %v3900_v51 = vsel %vm2055_vm4, %v3897_v30, %v3899_v60  ;;  %v13200_v37 = vld [vmem:[#allocation97_spill] sm:$0xff]  ;;  %v13201_v30 = vld [vmem:[#allocation55_spill] sm:$0xff] }
 0x243   : > { %v3648_v13 = vpop.f32.mrf.mxu1  ;;  %v8721_v42 = vpop.f32.mrf.mxu0  ;;  %8964 = vmatmul.mubr.msk.f32.gmra.mxu0 %vm344_vm1, %v13127_v11  ;;  %v11657_v54 = vadd.f32 %v3898_v47, %v13198_v43  ;;  %v11660_v5 = vadd.f32 %v3900_v51, %v13199_v2  ;;  %v13202_v47 = vld [vmem:[#allocation32_spill] sm:$0xff] }
 0x244   : > { %v11663_v45 = vadd.f32 %v3346_v36, %v11393_v8  ;;  %v11666_v0 = vadd.f32 %v8721_v42, %v11435_v16  ;;  %8966 = vmatprep.mubr.msk.f32.mxu0 %vm344_vm1, %v13128_v50  ;;  %v11671_v13 = vadd.f32 %v3901_v35, %v13200_v37  ;;  %v3347_v11 = vsel %vm1488_vm3, %v3345_v6, %v3346_v36  ;;  %v13203_v42 = vld [vmem:[#allocation4_spill] sm:$0xff]  ;;  %v13204_v37 = vld [vmem:[#allocation6_spill] sm:$0xff] }
 0x245   : > { %v8668_v60 = vpop.f32.mrf.mxu1  ;;  %8911 = vmatmul.mubr.msk.f32.gmra.mxu1 %vm344_vm1, %v13201_v30  ;;  %v4370_v2 = vpop.f32.mrf.mxu0  ;;  %v11677_v51 = vadd.f32 %v3347_v11, %v13202_v47 }
 0x246   : > { %v3904_v8 = vrot.slane %v8668_v60, 2  ;;  %v11680_v16 = vadd.f32 %v4370_v2, %v11404_v61  ;;  %9013 = vmatprep.mubr.msk.f32.mxu1 %vm344_vm1, %v13203_v42  ;;  %v13205_v2 = vld [vmem:[#allocation8_spill] sm:$0xff] }
 0x247   : > { %v3657_v50 = vpop.f32.mrf.mxu1  ;;  %v8724_v43 = vpop.f32.mrf.mxu0  ;;  %8967 = vmatmul.mubr.msk.f32.gmra.mxu0 %vm344_vm1, %v13131_v49 }
 0x248   : > { %v3902_v6 = vrot.slane %v3657_v50, 2  ;;  %8969 = vmatprep.mubr.msk.f32.mxu0 %vm344_vm1, %v13135_v48  ;;  %v13206_v48 = vld [vmem:[#allocation57_spill] sm:$0xff] }
 0x249   : > { %v8671_v36 = vpop.f32.mrf.mxu1  ;;  %9014 = vmatmul.mubr.msk.f32.vlgmr.msra.gmra.mxu1 %vm344_vm1, %v13204_v37  ;;  %v4380_v11 = vpop.f32.mrf.mxu0  ;;  %v13207_v37 = vld [vmem:[#allocation43_spill] sm:$0xff] }
 0x24a   : > { %v3906_v60 = vrot.slane %v8671_v36, 2  ;;  %v11691_v61 = vadd.f32 %v4380_v11, %v11438_v41  ;;  %9016 = vmatprep.mubr.msk.f32.mxu1 %vm344_vm1, %v13205_v2  ;;  %v3903_v47 = vsel %vm2055_vm4, %v3901_v35, %v3902_v6  ;;  %v3905_v49 = vsel %vm2055_vm4, %v3902_v6, %v3904_v8  ;;  %v13208_v11 = vld [vmem:[#allocation45_spill] sm:$0xff]  ;;  %v13210_v6 = vld [vmem:[#allocation10_spill] sm:$0xff] }
 0x24b   : > { %v3667_v42 = vpop.f32.mrf.mxu1  ;;  %v8727_v50 = vpop.f32.mrf.mxu0  ;;  %8970 = vmatmul.mubr.msk.f32.gmra.mxu0 %vm344_vm1, %v13136_v63  ;;  %v11700_v43 = vadd.f32 %v3903_v47, %v13206_v48  ;;  %v11703_v36 = vadd.f32 %v3905_v49, %v13207_v37  ;;  %v13209_v35 = vld [vmem:[#allocation53_spill] sm:$0xff]  ;;  %v13211_v49 = vld [vmem:[#allocation12_spill] sm:$0xff] }
 0x24c   : > { %v11706_v41 = vadd.f32 %v8727_v50, %v11472_v22  ;;  %8972 = vmatprep.mubr.msk.f32.mxu0 %vm344_vm1, %v13208_v11  ;;  %v11711_v2 = vadd.f32 %v3906_v60, %v13209_v35  ;;  %v13212_v11 = vld [vmem:[#allocation16_spill] sm:$0xff] }
 0x24d   : > { %v8674_v8 = vpop.f32.mrf.mxu1  ;;  %9017 = vmatmul.mubr.msk.f32.gmra.mxu1 %vm344_vm1, %v13210_v6  ;;  %v4389_v63 = vpop.f32.mrf.mxu0  ;;  %v13213_v6 = vld [vmem:[#allocation19_spill] sm:$0xff] }
 0x24e   : > { %v3909_v42 = vrot.slane %v8674_v8, 2  ;;  %v11716_v47 = vadd.f32 %v4389_v63, %v11441_v55  ;;  %9019 = vmatprep.mubr.msk.f32.mxu1 %vm344_vm1, %v13211_v49 }
 0x24f   : > { %v3676_v22 = vpop.f32.mrf.mxu1  ;;  %v8730_v50 = vpop.f32.mrf.mxu0  ;;  %8973 = vmatmul.mubr.msk.f32.gmra.mxu0 %vm344_vm1, %v13142_v12 }
 0x250   : > { %v3907_v48 = vrot.slane %v3676_v22, 2  ;;  %8975 = vmatprep.mubr.msk.f32.mxu0 %vm344_vm1, %v13146_v53  ;;  %v13214_v53 = vld [vmem:[#allocation39_spill] sm:$0xff] }
 0x251   : > { %v8677_v37 = vpop.f32.mrf.mxu1  ;;  %9020 = vmatmul.mubr.msk.f32.gmra.mxu1 %vm344_vm1, %v13212_v11  ;;  %v4399_v35 = vpop.f32.mrf.mxu0  ;;  %v13215_v11 = vld [vmem:[#allocation47_spill] sm:$0xff] }
 0x252   : > { %v3911_v8 = vrot.slane %v8677_v37, 2  ;;  %v11727_v55 = vadd.f32 %v4399_v35, %v11475_v52  ;;  %9022 = vmatprep.mubr.msk.f32.mxu1 %vm344_vm1, %v13213_v6  ;;  %v3908_v63 = vsel %vm2055_vm4, %v3906_v60, %v3907_v48  ;;  %v3910_v12 = vsel %vm2055_vm4, %v3907_v48, %v3909_v42  ;;  %v13216_v35 = vld [vmem:[#allocation64_spill] sm:$0xff]  ;;  %v13217_v60 = vld [vmem:[#allocation42_spill] sm:$0xff]  ;;  %v13218_v48 = vld [vmem:[#allocation21_spill] sm:$0xff] }
 0x253   : > { %v3686_v49 = vpop.f32.mrf.mxu1  ;;  %v8733_v22 = vpop.f32.mrf.mxu0  ;;  %8976 = vmatmul.mubr.msk.f32.gmra.mxu0 %vm344_vm1, %v13147_v24  ;;  %v11736_v50 = vadd.f32 %v3908_v63, %v13214_v53  ;;  %v11739_v37 = vadd.f32 %v3910_v12, %v13215_v11  ;;  %v13219_v12 = vld [vmem:[#allocation24_spill] sm:$0xff] }
 0x254   : > { %v11742_v52 = vadd.f32 %v8733_v22, %v11509_v33  ;;  %8978 = vmatprep.mubr.msk.f32.mxu0 %vm344_vm1, %v13216_v35  ;;  %v11747_v6 = vadd.f32 %v3911_v8, %v13217_v60  ;;  %v13220_v35 = vld [vmem:[#allocation25_spill] sm:$0xff] }
 0x255   : > { %v8680_v42 = vpop.f32.mrf.mxu1  ;;  %9023 = vmatmul.mubr.msk.f32.gmra.mxu1 %vm344_vm1, %v13218_v48  ;;  %v4408_v24 = vpop.f32.mrf.mxu0  ;;  %v13221_v48 = vld [vmem:[#allocation26_spill] sm:$0xff] }
 0x256   : > { %v3914_v49 = vrot.slane %v8680_v42, 2  ;;  %v11752_v63 = vadd.f32 %v4408_v24, %v11478_v32  ;;  %9025 = vmatprep.mubr.msk.f32.mxu1 %vm344_vm1, %v13219_v12 }
 0x257   : > { %v3695_v33 = vpop.f32.mrf.mxu1  ;;  %v8736_v22 = vpop.f32.mrf.mxu0  ;;  %8979 = vmatmul.mubr.msk.f32.gmra.mxu0 %vm344_vm1, %v13153_v57 }
 0x258   : > { %v3912_v53 = vrot.slane %v3695_v33, 2  ;;  %8981 = vmatprep.mubr.msk.f32.mxu0 %vm344_vm1, %v13156_v27  ;;  %v13222_v27 = vld [vmem:[#allocation58_spill] sm:$0xff] }
 0x259   : > { %v8683_v11 = vpop.f32.mrf.mxu1  ;;  %9026 = vmatmul.mubr.msk.f32.gmra.mxu1 %vm344_vm1, %v13220_v35  ;;  %v4418_v60 = vpop.f32.mrf.mxu0  ;;  %v13223_v35 = vld [vmem:[#allocation44_spill] sm:$0xff] }
 0x25a   : > { %v3916_v42 = vrot.slane %v8683_v11, 2  ;;  %v11763_v32 = vadd.f32 %v4418_v60, %v11512_v44  ;;  %9028 = vmatprep.mubr.msk.f32.mxu1 %vm344_vm1, %v13221_v48  ;;  %v3913_v24 = vsel %vm2055_vm4, %v3911_v8, %v3912_v53  ;;  %v3915_v57 = vsel %vm2055_vm4, %v3912_v53, %v3914_v49  ;;  %v13224_v8 = vld [vmem:[#allocation48_spill] sm:$0xff]  ;;  %v13225_v53 = vld [vmem:[#allocation27_spill] sm:$0xff] }
 0x25b   : > { %v3705_v12 = vpop.f32.mrf.mxu1  ;;  %v8739_v33 = vpop.f32.mrf.mxu0  ;;  %8982 = vmatmul.mubr.msk.f32.gmra.mxu0 %vm344_vm1, %v13157_v38  ;;  %v11772_v22 = vadd.f32 %v3913_v24, %v13222_v27  ;;  %v11775_v11 = vadd.f32 %v3915_v57, %v13223_v35  ;;  %v13226_v57 = vld [vmem:[#allocation29_spill] sm:$0xff]  ;;  %v13227_v27 = vld [vmem:[#allocation30_spill] sm:$0xff] }
 0x25c   : > { %v11778_v44 = vadd.f32 %v8739_v33, %v11546_v9  ;;  %8984 = vmatprep.mubr.msk.f32.mxu0 %vm344_vm1, %v13158_v17  ;;  %v11783_v60 = vadd.f32 %v3916_v42, %v13224_v8 }
 0x25d   : > { %v8686_v49 = vpop.f32.mrf.mxu1  ;;  %9029 = vmatmul.mubr.msk.f32.gmra.mxu1 %vm344_vm1, %v13225_v53  ;;  %v4427_v38 = vpop.f32.mrf.mxu0 }
 0x25e   : > { %v3919_v48 = vrot.slane %v8686_v49, 2  ;;  %v11788_v24 = vadd.f32 %v4427_v38, %v11515_v10  ;;  %9031 = vmatprep.mubr.msk.f32.mxu1 %vm344_vm1, %v13226_v57  ;;  %v13228_v49 = vld [vmem:[#allocation31_spill] sm:$0xff] }
 0x25f   : > { %v3714_v9 = vpop.f32.mrf.mxu1  ;;  %v8742_v12 = vpop.f32.mrf.mxu0  ;;  %8985 = vmatmul.mubr.msk.f32.gmra.mxu0 %vm344_vm1, %v13161_v26 }
 0x260   : > { %v3917_v17 = vrot.slane %v3714_v9, 2  ;;  %8987 = vmatprep.mubr.msk.f32.mxu0 %vm344_vm1, %v13164_v7  ;;  %v13229_v9 = vld [vmem:[#allocation60_spill] sm:$0xff] }
 0x261   : > { %v8689_v33 = vpop.f32.mrf.mxu1  ;;  %9032 = vmatmul.mubr.msk.f32.gmra.mxu1 %vm344_vm1, %v13227_v27  ;;  %v4437_v35 = vpop.f32.mrf.mxu0 }
 0x262   : > { %v3921_v8 = vrot.slane %v8689_v33, 2  ;;  %v11799_v10 = vadd.f32 %v4437_v35, %v11549_v23  ;;  %9034 = vmatprep.mubr.msk.f32.mxu1 %vm344_vm1, %v13228_v49  ;;  %v3918_v53 = vsel %vm2055_vm4, %v3916_v42, %v3917_v17  ;;  %v3920_v26 = vsel %vm2055_vm4, %v3917_v17, %v3919_v48  ;;  %v13230_v42 = vld [vmem:[#allocation65_spill] sm:$0xff]  ;;  %v13232_v35 = vld [vmem:[#allocation35_spill] sm:$0xff] }
 0x263   : > { %v3724_v38 = vpop.f32.mrf.mxu1  ;;  %v8745_v57 = vpop.f32.mrf.mxu0  ;;  %8988 = vmatmul.mubr.msk.f32.gmra.mxu0 %vm344_vm1, %v13165_v3  ;;  %v11808_v7 = vadd.f32 %v3918_v53, %v11489_v46  ;;  %v11811_v12 = vadd.f32 %v3920_v26, %v13229_v9  ;;  %v13231_v17 = vld [vmem:[#allocation33_spill] sm:$0xff]  ;;  %v13233_v26 = vld [vmem:[#allocation36_spill] sm:$0xff] }
 0x264   : > { %v11814_v23 = vadd.f32 %v8745_v57, %v11583_v40  ;;  %8990 = vmatprep.mubr.msk.f32.mxu0 %vm344_vm1, %v11196_v15  ;;  %v11819_v33 = vadd.f32 %v3921_v8, %v13230_v42  ;;  %v13234_v9 = vld [vmem:[#allocation37_spill] sm:$0xff] }
 0x265   : > { %v8692_v48 = vpop.f32.mrf.mxu1  ;;  %9035 = vmatmul.mubr.msk.f32.gmra.mxu1 %vm344_vm1, %v13231_v17  ;;  %v4446_v3 = vpop.f32.mrf.mxu0 }
 0x266   : > { %v3924_v27 = vrot.slane %v8692_v48, 2  ;;  %v11824_v46 = vadd.f32 %v4446_v3, %v11557_v31  ;;  %9037 = vmatprep.mubr.msk.f32.mxu1 %vm344_vm1, %v13232_v35  ;;  %v13235_v3 = vld [vmem:[#allocation56_spill] sm:$0xff] }
 0x267   : > { %v3733_v40 = vpop.f32.mrf.mxu1  ;;  %v8748_v49 = vpop.f32.mrf.mxu0  ;;  %8991 = vmatmul.mubr.msk.f32.gmra.mxu0 %vm344_vm1, %v13169_v62 }
 0x268   : > { %v3922_v15 = vrot.slane %v3733_v40, 2  ;;  %8993 = vmatprep.mubr.msk.f32.mxu0 %vm344_vm1, %v13173_v19  ;;  %v13236_v40 = vld [vmem:[#allocation86_spill] sm:$0xff] }
 0x269   : > { %v8695_v53 = vpop.f32.mrf.mxu1  ;;  %9038 = vmatmul.mubr.msk.f32.gmra.mxu1 %vm344_vm1, %v13233_v26  ;;  %v4456_v38 = vpop.f32.mrf.mxu0  ;;  %v13239_v26 = vld [vmem:[#allocation40_spill] sm:$0xff] }
 0x26a   : > { %v3926_v57 = vrot.slane %v8695_v53, 2  ;;  %v11835_v31 = vadd.f32 %v4456_v38, %v11586_v25  ;;  %9040 = vmatprep.mubr.msk.f32.mxu1 %vm344_vm1, %v13234_v9  ;;  %v3923_v42 = vsel %vm2055_vm4, %v3921_v8, %v3922_v15  ;;  %v3925_v62 = vsel %vm2055_vm4, %v3922_v15, %v3924_v27  ;;  %v13237_v8 = vld [vmem:[#allocation63_spill] sm:$0xff]  ;;  %v13238_v15 = vld [vmem:[#allocation38_spill] sm:$0xff] }
 0x26b   : > { %v3743_v48 = vpop.f32.mrf.mxu1  ;;  %v8751_v17 = vpop.f32.mrf.mxu0  ;;  %8994 = vmatmul.mubr.msk.f32.gmra.mxu0 %vm344_vm1, %v13174_v39  ;;  %v11844_v19 = vadd.f32 %v3923_v42, %v11526_v28  ;;  %v11847_v35 = vadd.f32 %v3925_v62, %v13235_v3  ;;  %v13240_v62 = vld [vmem:[#allocation41_spill] sm:$0xff]  ;;  %v13242_v3 = vld [vmem:[#allocation3_spill] sm:$0xff] }
 0x26c   : > { %v11850_v25 = vadd.f32 %v8751_v17, %v11620_v59  ;;  %8996 = vmatprep.mubr.msk.f32.mxu0 %vm344_vm1, %v13236_v40  ;;  %v11855_v49 = vadd.f32 %v3926_v57, %v13237_v8 }
 0x26d   : > { %v8698_v27 = vpop.f32.mrf.mxu1  ;;  %9041 = vmatmul.mubr.msk.f32.gmra.mxu1 %vm344_vm1, %v13238_v15  ;;  %v4465_v39 = vpop.f32.mrf.mxu0  ;;  %v13243_v15 = vld [vmem:[#allocation82_spill] sm:$0xff] }
 0x26e   : > { %v3929_v53 = vrot.slane %v8698_v27, 2  ;;  %v11860_v28 = vadd.f32 %v4465_v39, %v11594_v4  ;;  %9043 = vmatprep.mubr.msk.f32.mxu1 %vm344_vm1, %v13239_v26  ;;  %v13245_v26 = vld [vmem:[#allocation59_spill] sm:$0xff] }
 0x26f   : > { %v3752_v59 = vpop.f32.mrf.mxu1  ;;  %v8754_v38 = vpop.f32.mrf.mxu0  ;;  %8997 = vmatmul.mubr.msk.f32.gmra.mxu0 %vm344_vm1, %v13181_v1 }
 0x270   : > { %v3927_v9 = vrot.slane %v3752_v59, 2  ;;  %8999 = vmatprep.mubr.msk.f32.mxu0 %vm344_vm1, %v13185_v20  ;;  %v13244_v20 = vld [vmem:[#allocation13_spill] sm:$0xff] }
 0x271   : > { %v8701_v42 = vpop.f32.mrf.mxu1  ;;  %9044 = vmatmul.mubr.msk.f32.gmra.mxu1 %vm344_vm1, %v13240_v62  ;;  %v4475_v48 = vpop.f32.mrf.mxu0 }
 0x272   : > { %v3931_v17 = vrot.slane %v8701_v42, 2  ;;  %v11871_v4 = vadd.f32 %v4475_v48, %v11623_v56  ;;  %9046 = vmatprep.mubr.msk.f32.mxu1 %vm344_vm1, %v13242_v3  ;;  %v3928_v40 = vsel %vm2055_vm4, %v3926_v57, %v3927_v9  ;;  %v3930_v1 = vsel %vm2055_vm4, %v3927_v9, %v3929_v53  ;;  %v13246_v57 = vld [vmem:[#allocation66_spill] sm:$0xff]  ;;  %v13247_v9 = vld [vmem:[#allocation5_spill] sm:$0xff]  ;;  %v13248_v3 = vld [vmem:[#allocation7_spill] sm:$0xff] }
 0x273   : > { %v3762_v8 = vpop.f32.mrf.mxu1  ;;  %v8757_v27 = vpop.f32.mrf.mxu0  ;;  %9000 = vmatmul.mubr.msk.f32.gmra.mxu0 %vm344_vm1, %v13243_v15  ;;  %v11880_v39 = vadd.f32 %v3928_v40, %v13244_v20  ;;  %v11883_v59 = vadd.f32 %v3930_v1, %v13245_v26  ;;  %v13251_v20 = vld [vmem:[#allocation11_spill] sm:$0xff] }
 0x274   : > { %13241 = vst [vmem:[#allocation61_spill] sm:$0xff] %v11871_v4  ;;  %v11886_v56 = vadd.f32 %v8757_v27, %v11657_v54  ;;  %9002 = vmatprep.mubr.msk.f32.mxu0 %vm344_vm1, %v13187_v18  ;;  %v11891_v38 = vadd.f32 %v3931_v17, %v13246_v57  ;;  %v13249_v8 = vld [vmem:[#allocation9_spill] sm:$0xff] }
 0x275   : > { %v8704_v53 = vpop.f32.mrf.mxu1  ;;  %9047 = vmatmul.mubr.msk.f32.gmra.mxu1 %vm344_vm1, %v13247_v9  ;;  %v4484_v42 = vpop.f32.mrf.mxu0 }
 0x276   : > { %v3934_v62 = vrot.slane %v8704_v53, 2  ;;  %v11896_v48 = vadd.f32 %v4484_v42, %v11631_v58  ;;  %9049 = vmatprep.mubr.msk.f32.mxu1 %vm344_vm1, %v13248_v3  ;;  %v13253_v42 = vld [vmem:[#allocation14_spill] sm:$0xff] }
 0x277   : > { %v3771_v54 = vpop.f32.mrf.mxu1  ;;  %v8760_v40 = vpop.f32.mrf.mxu0  ;;  %9003 = vmatmul.mubr.msk.f32.gmra.mxu0 %vm344_vm1, %v13192_v21 }
 0x278   : > { %v3932_v18 = vrot.slane %v3771_v54, 2  ;;  %9005 = vmatprep.mubr.msk.f32.mxu0 %vm344_vm1, %v13196_v14  ;;  %v13252_v14 = vld [vmem:[#allocation70_spill] sm:$0xff]  ;;  %v13255_v40 = vld [vmem:[#allocation15_spill] sm:$0xff] }
 0x279   : > { %v8707_v1 = vpop.f32.mrf.mxu1  ;;  %9050 = vmatmul.mubr.msk.f32.gmra.mxu1 %vm344_vm1, %v13249_v8  ;;  %v4494_v27 = vpop.f32.mrf.mxu0  ;;  %v13256_v8 = vld [vmem:[#allocation17_spill] sm:$0xff] }
 0x27a   : > { %v3936_v15 = vrot.slane %v8707_v1, 2  ;;  %v11907_v58 = vadd.f32 %v4494_v27, %v11660_v5  ;;  %9052 = vmatprep.mubr.msk.f32.mxu1 %vm344_vm1, %v13251_v20  ;;  %v3933_v26 = vsel %vm2055_vm4, %v3931_v17, %v3932_v18  ;;  %v3935_v21 = vsel %vm2055_vm4, %v3932_v18, %v3934_v62  ;;  %v13254_v17 = vld [vmem:[#allocation62_spill] sm:$0xff] }
 0x27b   : > { %v3781_v57 = vpop.f32.mrf.mxu1  ;;  %v8763_v53 = vpop.f32.mrf.mxu0  ;;  %9006 = vmatmul.mubr.msk.f32.gmra.mxu0 %vm344_vm1, %v13197_v34  ;;  %v11916_v9 = vadd.f32 %v3933_v26, %v13252_v14  ;;  %v11919_v3 = vadd.f32 %v3935_v21, %v13253_v42  ;;  %v13257_v26 = vld [vmem:[#allocation20_spill] sm:$0xff] }
 0x27c   : > { %13250 = vst [vmem:[#allocation68_spill] sm:$0xff] %v11907_v58  ;;  %v11922_v5 = vadd.f32 %v8763_v53, %v11700_v43  ;;  %9008 = vmatprep.mubr.msk.f32.mxu0 %vm344_vm1, %v11325_v29  ;;  %v11927_v54 = vadd.f32 %v3936_v15, %v13254_v17 }
 0x27d   : > { %v8710_v62 = vpop.f32.mrf.mxu1  ;;  %9053 = vmatmul.mubr.msk.f32.gmra.mxu1 %vm344_vm1, %v13255_v40  ;;  %v4503_v34 = vpop.f32.mrf.mxu0 }
 0x27e   : > { %v3939_v18 = vrot.slane %v8710_v62, 2  ;;  %v11932_v1 = vadd.f32 %v4503_v34, %v11671_v13  ;;  %9055 = vmatprep.mubr.msk.f32.mxu1 %vm344_vm1, %v13256_v8  ;;  %v13259_v13 = vld [vmem:[#allocation49_spill] sm:$0xff]  ;;  %v13261_v34 = vld [vmem:[#allocation18_spill] sm:$0xff] }
 0x27f   : > { %v3790_v43 = vpop.f32.mrf.mxu1  ;;  %v8766_v27 = vpop.f32.mrf.mxu0  ;;  %9009 = vmatmul.mubr.msk.f32.gmra.mxu0 %vm344_vm1, %v13201_v30  ;;  %v13260_v30 = vld [vmem:[#allocation71_spill] sm:$0xff] }
 0x280   : > { %v3937_v29 = vrot.slane %v3790_v43, 2 }
 0x281   : > { %v8713_v20 = vpop.f32.mrf.mxu1  ;;  %9056 = vmatmul.mubr.msk.f32.gmra.mxu1 %vm344_vm1, %v13257_v26  ;;  %v4513_v21 = vpop.f32.mrf.mxu0  ;;  %v13263_v26 = vld [vmem:[#allocation50_spill] sm:$0xff] }
 0x282   : > { %v3941_v57 = vrot.slane %v8713_v20, 2  ;;  %v11941_v53 = vadd.f32 %v4513_v21, %v11703_v36  ;;  %9058 = vmatprep.mubr.msk.f32.mxu1 %vm344_vm1, %v13259_v13  ;;  %v3938_v14 = vsel %vm2055_vm4, %v3936_v15, %v3937_v29  ;;  %v3940_v42 = vsel %vm2055_vm4, %v3937_v29, %v3939_v18  ;;  %v13262_v36 = vld [vmem:[#allocation67_spill] sm:$0xff] }
 0x283   : > { %v3800_v17 = vpop.f32.mrf.mxu1  ;;  %v8769_v62 = vpop.f32.mrf.mxu0  ;;  %v11948_v40 = vadd.f32 %v3938_v14, %v13260_v30  ;;  %v11951_v8 = vadd.f32 %v3940_v42, %v13261_v34 }
 0x284   : > { %13258 = vst [vmem:[#allocation72_spill] sm:$0xff] %v11941_v53  ;;  %v11954_v43 = vadd.f32 %v8769_v62, %v11736_v50  ;;  %v11957_v27 = vadd.f32 %v3941_v57, %v13262_v36 }
 0x285   : > { %v8716_v20 = vpop.f32.mrf.mxu1  ;;  %9059 = vmatmul.mubr.msk.f32.gmra.mxu1 %vm344_vm1, %v13263_v26  ;;  %v4522_v15 = vpop.f32.mrf.mxu0 }
 0x286   : > { %v3944_v18 = vrot.slane %v8716_v20, 2  ;;  %v11962_v29 = vadd.f32 %v4522_v15, %v11711_v2 }
 0x287   : > { %v3809_v21 = vpop.f32.mrf.mxu1  ;;  %v8772_v13 = vpop.f32.mrf.mxu0 }
 0x288   : > { %v3942_v14 = vrot.slane %v3809_v21, 2 }
 0x289   : > { %v11964_v42 = vpop.f32.mrf.mxu1  ;;  %v4532_v17 = vpop.f32.mrf.mxu0 }
 0x28a   : > { %v11967_v50 = vadd.f32 %v4532_v17, %v11739_v37  ;;  %v3943_v62 = vsel %vm2055_vm4, %v3941_v57, %v3942_v14  ;;  %v3945_v30 = vsel %vm2055_vm4, %v3942_v14, %v3944_v18 }
 0x28b   : > { %v4792_v34 = vpop.f32.mrf.mxu1  ;;  %v8775_v36 = vpop.f32.mrf.mxu0  ;;  %v11972_v20 = vadd.f32 %v3943_v62, %v11677_v51  ;;  %v11975_v2 = vadd.f32 %v3945_v30, %v11663_v45 }
 0x28c   : > { %13264 = vst [vmem:[#allocation22_spill] sm:$0xff] %v11967_v50  ;;  %v11978_v26 = vadd.f32 %v8775_v36, %v11772_v22 }
 0x28d   : > { %v8822_v15 = vpop.f32.mrf.mxu1  ;;  %v4541_v21 = vpop.f32.mrf.mxu0 }
 0x28e   : > { %v11981_v37 = vadd.f32 %v4541_v21, %v11747_v6 }
 0x28f   : > { %v11983_v13 = vpop.f32.mrf.mxu1  ;;  %v8778_v57 = vpop.f32.mrf.mxu0 }
 0x291   : > { %v8825_v18 = vpop.f32.mrf.mxu1  ;;  %v4551_v14 = vpop.f32.mrf.mxu0 }
 0x292   : > { %v5114_v17 = vrot.slane %v8825_v18, 1  ;;  %v11986_v51 = vadd.f32 %v4551_v14, %v11775_v11 }
 0x293   : > { %v4810_v62 = vpop.f32.mrf.mxu1  ;;  %v8781_v45 = vpop.f32.mrf.mxu0 }
 0x294   : > { %13265 = vst [vmem:[#allocation73_spill] sm:$0xff] %v11986_v51  ;;  %v11989_v30 = vadd.f32 %v5114_v17, %v11716_v47  ;;  %v11992_v22 = vadd.f32 %v8781_v45, %v11808_v7 }
 0x295   : > { %v8828_v34 = vpop.f32.mrf.mxu1  ;;  %v4560_v6 = vpop.f32.mrf.mxu0 }
 0x296   : > { %v11995_v36 = vadd.f32 %v4560_v6, %v11783_v60 }
 0x297   : > { %v11997_v15 = vpop.f32.mrf.mxu1  ;;  %v8784_v21 = vpop.f32.mrf.mxu0 }
 0x298   : > { %v12854_v57 = vrot.slane %v11997_v15, 1 }
 0x299   : > { %v12000_v11 = vpop.f32.mrf.mxu1  ;;  %v4570_v18 = vpop.f32.mrf.mxu0 }
 0x29a   : > { %v5116_v47 = vsel %vm1488_vm3, %v5114_v17, %v12854_v57  ;;  %v12006_v7 = vadd.f32 %v4570_v18, %v11811_v12 }
 0x29b   : > { %v12009_v14 = vadd.f32 %v5116_v47, %v11706_v41  ;;  %v4828_v60 = vpop.f32.mrf.mxu1  ;;  %v8787_v62 = vpop.f32.mrf.mxu0 }
 0x29c   : > { %v12012_v45 = vadd.f32 %v8787_v62, %v11844_v19 }
 0x29d   : > { %v8834_v34 = vpop.f32.mrf.mxu1  ;;  %v4579_v6 = vpop.f32.mrf.mxu0 }
 0x29e   : > { %v12015_v21 = vadd.f32 %v4579_v6, %v11819_v33 }
 0x29f   : > { %v12017_v51 = vpop.f32.mrf.mxu1  ;;  %v8790_v50 = vpop.f32.mrf.mxu0 }
 0x2a1   : > { %v8837_v17 = vpop.f32.mrf.mxu1  ;;  %v4589_v57 = vpop.f32.mrf.mxu0 }
 0x2a2   : > { %v5120_v12 = vrot.slane %v8837_v17, 1  ;;  %v12020_v18 = vadd.f32 %v4589_v57, %v11847_v35 }
 0x2a3   : > { %v4846_v41 = vpop.f32.mrf.mxu1  ;;  %v8793_v47 = vpop.f32.mrf.mxu0 }
 0x2a4   : > { %v12023_v60 = vadd.f32 %v5120_v12, %v11788_v24  ;;  %v12026_v19 = vadd.f32 %v8793_v47, %v11880_v39 }
 0x2a5   : > { %v8840_v62 = vpop.f32.mrf.mxu1  ;;  %v4598_v33 = vpop.f32.mrf.mxu0 }
 0x2a6   : > { %v12029_v34 = vadd.f32 %v4598_v33, %v11855_v49 }
 0x2a7   : > { %v12031_v50 = vpop.f32.mrf.mxu1  ;;  %v8796_v6 = vpop.f32.mrf.mxu0 }
 0x2a8   : > { %v12855_v17 = vrot.slane %v12031_v50, 1 }
 0x2a9   : > { %v8843_v35 = vpop.f32.mrf.mxu1  ;;  %v4608_v57 = vpop.f32.mrf.mxu0 }
 0x2aa   : > { %v5122_v24 = vsel %vm1488_vm3, %v5120_v12, %v12855_v17  ;;  %v5123_v41 = vrot.slane %v8843_v35, 1  ;;  %v12038_v39 = vadd.f32 %v4608_v57, %v11883_v59 }
 0x2ab   : > { %v12041_v47 = vadd.f32 %v5122_v24, %v11778_v44  ;;  %v4864_v49 = vpop.f32.mrf.mxu1  ;;  %v8799_v62 = vpop.f32.mrf.mxu0 }
 0x2ac   : > { %v12044_v33 = vadd.f32 %v5123_v41, %v11824_v46  ;;  %v12047_v6 = vadd.f32 %v8799_v62, %v11916_v9 }
 0x2ad   : > { %v8846_v53 = vpop.f32.mrf.mxu1  ;;  %v4617_v58 = vpop.f32.mrf.mxu0 }
 0x2ae   : > { %13266 = vst [vmem:[#allocation69_spill] sm:$0xff] %v12047_v6  ;;  %v12050_v4 = vadd.f32 %v4617_v58, %v11891_v38 }
 0x2af   : > { %v12052_v12 = vpop.f32.mrf.mxu1  ;;  %v8802_v59 = vpop.f32.mrf.mxu0 }
 0x2b0   : > { %v12856_v35 = vrot.slane %v12052_v12, 1 }
 0x2b1   : > { %v8849_v44 = vpop.f32.mrf.mxu1  ;;  %v4627_v57 = vpop.f32.mrf.mxu0 }
 0x2b2   : > { %v5125_v46 = vsel %vm1488_vm3, %v5123_v41, %v12856_v35  ;;  %v5126_v24 = vrot.slane %v8849_v44, 1  ;;  %v12059_v9 = vadd.f32 %v4627_v57, %v11919_v3 }
 0x2b3   : > { %v12062_v53 = vadd.f32 %v5125_v46, %v11814_v23  ;;  %v4882_v38 = vpop.f32.mrf.mxu1  ;;  %v8805_v58 = vpop.f32.mrf.mxu0 }
 0x2b4   : > { %v12065_v49 = vadd.f32 %v5126_v24, %v11860_v28  ;;  %v12068_v62 = vadd.f32 %v8805_v58, %v11948_v40 }
 0x2b5   : > { %v8852_v59 = vpop.f32.mrf.mxu1  ;;  %v4636_v17 = vpop.f32.mrf.mxu0 }
 0x2b6   : > { %13267 = vst [vmem:[#allocation74_spill] sm:$0xff] %v12068_v62  ;;  %v12071_v6 = vadd.f32 %v4636_v17, %v11927_v54 }
 0x2b7   : > { %v12073_v41 = vpop.f32.mrf.mxu1  ;;  %v8808_v3 = vpop.f32.mrf.mxu0 }
 0x2b8   : > { %v12857_v44 = vrot.slane %v12073_v41, 1 }
 0x2b9   : > { %v8855_v23 = vpop.f32.mrf.mxu1  ;;  %v4646_v57 = vpop.f32.mrf.mxu0 }
 0x2ba   : > { %v5128_v28 = vsel %vm1488_vm3, %v5126_v24, %v12857_v44  ;;  %v5129_v46 = vrot.slane %v8855_v23, 1  ;;  %v12080_v40 = vadd.f32 %v4646_v57, %v11951_v8 }
 0x2bb   : > { %v12083_v38 = vadd.f32 %v5128_v28, %v11850_v25  ;;  %v4900_v54 = vpop.f32.mrf.mxu1  ;;  %v8811_v17 = vpop.f32.mrf.mxu0 }
 0x2bc   : > { %13268 = vst [vmem:[#allocation77_spill] sm:$0xff] %v12080_v40  ;;  %v12086_v58 = vadd.f32 %v5129_v46, %v11896_v48  ;;  %v12089_v59 = vadd.f32 %v8811_v17, %v11972_v20  ;;  %v5112_v17 = vrot.slane %v11983_v13, 1 }
 0x2bd   : > { %v8858_v3 = vpop.f32.mrf.mxu1  ;;  %v4655_v35 = vpop.f32.mrf.mxu0 }
 0x2be   : > { %13269 = vst [vmem:[#allocation78_spill] sm:$0xff] %v12089_v59  ;;  %v12092_v62 = vadd.f32 %v4655_v35, %v11957_v27 }
 0x2bf   : > { %v12094_v24 = vpop.f32.mrf.mxu1  ;;  %v8814_v8 = vpop.f32.mrf.mxu0 }
 0x2c0   : > { %13270 = vst [vmem:[#allocation75_spill] sm:$0xff] %v12092_v62  ;;  %v12858_v23 = vrot.slane %v12094_v24, 1  ;;  %v5111_v8 = vrot.slane %v11964_v42, 1 }
 0x2c1   : > { %v8861_v25 = vpop.f32.mrf.mxu1  ;;  %v4665_v57 = vpop.f32.mrf.mxu0 }
 0x2c2   : > { %v5131_v48 = vsel %vm1488_vm3, %v5129_v46, %v12858_v23  ;;  %v5132_v28 = vrot.slane %v8861_v25, 1  ;;  %v12101_v20 = vadd.f32 %v4665_v57, %v11975_v2  ;;  %v5113_v2 = vsel %vm1488_vm3, %v5111_v8, %v5112_v17 }
 0x2c3   : > { %v12104_v54 = vadd.f32 %v5131_v48, %v11886_v56  ;;  %v4918_v27 = vpop.f32.mrf.mxu1  ;;  %v8917_v35 = vpop.f32.mrf.mxu0  ;;  %v5207_v57 = vadd.f32 %v5111_v8, %v11680_v16 }
 0x2c4   : > { %13271 = vst [vmem:[#allocation76_spill] sm:$0xff] %v12101_v20  ;;  %v12108_v3 = vadd.f32 %v5132_v28, %v11932_v1  ;;  %v5677_v62 = vrot.slane %v8917_v35, 2  ;;  %v5209_v35 = vadd.f32 %v5112_v17, %v11691_v61 }
 0x2c5   : > { %v8864_v44 = vpop.f32.mrf.mxu1  ;;  %v5326_v59 = vpop.f32.mrf.mxu0 }
 0x2c6   : > { %13272 = vst [vmem:[#allocation80_spill] sm:$0xff] %v12108_v3  ;;  %v5208_v59 = vadd.f32 %v5113_v2, %v11666_v0  ;;  %v5805_v23 = vadd.f32 %v5677_v62, %v5207_v57 }
 0x2c7   : > { %v12111_v46 = vpop.f32.mrf.mxu1  ;;  %v8920_v25 = vpop.f32.mrf.mxu0 }
 0x2c8   : > { %v12859_v56 = vrot.slane %v12111_v46, 1  ;;  %v5680_v13 = vrot.slane %v8920_v25, 2  ;;  %v5902_v0 = vrot.slane %v5805_v23, 7  ;;  %v5118_v23 = vrot.slane %v12017_v51, 1 }
 0x2c9   : > { %v8867_v48 = vpop.f32.mrf.mxu1  ;;  %v5335_v27 = vpop.f32.mrf.mxu0 }
 0x2ca   : > { %v5134_v1 = vsel %vm1488_vm3, %v5132_v28, %v12859_v56  ;;  %v5135_v42 = vrot.slane %v8867_v48, 1  ;;  %v5678_v44 = vrot.slane %v5335_v27, 2 }
 0x2cb   : > { %v12122_v20 = vadd.f32 %v5134_v1, %v11922_v5  ;;  %v4936_v3 = vpop.f32.mrf.mxu1  ;;  %v8923_v16 = vpop.f32.mrf.mxu0 }
 0x2cc   : > { %v12125_v8 = vadd.f32 %v5135_v42, %v11962_v29  ;;  %v5679_v40 = vsel %vm2055_vm4, %v5677_v62, %v5678_v44  ;;  %v5681_v28 = vsel %vm2055_vm4, %v5678_v44, %v5680_v13 }
 0x2cd   : > { %v5806_v25 = vadd.f32 %v5679_v40, %v5208_v59  ;;  %v5807_v48 = vadd.f32 %v5681_v28, %v5209_v35  ;;  %v8870_v27 = vpop.f32.mrf.mxu1  ;;  %v5345_v56 = vpop.f32.mrf.mxu0  ;;  %v5117_v40 = vrot.slane %v12000_v11, 1 }
 0x2ce   : > { %v5682_v56 = vrot.slane %v8923_v16, 2 }
 0x2cf   : > { %v5903_v61 = vrot.slane %v5806_v25, 7  ;;  %v5905_v5 = vrot.slane %v5807_v48, 7  ;;  %v12136_v29 = vpop.f32.mrf.mxu1  ;;  %v8926_v62 = vpop.f32.mrf.mxu0 }
 0x2d0   : > { %v5136_v17 = vrot.slane %v12136_v29, 1  ;;  %v5685_v28 = vrot.slane %v8926_v62, 2 }
 0x2d1   : > { %v5904_v3 = vsel %vm5901_vm5, %v5902_v0, %v5903_v61  ;;  %v5906_v2 = vsel %vm5901_vm5, %v5903_v61, %v5905_v5  ;;  %v8873_v57 = vpop.f32.mrf.mxu1  ;;  %v5354_v1 = vpop.f32.mrf.mxu0 }
 0x2d2   : > { %6340 = vst.msk [vmem:[%s12134_s8] sm:$0xff] %vm6339_vm6, %v5904_v3  ;;  %6341 = vst.msk [vmem:[%s12134_s8 + $0x8] sm:$0xff] %vm6339_vm6, %v5906_v2  ;;  %v6372_v13 = vsel %vm6339_vm6, %v5904_v3, 0.0  ;;  %v6373_v44 = vsel %vm6339_vm6, %v5906_v2, 0.0  ;;  %v6443_v11 = vmul.f32 %v5904_v3, %v5904_v3  ;;  %v6444_v59 = vmul.f32 %v5906_v2, %v5906_v2 }
 0x2d3   : > { %v6374_v35 = vadd.f32 %v6373_v44, %v6372_v13  ;;  %v5137_v51 = vsel %vm1488_vm3, %v5135_v42, %v5136_v17  ;;  %v5138_v25 = vrot.slane %v8873_v57, 1  ;;  %v4954_v16 = vpop.f32.mrf.mxu1  ;;  %v8929_v48 = vpop.f32.mrf.mxu0  ;;  %v5683_v5 = vrot.slane %v5354_v1, 2 }
 0x2d4   : > { %v6475_v27 = vsel %vm6339_vm6, %v6443_v11, 0.0  ;;  %v6476_v0 = vsel %vm6339_vm6, %v6444_v59, 0.0  ;;  %v12155_v61 = vadd.f32 %v5137_v51, %v11954_v43  ;;  %v13273_v3 = vrot.slane %v11997_v15, 1 }
 0x2d5   : > { %v6477_v13 = vadd.f32 %v6476_v0, %v6475_v27  ;;  %v5808_v44 = vadd.f32 %v5682_v56, %v11989_v30  ;;  %v12162_v42 = vadd.f32 %v5138_v25, %v11981_v37  ;;  %v8876_v62 = vpop.f32.mrf.mxu1  ;;  %v5364_v57 = vpop.f32.mrf.mxu0  ;;  %v5684_v11 = vsel %vm2055_vm4, %v5682_v56, %v5683_v5 }
 0x2d6   : > { %v5212_v2 = vadd.f32 %v13273_v3, %v11727_v55  ;;  %v5686_v59 = vsel %vm2055_vm4, %v5683_v5, %v5685_v28  ;;  %v5687_v16 = vrot.slane %v8929_v48, 2  ;;  %v5809_v43 = vadd.f32 %v5684_v11, %v12009_v14 }
 0x2d7   : > { %v12167_v51 = vpop.f32.mrf.mxu1  ;;  %v8932_v15 = vpop.f32.mrf.mxu0  ;;  %v5213_v55 = vadd.f32 %v5117_v40, %v11752_v63  ;;  %v5119_v30 = vsel %vm1488_vm3, %v5117_v40, %v5118_v23  ;;  %v5215_v27 = vadd.f32 %v5118_v23, %v11763_v32  ;;  %v5907_v0 = vrot.slane %v5808_v44, 7 }
 0x2d8   : > { %v5810_v1 = vadd.f32 %v5686_v59, %v5212_v2  ;;  %v5139_v37 = vrot.slane %v12167_v51, 1  ;;  %v5908_v56 = vrot.slane %v5809_v43, 7  ;;  %v5690_v23 = vrot.slane %v8932_v15, 2 }
 0x2d9   : > { %v8879_v48 = vpop.f32.mrf.mxu1  ;;  %v5373_v5 = vpop.f32.mrf.mxu0  ;;  %v5811_v14 = vadd.f32 %v5687_v16, %v5213_v55  ;;  %v5214_v11 = vadd.f32 %v5119_v30, %v11742_v52 }
 0x2da   : > { %v5910_v28 = vrot.slane %v5810_v1, 7  ;;  %v5140_v3 = vsel %vm1488_vm3, %v5138_v25, %v5139_v37  ;;  %v5141_v2 = vrot.slane %v8879_v48, 1  ;;  %v5688_v63 = vrot.slane %v5373_v5, 2 }
 0x2db   : > { %v5909_v40 = vsel %vm5901_vm5, %v5907_v0, %v5908_v56  ;;  %v12179_v32 = vadd.f32 %v5140_v3, %v11978_v26  ;;  %v4972_v44 = vpop.f32.mrf.mxu1  ;;  %v8935_v57 = vpop.f32.mrf.mxu0 }
 0x2dc   : > { %v5911_v62 = vsel %vm5901_vm5, %v5908_v56, %v5910_v28  ;;  %6342 = vst.msk [vmem:[%s12134_s8 + $0x10] sm:$0xff] %vm6339_vm6, %v5909_v40  ;;  %v6375_v25 = vsel %vm6339_vm6, %v5909_v40, 0.0  ;;  %v6445_v59 = vmul.f32 %v5909_v40, %v5909_v40  ;;  %v12188_v55 = vadd.f32 %v5141_v2, %v11995_v36 }
 0x2dd   : > { %6343 = vst.msk [vmem:[%s12134_s8 + $0x18] sm:$0xff] %vm6339_vm6, %v5911_v62  ;;  %v6446_v43 = vmul.f32 %v5911_v62, %v5911_v62  ;;  %v6376_v1 = vadd.f32 %v6375_v25, %v6374_v35  ;;  %v5689_v26 = vsel %vm2055_vm4, %v5687_v16, %v5688_v63  ;;  %v5691_v15 = vsel %vm2055_vm4, %v5688_v63, %v5690_v23  ;;  %v8882_v0 = vpop.f32.mrf.mxu1  ;;  %v5383_v56 = vpop.f32.mrf.mxu0 }
 0x2de   : > { %v6377_v52 = vsel %vm6339_vm6, %v5911_v62, 0.0  ;;  %v6478_v30 = vsel %vm6339_vm6, %v6445_v59, 0.0  ;;  %v5812_v28 = vadd.f32 %v5689_v26, %v5214_v11  ;;  %v5813_v48 = vadd.f32 %v5691_v15, %v5215_v27 }
 0x2df   : > { %v6378_v5 = vadd.f32 %v6377_v52, %v6376_v1  ;;  %v6479_v3 = vadd.f32 %v6478_v30, %v6477_v13  ;;  %v5912_v40 = vrot.slane %v5811_v14, 7  ;;  %v4981_v35 = vpop.f32.mrf.mxu1  ;;  %v8938_v36 = vpop.f32.mrf.mxu0  ;;  %v6480_v44 = vsel %vm6339_vm6, %v6446_v43, 0.0 }
 0x2e0   : > { %v5913_v16 = vrot.slane %v5812_v28, 7  ;;  %v5915_v25 = vrot.slane %v5813_v48, 7  ;;  %v5142_v63 = vrot.slane %v4981_v35, 1  ;;  %v5692_v0 = vrot.slane %v8935_v57, 2 }
 0x2e1   : > { %v6481_v23 = vadd.f32 %v6480_v44, %v6479_v3  ;;  %v8885_v56 = vpop.f32.mrf.mxu1  ;;  %v5392_v62 = vpop.f32.mrf.mxu0  ;;  %v5695_v30 = vrot.slane %v8938_v36, 2  ;;  %v13274_v44 = vrot.slane %v12031_v50, 1 }
 0x2e2   : > { %v5914_v59 = vsel %vm5901_vm5, %v5912_v40, %v5913_v16  ;;  %v5916_v27 = vsel %vm5901_vm5, %v5913_v16, %v5915_v25  ;;  %v5143_v13 = vsel %vm1488_vm3, %v5141_v2, %v5142_v63  ;;  %v12199_v14 = vadd.f32 %v5142_v63, %v12006_v7 }
 0x2e3   : > { %6344 = vst.msk [vmem:[%s12134_s8 + $0x20] sm:$0xff] %vm6339_vm6, %v5914_v59  ;;  %6345 = vst.msk [vmem:[%s12134_s8 + $0x28] sm:$0xff] %vm6339_vm6, %v5916_v27  ;;  %v6379_v11 = vsel %vm6339_vm6, %v5914_v59, 0.0  ;;  %v6447_v43 = vmul.f32 %v5914_v59, %v5914_v59  ;;  %v6448_v1 = vmul.f32 %v5916_v27, %v5916_v27  ;;  %v4990_v57 = vpop.f32.mrf.mxu1  ;;  %v8941_v26 = vpop.f32.mrf.mxu0  ;;  %v12207_v52 = vadd.f32 %v5143_v13, %v11992_v22 }
 0x2e4   : > { %v6380_v15 = vadd.f32 %v6379_v11, %v6378_v5  ;;  %v5144_v28 = vrot.slane %v8885_v56, 1  ;;  %v6381_v2 = vsel %vm6339_vm6, %v5916_v27, 0.0  ;;  %v5814_v48 = vadd.f32 %v5692_v0, %v12023_v60 }
 0x2e5   : > { %v6482_v7 = vsel %vm6339_vm6, %v6447_v43, 0.0  ;;  %v5693_v3 = vrot.slane %v5392_v62, 2  ;;  %v8888_v40 = vpop.f32.mrf.mxu1  ;;  %v5402_v35 = vpop.f32.mrf.mxu0  ;;  %v5218_v16 = vadd.f32 %v13274_v44, %v11799_v10  ;;  %v6484_v36 = vsel %vm6339_vm6, %v6448_v1, 0.0 }
 0x2e6   : > { %v6382_v25 = vadd.f32 %v6381_v2, %v6380_v15  ;;  %v6483_v5 = vadd.f32 %v6482_v7, %v6481_v23  ;;  %v12216_v22 = vadd.f32 %v5144_v28, %v12015_v21  ;;  %v5917_v50 = vrot.slane %v5814_v48, 7 }
 0x2e7   : > { %v5694_v63 = vsel %vm2055_vm4, %v5692_v0, %v5693_v3  ;;  %v5696_v56 = vsel %vm2055_vm4, %v5693_v3, %v5695_v30  ;;  %v4999_v59 = vpop.f32.mrf.mxu1  ;;  %v8944_v60 = vpop.f32.mrf.mxu0  ;;  %v5697_v10 = vrot.slane %v8941_v26, 2  ;;  %v13275_v26 = vrot.slane %v12052_v12, 1 }
 0x2e8   : > { %v6485_v62 = vadd.f32 %v6484_v36, %v6483_v5  ;;  %v5815_v27 = vadd.f32 %v5694_v63, %v12041_v47  ;;  %v5816_v13 = vadd.f32 %v5696_v56, %v5218_v16  ;;  %v5145_v11 = vrot.slane %v4999_v59, 1 }
 0x2e9   : > { %v8891_v23 = vpop.f32.mrf.mxu1  ;;  %v5411_v21 = vpop.f32.mrf.mxu0  ;;  %v5221_v48 = vadd.f32 %v13275_v26, %v11835_v31  ;;  %v5700_v35 = vrot.slane %v8944_v60, 2  ;;  %v5817_v44 = vadd.f32 %v5697_v10, %v12044_v33 }
 0x2ea   : > { %v5918_v43 = vrot.slane %v5815_v27, 7  ;;  %v5920_v57 = vrot.slane %v5816_v13, 7  ;;  %v5146_v1 = vsel %vm1488_vm3, %v5144_v28, %v5145_v11  ;;  %v12224_v0 = vadd.f32 %v5145_v11, %v12020_v18 }
 0x2eb   : > { %v12227_v15 = vadd.f32 %v5146_v1, %v12012_v45  ;;  %v5147_v30 = vrot.slane %v8891_v23, 1  ;;  %v5698_v47 = vrot.slane %v5411_v21, 2  ;;  %v5008_v2 = vpop.f32.mrf.mxu1  ;;  %v8947_v7 = vpop.f32.mrf.mxu0 }
 0x2ec   : > { %v5919_v3 = vsel %vm5901_vm5, %v5917_v50, %v5918_v43  ;;  %v5921_v40 = vsel %vm5901_vm5, %v5918_v43, %v5920_v57 }
 0x2ed   : > { %6346 = vst.msk [vmem:[%s12134_s8 + $0x30] sm:$0xff] %vm6339_vm6, %v5919_v3  ;;  %6347 = vst.msk [vmem:[%s12134_s8 + $0x38] sm:$0xff] %vm6339_vm6, %v5921_v40  ;;  %v6383_v45 = vsel %vm6339_vm6, %v5919_v3, 0.0  ;;  %v6449_v18 = vmul.f32 %v5919_v3, %v5919_v3  ;;  %v6450_v28 = vmul.f32 %v5921_v40, %v5921_v40  ;;  %v8894_v16 = vpop.f32.mrf.mxu1  ;;  %v5421_v5 = vpop.f32.mrf.mxu0  ;;  %v12241_v31 = vadd.f32 %v5147_v30, %v12029_v34 }
 0x2ee   : > { %v6384_v36 = vadd.f32 %v6383_v45, %v6382_v25  ;;  %v5699_v12 = vsel %vm2055_vm4, %v5697_v10, %v5698_v47  ;;  %v5701_v63 = vsel %vm2055_vm4, %v5698_v47, %v5700_v35  ;;  %v6385_v56 = vsel %vm6339_vm6, %v5921_v40, 0.0  ;;  %v13276_v5 = vld [vmem:[#allocation61_spill] sm:$0xff] }
 0x2ef   : > { %v6486_v59 = vsel %vm6339_vm6, %v6449_v18, 0.0  ;;  %v5818_v60 = vadd.f32 %v5699_v12, %v12062_v53  ;;  %v5819_v27 = vadd.f32 %v5701_v63, %v5221_v48  ;;  %v5017_v13 = vpop.f32.mrf.mxu1  ;;  %v8950_v11 = vpop.f32.mrf.mxu0  ;;  %v6488_v25 = vsel %vm6339_vm6, %v6450_v28, 0.0 }
 0x2f0   : > { %v6386_v33 = vadd.f32 %v6385_v56, %v6384_v36  ;;  %v6487_v50 = vadd.f32 %v6486_v59, %v6485_v62  ;;  %v5148_v23 = vrot.slane %v5017_v13, 1  ;;  %v5922_v34 = vrot.slane %v5817_v44, 7 }
 0x2f1   : > { %v5923_v10 = vrot.slane %v5818_v60, 7  ;;  %v5925_v21 = vrot.slane %v5819_v27, 7  ;;  %v8897_v43 = vpop.f32.mrf.mxu1  ;;  %v5430_v57 = vpop.f32.mrf.mxu0  ;;  %v5702_v47 = vrot.slane %v8947_v7, 2  ;;  %v5705_v18 = vrot.slane %v8950_v11, 2 }
 0x2f2   : > { %v6489_v1 = vadd.f32 %v6488_v25, %v6487_v50  ;;  %v5149_v2 = vsel %vm1488_vm3, %v5147_v30, %v5148_v23  ;;  %v12251_v53 = vadd.f32 %v5148_v23, %v12038_v39  ;;  %v5150_v3 = vrot.slane %v8897_v43, 1 }
 0x2f3   : > { %v5924_v26 = vsel %vm5901_vm5, %v5922_v34, %v5923_v10  ;;  %v5926_v62 = vsel %vm5901_vm5, %v5923_v10, %v5925_v21  ;;  %v12256_v48 = vadd.f32 %v5149_v2, %v12026_v19  ;;  %v5026_v40 = vpop.f32.mrf.mxu1  ;;  %v8953_v35 = vpop.f32.mrf.mxu0  ;;  %v5703_v44 = vrot.slane %v5430_v57, 2  ;;  %v13278_v2 = vld [vmem:[#allocation69_spill] sm:$0xff] }
 0x2f4   : > { %6348 = vst.msk [vmem:[%s12134_s8 + $0x40] sm:$0xff] %vm6339_vm6, %v5924_v26  ;;  %6349 = vst.msk [vmem:[%s12134_s8 + $0x48] sm:$0xff] %vm6339_vm6, %v5926_v62  ;;  %v6387_v7 = vsel %vm6339_vm6, %v5924_v26, 0.0  ;;  %v6451_v30 = vmul.f32 %v5924_v26, %v5924_v26  ;;  %v6452_v45 = vmul.f32 %v5926_v62, %v5926_v62  ;;  %v12264_v28 = vadd.f32 %v5150_v3, %v12050_v4 }
 0x2f5   : > { %v6388_v39 = vadd.f32 %v6387_v7, %v6386_v33  ;;  %v8900_v16 = vpop.f32.mrf.mxu1  ;;  %v5440_v19 = vpop.f32.mrf.mxu0  ;;  %v13277_v36 = vrot.slane %v12073_v41, 1  ;;  %v6389_v63 = vsel %vm6339_vm6, %v5926_v62, 0.0  ;;  %v5820_v59 = vadd.f32 %v5702_v47, %v12065_v49 }
 0x2f6   : > { %v6490_v56 = vsel %vm6339_vm6, %v6451_v30, 0.0  ;;  %v5704_v13 = vsel %vm2055_vm4, %v5702_v47, %v5703_v44  ;;  %v5706_v4 = vsel %vm2055_vm4, %v5703_v44, %v5705_v18  ;;  %v6492_v50 = vsel %vm6339_vm6, %v6452_v45, 0.0 }
 0x2f7   : > { %v5224_v12 = vadd.f32 %v13277_v36, %v13276_v5  ;;  %v6390_v60 = vadd.f32 %v6389_v63, %v6388_v39  ;;  %v6491_v27 = vadd.f32 %v6490_v56, %v6489_v1  ;;  %v5035_v11 = vpop.f32.mrf.mxu1  ;;  %v8956_v33 = vpop.f32.mrf.mxu0  ;;  %v5821_v23 = vadd.f32 %v5704_v13, %v12083_v38 }
 0x2f8   : > { %v5151_v25 = vrot.slane %v5035_v11, 1  ;;  %v5707_v10 = vrot.slane %v8953_v35, 2  ;;  %v5927_v49 = vrot.slane %v5820_v59, 7  ;;  %v13279_v35 = vld [vmem:[#allocation68_spill] sm:$0xff]  ;;  %v13280_v45 = vrot.slane %v12094_v24, 1 }
 0x2f9   : > { %v5822_v41 = vadd.f32 %v5706_v4, %v5224_v12  ;;  %v6493_v34 = vadd.f32 %v6492_v50, %v6491_v27  ;;  %v8903_v21 = vpop.f32.mrf.mxu1  ;;  %v5449_v43 = vpop.f32.mrf.mxu0  ;;  %v5928_v57 = vrot.slane %v5821_v23, 7  ;;  %v13282_v23 = vrot.slane %v12111_v46, 1 }
 0x2fa   : > { %v5152_v47 = vsel %vm1488_vm3, %v5150_v3, %v5151_v25  ;;  %v12281_v62 = vadd.f32 %v5151_v25, %v12059_v9  ;;  %v5153_v38 = vrot.slane %v8903_v21, 1  ;;  %v5708_v40 = vrot.slane %v5449_v43, 2 }
 0x2fb   : > { %v5930_v1 = vrot.slane %v5822_v41, 7  ;;  %v12278_v26 = vadd.f32 %v5152_v47, %v13278_v2  ;;  %v5044_v7 = vpop.f32.mrf.mxu1  ;;  %v12283_v30 = vpop.f32.mrf.mxu0  ;;  %v5227_v39 = vadd.f32 %v13280_v45, %v13279_v35  ;;  %v5929_v18 = vsel %vm5901_vm5, %v5927_v49, %v5928_v57  ;;  %v13284_v35 = vld [vmem:[#allocation74_spill] sm:$0xff] }
 0x2fc   : > { %v5710_v3 = vrot.slane %v8956_v33, 2  ;;  %6350 = vst.msk [vmem:[%s12134_s8 + $0x50] sm:$0xff] %vm6339_vm6, %v5929_v18  ;;  %v6391_v9 = vsel %vm6339_vm6, %v5929_v18, 0.0  ;;  %v6453_v16 = vmul.f32 %v5929_v18, %v5929_v18  ;;  %v5823_v5 = vadd.f32 %v5707_v10, %v12086_v58  ;;  %v13281_v58 = vld [vmem:[#allocation72_spill] sm:$0xff] }
 0x2fd   : > { %v5931_v44 = vsel %vm5901_vm5, %v5928_v57, %v5930_v1  ;;  %v8906_v36 = vpop.f32.mrf.mxu1  ;;  %v5459_v12 = vpop.f32.mrf.mxu0  ;;  %v6392_v63 = vadd.f32 %v6391_v9, %v6390_v60  ;;  %v12297_v24 = vadd.f32 %v5153_v38, %v12071_v6  ;;  %v5709_v56 = vsel %vm2055_vm4, %v5707_v10, %v5708_v40 }
 0x2fe   : > { %6351 = vst.msk [vmem:[%s12134_s8 + $0x58] sm:$0xff] %vm6339_vm6, %v5931_v44  ;;  %v6454_v19 = vmul.f32 %v5931_v44, %v5931_v44  ;;  %v5711_v59 = vsel %vm2055_vm4, %v5708_v40, %v5710_v3  ;;  %v6393_v27 = vsel %vm6339_vm6, %v5931_v44, 0.0  ;;  %v6494_v13 = vsel %vm6339_vm6, %v6453_v16, 0.0  ;;  %v13283_v40 = vld [vmem:[#allocation77_spill] sm:$0xff] }
 0x2ff   : > { %v5824_v4 = vadd.f32 %v5709_v56, %v12104_v54  ;;  %v5825_v11 = vadd.f32 %v5711_v59, %v5227_v39  ;;  %v5053_v33 = vpop.f32.mrf.mxu1  ;;  %v8962_v50 = vpop.f32.mrf.mxu0  ;;  %v5230_v60 = vadd.f32 %v13282_v23, %v13281_v58  ;;  %v6394_v41 = vadd.f32 %v6393_v27, %v6392_v63 }
 0x300   : > { %v6495_v6 = vadd.f32 %v6494_v13, %v6493_v34  ;;  %v5154_v25 = vrot.slane %v5053_v33, 1  ;;  %v6496_v10 = vsel %vm6339_vm6, %v6454_v19, 0.0  ;;  %v5932_v21 = vrot.slane %v5823_v5, 7  ;;  %v13285_v19 = vld [vmem:[#allocation75_spill] sm:$0xff] }
 0x301   : > { %v5933_v43 = vrot.slane %v5824_v4, 7  ;;  %v5935_v49 = vrot.slane %v5825_v11, 7  ;;  %v8909_v57 = vpop.f32.mrf.mxu1  ;;  %v5468_v1 = vpop.f32.mrf.mxu0  ;;  %v5712_v47 = vrot.slane %v12283_v30, 2  ;;  %v5715_v9 = vrot.slane %v8962_v50, 2  ;;  %v13286_v4 = vld [vmem:[#allocation80_spill] sm:$0xff] }
 0x302   : > { %v6497_v54 = vadd.f32 %v6496_v10, %v6495_v6  ;;  %v5155_v2 = vsel %vm1488_vm3, %v5153_v38, %v5154_v25  ;;  %v12311_v46 = vadd.f32 %v5154_v25, %v13283_v40  ;;  %v5156_v39 = vrot.slane %v8909_v57, 1 }
 0x303   : > { %v5934_v34 = vsel %vm5901_vm5, %v5932_v21, %v5933_v43  ;;  %v5936_v7 = vsel %vm5901_vm5, %v5933_v43, %v5935_v49  ;;  %v12316_v45 = vadd.f32 %v5155_v2, %v13284_v35  ;;  %v5062_v18 = vpop.f32.mrf.mxu1  ;;  %v8965_v44 = vpop.f32.mrf.mxu0  ;;  %v5713_v36 = vrot.slane %v5468_v1, 2  ;;  %v13287_v49 = vld [vmem:[#allocation22_spill] sm:$0xff]  ;;  %v13288_v1 = vld [vmem:[#allocation73_spill] sm:$0xff] }
 0x304   : > { %6352 = vst.msk [vmem:[%s12134_s8 + $0x60] sm:$0xff] %vm6339_vm6, %v5934_v34  ;;  %6353 = vst.msk [vmem:[%s12134_s8 + $0x68] sm:$0xff] %vm6339_vm6, %v5936_v7  ;;  %v6395_v30 = vsel %vm6339_vm6, %v5934_v34, 0.0  ;;  %v6455_v38 = vmul.f32 %v5934_v34, %v5934_v34  ;;  %v6456_v3 = vmul.f32 %v5936_v7, %v5936_v7  ;;  %v12324_v5 = vadd.f32 %v5156_v39, %v13285_v19  ;;  %v13289_v35 = vld [vmem:[#allocation78_spill] sm:$0xff] }
 0x305   : > { %v6396_v16 = vadd.f32 %v6395_v30, %v6394_v41  ;;  %v5717_v12 = vrot.slane %v8965_v44, 2  ;;  %v8912_v63 = vpop.f32.mrf.mxu1  ;;  %v5478_v56 = vpop.f32.mrf.mxu0  ;;  %v6397_v59 = vsel %vm6339_vm6, %v5936_v7, 0.0  ;;  %v5826_v11 = vadd.f32 %v5712_v47, %v13286_v4 }
 0x306   : > { %v6498_v27 = vsel %vm6339_vm6, %v6455_v38, 0.0  ;;  %v6500_v13 = vsel %vm6339_vm6, %v6456_v3, 0.0  ;;  %v5714_v50 = vsel %vm2055_vm4, %v5712_v47, %v5713_v36  ;;  %v5716_v23 = vsel %vm2055_vm4, %v5713_v36, %v5715_v9 }
 0x307   : > { %v6398_v33 = vadd.f32 %v6397_v59, %v6396_v16  ;;  %v6499_v58 = vadd.f32 %v6498_v27, %v6497_v54  ;;  %v5071_v41 = vpop.f32.mrf.mxu1  ;;  %v8968_v6 = vpop.f32.mrf.mxu0  ;;  %v5827_v25 = vadd.f32 %v5714_v50, %v12122_v20  ;;  %v5828_v10 = vadd.f32 %v5716_v23, %v5230_v60 }
 0x308   : > { %v5829_v21 = vadd.f32 %v5717_v12, %v12125_v8  ;;  %v5157_v43 = vrot.slane %v5071_v41, 1  ;;  %v5233_v57 = vadd.f32 %v5136_v17, %v13287_v49  ;;  %v12340_v54 = vadd.f32 %v5139_v37, %v13288_v1 }
 0x309   : > { %v6501_v47 = vadd.f32 %v6500_v13, %v6499_v58  ;;  %v9015_v2 = vpop.f32.mrf.mxu1  ;;  %v5487_v40 = vpop.f32.mrf.mxu0  ;;  %v5937_v34 = vrot.slane %v5826_v11, 7  ;;  %v5938_v20 = vrot.slane %v5827_v25, 7  ;;  %v5940_v60 = vrot.slane %v5828_v10, 7 }
 0x30a   : > { %v5158_v8 = vsel %vm1488_vm3, %v5156_v39, %v5157_v43  ;;  %v5942_v7 = vrot.slane %v5829_v21, 7  ;;  %v5720_v29 = vrot.slane %v8968_v6, 2  ;;  %v6616_v17 = vmul.f32 %v9015_v2, %v9015_v2 }
 0x30b   : > { %v12344_v18 = vadd.f32 %v5158_v8, %v13289_v35  ;;  %v6180_v44 = vpop.f32.mrf.mxu1  ;;  %v12346_v51 = vpop.f32.mrf.mxu0  ;;  %v5939_v37 = vsel %vm5901_vm5, %v5937_v34, %v5938_v20  ;;  %v5941_v30 = vsel %vm5901_vm5, %v5938_v20, %v5940_v60  ;;  %v6546_v38 = vsel %vm6339_vm6, %v9015_v2, 0.0  ;;  %v13290_v60 = vld [vmem:[#allocation76_spill] sm:$0xff] }
 0x30c   : > { %v5718_v3 = vrot.slane %v5487_v40, 2  ;;  %6354 = vst.msk [vmem:[%s12134_s8 + $0x70] sm:$0xff] %vm6339_vm6, %v5939_v37  ;;  %6355 = vst.msk [vmem:[%s12134_s8 + $0x78] sm:$0xff] %vm6339_vm6, %v5941_v30  ;;  %v6399_v39 = vsel %vm6339_vm6, %v5939_v37, 0.0  ;;  %v6457_v9 = vmul.f32 %v5939_v37, %v5939_v37  ;;  %v6458_v16 = vmul.f32 %v5941_v30, %v5941_v30 }
 0x30d   : > { %v6545_v19 = vsel %vm6339_vm6, %v6180_v44, 0.0  ;;  %v9018_v36 = vpop.f32.mrf.mxu1  ;;  %v5497_v63 = vpop.f32.mrf.mxu0  ;;  %v6400_v56 = vadd.f32 %v6399_v39, %v6398_v33  ;;  %v6401_v59 = vsel %vm6339_vm6, %v5941_v30, 0.0  ;;  %v6648_v11 = vsel %vm6339_vm6, %v6616_v17, 0.0 }
 0x30e   : > { %v5719_v27 = vsel %vm2055_vm4, %v5717_v12, %v5718_v3  ;;  %v5721_v13 = vsel %vm2055_vm4, %v5718_v3, %v5720_v29  ;;  %v6502_v4 = vsel %vm6339_vm6, %v6457_v9, 0.0  ;;  %v6504_v10 = vsel %vm6339_vm6, %v6458_v16, 0.0 }
 0x30f   : > { %v5830_v58 = vadd.f32 %v5719_v27, %v12155_v61  ;;  %v5831_v50 = vadd.f32 %v5721_v13, %v5233_v57  ;;  %v6190_v23 = vpop.f32.mrf.mxu1  ;;  %v8974_v41 = vpop.f32.mrf.mxu0  ;;  %v6402_v6 = vadd.f32 %v6401_v59, %v6400_v56  ;;  %v6503_v25 = vadd.f32 %v6502_v4, %v6501_v47 }
 0x310   : > { %v6615_v33 = vmul.f32 %v6180_v44, %v6180_v44  ;;  %v6547_v12 = vadd.f32 %v6546_v38, %v6545_v19  ;;  %v5722_v1 = vrot.slane %v12346_v51, 2  ;;  %v6618_v57 = vmul.f32 %v9018_v36, %v9018_v36 }
 0x311   : > { %v5943_v21 = vrot.slane %v5830_v58, 7  ;;  %v5945_v49 = vrot.slane %v5831_v50, 7  ;;  %v9021_v2 = vpop.f32.mrf.mxu1  ;;  %v5506_v40 = vpop.f32.mrf.mxu0  ;;  %v6505_v34 = vadd.f32 %v6504_v10, %v6503_v25  ;;  %v6548_v20 = vsel %vm6339_vm6, %v6190_v23, 0.0 }
 0x312   : > { %v6647_v61 = vsel %vm6339_vm6, %v6615_v33, 0.0  ;;  %v12368_v47 = vadd.f32 %v5157_v43, %v13290_v60  ;;  %v6550_v29 = vsel %vm6339_vm6, %v9018_v36, 0.0  ;;  %v6549_v39 = vadd.f32 %v6548_v20, %v6547_v12 }
 0x313   : > { %v5944_v8 = vsel %vm5901_vm5, %v5942_v7, %v5943_v21  ;;  %v5946_v35 = vsel %vm5901_vm5, %v5943_v21, %v5945_v49  ;;  %v6200_v17 = vpop.f32.mrf.mxu1  ;;  %v12373_v44 = vpop.f32.mrf.mxu0  ;;  %v6649_v38 = vadd.f32 %v6648_v11, %v6647_v61  ;;  %v5832_v7 = vadd.f32 %v5722_v1, %v12162_v42 }
 0x314   : > { %6356 = vst.msk [vmem:[%s12134_s8 + $0x80] sm:$0xff] %vm6339_vm6, %v5944_v8  ;;  %6357 = vst.msk [vmem:[%s12134_s8 + $0x88] sm:$0xff] %vm6339_vm6, %v5946_v35  ;;  %v6403_v51 = vsel %vm6339_vm6, %v5944_v8, 0.0  ;;  %v6459_v37 = vmul.f32 %v5944_v8, %v5944_v8  ;;  %v6460_v30 = vmul.f32 %v5946_v35, %v5946_v35  ;;  %v6405_v3 = vsel %vm6339_vm6, %v5946_v35, 0.0 }
 0x315   : > { %v6404_v43 = vadd.f32 %v6403_v51, %v6402_v6  ;;  %v9024_v9 = vpop.f32.mrf.mxu1  ;;  %v5516_v16 = vpop.f32.mrf.mxu0  ;;  %v6652_v63 = vsel %vm6339_vm6, %v6618_v57, 0.0  ;;  %v6617_v56 = vmul.f32 %v6190_v23, %v6190_v23  ;;  %v5725_v13 = vrot.slane %v8974_v41, 2 }
 0x316   : > { %v6506_v19 = vsel %vm6339_vm6, %v6459_v37, 0.0  ;;  %v6508_v36 = vsel %vm6339_vm6, %v6460_v30, 0.0  ;;  %v6620_v4 = vmul.f32 %v9021_v2, %v9021_v2  ;;  %v5723_v42 = vrot.slane %v5506_v40, 2 }
 0x317   : > { %v6406_v59 = vadd.f32 %v6405_v3, %v6404_v43  ;;  %v6507_v27 = vadd.f32 %v6506_v19, %v6505_v34  ;;  %v6210_v11 = vpop.f32.mrf.mxu1  ;;  %v12385_v58 = vpop.f32.mrf.mxu0  ;;  %v6650_v50 = vsel %vm6339_vm6, %v6617_v56, 0.0  ;;  %v6551_v6 = vadd.f32 %v6550_v29, %v6549_v39 }
 0x318   : > { %v6552_v25 = vsel %vm6339_vm6, %v6200_v17, 0.0  ;;  %v6651_v33 = vadd.f32 %v6650_v50, %v6649_v38  ;;  %v6554_v21 = vsel %vm6339_vm6, %v9021_v2, 0.0  ;;  %v6619_v49 = vmul.f32 %v6200_v17, %v6200_v17 }
 0x319   : > { %v6509_v10 = vadd.f32 %v6508_v36, %v6507_v27  ;;  %v9027_v12 = vpop.f32.mrf.mxu1  ;;  %v5525_v23 = vpop.f32.mrf.mxu0  ;;  %v5724_v34 = vsel %vm2055_vm4, %v5722_v1, %v5723_v42  ;;  %v5726_v41 = vsel %vm2055_vm4, %v5723_v42, %v5725_v13  ;;  %v6553_v61 = vadd.f32 %v6552_v25, %v6551_v6 }
 0x31a   : > { %v5727_v57 = vrot.slane %v12373_v44, 2  ;;  %v5833_v20 = vadd.f32 %v5724_v34, %v12179_v32  ;;  %v5834_v40 = vadd.f32 %v5726_v41, %v12340_v54  ;;  %v6653_v60 = vadd.f32 %v6652_v63, %v6651_v33 }
 0x31b   : > { %v6654_v8 = vsel %vm6339_vm6, %v6619_v49, 0.0  ;;  %v6220_v35 = vpop.f32.mrf.mxu1  ;;  %v12396_v29 = vpop.f32.mrf.mxu0  ;;  %v5947_v2 = vrot.slane %v5832_v7, 7  ;;  %v6656_v17 = vsel %vm6339_vm6, %v6620_v4, 0.0  ;;  %v6622_v51 = vmul.f32 %v9024_v9, %v9024_v9 }
 0x31c   : > { %v6555_v1 = vadd.f32 %v6554_v21, %v6553_v61  ;;  %v5948_v37 = vrot.slane %v5833_v20, 7  ;;  %v5950_v30 = vrot.slane %v5834_v40, 7  ;;  %v6655_v44 = vadd.f32 %v6654_v8, %v6653_v60 }
 0x31d   : > { %v6556_v32 = vsel %vm6339_vm6, %v6210_v11, 0.0  ;;  %v9030_v38 = vpop.f32.mrf.mxu1  ;;  %v5535_v54 = vpop.f32.mrf.mxu0  ;;  %v5835_v43 = vadd.f32 %v5727_v57, %v12188_v55  ;;  %v6558_v3 = vsel %vm6339_vm6, %v9024_v9, 0.0  ;;  %v6660_v39 = vsel %vm6339_vm6, %v6622_v51, 0.0 }
 0x31e   : > { %v6621_v7 = vmul.f32 %v6210_v11, %v6210_v11  ;;  %v5949_v16 = vsel %vm5901_vm5, %v5947_v2, %v5948_v37  ;;  %v5951_v19 = vsel %vm5901_vm5, %v5948_v37, %v5950_v30  ;;  %v6557_v36 = vadd.f32 %v6556_v32, %v6555_v1 }
 0x31f   : > { %v6657_v63 = vadd.f32 %v6656_v17, %v6655_v44  ;;  %v6230_v56 = vpop.f32.mrf.mxu1  ;;  %v12405_v27 = vpop.f32.mrf.mxu0  ;;  %6358 = vst.msk [vmem:[%s12134_s8 + $0x90] sm:$0xff] %vm6339_vm6, %v5949_v16  ;;  %6359 = vst.msk [vmem:[%s12134_s8 + $0x98] sm:$0xff] %vm6339_vm6, %v5951_v19  ;;  %v6407_v55 = vsel %vm6339_vm6, %v5949_v16, 0.0  ;;  %v6461_v13 = vmul.f32 %v5949_v16, %v5949_v16  ;;  %v6462_v9 = vmul.f32 %v5951_v19, %v5951_v19 }
 0x320   : > { %v5730_v4 = vrot.slane %v12385_v58, 2  ;;  %v6408_v11 = vadd.f32 %v6407_v55, %v6406_v59  ;;  %v6409_v50 = vsel %vm6339_vm6, %v5951_v19, 0.0  ;;  %v6658_v42 = vsel %vm6339_vm6, %v6621_v7, 0.0 }
 0x321   : > { %v6562_v6 = vsel %vm6339_vm6, %v9027_v12, 0.0  ;;  %v12416_v25 = vpop.f32.mrf.mxu1  ;;  %v12418_v33 = vpop.f32.mrf.mxu0  ;;  %v6510_v21 = vsel %vm6339_vm6, %v6461_v13, 0.0  ;;  %v6659_v49 = vadd.f32 %v6658_v42, %v6657_v63  ;;  %v6624_v34 = vmul.f32 %v9027_v12, %v9027_v12 }
 0x322   : > { %v5728_v41 = vrot.slane %v5525_v23, 2  ;;  %v6410_v61 = vadd.f32 %v6409_v50, %v6408_v11  ;;  %v6511_v20 = vadd.f32 %v6510_v21, %v6509_v10  ;;  %v6512_v58 = vsel %vm6339_vm6, %v6462_v9, 0.0 }
 0x323   : > { %v6559_v59 = vadd.f32 %v6558_v3, %v6557_v36  ;;  %v6240_v40 = vpop.f32.mrf.mxu1  ;;  %v12422_v60 = vpop.f32.mrf.mxu0  ;;  %v6560_v17 = vsel %vm6339_vm6, %v6220_v35, 0.0  ;;  %v6623_v51 = vmul.f32 %v6220_v35, %v6220_v35  ;;  %v5952_v44 = vrot.slane %v5835_v43, 7 }
 0x324   : > { %v5729_v8 = vsel %vm2055_vm4, %v5727_v57, %v5728_v41  ;;  %v5731_v2 = vsel %vm2055_vm4, %v5728_v41, %v5730_v4  ;;  %v6513_v1 = vadd.f32 %v6512_v58, %v6511_v20  ;;  %v6661_v32 = vadd.f32 %v6660_v39, %v6659_v49 }
 0x325   : > { %v5836_v37 = vadd.f32 %v5729_v8, %v12207_v52  ;;  %v5837_v12 = vadd.f32 %v5731_v2, %v12199_v14  ;;  %v6561_v23 = vadd.f32 %v6560_v17, %v6559_v59  ;;  %v12429_v10 = vpop.f32.mrf.mxu1  ;;  %v5554_v30 = vpop.f32.mrf.mxu0  ;;  %v6662_v54 = vsel %vm6339_vm6, %v6623_v51, 0.0 }
 0x326   : > { %v5732_v57 = vrot.slane %v12396_v29, 2  ;;  %v6626_v35 = vmul.f32 %v9030_v38, %v9030_v38  ;;  %v6664_v14 = vsel %vm6339_vm6, %v6624_v34, 0.0  ;;  %v6663_v36 = vadd.f32 %v6662_v54, %v6661_v32 }
 0x327   : > { %v5953_v3 = vrot.slane %v5836_v37, 7  ;;  %v5955_v7 = vrot.slane %v5837_v12, 7  ;;  %v6563_v16 = vadd.f32 %v6562_v6, %v6561_v23  ;;  %v6250_v19 = vpop.f32.mrf.mxu1  ;;  %v12433_v52 = vpop.f32.mrf.mxu0  ;;  %v6564_v63 = vsel %vm6339_vm6, %v6230_v56, 0.0 }
 0x328   : > { %v6625_v43 = vmul.f32 %v6230_v56, %v6230_v56  ;;  %v5838_v29 = vadd.f32 %v5732_v57, %v12216_v22  ;;  %v6566_v13 = vsel %vm6339_vm6, %v9030_v38, 0.0  ;;  %v6668_v21 = vsel %vm6339_vm6, %v6626_v35, 0.0 }
 0x329   : > { %v5954_v39 = vsel %vm5901_vm5, %v5952_v44, %v5953_v3  ;;  %v5956_v55 = vsel %vm5901_vm5, %v5953_v3, %v5955_v7  ;;  %v12441_v9 = vpop.f32.mrf.mxu1  ;;  %v12443_v4 = vpop.f32.mrf.mxu0  ;;  %v6565_v42 = vadd.f32 %v6564_v63, %v6563_v16  ;;  %v6665_v49 = vadd.f32 %v6664_v14, %v6663_v36 }
 0x32a   : > { %6360 = vst.msk [vmem:[%s12134_s8 + $0xa0] sm:$0xff] %vm6339_vm6, %v5954_v39  ;;  %6361 = vst.msk [vmem:[%s12134_s8 + $0xa8] sm:$0xff] %vm6339_vm6, %v5956_v55  ;;  %v6411_v11 = vsel %vm6339_vm6, %v5954_v39, 0.0  ;;  %v6463_v50 = vmul.f32 %v5954_v39, %v5954_v39  ;;  %v6464_v56 = vmul.f32 %v5956_v55, %v5956_v55  ;;  %v6666_v22 = vsel %vm6339_vm6, %v6625_v43, 0.0 }
 0x32b   : > { %v6412_v6 = vadd.f32 %v6411_v11, %v6410_v61  ;;  %v12452_v38 = vpop.f32.mrf.mxu1  ;;  %v12454_v34 = vpop.f32.mrf.mxu0  ;;  %v6413_v41 = vsel %vm6339_vm6, %v5956_v55, 0.0  ;;  %v5735_v59 = vrot.slane %v12405_v27, 2  ;;  %v6667_v61 = vadd.f32 %v6666_v22, %v6665_v49 }
 0x32c   : > { %v6514_v20 = vsel %vm6339_vm6, %v6463_v50, 0.0  ;;  %v6516_v58 = vsel %vm6339_vm6, %v6464_v56, 0.0  ;;  %v6628_v17 = vmul.f32 %v12416_v25, %v12416_v25  ;;  %v5733_v12 = vrot.slane %v12418_v33, 2 }
 0x32d   : > { %v6414_v8 = vadd.f32 %v6413_v41, %v6412_v6  ;;  %v6515_v2 = vadd.f32 %v6514_v20, %v6513_v1  ;;  %v12462_v51 = vpop.f32.mrf.mxu1  ;;  %v5573_v37 = vpop.f32.mrf.mxu0  ;;  %v6567_v23 = vadd.f32 %v6566_v13, %v6565_v42  ;;  %v6568_v30 = vsel %vm6339_vm6, %v6240_v40, 0.0 }
 0x32e   : > { %v6627_v44 = vmul.f32 %v6240_v40, %v6240_v40  ;;  %v6570_v54 = vsel %vm6339_vm6, %v12416_v25, 0.0  ;;  %v6669_v27 = vadd.f32 %v6668_v21, %v6667_v61  ;;  %v5737_v1 = vrot.slane %v12422_v60, 2 }
 0x32f   : > { %v6517_v32 = vadd.f32 %v6516_v58, %v6515_v2  ;;  %v12469_v3 = vpop.f32.mrf.mxu1  ;;  %v12471_v7 = vpop.f32.mrf.mxu0  ;;  %v5734_v35 = vsel %vm2055_vm4, %v5732_v57, %v5733_v12  ;;  %v5736_v16 = vsel %vm2055_vm4, %v5733_v12, %v5735_v59  ;;  %v6569_v33 = vadd.f32 %v6568_v30, %v6567_v23 }
 0x330   : > { %v6670_v14 = vsel %vm6339_vm6, %v6627_v44, 0.0  ;;  %v6672_v40 = vsel %vm6339_vm6, %v6628_v17, 0.0  ;;  %v5839_v36 = vadd.f32 %v5734_v35, %v12227_v15  ;;  %v5840_v25 = vadd.f32 %v5736_v16, %v12224_v0 }
 0x331   : > { %v6671_v63 = vadd.f32 %v6670_v14, %v6669_v27  ;;  %v12479_v43 = vpop.f32.mrf.mxu1  ;;  %v12481_v60 = vpop.f32.mrf.mxu0  ;;  %v5957_v39 = vrot.slane %v5838_v29, 7  ;;  %v6630_v57 = vmul.f32 %v12429_v10, %v12429_v10  ;;  %v6571_v55 = vadd.f32 %v6570_v54, %v6569_v33 }
 0x332   : > { %v6572_v13 = vsel %vm6339_vm6, %v6250_v19, 0.0  ;;  %v5958_v11 = vrot.slane %v5839_v36, 7  ;;  %v5960_v50 = vrot.slane %v5840_v25, 7  ;;  %v5841_v15 = vadd.f32 %v5737_v1, %v12241_v31 }
 0x333   : > { %v6629_v56 = vmul.f32 %v6250_v19, %v6250_v19  ;;  %v12487_v0 = vpop.f32.mrf.mxu1  ;;  %v12489_v42 = vpop.f32.mrf.mxu0  ;;  %v6574_v29 = vsel %vm6339_vm6, %v12429_v10, 0.0  ;;  %v6676_v6 = vsel %vm6339_vm6, %v6630_v57, 0.0  ;;  %v6573_v21 = vadd.f32 %v6572_v13, %v6571_v55 }
 0x334   : > { %v6673_v49 = vadd.f32 %v6672_v40, %v6671_v63  ;;  %v5959_v22 = vsel %vm5901_vm5, %v5957_v39, %v5958_v11  ;;  %v5961_v41 = vsel %vm5901_vm5, %v5958_v11, %v5960_v50  ;;  %v5740_v31 = vrot.slane %v12433_v52, 2 }
 0x335   : > { %v6674_v20 = vsel %vm6339_vm6, %v6629_v56, 0.0  ;;  %v5592_v19 = vpop.f32.mrf.mxu0  ;;  %6362 = vst.msk [vmem:[%s12134_s8 + $0xb0] sm:$0xff] %vm6339_vm6, %v5959_v22  ;;  %6363 = vst.msk [vmem:[%s12134_s8 + $0xb8] sm:$0xff] %vm6339_vm6, %v5961_v41  ;;  %v6415_v58 = vsel %vm6339_vm6, %v5959_v22, 0.0  ;;  %v6465_v10 = vmul.f32 %v5959_v22, %v5959_v22  ;;  %v6466_v59 = vmul.f32 %v5961_v41, %v5961_v41  ;;  %v12505_v61 = vpop.f32.mrf.mxu1 }
 0x336   : > { %v6578_v2 = vsel %vm6339_vm6, %v12441_v9, 0.0  ;;  %v6416_v17 = vadd.f32 %v6415_v58, %v6414_v8  ;;  %v6417_v37 = vsel %vm6339_vm6, %v5961_v41, 0.0  ;;  %v6675_v12 = vadd.f32 %v6674_v20, %v6673_v49 }
 0x337   : > { %v5738_v52 = vrot.slane %v12443_v4, 2  ;;  %v12509_v23 = vpop.f32.mrf.mxu0  ;;  %v6518_v30 = vsel %vm6339_vm6, %v6465_v10, 0.0  ;;  %v6632_v44 = vmul.f32 %v12441_v9, %v12441_v9  ;;  %v6575_v54 = vadd.f32 %v6574_v29, %v6573_v21  ;;  %v12524_v25 = vpop.f32.mrf.mxu1 }
 0x338   : > { %v6576_v27 = vsel %vm6339_vm6, %v12452_v38, 0.0  ;;  %v6418_v35 = vadd.f32 %v6417_v37, %v6416_v17  ;;  %v6519_v16 = vadd.f32 %v6518_v30, %v6517_v32  ;;  %v6520_v8 = vsel %vm6339_vm6, %v6466_v59, 0.0 }
 0x339   : > { %v5739_v33 = vsel %vm2055_vm4, %v5737_v1, %v5738_v52  ;;  %v12518_v14 = vpop.f32.mrf.mxu0  ;;  %v5741_v4 = vsel %vm2055_vm4, %v5738_v52, %v5740_v31  ;;  %v6577_v36 = vadd.f32 %v6576_v27, %v6575_v54  ;;  %v6631_v9 = vmul.f32 %v12452_v38, %v12452_v38  ;;  %v12541_v49 = vpop.f32.mrf.mxu1 }
 0x33a   : > { %v5842_v40 = vadd.f32 %v5739_v33, %v12256_v48  ;;  %v6521_v63 = vadd.f32 %v6520_v8, %v6519_v16  ;;  %v5843_v39 = vadd.f32 %v5741_v4, %v12251_v53  ;;  %v6677_v32 = vadd.f32 %v6676_v6, %v6675_v12 }
 0x33b   : > { %v5742_v57 = vrot.slane %v12454_v34, 2  ;;  %v12528_v55 = vpop.f32.mrf.mxu0  ;;  %v5962_v1 = vrot.slane %v5841_v15, 7  ;;  %v6678_v11 = vsel %vm6339_vm6, %v6631_v9, 0.0  ;;  %v6634_v48 = vmul.f32 %v12462_v51, %v12462_v51  ;;  %v6300_v30 = vpop.f32.mrf.mxu1 }
 0x33c   : > { %v5963_v13 = vrot.slane %v5842_v40, 7  ;;  %v6680_v38 = vsel %vm6339_vm6, %v6632_v44, 0.0  ;;  %v5965_v50 = vrot.slane %v5843_v39, 7  ;;  %v6679_v56 = vadd.f32 %v6678_v11, %v6677_v32 }
 0x33d   : > { %v6579_v29 = vadd.f32 %v6578_v2, %v6577_v36  ;;  %v5611_v53 = vpop.f32.mrf.mxu0  ;;  %v6582_v34 = vsel %vm6339_vm6, %v12462_v51, 0.0  ;;  %v6580_v15 = vsel %vm6339_vm6, %v12469_v3, 0.0  ;;  %v6633_v21 = vmul.f32 %v12469_v3, %v12469_v3  ;;  %v9054_v32 = vpop.f32.mrf.mxu1 }
 0x33e   : > { %v5964_v6 = vsel %vm5901_vm5, %v5962_v1, %v5963_v13  ;;  %v5966_v22 = vsel %vm5901_vm5, %v5963_v13, %v5965_v50  ;;  %v5844_v31 = vadd.f32 %v5742_v57, %v12264_v28  ;;  %v6684_v58 = vsel %vm6339_vm6, %v6634_v48, 0.0 }
 0x33f   : > { %6364 = vst.msk [vmem:[%s12134_s8 + $0xc0] sm:$0xff] %vm6339_vm6, %v5964_v6  ;;  %v6419_v41 = vsel %vm6339_vm6, %v5964_v6, 0.0  ;;  %v6467_v20 = vmul.f32 %v5964_v6, %v5964_v6  ;;  %6365 = vst.msk [vmem:[%s12134_s8 + $0xc8] sm:$0xff] %vm6339_vm6, %v5966_v22  ;;  %v6468_v19 = vmul.f32 %v5966_v22, %v5966_v22  ;;  %v6581_v10 = vadd.f32 %v6580_v15, %v6579_v29  ;;  %v6310_v15 = vpop.f32.mrf.mxu1 }
 0x340   : > { %v6420_v51 = vadd.f32 %v6419_v41, %v6418_v35  ;;  %v6421_v3 = vsel %vm6339_vm6, %v5966_v22, 0.0  ;;  %v6681_v2 = vadd.f32 %v6680_v38, %v6679_v56  ;;  %v6682_v17 = vsel %vm6339_vm6, %v6633_v21, 0.0 }
 0x341   : > { %v6522_v59 = vsel %vm6339_vm6, %v6467_v20, 0.0  ;;  %v6524_v52 = vsel %vm6339_vm6, %v6468_v19, 0.0  ;;  %v5745_v28 = vrot.slane %v12471_v7, 2  ;;  %v6636_v54 = vmul.f32 %v12479_v43, %v12479_v43 }
 0x342   : > { %v6422_v37 = vadd.f32 %v6421_v3, %v6420_v51  ;;  %v6523_v12 = vadd.f32 %v6522_v59, %v6521_v63  ;;  %v6683_v44 = vadd.f32 %v6682_v17, %v6681_v2  ;;  %v5743_v27 = vrot.slane %v12481_v60, 2  ;;  %v9057_v17 = vpop.f32.mrf.mxu1 }
 0x343   : > { %v6583_v35 = vadd.f32 %v6582_v34, %v6581_v10  ;;  %v6586_v8 = vsel %vm6339_vm6, %v12479_v43, 0.0  ;;  %v6584_v33 = vsel %vm6339_vm6, %v12487_v0, 0.0  ;;  %v6635_v4 = vmul.f32 %v12487_v0, %v12487_v0 }
 0x344   : > { %v6525_v16 = vadd.f32 %v6524_v52, %v6523_v12  ;;  %v5744_v7 = vsel %vm2055_vm4, %v5742_v57, %v5743_v27  ;;  %v5746_v40 = vsel %vm2055_vm4, %v5743_v27, %v5745_v28  ;;  %v5747_v9 = vrot.slane %v12489_v42, 2 }
 0x345   : > { %v6585_v36 = vadd.f32 %v6584_v33, %v6583_v35  ;;  %v5845_v60 = vadd.f32 %v5744_v7, %v12278_v26  ;;  %v5846_v63 = vadd.f32 %v5746_v40, %v12281_v62  ;;  %v6685_v39 = vadd.f32 %v6684_v58, %v6683_v44 }
 0x346   : > { %v6686_v43 = vsel %vm6339_vm6, %v6635_v4, 0.0  ;;  %v5967_v1 = vrot.slane %v5844_v31, 7  ;;  %v6688_v13 = vsel %vm6339_vm6, %v6636_v54, 0.0  ;;  %v6638_v0 = vmul.f32 %v12505_v61, %v12505_v61 }
 0x347   : > { %v6587_v57 = vadd.f32 %v6586_v8, %v6585_v36  ;;  %v5968_v11 = vrot.slane %v5845_v60, 7  ;;  %v5970_v48 = vrot.slane %v5846_v63, 7  ;;  %v6687_v42 = vadd.f32 %v6686_v43, %v6685_v39  ;;  %v9010_v36 = vpop.f32.mrf.mxu0 }
 0x348   : > { %v6588_v26 = vsel %vm6339_vm6, %v12524_v25, 0.0  ;;  %v5847_v62 = vadd.f32 %v5747_v9, %v12297_v24  ;;  %v6590_v38 = vsel %vm6339_vm6, %v12505_v61, 0.0  ;;  %v6692_v50 = vsel %vm6339_vm6, %v6638_v0, 0.0 }
 0x349   : > { %v6637_v56 = vmul.f32 %v12524_v25, %v12524_v25  ;;  %v5969_v29 = vsel %vm5901_vm5, %v5967_v1, %v5968_v11  ;;  %v5971_v53 = vsel %vm5901_vm5, %v5968_v11, %v5970_v48  ;;  %v6589_v6 = vadd.f32 %v6588_v26, %v6587_v57 }
 0x34a   : > { %v6689_v34 = vadd.f32 %v6688_v13, %v6687_v42  ;;  %6366 = vst.msk [vmem:[%s12134_s8 + $0xd0] sm:$0xff] %vm6339_vm6, %v5969_v29  ;;  %6367 = vst.msk [vmem:[%s12134_s8 + $0xd8] sm:$0xff] %vm6339_vm6, %v5971_v53  ;;  %v6423_v24 = vsel %vm6339_vm6, %v5969_v29, 0.0  ;;  %v6469_v21 = vmul.f32 %v5969_v29, %v5969_v29  ;;  %v6470_v61 = vmul.f32 %v5971_v53, %v5971_v53 }
 0x34b   : > { %v5750_v22 = vrot.slane %v12509_v23, 2  ;;  %v6424_v41 = vadd.f32 %v6423_v24, %v6422_v37  ;;  %v6425_v25 = vsel %vm6339_vm6, %v5971_v53, 0.0  ;;  %v6690_v20 = vsel %vm6339_vm6, %v6637_v56, 0.0 }
 0x34c   : > { %v6594_v31 = vsel %vm6339_vm6, %v12541_v49, 0.0  ;;  %v6526_v51 = vsel %vm6339_vm6, %v6469_v21, 0.0  ;;  %v6691_v19 = vadd.f32 %v6690_v20, %v6689_v34  ;;  %v6640_v58 = vmul.f32 %v12541_v49, %v12541_v49 }
 0x34d   : > { %v5748_v10 = vrot.slane %v12518_v14, 2  ;;  %v6426_v3 = vadd.f32 %v6425_v25, %v6424_v41  ;;  %v6527_v59 = vadd.f32 %v6526_v51, %v6525_v16  ;;  %v6528_v23 = vsel %vm6339_vm6, %v6470_v61, 0.0 }
 0x34e   : > { %v6591_v2 = vadd.f32 %v6590_v38, %v6589_v6  ;;  %v6592_v52 = vsel %vm6339_vm6, %v6300_v30, 0.0  ;;  %v6639_v28 = vmul.f32 %v6300_v30, %v6300_v30  ;;  %v5972_v14 = vrot.slane %v5847_v62, 7  ;;  %v6320_v30 = vpop.f32.mrf.mxu1  ;;  %v5620_v62 = vpop.f32.mrf.mxu0 }
 0x34f   : > { %v5749_v37 = vsel %vm2055_vm4, %v5747_v9, %v5748_v10  ;;  %v5751_v12 = vsel %vm2055_vm4, %v5748_v10, %v5750_v22  ;;  %v6529_v44 = vadd.f32 %v6528_v23, %v6527_v59  ;;  %v6693_v35 = vadd.f32 %v6692_v50, %v6691_v19 }
 0x350   : > { %v5848_v54 = vadd.f32 %v5749_v37, %v12316_v45  ;;  %v5849_v49 = vadd.f32 %v5751_v12, %v12311_v46  ;;  %v6593_v27 = vadd.f32 %v6592_v52, %v6591_v2  ;;  %v6694_v16 = vsel %vm6339_vm6, %v6639_v28, 0.0  ;;  %v9060_v38 = vpop.f32.mrf.mxu1 }
 0x351   : > { %v5752_v8 = vrot.slane %v12528_v55, 2  ;;  %v6642_v7 = vmul.f32 %v9054_v32, %v9054_v32  ;;  %v6696_v9 = vsel %vm6339_vm6, %v6640_v58, 0.0  ;;  %v6695_v45 = vadd.f32 %v6694_v16, %v6693_v35 }
 0x352   : > { %v5973_v33 = vrot.slane %v5848_v54, 7  ;;  %v5975_v4 = vrot.slane %v5849_v49, 7  ;;  %v6595_v40 = vadd.f32 %v6594_v31, %v6593_v27  ;;  %v6596_v46 = vsel %vm6339_vm6, %v6310_v15, 0.0  ;;  %v6330_v31 = vpop.f32.mrf.mxu1 }
 0x353   : > { %v6641_v60 = vmul.f32 %v6310_v15, %v6310_v15  ;;  %v5850_v43 = vadd.f32 %v5752_v8, %v12324_v5  ;;  %v6598_v55 = vsel %vm6339_vm6, %v9054_v32, 0.0  ;;  %v6700_v48 = vsel %vm6339_vm6, %v6642_v7, 0.0 }
 0x354   : > { %v5974_v63 = vsel %vm5901_vm5, %v5972_v14, %v5973_v33  ;;  %v5976_v39 = vsel %vm5901_vm5, %v5973_v33, %v5975_v4  ;;  %v6597_v57 = vadd.f32 %v6596_v46, %v6595_v40  ;;  %v6697_v42 = vadd.f32 %v6696_v9, %v6695_v45 }
 0x355   : > { %6368 = vst.msk [vmem:[%s12134_s8 + $0xe0] sm:$0xff] %vm6339_vm6, %v5974_v63  ;;  %6369 = vst.msk [vmem:[%s12134_s8 + $0xe8] sm:$0xff] %vm6339_vm6, %v5976_v39  ;;  %v6427_v1 = vsel %vm6339_vm6, %v5974_v63, 0.0  ;;  %v6471_v13 = vmul.f32 %v5974_v63, %v5974_v63  ;;  %v6472_v0 = vmul.f32 %v5976_v39, %v5976_v39  ;;  %v6698_v26 = vsel %vm6339_vm6, %v6641_v60, 0.0 }
 0x356   : > { %v6428_v11 = vadd.f32 %v6427_v1, %v6426_v3  ;;  %v6429_v5 = vsel %vm6339_vm6, %v5976_v39, 0.0  ;;  %v5755_v56 = vrot.slane %v9010_v36, 2  ;;  %v6699_v6 = vadd.f32 %v6698_v26, %v6697_v42 }
 0x357   : > { %v6530_v32 = vsel %vm6339_vm6, %v6471_v13, 0.0  ;;  %v6532_v50 = vsel %vm6339_vm6, %v6472_v0, 0.0  ;;  %v6644_v34 = vmul.f32 %v9057_v17, %v9057_v17  ;;  %v5753_v15 = vrot.slane %v5620_v62, 2 }
 0x358   : > { %v6430_v29 = vadd.f32 %v6429_v5, %v6428_v11  ;;  %v6531_v53 = vadd.f32 %v6530_v32, %v6529_v44  ;;  %v6599_v24 = vadd.f32 %v6598_v55, %v6597_v57  ;;  %v6600_v21 = vsel %vm6339_vm6, %v6320_v30, 0.0 }
 0x359   : > { %v6643_v61 = vmul.f32 %v6320_v30, %v6320_v30  ;;  %v6602_v41 = vsel %vm6339_vm6, %v9057_v17, 0.0  ;;  %v6704_v25 = vsel %vm6339_vm6, %v6644_v34, 0.0  ;;  %v6701_v20 = vadd.f32 %v6700_v48, %v6699_v6 }
 0x35a   : > { %v6533_v22 = vadd.f32 %v6532_v50, %v6531_v53  ;;  %v5754_v51 = vsel %vm2055_vm4, %v5752_v8, %v5753_v15  ;;  %v5756_v19 = vsel %vm2055_vm4, %v5753_v15, %v5755_v56  ;;  %v6601_v58 = vadd.f32 %v6600_v21, %v6599_v24 }
 0x35b   : > { %v6702_v10 = vsel %vm6339_vm6, %v6643_v61, 0.0  ;;  %v5851_v3 = vadd.f32 %v5754_v51, %v12344_v18  ;;  %v5852_v59 = vadd.f32 %v5756_v19, %v12368_v47  ;;  %v6646_v2 = vmul.f32 %v9060_v38, %v9060_v38 }
 0x35c   : > { %v6703_v23 = vadd.f32 %v6702_v10, %v6701_v20  ;;  %v6603_v17 = vadd.f32 %v6602_v41, %v6601_v58  ;;  %v6604_v37 = vsel %vm6339_vm6, %v6330_v31, 0.0  ;;  %v6645_v12 = vmul.f32 %v6330_v31, %v6330_v31 }
 0x35d   : > { %v5977_v52 = vrot.slane %v5850_v43, 7  ;;  %v5978_v28 = vrot.slane %v5851_v3, 7  ;;  %v5980_v44 = vrot.slane %v5852_v59, 7  ;;  %v6606_v49 = vsel %vm6339_vm6, %v9060_v38, 0.0 }
 0x35e   : > { %v6705_v54 = vadd.f32 %v6704_v25, %v6703_v23  ;;  %v6708_v27 = vsel %vm6339_vm6, %v6646_v2, 0.0  ;;  %v6605_v14 = vadd.f32 %v6604_v37, %v6603_v17  ;;  %v6706_v18 = vsel %vm6339_vm6, %v6645_v12, 0.0 }
 0x35f   : > { %v5979_v47 = vsel %vm5901_vm5, %v5977_v52, %v5978_v28  ;;  %v5981_v35 = vsel %vm5901_vm5, %v5978_v28, %v5980_v44 }
 0x360   : > { %v6707_v16 = vadd.f32 %v6706_v18, %v6705_v54  ;;  %6370 = vst.msk [vmem:[%s12134_s8 + $0xf0] sm:$0xff] %vm6339_vm6, %v5979_v47  ;;  %6371 = vst.msk [vmem:[%s12134_s8 + $0xf8] sm:$0xff] %vm6339_vm6, %v5981_v35  ;;  %v6431_v8 = vsel %vm6339_vm6, %v5979_v47, 0.0  ;;  %v6473_v33 = vmul.f32 %v5979_v47, %v5979_v47  ;;  %v6474_v4 = vmul.f32 %v5981_v35, %v5981_v35 }
 0x361   : > { %v6432_v7 = vadd.f32 %v6431_v8, %v6430_v29  ;;  %v6607_v40 = vadd.f32 %v6606_v49, %v6605_v14  ;;  %v6433_v30 = vsel %vm6339_vm6, %v5981_v35, 0.0 }
 0x362   : > { %v6709_v36 = vadd.f32 %v6708_v27, %v6707_v16  ;;  %v6534_v9 = vsel %vm6339_vm6, %v6473_v33, 0.0  ;;  %v6536_v39 = vsel %vm6339_vm6, %v6474_v4, 0.0 }
 0x363   : > { %v6434_v45 = vadd.f32 %v6433_v30, %v6432_v7  ;;  %v6535_v46 = vadd.f32 %v6534_v9, %v6533_v22  ;;  %v6608_v60 = vrot.slane %v6607_v40, 4 }
 0x364   : > { %v6710_v63 = vrot.slane %v6709_v36, 4 }
 0x365   : > { %v6435_v43 = vrot.slane %v6434_v45, 4  ;;  %v6537_v55 = vadd.f32 %v6536_v39, %v6535_v46  ;;  %v6609_v1 = vadd.f32 %v6608_v60, %v6607_v40 }
 0x366   : > { %v6711_v13 = vadd.f32 %v6710_v63, %v6709_v36 }
 0x367   : > { %v6436_v0 = vadd.f32 %v6435_v43, %v6434_v45  ;;  %v6538_v57 = vrot.slane %v6537_v55, 4  ;;  %v6610_v11 = vrot.slane %v6609_v1, 2 }
 0x368   : > { %v6712_v48 = vrot.slane %v6711_v13, 2 }
 0x369   : > { %v6437_v42 = vrot.slane %v6436_v0, 2  ;;  %v6539_v26 = vadd.f32 %v6538_v57, %v6537_v55  ;;  %v6611_v62 = vadd.f32 %v6610_v11, %v6609_v1 }
 0x36a   : > { %v6713_v38 = vadd.f32 %v6712_v48, %v6711_v13 }
 0x36b   : > { %v6438_v5 = vadd.f32 %v6437_v42, %v6436_v0  ;;  %v6540_v32 = vrot.slane %v6539_v26, 2  ;;  %v6612_v50 = vrot.slane %v6611_v62, 1 }
 0x36c   : > { %v6714_v56 = vrot.slane %v6713_v38, 1 }
 0x36d   : > { %v6439_v29 = vrot.slane %v6438_v5, 1  ;;  %v6541_v53 = vadd.f32 %v6540_v32, %v6539_v26  ;;  %v6613_v6 = vadd.f32 %v6612_v50, %v6611_v62 }
 0x36e   : > { %v6715_v34 = vadd.f32 %v6714_v56, %v6713_v38 }
 0x36f   : > { %v6440_v15 = vadd.f32 %v6439_v29, %v6438_v5  ;;  %v6542_v24 = vrot.slane %v6541_v53, 1  ;;  %6614 = vst.msk [vmem:[%s308_s11] sm:$0x1] %vm6441_vm7, %v6613_v6 }
 0x370   : > { %6716 = vst.msk [vmem:[%s311_s14] sm:$0x1] %vm6441_vm7, %v6715_v34 }
 0x371   : > { %v6543_v21 = vadd.f32 %v6542_v24, %v6541_v53  ;;  %6442 = vst.msk [vmem:[%s302_s17] sm:$0x1] %vm6441_vm7, %v6440_v15 }
 0x373   : > { %6544 = vst.msk [vmem:[%s305_s20] sm:$0x1] %vm6441_vm7, %v6543_v21 }
 0x374 PF: > { %s18_s24 = sadd.s32 1, %s9137_s24  }
 0x375   : > { %p15_p4 = scmp.ge.s32.totalorder %s18_s24, 4  }
 0x377   :  { %17 = sbr.rel (!%p15_p4) target bundleno = 1 (0x1), region = 121 }

// kernel: residual_block_forward.4
= control target key start
LH: loop header
LB: loop body
LE: loop exit
PB: predicated region body
PF: predicated region fallthrough
CT: control target
= control target key end

     0   :  { %s8558_s21 = smov 0   ;;  %s11171_s0 = inlined_call_operand.vmem [shape: f32[2,256,8], index: 0, kind: input, shape index: {}]   ;;  %s11172_s1 = inlined_call_operand.vmem [shape: f32[1,8], index: 1, kind: input, shape index: {}]   ;;  %s11173_s2 = inlined_call_operand.vmem [shape: f32[1,8], index: 2, kind: input, shape index: {}]   ;;  %s11174_s3 = inlined_call_operand.vmem [shape: f32[3,3,8,8], index: 3, kind: input, shape index: {}]   ;;  %s11175_s4 = inlined_call_operand.vmem [shape: f32[2,256,8], index: 4, kind: output, shape index: {0}]   ;;  %s11176_s5 = inlined_call_operand.vmem [shape: f32[2,1,8], index: 5, kind: output, shape index: {1}]   ;;  %s11177_s6 = inlined_call_operand.vmem [shape: f32[2,1,8], index: 6, kind: output, shape index: {2}]  }
   0x1 LB: > { %s6362_s22 = sadd.s32 4294967295, %s8520_s21   ;;  %p6366_p0 = scmp.ge.s32.totalorder %s8520_s21, 1  ;;  %s8520_s21 = sphi %s8558_s21, %s17_s21  }
   0x2   : > { %p217_p1 = scmp.lt.s32.totalorder %s8520_s21, 3 }
   0x4   : > { %p218_p2 = pnand %p6366_p0, %p217_p1 }
   0x6   : > { %221 = sbr.rel (%p218_p2) target bundleno = 837 (0x345), region = 36 }
   0xb   : > { %v551_v0 = vld [vmem:[%s11174_s3] sm:$0xff]  ;;  %vm411_vm0 = vcmask 64512   ;;  %vm422_vm1 = vcmask 57344   ;;  %v8572_v1 = vld [vmem:[%s11174_s3 + $0x8] sm:$0xff]  ;;  %p8576_p3 = scmp.lt.s32.totalorder %s6362_s22, 1  ;;  %v8522_v2 = vmov 0.0  }
   0xc   : > { %7546 = vmatprep.subr.mxu0 %v551_v0  ;;  %412 = vst.msk [vmem:[#allocation2] sm:$0xff] %vm411_vm0, %v8522_v2  ;;  %413 = vst.msk [vmem:[#allocation2 + $0x8] sm:$0xff] %vm411_vm0, %v8522_v2  ;;  %8428 = vmatprep.subr.mxu1 %v551_v0  ;;  %v6502_v3 = vld [vmem:[%s11174_s3 + $0x10] sm:$0xff]  ;;  %v8634_v4 = vld [vmem:[%s11172_s1] ss:$0 sm:$0xff]  ;;  %vm2112_vm2 = vcmask 1045504  }
   0xd   : > { %414 = vst.msk [vmem:[#allocation2 + $0x10] sm:$0xff] %vm411_vm0, %v8522_v2  ;;  %415 = vst.msk [vmem:[#allocation2 + $0x18] sm:$0xff] %vm411_vm0, %v8522_v2  ;;  %7547 = vmatpush3.msra.mxu0 %v551_v0  ;;  %8429 = vmatpush3.msra.mxu1 %v551_v0  ;;  %s11509_s22 = smov (!%p8576_p3, %s6362_s22), 1  ;;  %v8646_v5 = vld [vmem:[%s11173_s2] ss:$0 sm:$0xff]  ;;  %vm1548_vm3 = vcmask 1046528  }
   0xe   : > { %417 = vst.msk [vmem:[#allocation2 + $0x220] sm:$0xff] %vm411_vm0, %v8522_v2  ;;  %418 = vst.msk [vmem:[#allocation2 + $0x228] sm:$0xff] %vm411_vm0, %v8522_v2  ;;  %7644 = vmatprep.subr.mxu1 %v8572_v1  ;;  %7742 = vmatprep.subr.mxu0 %v6502_v3  ;;  %s6959_s30 = sshll.u32 %s11509_s22, 8  ;;  %v8676_v25 = vld [vmem:[%s11174_s3 + $0x20] sm:$0xff]  ;;  %vm5940_vm4 = vcmask 1040384   ;;  %s265_s9 = scalar_lea.vmem %s11176_s5, %s11509_s22 }
   0xf   : > { %419 = vst.msk [vmem:[#allocation2 + $0x230] sm:$0xff] %vm411_vm0, %v8522_v2  ;;  %420 = vst.msk [vmem:[#allocation2 + $0x238] sm:$0xff] %vm411_vm0, %v8522_v2  ;;  %s8641_s11 = scalar_lea.vmem %s11171_s0, %s6959_s30  ;;  %s10862_s7 = scalar_lea.vmem %s11175_s4, %s6959_s30 }
  0x10   : > { %430 = vst.msk [vmem:[#allocation2 + $0x107] sm:$0x1] %vm422_vm1, %v8522_v2  ;;  %423 = vst.msk [vmem:[#allocation2 + $0x27] sm:$0x1] %vm422_vm1, %v8522_v2  ;;  %v283_v6 = vld [vmem:[%s8641_s11 + $0x70] sm:$0xff]  ;;  %v269_v7 = vld [vmem:[%s8641_s11] sm:$0xff]  ;;  %s268_s12 = scalar_lea.vmem %s11177_s6, %s11509_s22 }
  0x11   : > { %424 = vst.msk [vmem:[#allocation2 + $0x47] sm:$0x1] %vm422_vm1, %v8522_v2  ;;  %425 = vst.msk [vmem:[#allocation2 + $0x67] sm:$0x1] %vm422_vm1, %v8522_v2  ;;  %v284_v8 = vld [vmem:[%s8641_s11 + $0x78] sm:$0xff]  ;;  %v322_v9 = vmul.f32 %v8634_v4, %v283_v6  ;;  %v308_v10 = vmul.f32 %v8634_v4, %v269_v7  ;;  %v270_v12 = vld [vmem:[%s8641_s11 + $0x8] sm:$0xff] }
  0x12   : > { %426 = vst.msk [vmem:[#allocation2 + $0x87] sm:$0x1] %vm422_vm1, %v8522_v2  ;;  %427 = vst.msk [vmem:[#allocation2 + $0xa7] sm:$0x1] %vm422_vm1, %v8522_v2  ;;  %v323_v11 = vmul.f32 %v8634_v4, %v284_v8  ;;  %v285_v13 = vld [vmem:[%s8641_s11 + $0x80] sm:$0xff]  ;;  %v271_v14 = vld [vmem:[%s8641_s11 + $0x10] sm:$0xff]  ;;  %v309_v18 = vmul.f32 %v8634_v4, %v270_v12 }
  0x13   : > { %428 = vst.msk [vmem:[#allocation2 + $0xc7] sm:$0x1] %vm422_vm1, %v8522_v2  ;;  %429 = vst.msk [vmem:[#allocation2 + $0xe7] sm:$0x1] %vm422_vm1, %v8522_v2  ;;  %v8657_v15 = vld [vmem:[#allocation2] sm:$0xff]  ;;  %v8659_v16 = vld [vmem:[#allocation2 + $0x8] sm:$0xff]  ;;  %v324_v19 = vmul.f32 %v8634_v4, %v285_v13  ;;  %v310_v20 = vmul.f32 %v8634_v4, %v271_v14  ;;  %v361_v22 = vadd.f32 %v8646_v5, %v322_v9 }
  0x14   : > { %431 = vst.msk [vmem:[#allocation2 + $0x127] sm:$0x1] %vm422_vm1, %v8522_v2  ;;  %432 = vst.msk [vmem:[#allocation2 + $0x147] sm:$0x1] %vm422_vm1, %v8522_v2  ;;  %v8661_v17 = vld [vmem:[#allocation2 + $0x10] sm:$0xff]  ;;  %7548 = vmatprep.mubr.msk.f32.mxu0 %vm411_vm0, %v8657_v15  ;;  %v347_v23 = vadd.f32 %v8646_v5, %v308_v10  ;;  %v362_v24 = vadd.f32 %v8646_v5, %v323_v11  ;;  %v348_v26 = vadd.f32 %v8646_v5, %v309_v18  ;;  %v8687_v29 = vld [vmem:[#allocation2 + $0x18] sm:$0xff] }
  0x15   : > { %433 = vst.msk [vmem:[#allocation2 + $0x167] sm:$0x1] %vm422_vm1, %v8522_v2  ;;  %434 = vst.msk [vmem:[#allocation2 + $0x187] sm:$0x1] %vm422_vm1, %v8522_v2  ;;  %7549 = vmatmul.mubr.msk.f32.vlgmr.msra.gmra.mxu0 %vm411_vm0, %v8659_v16  ;;  %v363_v27 = vadd.f32 %v8646_v5, %v324_v19  ;;  %v349_v28 = vadd.f32 %v8646_v5, %v310_v20  ;;  %v393_v30 = vmax.f32 %v361_v22, 0.0  ;;  %v286_v33 = vld [vmem:[%s8641_s11 + $0x88] sm:$0xff] }
  0x16   : > { %435 = vst.msk [vmem:[#allocation2 + $0x1a7] sm:$0x1] %vm422_vm1, %v8522_v2  ;;  %436 = vst.msk [vmem:[#allocation2 + $0x1c7] sm:$0x1] %vm422_vm1, %v8522_v2  ;;  %7551 = vmatprep.mubr.msk.f32.mxu0 %vm411_vm0, %v8661_v17  ;;  %v379_v31 = vmax.f32 %v347_v23, 0.0  ;;  %7743 = vmatpush3.msra.mxu0 %v6502_v3  ;;  %v394_v32 = vmax.f32 %v362_v24, 0.0  ;;  %v325_v39 = vmul.f32 %v8634_v4, %v286_v33 }
  0x17   : > { %437 = vst.msk [vmem:[#allocation2 + $0x1e7] sm:$0x1] %vm422_vm1, %v8522_v2  ;;  %438 = vst.msk [vmem:[#allocation2 + $0x207] sm:$0x1] %vm422_vm1, %v8522_v2  ;;  %v8668_v21 = vld [vmem:[#allocation2 + $0x100] sm:$0xff]  ;;  %v272_v34 = vld [vmem:[%s8641_s11 + $0x18] sm:$0xff]  ;;  %7938 = vmatprep.subr.mxu0 %v8676_v25 }
  0x18   : > { %439 = vst.msk [vmem:[#allocation2 + $0x38] sm:$0x1] %vm422_vm1, %v8522_v2  ;;  %440 = vst.msk [vmem:[#allocation2 + $0x58] sm:$0x1] %vm422_vm1, %v8522_v2  ;;  %7596 = vmatprep.mubr.msk.f32.mxu1 %vm411_vm0, %v8668_v21  ;;  %v8691_v35 = vld [vmem:[#allocation2 + $0x20] sm:$0xff]  ;;  %v380_v36 = vmax.f32 %v348_v26, 0.0  ;;  %v311_v40 = vmul.f32 %v8634_v4, %v272_v34  ;;  %v364_v43 = vadd.f32 %v8646_v5, %v325_v39 }
  0x19   : > { %441 = vst.msk [vmem:[#allocation2 + $0x78] sm:$0x1] %vm422_vm1, %v8522_v2  ;;  %442 = vst.msk [vmem:[#allocation2 + $0x98] sm:$0x1] %vm422_vm1, %v8522_v2  ;;  %v395_v37 = vmax.f32 %v363_v27, 0.0  ;;  %v381_v38 = vmax.f32 %v349_v28, 0.0  ;;  %7552 = vmatmul.mubr.msk.f32.gmra.mxu0 %vm411_vm0, %v8687_v29 }
  0x1a   : > { %443 = vst.msk [vmem:[#allocation2 + $0xb8] sm:$0x1] %vm422_vm1, %v8522_v2  ;;  %444 = vst.msk [vmem:[#allocation2 + $0xd8] sm:$0x1] %vm422_vm1, %v8522_v2  ;;  %v287_v41 = vld [vmem:[%s8641_s11 + $0x90] sm:$0xff]  ;;  %v273_v42 = vld [vmem:[%s8641_s11 + $0x20] sm:$0xff]  ;;  %7554 = vmatprep.mubr.msk.f32.mxu0 %vm411_vm0, %v8691_v35  ;;  %v350_v48 = vadd.f32 %v8646_v5, %v311_v40 }
  0x1b   : > { %445 = vst.msk [vmem:[#allocation2 + $0xf8] sm:$0x1] %vm422_vm1, %v8522_v2  ;;  %446 = vst.msk [vmem:[#allocation2 + $0x118] sm:$0x1] %vm422_vm1, %v8522_v2  ;;  %v326_v44 = vmul.f32 %v8634_v4, %v287_v41  ;;  %v312_v45 = vmul.f32 %v8634_v4, %v273_v42  ;;  %v288_v46 = vld [vmem:[%s8641_s11 + $0x98] sm:$0xff]  ;;  %v274_v47 = vld [vmem:[%s8641_s11 + $0x28] sm:$0xff] }
  0x1c   : > { %447 = vst.msk [vmem:[#allocation2 + $0x138] sm:$0x1] %vm422_vm1, %v8522_v2  ;;  %448 = vst.msk [vmem:[#allocation2 + $0x158] sm:$0x1] %vm422_vm1, %v8522_v2  ;;  %v327_v49 = vmul.f32 %v8634_v4, %v288_v46  ;;  %v313_v50 = vmul.f32 %v8634_v4, %v274_v47  ;;  %v396_v51 = vmax.f32 %v364_v43, 0.0  ;;  %v289_v54 = vld [vmem:[%s8641_s11 + $0xa0] sm:$0xff] }
  0x1d   : > { %449 = vst.msk [vmem:[#allocation2 + $0x178] sm:$0x1] %vm422_vm1, %v8522_v2  ;;  %450 = vst.msk [vmem:[#allocation2 + $0x198] sm:$0x1] %vm422_vm1, %v8522_v2  ;;  %v365_v52 = vadd.f32 %v8646_v5, %v326_v44  ;;  %v351_v53 = vadd.f32 %v8646_v5, %v312_v45  ;;  %v275_v55 = vld [vmem:[%s8641_s11 + $0x30] sm:$0xff]  ;;  %v290_v56 = vld [vmem:[%s8641_s11 + $0xa8] sm:$0xff]  ;;  %v328_v60 = vmul.f32 %v8634_v4, %v289_v54 }
  0x1e   : > { %451 = vst.msk [vmem:[#allocation2 + $0x1b8] sm:$0x1] %vm422_vm1, %v8522_v2  ;;  %452 = vst.msk [vmem:[#allocation2 + $0x1d8] sm:$0x1] %vm422_vm1, %v8522_v2  ;;  %v382_v57 = vmax.f32 %v350_v48, 0.0  ;;  %v366_v58 = vadd.f32 %v8646_v5, %v327_v49  ;;  %v352_v59 = vadd.f32 %v8646_v5, %v313_v50  ;;  %v276_v61 = vld [vmem:[%s8641_s11 + $0x38] sm:$0xff]  ;;  %v314_v0 = vmul.f32 %v8634_v4, %v275_v55 }
  0x1f   : > { %453 = vst.msk [vmem:[#allocation2 + $0x1f8] sm:$0x1] %vm422_vm1, %v8522_v2  ;;  %454 = vst.msk [vmem:[#allocation2 + $0x218] sm:$0x1] %vm422_vm1, %v8522_v2  ;;  %v397_v62 = vmax.f32 %v365_v52, 0.0  ;;  %v383_v63 = vmax.f32 %v351_v53, 0.0  ;;  %v329_v2 = vmul.f32 %v8634_v4, %v290_v56  ;;  %v367_v9 = vadd.f32 %v8646_v5, %v328_v60 }
  0x20   : > { %11260 = vst [vmem:[#allocation3_spill] sm:$0xff] %v8646_v5  ;;  %469 = vst.msk [vmem:[#allocation2 + $0x108] sm:$0xff] %vm411_vm0, %v393_v30  ;;  %v291_v3 = vld [vmem:[%s8641_s11 + $0xb0] sm:$0xff]  ;;  %v8732_v6 = vld [vmem:[%s11174_s3 + $0x18] sm:$0xff]  ;;  %v398_v7 = vmax.f32 %v366_v58, 0.0  ;;  %v384_v8 = vmax.f32 %v352_v59, 0.0  ;;  %v315_v10 = vmul.f32 %v8634_v4, %v276_v61  ;;  %v353_v20 = vadd.f32 %v8646_v5, %v314_v0 }
  0x21   : > { %455 = vst.msk [vmem:[#allocation2 + $0x28] sm:$0xff] %vm411_vm0, %v379_v31  ;;  %470 = vst.msk [vmem:[#allocation2 + $0x110] sm:$0xff] %vm411_vm0, %v394_v32  ;;  %v277_v11 = vld [vmem:[%s8641_s11 + $0x40] sm:$0xff]  ;;  %v292_v12 = vld [vmem:[%s8641_s11 + $0xb8] sm:$0xff]  ;;  %v368_v22 = vadd.f32 %v8646_v5, %v329_v2  ;;  %v330_v23 = vmul.f32 %v8634_v4, %v291_v3  ;;  %v399_v27 = vmax.f32 %v367_v9, 0.0 }
  0x22   : > { %456 = vst.msk [vmem:[#allocation2 + $0x30] sm:$0xff] %vm411_vm0, %v380_v36  ;;  %471 = vst.msk [vmem:[#allocation2 + $0x128] sm:$0xff] %vm411_vm0, %v395_v37  ;;  %v278_v13 = vld [vmem:[%s8641_s11 + $0x48] sm:$0xff]  ;;  %v316_v24 = vmul.f32 %v8634_v4, %v277_v11  ;;  %v354_v28 = vadd.f32 %v8646_v5, %v315_v10  ;;  %v331_v30 = vmul.f32 %v8634_v4, %v292_v12  ;;  %v8766_v32 = vld [vmem:[#allocation2 + $0x118] sm:$0xff]  ;;  %v385_v36 = vmax.f32 %v353_v20, 0.0 }
  0x23   : > { %457 = vst.msk [vmem:[#allocation2 + $0x48] sm:$0xff] %vm411_vm0, %v381_v38  ;;  %472 = vst.msk [vmem:[#allocation2 + $0x130] sm:$0xff] %vm411_vm0, %v396_v51  ;;  %v317_v31 = vmul.f32 %v8634_v4, %v278_v13  ;;  %v8768_v33 = vld [vmem:[#allocation2 + $0x38] sm:$0xff]  ;;  %v8770_v34 = vld [vmem:[#allocation2 + $0x120] sm:$0xff]  ;;  %v400_v37 = vmax.f32 %v368_v22, 0.0  ;;  %v369_v38 = vadd.f32 %v8646_v5, %v330_v23 }
  0x24   : > { %458 = vst.msk [vmem:[#allocation2 + $0x50] sm:$0xff] %vm411_vm0, %v382_v57  ;;  %473 = vst.msk [vmem:[#allocation2 + $0x148] sm:$0xff] %vm411_vm0, %v397_v62  ;;  %v355_v39 = vadd.f32 %v8646_v5, %v316_v24  ;;  %v386_v40 = vmax.f32 %v354_v28, 0.0  ;;  %v370_v41 = vadd.f32 %v8646_v5, %v331_v30  ;;  %v293_v43 = vld [vmem:[%s8641_s11 + $0xc0] sm:$0xff]  ;;  %v279_v44 = vld [vmem:[%s8641_s11 + $0x50] sm:$0xff] }
  0x25   : > { %459 = vst.msk [vmem:[#allocation2 + $0x68] sm:$0xff] %vm411_vm0, %v383_v63  ;;  %474 = vst.msk [vmem:[#allocation2 + $0x150] sm:$0xff] %vm411_vm0, %v398_v7  ;;  %v356_v42 = vadd.f32 %v8646_v5, %v317_v31  ;;  %v401_v45 = vmax.f32 %v369_v38, 0.0  ;;  %v332_v47 = vmul.f32 %v8634_v4, %v293_v43  ;;  %v318_v48 = vmul.f32 %v8634_v4, %v279_v44  ;;  %v294_v49 = vld [vmem:[%s8641_s11 + $0xc8] sm:$0xff]  ;;  %v280_v50 = vld [vmem:[%s8641_s11 + $0x58] sm:$0xff] }
  0x26   : > { %460 = vst.msk [vmem:[#allocation2 + $0x70] sm:$0xff] %vm411_vm0, %v384_v8  ;;  %475 = vst.msk [vmem:[#allocation2 + $0x168] sm:$0xff] %vm411_vm0, %v399_v27  ;;  %v387_v46 = vmax.f32 %v355_v39, 0.0  ;;  %v402_v51 = vmax.f32 %v370_v41, 0.0  ;;  %v333_v53 = vmul.f32 %v8634_v4, %v294_v49  ;;  %v319_v54 = vmul.f32 %v8634_v4, %v280_v50  ;;  %v295_v59 = vld [vmem:[%s8641_s11 + $0xd0] sm:$0xff]  ;;  %v281_v2 = vld [vmem:[%s8641_s11 + $0x60] sm:$0xff] }
  0x27   : > { %v8740_v14 = vld [vmem:[#allocation2 + $0x108] sm:$0xff]  ;;  %461 = vst.msk [vmem:[#allocation2 + $0x88] sm:$0xff] %vm411_vm0, %v385_v36  ;;  %476 = vst.msk [vmem:[#allocation2 + $0x170] sm:$0xff] %vm411_vm0, %v400_v37  ;;  %v388_v52 = vmax.f32 %v356_v42, 0.0  ;;  %v371_v57 = vadd.f32 %v8646_v5, %v332_v47  ;;  %v357_v58 = vadd.f32 %v8646_v5, %v318_v48  ;;  %v334_v0 = vmul.f32 %v8634_v4, %v295_v59  ;;  %v296_v9 = vld [vmem:[%s8641_s11 + $0xd8] sm:$0xff] }
  0x28   : > { %v8742_v18 = vld [vmem:[#allocation2 + $0x28] sm:$0xff]  ;;  %v8744_v19 = vld [vmem:[#allocation2 + $0x110] sm:$0xff]  ;;  %7597 = vmatmul.mubr.msk.f32.vlgmr.msra.gmra.mxu1 %vm411_vm0, %v8740_v14  ;;  %462 = vst.msk [vmem:[#allocation2 + $0x90] sm:$0xff] %vm411_vm0, %v386_v40  ;;  %477 = vst.msk [vmem:[#allocation2 + $0x188] sm:$0xff] %vm411_vm0, %v401_v45  ;;  %v372_v62 = vadd.f32 %v8646_v5, %v333_v53  ;;  %v358_v63 = vadd.f32 %v8646_v5, %v319_v54  ;;  %v320_v8 = vmul.f32 %v8634_v4, %v281_v2 }
  0x29   : > { %7555 = vmatmul.mubr.msk.f32.gmra.mxu0 %vm411_vm0, %v8742_v18  ;;  %v8756_v26 = vld [vmem:[#allocation2 + $0x30] sm:$0xff]  ;;  %7645 = vmatpush3.msra.mxu1 %v8572_v1  ;;  %v8776_v1 = vld [vmem:[#allocation2 + $0x40] sm:$0xff]  ;;  %v8801_v55 = vld [vmem:[#allocation2 + $0x128] sm:$0xff]  ;;  %463 = vst.msk [vmem:[#allocation2 + $0xa8] sm:$0xff] %vm411_vm0, %v387_v46  ;;  %v403_v3 = vmax.f32 %v371_v57, 0.0  ;;  %v389_v7 = vmax.f32 %v357_v58, 0.0  ;;  %v373_v12 = vadd.f32 %v8646_v5, %v334_v0  ;;  %v335_v13 = vmul.f32 %v8634_v4, %v296_v9 }
  0x2a   : > { %7599 = vmatprep.mubr.msk.f32.mxu1 %vm411_vm0, %v8744_v19  ;;  %7557 = vmatprep.mubr.msk.f32.mxu0 %vm411_vm0, %v8756_v26  ;;  %v8803_v56 = vld [vmem:[#allocation2 + $0x48] sm:$0xff]  ;;  %v8810_v60 = vld [vmem:[#allocation2 + $0x130] sm:$0xff]  ;;  %478 = vst.msk [vmem:[#allocation2 + $0x190] sm:$0xff] %vm411_vm0, %v402_v51  ;;  %464 = vst.msk [vmem:[#allocation2 + $0xb0] sm:$0xff] %vm411_vm0, %v388_v52  ;;  %v404_v10 = vmax.f32 %v372_v62, 0.0  ;;  %v390_v11 = vmax.f32 %v358_v63, 0.0  ;;  %v359_v24 = vadd.f32 %v8646_v5, %v320_v8 }
  0x2b   : > { %7840 = vmatprep.subr.mxu1 %v8732_v6  ;;  %v8812_v61 = vld [vmem:[#allocation2 + $0x50] sm:$0xff]  ;;  %v282_v20 = vld [vmem:[%s8641_s11 + $0x68] sm:$0xff]  ;;  %v8833_v22 = vld [vmem:[#allocation2 + $0x138] sm:$0xff]  ;;  %479 = vst.msk [vmem:[#allocation2 + $0x1a8] sm:$0xff] %vm411_vm0, %v403_v3  ;;  %v405_v36 = vmax.f32 %v373_v12, 0.0  ;;  %v374_v37 = vadd.f32 %v8646_v5, %v335_v13 }
  0x2c   : > { %7600 = vmatmul.mubr.msk.f32.gmra.mxu1 %vm411_vm0, %v8766_v32  ;;  %v8835_v23 = vld [vmem:[#allocation2 + $0x58] sm:$0xff]  ;;  %465 = vst.msk [vmem:[#allocation2 + $0xc8] sm:$0xff] %vm411_vm0, %v389_v7  ;;  %v321_v27 = vmul.f32 %v8634_v4, %v282_v20  ;;  %v297_v28 = vld [vmem:[%s8641_s11 + $0xe0] sm:$0xff]  ;;  %480 = vst.msk [vmem:[#allocation2 + $0x1b0] sm:$0xff] %vm411_vm0, %v404_v10  ;;  %v391_v40 = vmax.f32 %v359_v24, 0.0 }
  0x2d   : > { %7558 = vmatmul.mubr.msk.f32.gmra.mxu0 %vm411_vm0, %v8768_v33  ;;  %7602 = vmatprep.mubr.msk.f32.mxu1 %vm411_vm0, %v8770_v34  ;;  %v8842_v30 = vld [vmem:[#allocation2 + $0x140] sm:$0xff]  ;;  %466 = vst.msk [vmem:[#allocation2 + $0xd0] sm:$0xff] %vm411_vm0, %v390_v11  ;;  %v336_v38 = vmul.f32 %v8634_v4, %v297_v28  ;;  %v298_v39 = vld [vmem:[%s8641_s11 + $0xe8] sm:$0xff]  ;;  %481 = vst.msk [vmem:[#allocation2 + $0x1c8] sm:$0xff] %vm411_vm0, %v405_v36  ;;  %v406_v43 = vmax.f32 %v374_v37, 0.0 }
  0x2e   : > { %7560 = vmatprep.mubr.msk.f32.mxu0 %vm411_vm0, %v8776_v1  ;;  %v8844_v31 = vld [vmem:[#allocation2 + $0x60] sm:$0xff]  ;;  %v360_v41 = vadd.f32 %v8646_v5, %v321_v27  ;;  %v337_v42 = vmul.f32 %v8634_v4, %v298_v39  ;;  %v8863_v45 = vld [vmem:[#allocation2 + $0x148] sm:$0xff]  ;;  %467 = vst.msk [vmem:[#allocation2 + $0xe8] sm:$0xff] %vm411_vm0, %v391_v40  ;;  %v8869_v49 = vld [vmem:[#allocation2 + $0x150] sm:$0xff] }
  0x2f   : > { %v375_v44 = vadd.f32 %v8646_v5, %v336_v38  ;;  %v8865_v46 = vld [vmem:[#allocation2 + $0x68] sm:$0xff]  ;;  %v8871_v50 = vld [vmem:[#allocation2 + $0x70] sm:$0xff]  ;;  %482 = vst.msk [vmem:[#allocation2 + $0x1d0] sm:$0xff] %vm411_vm0, %v406_v43  ;;  %v8884_v53 = vld [vmem:[#allocation2 + $0x158] sm:$0xff] }
  0x30   : > { %7603 = vmatmul.mubr.msk.f32.gmra.mxu1 %vm411_vm0, %v8801_v55  ;;  %v392_v47 = vmax.f32 %v360_v41, 0.0  ;;  %v376_v48 = vadd.f32 %v8646_v5, %v337_v42  ;;  %v8886_v54 = vld [vmem:[#allocation2 + $0x78] sm:$0xff]  ;;  %v8889_v57 = vld [vmem:[#allocation2 + $0x160] sm:$0xff]  ;;  %v8901_v59 = vld [vmem:[#allocation2 + $0x168] sm:$0xff] }
  0x31   : > { %7561 = vmatmul.mubr.msk.f32.gmra.mxu0 %vm411_vm0, %v8803_v56  ;;  %7605 = vmatprep.mubr.msk.f32.mxu1 %vm411_vm0, %v8810_v60  ;;  %v407_v51 = vmax.f32 %v375_v44, 0.0  ;;  %v8891_v58 = vld [vmem:[#allocation2 + $0x80] sm:$0xff]  ;;  %v8903_v62 = vld [vmem:[#allocation2 + $0x88] sm:$0xff]  ;;  %v8905_v63 = vld [vmem:[#allocation2 + $0x170] sm:$0xff] }
  0x32   : > { %7563 = vmatprep.mubr.msk.f32.mxu0 %vm411_vm0, %v8812_v61  ;;  %468 = vst.msk [vmem:[#allocation2 + $0xf0] sm:$0xff] %vm411_vm0, %v392_v47  ;;  %v408_v52 = vmax.f32 %v376_v48, 0.0  ;;  %v8907_v0 = vld [vmem:[#allocation2 + $0x90] sm:$0xff]  ;;  %v8917_v2 = vld [vmem:[#allocation2 + $0x178] sm:$0xff]  ;;  %v8921_v7 = vld [vmem:[#allocation2 + $0x180] sm:$0xff] }
  0x33   : > { %483 = vst.msk [vmem:[#allocation2 + $0x1e8] sm:$0xff] %vm411_vm0, %v407_v51  ;;  %v8919_v3 = vld [vmem:[#allocation2 + $0x98] sm:$0xff]  ;;  %v8923_v8 = vld [vmem:[#allocation2 + $0xa0] sm:$0xff]  ;;  %v8933_v9 = vld [vmem:[#allocation2 + $0x188] sm:$0xff] }
  0x34   : > { %7606 = vmatmul.mubr.msk.f32.gmra.mxu1 %vm411_vm0, %v8833_v22  ;;  %484 = vst.msk [vmem:[#allocation2 + $0x1f0] sm:$0xff] %vm411_vm0, %v408_v52  ;;  %v8935_v10 = vld [vmem:[#allocation2 + $0xa8] sm:$0xff]  ;;  %v8937_v11 = vld [vmem:[#allocation2 + $0x190] sm:$0xff]  ;;  %v8949_v13 = vld [vmem:[#allocation2 + $0x198] sm:$0xff] }
  0x35   : > { %7564 = vmatmul.mubr.msk.f32.gmra.mxu0 %vm411_vm0, %v8835_v23  ;;  %7608 = vmatprep.mubr.msk.f32.mxu1 %vm411_vm0, %v8842_v30  ;;  %v8939_v12 = vld [vmem:[#allocation2 + $0xb0] sm:$0xff]  ;;  %v8951_v20 = vld [vmem:[#allocation2 + $0xb8] sm:$0xff]  ;;  %v8953_v24 = vld [vmem:[#allocation2 + $0x1a0] sm:$0xff] }
  0x36   : > { %7566 = vmatprep.mubr.msk.f32.mxu0 %vm411_vm0, %v8844_v31  ;;  %v8955_v27 = vld [vmem:[#allocation2 + $0xc0] sm:$0xff]  ;;  %v8965_v28 = vld [vmem:[#allocation2 + $0x1a8] sm:$0xff]  ;;  %v8969_v37 = vld [vmem:[#allocation2 + $0x1b0] sm:$0xff] }
  0x37   : > { %v8967_v36 = vld [vmem:[#allocation2 + $0xc8] sm:$0xff]  ;;  %v8971_v38 = vld [vmem:[#allocation2 + $0xd0] sm:$0xff]  ;;  %v8981_v39 = vld [vmem:[#allocation2 + $0x1b8] sm:$0xff] }
  0x38   : > { %7609 = vmatmul.mubr.msk.f32.gmra.mxu1 %vm411_vm0, %v8863_v45  ;;  %v8983_v40 = vld [vmem:[#allocation2 + $0xd8] sm:$0xff]  ;;  %v8985_v41 = vld [vmem:[#allocation2 + $0x1c0] sm:$0xff]  ;;  %v8997_v43 = vld [vmem:[#allocation2 + $0x1c8] sm:$0xff] }
  0x39   : > { %7567 = vmatmul.mubr.msk.f32.gmra.mxu0 %vm411_vm0, %v8865_v46  ;;  %7611 = vmatprep.mubr.msk.f32.mxu1 %vm411_vm0, %v8869_v49  ;;  %v8987_v42 = vld [vmem:[#allocation2 + $0xe0] sm:$0xff]  ;;  %11261 = vst [vmem:[#allocation4_spill] sm:$0xff] %v8997_v43  ;;  %v8999_v44 = vld [vmem:[#allocation2 + $0xe8] sm:$0xff]  ;;  %v9001_v47 = vld [vmem:[#allocation2 + $0x1d0] sm:$0xff] }
  0x3a   : > { %7569 = vmatprep.mubr.msk.f32.mxu0 %vm411_vm0, %v8871_v50  ;;  %11262 = vst [vmem:[#allocation5_spill] sm:$0xff] %v9001_v47  ;;  %v9003_v48 = vld [vmem:[#allocation2 + $0xf0] sm:$0xff]  ;;  %v9013_v51 = vld [vmem:[#allocation2 + $0x1d8] sm:$0xff]  ;;  %v9017_v5 = vld [vmem:[#allocation2 + $0x1e0] sm:$0xff] }
  0x3b   : > { %11263 = vst [vmem:[#allocation6_spill] sm:$0xff] %v9013_v51  ;;  %v9015_v52 = vld [vmem:[#allocation2 + $0xf8] sm:$0xff] }
  0x3c   : > { %7612 = vmatmul.mubr.msk.f32.gmra.mxu1 %vm411_vm0, %v8884_v53 }
  0x3d   : > { %7570 = vmatmul.mubr.msk.f32.gmra.mxu0 %vm411_vm0, %v8886_v54  ;;  %7614 = vmatprep.mubr.msk.f32.mxu1 %vm411_vm0, %v8889_v57 }
  0x3e   : > { %7572 = vmatprep.mubr.msk.f32.mxu0 %vm411_vm0, %v8891_v58 }
  0x40   : > { %7615 = vmatmul.mubr.msk.f32.gmra.mxu1 %vm411_vm0, %v8901_v59 }
  0x41   : > { %7573 = vmatmul.mubr.msk.f32.gmra.mxu0 %vm411_vm0, %v8903_v62  ;;  %7617 = vmatprep.mubr.msk.f32.mxu1 %vm411_vm0, %v8905_v63 }
  0x42   : > { %7575 = vmatprep.mubr.msk.f32.mxu0 %vm411_vm0, %v8907_v0 }
  0x44   : > { %7618 = vmatmul.mubr.msk.f32.gmra.mxu1 %vm411_vm0, %v8917_v2 }
  0x45   : > { %7576 = vmatmul.mubr.msk.f32.gmra.mxu0 %vm411_vm0, %v8919_v3  ;;  %7620 = vmatprep.mubr.msk.f32.mxu1 %vm411_vm0, %v8921_v7 }
  0x46   : > { %7578 = vmatprep.mubr.msk.f32.mxu0 %vm411_vm0, %v8923_v8 }
  0x48   : > { %7621 = vmatmul.mubr.msk.f32.gmra.mxu1 %vm411_vm0, %v8933_v9 }
  0x49   : > { %7579 = vmatmul.mubr.msk.f32.gmra.mxu0 %vm411_vm0, %v8935_v10  ;;  %7623 = vmatprep.mubr.msk.f32.mxu1 %vm411_vm0, %v8937_v11 }
  0x4a   : > { %7581 = vmatprep.mubr.msk.f32.mxu0 %vm411_vm0, %v8939_v12 }
  0x4c   : > { %7624 = vmatmul.mubr.msk.f32.gmra.mxu1 %vm411_vm0, %v8949_v13 }
  0x4d   : > { %7582 = vmatmul.mubr.msk.f32.gmra.mxu0 %vm411_vm0, %v8951_v20  ;;  %7626 = vmatprep.mubr.msk.f32.mxu1 %vm411_vm0, %v8953_v24 }
  0x4e   : > { %7584 = vmatprep.mubr.msk.f32.mxu0 %vm411_vm0, %v8955_v27 }
  0x50   : > { %7627 = vmatmul.mubr.msk.f32.gmra.mxu1 %vm411_vm0, %v8965_v28 }
  0x51   : > { %7585 = vmatmul.mubr.msk.f32.gmra.mxu0 %vm411_vm0, %v8967_v36  ;;  %7629 = vmatprep.mubr.msk.f32.mxu1 %vm411_vm0, %v8969_v37 }
  0x52   : > { %7587 = vmatprep.mubr.msk.f32.mxu0 %vm411_vm0, %v8971_v38 }
  0x54   : > { %7630 = vmatmul.mubr.msk.f32.gmra.mxu1 %vm411_vm0, %v8981_v39 }
  0x55   : > { %7588 = vmatmul.mubr.msk.f32.gmra.mxu0 %vm411_vm0, %v8983_v40  ;;  %7632 = vmatprep.mubr.msk.f32.mxu1 %vm411_vm0, %v8985_v41 }
  0x56   : > { %7590 = vmatprep.mubr.msk.f32.mxu0 %vm411_vm0, %v8987_v42 }
  0x58   : > { %7633 = vmatmul.mubr.msk.f32.gmra.mxu1 %vm411_vm0, %v8997_v43  ;;  %v9025_v43 = vld [vmem:[#allocation2 + $0x1e8] sm:$0xff] }
  0x59   : > { %7591 = vmatmul.mubr.msk.f32.gmra.mxu0 %vm411_vm0, %v8999_v44  ;;  %7635 = vmatprep.mubr.msk.f32.mxu1 %vm411_vm0, %v9001_v47  ;;  %v9029_v47 = vld [vmem:[#allocation2 + $0x1f0] sm:$0xff] }
  0x5a   : > { %7593 = vmatprep.mubr.msk.f32.mxu0 %vm411_vm0, %v9003_v48  ;;  %11264 = vst [vmem:[#allocation7_spill] sm:$0xff] %v9029_v47 }
  0x5c   : > { %7636 = vmatmul.mubr.msk.f32.gmra.mxu1 %vm411_vm0, %v9013_v51  ;;  %v9037_v51 = vld [vmem:[#allocation2 + $0x1f8] sm:$0xff] }
  0x5d   : > { %7594 = vmatmul.mubr.msk.f32.gmra.mxu0 %vm411_vm0, %v9015_v52  ;;  %7638 = vmatprep.mubr.msk.f32.mxu1 %vm411_vm0, %v9017_v5 }
  0x5e   : > { %7744 = vmatprep.mubr.msk.f32.mxu0 %vm411_vm0, %v8657_v15 }
  0x60   : > { %7639 = vmatmul.mubr.msk.f32.gmra.mxu1 %vm411_vm0, %v9025_v43 }
  0x61   : > { %7745 = vmatmul.mubr.msk.f32.vlgmr.msra.gmra.mxu0 %vm411_vm0, %v8659_v16  ;;  %7641 = vmatprep.mubr.msk.f32.mxu1 %vm411_vm0, %v9029_v47  ;;  %v9053_v47 = vld [vmem:[%s11174_s3 + $0x28] sm:$0xff] }
  0x62   : > { %7747 = vmatprep.mubr.msk.f32.mxu0 %vm411_vm0, %v8661_v17  ;;  %7939 = vmatpush3.msra.mxu0 %v8676_v25 }
  0x64   : > { %7642 = vmatmul.mubr.msk.f32.gmra.mxu1 %vm411_vm0, %v9037_v51 }
  0x65   : > { %7748 = vmatmul.mubr.msk.f32.gmra.mxu0 %vm411_vm0, %v8687_v29  ;;  %7646 = vmatprep.mubr.msk.f32.mxu1 %vm411_vm0, %v8657_v15  ;;  %v9065_v15 = vld [vmem:[%s11174_s3 + $0x30] sm:$0xff] }
  0x66   : > { %7750 = vmatprep.mubr.msk.f32.mxu0 %vm411_vm0, %v8691_v35  ;;  %8134 = vmatprep.subr.mxu0 %v9065_v15 }
  0x68   : > { %7647 = vmatmul.mubr.msk.f32.vlgmr.msra.gmra.mxu1 %vm411_vm0, %v8659_v16  ;;  %v299_v16 = vld [vmem:[%s8641_s11 + $0xf0] sm:$0xff] }
  0x69   : > { %7751 = vmatmul.mubr.msk.f32.gmra.mxu0 %vm411_vm0, %v8742_v18  ;;  %7841 = vmatpush3.msra.mxu1 %v8732_v6 }
  0x6a   : > { %7649 = vmatprep.mubr.msk.f32.mxu1 %vm411_vm0, %v8661_v17  ;;  %7753 = vmatprep.mubr.msk.f32.mxu0 %vm411_vm0, %v8756_v26  ;;  %v338_v17 = vmul.f32 %v8634_v4, %v299_v16 }
  0x6b   : > { %8036 = vmatprep.subr.mxu1 %v9053_v47 }
  0x6c   : > { %7650 = vmatmul.mubr.msk.f32.gmra.mxu1 %vm411_vm0, %v8687_v29  ;;  %v300_v29 = vld [vmem:[%s8641_s11 + $0xf8] sm:$0xff] }
  0x6d   : > { %7754 = vmatmul.mubr.msk.f32.gmra.mxu0 %vm411_vm0, %v8768_v33  ;;  %7652 = vmatprep.mubr.msk.f32.mxu1 %vm411_vm0, %v8691_v35  ;;  %v339_v6 = vmul.f32 %v8634_v4, %v300_v29  ;;  %v11268_v4 = vld [vmem:[#allocation6_spill] sm:$0xff] }
  0x6e   : > { %7756 = vmatprep.mubr.msk.f32.mxu0 %vm411_vm0, %v8776_v1 }
  0x70   : > { %7653 = vmatmul.mubr.msk.f32.gmra.mxu1 %vm411_vm0, %v8742_v18 }
  0x71   : > { %7757 = vmatmul.mubr.msk.f32.gmra.mxu0 %vm411_vm0, %v8803_v56  ;;  %7655 = vmatprep.mubr.msk.f32.mxu1 %vm411_vm0, %v8756_v26 }
  0x72   : > { %7759 = vmatprep.mubr.msk.f32.mxu0 %vm411_vm0, %v8812_v61 }
  0x74   : > { %7656 = vmatmul.mubr.msk.f32.gmra.mxu1 %vm411_vm0, %v8768_v33 }
  0x75   : > { %7760 = vmatmul.mubr.msk.f32.gmra.mxu0 %vm411_vm0, %v8835_v23  ;;  %7658 = vmatprep.mubr.msk.f32.mxu1 %vm411_vm0, %v8776_v1 }
  0x76   : > { %7762 = vmatprep.mubr.msk.f32.mxu0 %vm411_vm0, %v8844_v31 }
  0x78   : > { %7659 = vmatmul.mubr.msk.f32.gmra.mxu1 %vm411_vm0, %v8803_v56 }
  0x79   : > { %7763 = vmatmul.mubr.msk.f32.gmra.mxu0 %vm411_vm0, %v8865_v46  ;;  %7661 = vmatprep.mubr.msk.f32.mxu1 %vm411_vm0, %v8812_v61 }
  0x7a   : > { %7765 = vmatprep.mubr.msk.f32.mxu0 %vm411_vm0, %v8871_v50 }
  0x7c   : > { %7662 = vmatmul.mubr.msk.f32.gmra.mxu1 %vm411_vm0, %v8835_v23 }
  0x7d   : > { %7766 = vmatmul.mubr.msk.f32.gmra.mxu0 %vm411_vm0, %v8886_v54  ;;  %7664 = vmatprep.mubr.msk.f32.mxu1 %vm411_vm0, %v8844_v31 }
  0x7e   : > { %7768 = vmatprep.mubr.msk.f32.mxu0 %vm411_vm0, %v8891_v58 }
  0x80   : > { %7665 = vmatmul.mubr.msk.f32.gmra.mxu1 %vm411_vm0, %v8865_v46 }
  0x81   : > { %7769 = vmatmul.mubr.msk.f32.gmra.mxu0 %vm411_vm0, %v8903_v62  ;;  %7667 = vmatprep.mubr.msk.f32.mxu1 %vm411_vm0, %v8871_v50 }
  0x82   : > { %7771 = vmatprep.mubr.msk.f32.mxu0 %vm411_vm0, %v8907_v0 }
  0x84   : > { %7668 = vmatmul.mubr.msk.f32.gmra.mxu1 %vm411_vm0, %v8886_v54 }
  0x85   : > { %7772 = vmatmul.mubr.msk.f32.gmra.mxu0 %vm411_vm0, %v8919_v3  ;;  %7670 = vmatprep.mubr.msk.f32.mxu1 %vm411_vm0, %v8891_v58 }
  0x86   : > { %7774 = vmatprep.mubr.msk.f32.mxu0 %vm411_vm0, %v8923_v8 }
  0x88   : > { %7671 = vmatmul.mubr.msk.f32.gmra.mxu1 %vm411_vm0, %v8903_v62 }
  0x89   : > { %7775 = vmatmul.mubr.msk.f32.gmra.mxu0 %vm411_vm0, %v8935_v10  ;;  %7673 = vmatprep.mubr.msk.f32.mxu1 %vm411_vm0, %v8907_v0 }
  0x8a   : > { %7777 = vmatprep.mubr.msk.f32.mxu0 %vm411_vm0, %v8939_v12 }
  0x8c   : > { %7674 = vmatmul.mubr.msk.f32.gmra.mxu1 %vm411_vm0, %v8919_v3 }
  0x8d   : > { %7778 = vmatmul.mubr.msk.f32.gmra.mxu0 %vm411_vm0, %v8951_v20  ;;  %7676 = vmatprep.mubr.msk.f32.mxu1 %vm411_vm0, %v8923_v8 }
  0x8e   : > { %7780 = vmatprep.mubr.msk.f32.mxu0 %vm411_vm0, %v8955_v27 }
  0x90   : > { %7677 = vmatmul.mubr.msk.f32.gmra.mxu1 %vm411_vm0, %v8935_v10 }
  0x91   : > { %7781 = vmatmul.mubr.msk.f32.gmra.mxu0 %vm411_vm0, %v8967_v36  ;;  %7679 = vmatprep.mubr.msk.f32.mxu1 %vm411_vm0, %v8939_v12 }
  0x92   : > { %7783 = vmatprep.mubr.msk.f32.mxu0 %vm411_vm0, %v8971_v38 }
  0x94   : > { %7680 = vmatmul.mubr.msk.f32.gmra.mxu1 %vm411_vm0, %v8951_v20 }
  0x95   : > { %7784 = vmatmul.mubr.msk.f32.gmra.mxu0 %vm411_vm0, %v8983_v40  ;;  %7682 = vmatprep.mubr.msk.f32.mxu1 %vm411_vm0, %v8955_v27 }
  0x96   : > { %7786 = vmatprep.mubr.msk.f32.mxu0 %vm411_vm0, %v8987_v42 }
  0x98   : > { %7683 = vmatmul.mubr.msk.f32.gmra.mxu1 %vm411_vm0, %v8967_v36 }
  0x99   : > { %7787 = vmatmul.mubr.msk.f32.gmra.mxu0 %vm411_vm0, %v8999_v44  ;;  %7685 = vmatprep.mubr.msk.f32.mxu1 %vm411_vm0, %v8971_v38 }
  0x9a   : > { %7789 = vmatprep.mubr.msk.f32.mxu0 %vm411_vm0, %v9003_v48 }
  0x9c   : > { %7686 = vmatmul.mubr.msk.f32.gmra.mxu1 %vm411_vm0, %v8983_v40 }
  0x9d   : > { %7790 = vmatmul.mubr.msk.f32.gmra.mxu0 %vm411_vm0, %v9015_v52  ;;  %7688 = vmatprep.mubr.msk.f32.mxu1 %vm411_vm0, %v8987_v42 }
  0x9e   : > { %7792 = vmatprep.mubr.msk.f32.mxu0 %vm411_vm0, %v8668_v21 }
  0xa0   : > { %7689 = vmatmul.mubr.msk.f32.gmra.mxu1 %vm411_vm0, %v8999_v44 }
  0xa1   : > { %7793 = vmatmul.mubr.msk.f32.gmra.mxu0 %vm411_vm0, %v8740_v14  ;;  %7691 = vmatprep.mubr.msk.f32.mxu1 %vm411_vm0, %v9003_v48 }
  0xa2   : > { %7795 = vmatprep.mubr.msk.f32.mxu0 %vm411_vm0, %v8744_v19 }
  0xa4   : > { %7692 = vmatmul.mubr.msk.f32.gmra.mxu1 %vm411_vm0, %v9015_v52 }
  0xa5   : > { %7796 = vmatmul.mubr.msk.f32.gmra.mxu0 %vm411_vm0, %v8766_v32  ;;  %7694 = vmatprep.mubr.msk.f32.mxu1 %vm411_vm0, %v8668_v21  ;;  %v11265_v21 = vld [vmem:[#allocation3_spill] sm:$0xff] }
  0xa6   : > { %7798 = vmatprep.mubr.msk.f32.mxu0 %vm411_vm0, %v8770_v34  ;;  %v377_v25 = vadd.f32 %v11265_v21, %v338_v17 }
  0xa8   : > { %7695 = vmatmul.mubr.msk.f32.gmra.mxu1 %vm411_vm0, %v8740_v14  ;;  %v409_v14 = vmax.f32 %v377_v25, 0.0 }
  0xa9   : > { %7799 = vmatmul.mubr.msk.f32.gmra.mxu0 %vm411_vm0, %v8801_v55  ;;  %7697 = vmatprep.mubr.msk.f32.mxu1 %vm411_vm0, %v8744_v19  ;;  %v11266_v19 = vld [vmem:[#allocation4_spill] sm:$0xff] }
  0xaa   : > { %7801 = vmatprep.mubr.msk.f32.mxu0 %vm411_vm0, %v8810_v60  ;;  %485 = vst.msk [vmem:[#allocation2 + $0x208] sm:$0xff] %vm411_vm0, %v409_v14 }
  0xac   : > { %7698 = vmatmul.mubr.msk.f32.gmra.mxu1 %vm411_vm0, %v8766_v32  ;;  %v378_v32 = vadd.f32 %v11265_v21, %v339_v6 }
  0xad   : > { %7802 = vmatmul.mubr.msk.f32.gmra.mxu0 %vm411_vm0, %v8833_v22  ;;  %7700 = vmatprep.mubr.msk.f32.mxu1 %vm411_vm0, %v8770_v34  ;;  %v11267_v34 = vld [vmem:[#allocation5_spill] sm:$0xff] }
  0xae   : > { %7804 = vmatprep.mubr.msk.f32.mxu0 %vm411_vm0, %v8842_v30 }
  0xb0   : > { %7701 = vmatmul.mubr.msk.f32.gmra.mxu1 %vm411_vm0, %v8801_v55  ;;  %v410_v55 = vmax.f32 %v378_v32, 0.0 }
  0xb1   : > { %7805 = vmatmul.mubr.msk.f32.gmra.mxu0 %vm411_vm0, %v8863_v45  ;;  %7703 = vmatprep.mubr.msk.f32.mxu1 %vm411_vm0, %v8810_v60  ;;  %v11269_v60 = vld [vmem:[#allocation7_spill] sm:$0xff] }
  0xb2   : > { %7807 = vmatprep.mubr.msk.f32.mxu0 %vm411_vm0, %v8869_v49  ;;  %486 = vst.msk [vmem:[#allocation2 + $0x210] sm:$0xff] %vm411_vm0, %v410_v55 }
  0xb4   : > { %7704 = vmatmul.mubr.msk.f32.gmra.mxu1 %vm411_vm0, %v8833_v22 }
  0xb5   : > { %7808 = vmatmul.mubr.msk.f32.gmra.mxu0 %vm411_vm0, %v8884_v53  ;;  %7706 = vmatprep.mubr.msk.f32.mxu1 %vm411_vm0, %v8842_v30 }
  0xb6   : > { %7810 = vmatprep.mubr.msk.f32.mxu0 %vm411_vm0, %v8889_v57 }
  0xb8   : > { %7707 = vmatmul.mubr.msk.f32.gmra.mxu1 %vm411_vm0, %v8863_v45 }
  0xb9   : > { %7811 = vmatmul.mubr.msk.f32.gmra.mxu0 %vm411_vm0, %v8901_v59  ;;  %7709 = vmatprep.mubr.msk.f32.mxu1 %vm411_vm0, %v8869_v49 }
  0xba   : > { %7813 = vmatprep.mubr.msk.f32.mxu0 %vm411_vm0, %v8905_v63 }
  0xbc   : > { %7710 = vmatmul.mubr.msk.f32.gmra.mxu1 %vm411_vm0, %v8884_v53 }
  0xbd   : > { %7814 = vmatmul.mubr.msk.f32.gmra.mxu0 %vm411_vm0, %v8917_v2  ;;  %7712 = vmatprep.mubr.msk.f32.mxu1 %vm411_vm0, %v8889_v57 }
  0xbe   : > { %7816 = vmatprep.mubr.msk.f32.mxu0 %vm411_vm0, %v8921_v7 }
  0xc0   : > { %7713 = vmatmul.mubr.msk.f32.gmra.mxu1 %vm411_vm0, %v8901_v59 }
  0xc1   : > { %7817 = vmatmul.mubr.msk.f32.gmra.mxu0 %vm411_vm0, %v8933_v9  ;;  %7715 = vmatprep.mubr.msk.f32.mxu1 %vm411_vm0, %v8905_v63 }
  0xc2   : > { %7819 = vmatprep.mubr.msk.f32.mxu0 %vm411_vm0, %v8937_v11 }
  0xc4   : > { %7716 = vmatmul.mubr.msk.f32.gmra.mxu1 %vm411_vm0, %v8917_v2 }
  0xc5   : > { %7820 = vmatmul.mubr.msk.f32.gmra.mxu0 %vm411_vm0, %v8949_v13  ;;  %7718 = vmatprep.mubr.msk.f32.mxu1 %vm411_vm0, %v8921_v7 }
  0xc6   : > { %7822 = vmatprep.mubr.msk.f32.mxu0 %vm411_vm0, %v8953_v24 }
  0xc8   : > { %7719 = vmatmul.mubr.msk.f32.gmra.mxu1 %vm411_vm0, %v8933_v9 }
  0xc9   : > { %7823 = vmatmul.mubr.msk.f32.gmra.mxu0 %vm411_vm0, %v8965_v28  ;;  %7721 = vmatprep.mubr.msk.f32.mxu1 %vm411_vm0, %v8937_v11 }
  0xca   : > { %7825 = vmatprep.mubr.msk.f32.mxu0 %vm411_vm0, %v8969_v37 }
  0xcc   : > { %7722 = vmatmul.mubr.msk.f32.gmra.mxu1 %vm411_vm0, %v8949_v13 }
  0xcd   : > { %7826 = vmatmul.mubr.msk.f32.gmra.mxu0 %vm411_vm0, %v8981_v39  ;;  %7724 = vmatprep.mubr.msk.f32.mxu1 %vm411_vm0, %v8953_v24 }
  0xce   : > { %7828 = vmatprep.mubr.msk.f32.mxu0 %vm411_vm0, %v8985_v41 }
  0xd0   : > { %7725 = vmatmul.mubr.msk.f32.gmra.mxu1 %vm411_vm0, %v8965_v28 }
  0xd1   : > { %7829 = vmatmul.mubr.msk.f32.gmra.mxu0 %vm411_vm0, %v11266_v19  ;;  %7727 = vmatprep.mubr.msk.f32.mxu1 %vm411_vm0, %v8969_v37 }
  0xd2   : > { %7831 = vmatprep.mubr.msk.f32.mxu0 %vm411_vm0, %v11267_v34 }
  0xd4   : > { %7728 = vmatmul.mubr.msk.f32.gmra.mxu1 %vm411_vm0, %v8981_v39 }
  0xd5   : > { %7832 = vmatmul.mubr.msk.f32.gmra.mxu0 %vm411_vm0, %v11268_v4  ;;  %7730 = vmatprep.mubr.msk.f32.mxu1 %vm411_vm0, %v8985_v41  ;;  %v9311_v30 = vpop.f32.mrf.mxu0 }
  0xd6   : > { %7834 = vmatprep.mubr.msk.f32.mxu0 %vm411_vm0, %v9017_v5 }
  0xd7   : > { %v9313_v45 = vpop.f32.mrf.mxu0 }
  0xd8   : > { %7731 = vmatmul.mubr.msk.f32.gmra.mxu1 %vm411_vm0, %v11266_v19 }
  0xd9   : > { %7835 = vmatmul.mubr.msk.f32.gmra.mxu0 %vm411_vm0, %v9025_v43  ;;  %7733 = vmatprep.mubr.msk.f32.mxu1 %vm411_vm0, %v11267_v34  ;;  %v7553_v16 = vpop.f32.mrf.mxu0 }
  0xda   : > { %7837 = vmatprep.mubr.msk.f32.mxu0 %vm411_vm0, %v11269_v60 }
  0xdb   : > { %v9328_v17 = vpop.f32.mrf.mxu0 }
  0xdc   : > { %7734 = vmatmul.mubr.msk.f32.gmra.mxu1 %vm411_vm0, %v11268_v4 }
  0xdd   : > { %7838 = vmatmul.mubr.msk.f32.gmra.mxu0 %vm411_vm0, %v9037_v51  ;;  %7736 = vmatprep.mubr.msk.f32.mxu1 %vm411_vm0, %v9017_v5 }
  0xde   : > { %7940 = vmatprep.mubr.msk.f32.mxu0 %vm411_vm0, %v8691_v35 }
  0xe0   : > { %7737 = vmatmul.mubr.msk.f32.gmra.mxu1 %vm411_vm0, %v9025_v43 }
  0xe1   : > { %7941 = vmatmul.mubr.msk.f32.vlgmr.msra.gmra.mxu0 %vm411_vm0, %v8742_v18  ;;  %7739 = vmatprep.mubr.msk.f32.mxu1 %vm411_vm0, %v11269_v60 }
  0xe2   : > { %7943 = vmatprep.mubr.msk.f32.mxu0 %vm411_vm0, %v8756_v26  ;;  %8135 = vmatpush3.msra.mxu0 %v9065_v15 }
  0xe4   : > { %7740 = vmatmul.mubr.msk.f32.gmra.mxu1 %vm411_vm0, %v9037_v51 }
  0xe5   : > { %7944 = vmatmul.mubr.msk.f32.gmra.mxu0 %vm411_vm0, %v8768_v33  ;;  %7842 = vmatprep.mubr.msk.f32.mxu1 %vm411_vm0, %v8691_v35  ;;  %v9348_v35 = vld [vmem:[%s11174_s3 + $0x38] sm:$0xff] }
  0xe6   : > { %7946 = vmatprep.mubr.msk.f32.mxu0 %vm411_vm0, %v8776_v1  ;;  %11271 = vst [vmem:[#allocation4_spill] sm:$0xff] %v9348_v35 }
  0xe8   : > { %v9334_v21 = vpop.f32.mrf.mxu1  ;;  %7843 = vmatmul.mubr.msk.f32.vlgmr.msra.gmra.mxu1 %vm411_vm0, %v8742_v18  ;;  %v9360_v18 = vld [vmem:[%s11174_s3 + $0x40] sm:$0xff] }
  0xe9   : > { %11270 = vst [vmem:[#allocation3_spill] sm:$0xff] %v9334_v21  ;;  %v9338_v15 = vpop.f32.mrf.mxu0  ;;  %7947 = vmatmul.mubr.msk.f32.gmra.mxu0 %vm411_vm0, %v8803_v56  ;;  %8037 = vmatpush3.msra.mxu1 %v9053_v47 }
  0xea   : > { %7845 = vmatprep.mubr.msk.f32.mxu1 %vm411_vm0, %v8756_v26  ;;  %v9350_v25 = vpop.f32.mrf.mxu1  ;;  %7949 = vmatprep.mubr.msk.f32.mxu0 %vm411_vm0, %v8812_v61 }
  0xeb   : > { %11272 = vst [vmem:[#allocation5_spill] sm:$0xff] %v9350_v25  ;;  %v9352_v29 = vpop.f32.mrf.mxu0  ;;  %8232 = vmatprep.subr.mxu1 %v9348_v35  ;;  %8330 = vmatprep.subr.mxu0 %v9360_v18 }
  0xec   : > { %v7601_v26 = vpop.f32.mrf.mxu1  ;;  %7846 = vmatmul.mubr.msk.f32.gmra.mxu1 %vm411_vm0, %v8768_v33 }
  0xed   : > { %v7559_v47 = vpop.f32.mrf.mxu0  ;;  %7950 = vmatmul.mubr.msk.f32.gmra.mxu0 %vm411_vm0, %v8835_v23  ;;  %7848 = vmatprep.mubr.msk.f32.mxu1 %vm411_vm0, %v8776_v1 }
  0xee   : > { %7952 = vmatprep.mubr.msk.f32.mxu0 %vm411_vm0, %v8844_v31  ;;  %v9370_v6 = vpop.f32.mrf.mxu1 }
  0xef   : > { %11273 = vst [vmem:[#allocation6_spill] sm:$0xff] %v9370_v6  ;;  %v9372_v14 = vpop.f32.mrf.mxu0 }
  0xf0   : > { %v9375_v32 = vpop.f32.mrf.mxu1  ;;  %7849 = vmatmul.mubr.msk.f32.gmra.mxu1 %vm411_vm0, %v8803_v56 }
  0xf1   : > { %11274 = vst [vmem:[#allocation7_spill] sm:$0xff] %v9375_v32  ;;  %v9379_v33 = vpop.f32.mrf.mxu0  ;;  %7953 = vmatmul.mubr.msk.f32.gmra.mxu0 %vm411_vm0, %v8865_v46  ;;  %7851 = vmatprep.mubr.msk.f32.mxu1 %vm411_vm0, %v8812_v61 }
  0xf2   : > { %7955 = vmatprep.mubr.msk.f32.mxu0 %vm411_vm0, %v8871_v50  ;;  %v9387_v1 = vpop.f32.mrf.mxu1 }
  0xf3   : > { %11275 = vst [vmem:[#allocation8_spill] sm:$0xff] %v9387_v1  ;;  %v9389_v55 = vpop.f32.mrf.mxu0 }
  0xf4   : > { %v7607_v16 = vpop.f32.mrf.mxu1  ;;  %7852 = vmatmul.mubr.msk.f32.gmra.mxu1 %vm411_vm0, %v8835_v23 }
  0xf5   : > { %v7565_v56 = vpop.f32.mrf.mxu0  ;;  %7956 = vmatmul.mubr.msk.f32.gmra.mxu0 %vm411_vm0, %v8886_v54  ;;  %7854 = vmatprep.mubr.msk.f32.mxu1 %vm411_vm0, %v8844_v31 }
  0xf6   : > { %7958 = vmatprep.mubr.msk.f32.mxu0 %vm411_vm0, %v8891_v58  ;;  %v9399_v61 = vpop.f32.mrf.mxu1 }
  0xf7   : > { %11276 = vst [vmem:[#allocation9_spill] sm:$0xff] %v9399_v61  ;;  %v9401_v26 = vpop.f32.mrf.mxu0 }
  0xf8   : > { %v9403_v47 = vpop.f32.mrf.mxu1  ;;  %7855 = vmatmul.mubr.msk.f32.gmra.mxu1 %vm411_vm0, %v8865_v46 }
  0xf9   : > { %11277 = vst [vmem:[#allocation10_spill] sm:$0xff] %v9403_v47  ;;  %v9407_v23 = vpop.f32.mrf.mxu0  ;;  %7959 = vmatmul.mubr.msk.f32.gmra.mxu0 %vm411_vm0, %v8903_v62  ;;  %7857 = vmatprep.mubr.msk.f32.mxu1 %vm411_vm0, %v8871_v50 }
  0xfa   : > { %7961 = vmatprep.mubr.msk.f32.mxu0 %vm411_vm0, %v8907_v0  ;;  %v9415_v31 = vpop.f32.mrf.mxu1 }
  0xfb   : > { %11278 = vst [vmem:[#allocation11_spill] sm:$0xff] %v9415_v31  ;;  %v9417_v16 = vpop.f32.mrf.mxu0 }
  0xfc   : > { %v7613_v56 = vpop.f32.mrf.mxu1  ;;  %7858 = vmatmul.mubr.msk.f32.gmra.mxu1 %vm411_vm0, %v8886_v54 }
  0xfd   : > { %v7571_v46 = vpop.f32.mrf.mxu0  ;;  %7962 = vmatmul.mubr.msk.f32.gmra.mxu0 %vm411_vm0, %v8919_v3  ;;  %7860 = vmatprep.mubr.msk.f32.mxu1 %vm411_vm0, %v8891_v58 }
  0xfe   : > { %7964 = vmatprep.mubr.msk.f32.mxu0 %vm411_vm0, %v8923_v8  ;;  %v9427_v50 = vpop.f32.mrf.mxu1 }
  0xff   : > { %11279 = vst [vmem:[#allocation12_spill] sm:$0xff] %v9427_v50  ;;  %v9429_v47 = vpop.f32.mrf.mxu0 }
 0x100   : > { %v9431_v31 = vpop.f32.mrf.mxu1  ;;  %7861 = vmatmul.mubr.msk.f32.gmra.mxu1 %vm411_vm0, %v8903_v62 }
 0x101   : > { %11280 = vst [vmem:[#allocation13_spill] sm:$0xff] %v9431_v31  ;;  %v9435_v54 = vpop.f32.mrf.mxu0  ;;  %7965 = vmatmul.mubr.msk.f32.gmra.mxu0 %vm411_vm0, %v8935_v10  ;;  %7863 = vmatprep.mubr.msk.f32.mxu1 %vm411_vm0, %v8907_v0 }
 0x102   : > { %7967 = vmatprep.mubr.msk.f32.mxu0 %vm411_vm0, %v8939_v12  ;;  %v9443_v58 = vpop.f32.mrf.mxu1 }
 0x103   : > { %11281 = vst [vmem:[#allocation14_spill] sm:$0xff] %v9443_v58  ;;  %v9445_v56 = vpop.f32.mrf.mxu0 }
 0x104   : > { %v7619_v46 = vpop.f32.mrf.mxu1  ;;  %7864 = vmatmul.mubr.msk.f32.gmra.mxu1 %vm411_vm0, %v8919_v3 }
 0x105   : > { %v7577_v62 = vpop.f32.mrf.mxu0  ;;  %7968 = vmatmul.mubr.msk.f32.gmra.mxu0 %vm411_vm0, %v8951_v20  ;;  %7866 = vmatprep.mubr.msk.f32.mxu1 %vm411_vm0, %v8923_v8 }
 0x106   : > { %7970 = vmatprep.mubr.msk.f32.mxu0 %vm411_vm0, %v8955_v27  ;;  %v9455_v0 = vpop.f32.mrf.mxu1 }
 0x107   : > { %11282 = vst [vmem:[#allocation15_spill] sm:$0xff] %v9455_v0  ;;  %v9457_v31 = vpop.f32.mrf.mxu0 }
 0x108   : > { %v9459_v58 = vpop.f32.mrf.mxu1  ;;  %7867 = vmatmul.mubr.msk.f32.gmra.mxu1 %vm411_vm0, %v8935_v10 }
 0x109   : > { %11283 = vst [vmem:[#allocation16_spill] sm:$0xff] %v9459_v58  ;;  %v9463_v3 = vpop.f32.mrf.mxu0  ;;  %7971 = vmatmul.mubr.msk.f32.gmra.mxu0 %vm411_vm0, %v8967_v36  ;;  %7869 = vmatprep.mubr.msk.f32.mxu1 %vm411_vm0, %v8939_v12 }
 0x10a   : > { %7973 = vmatprep.mubr.msk.f32.mxu0 %vm411_vm0, %v8971_v38  ;;  %v9471_v8 = vpop.f32.mrf.mxu1 }
 0x10b   : > { %11284 = vst [vmem:[#allocation17_spill] sm:$0xff] %v9471_v8  ;;  %v9473_v46 = vpop.f32.mrf.mxu0 }
 0x10c   : > { %v7625_v62 = vpop.f32.mrf.mxu1  ;;  %7870 = vmatmul.mubr.msk.f32.gmra.mxu1 %vm411_vm0, %v8951_v20 }
 0x10d   : > { %v7583_v10 = vpop.f32.mrf.mxu0  ;;  %7974 = vmatmul.mubr.msk.f32.gmra.mxu0 %vm411_vm0, %v8983_v40  ;;  %7872 = vmatprep.mubr.msk.f32.mxu1 %vm411_vm0, %v8955_v27 }
 0x10e   : > { %7976 = vmatprep.mubr.msk.f32.mxu0 %vm411_vm0, %v8987_v42  ;;  %v9483_v12 = vpop.f32.mrf.mxu1  ;;  %v9503_v10 = vld [vmem:[#allocation2 + $0x100] sm:$0xff] }
 0x10f   : > { %11285 = vst [vmem:[#allocation18_spill] sm:$0xff] %v9483_v12  ;;  %v9485_v58 = vpop.f32.mrf.mxu0  ;;  %11288 = vst [vmem:[#allocation21_spill] sm:$0xff] %v9503_v10 }
 0x110   : > { %v9487_v8 = vpop.f32.mrf.mxu1  ;;  %7873 = vmatmul.mubr.msk.f32.gmra.mxu1 %vm411_vm0, %v8967_v36 }
 0x111   : > { %11286 = vst [vmem:[#allocation19_spill] sm:$0xff] %v9487_v8  ;;  %v9491_v20 = vpop.f32.mrf.mxu0  ;;  %7977 = vmatmul.mubr.msk.f32.gmra.mxu0 %vm411_vm0, %v8999_v44  ;;  %7875 = vmatprep.mubr.msk.f32.mxu1 %vm411_vm0, %v8971_v38  ;;  %v9513_v38 = vld [vmem:[#allocation2 + $0x108] sm:$0xff] }
 0x112   : > { %7979 = vmatprep.mubr.msk.f32.mxu0 %vm411_vm0, %v9003_v48  ;;  %v9499_v27 = vpop.f32.mrf.mxu1  ;;  %11289 = vst [vmem:[#allocation22_spill] sm:$0xff] %v9513_v38 }
 0x113   : > { %11287 = vst [vmem:[#allocation20_spill] sm:$0xff] %v9499_v27  ;;  %v9501_v62 = vpop.f32.mrf.mxu0 }
 0x114   : > { %v7631_v8 = vpop.f32.mrf.mxu1  ;;  %7876 = vmatmul.mubr.msk.f32.gmra.mxu1 %vm411_vm0, %v8983_v40 }
 0x115   : > { %v7589_v36 = vpop.f32.mrf.mxu0  ;;  %7980 = vmatmul.mubr.msk.f32.gmra.mxu0 %vm411_vm0, %v9015_v52  ;;  %7878 = vmatprep.mubr.msk.f32.mxu1 %vm411_vm0, %v8987_v42  ;;  %v9519_v8 = vld [vmem:[#allocation2 + $0x110] sm:$0xff]  ;;  %v9533_v42 = vld [vmem:[#allocation2 + $0x118] sm:$0xff] }
 0x116   : > { %7982 = vmatprep.mubr.msk.f32.mxu0 %vm411_vm0, %v9503_v10  ;;  %v9515_v27 = vpop.f32.mrf.mxu1  ;;  %11291 = vst [vmem:[#allocation24_spill] sm:$0xff] %v9519_v8  ;;  %11294 = vst [vmem:[#allocation27_spill] sm:$0xff] %v9533_v42 }
 0x117   : > { %11290 = vst [vmem:[#allocation23_spill] sm:$0xff] %v9515_v27  ;;  %v9517_v12 = vpop.f32.mrf.mxu0 }
 0x118   : > { %v9521_v0 = vpop.f32.mrf.mxu1  ;;  %7879 = vmatmul.mubr.msk.f32.gmra.mxu1 %vm411_vm0, %v8999_v44 }
 0x119   : > { %11292 = vst [vmem:[#allocation25_spill] sm:$0xff] %v9521_v0  ;;  %v9525_v40 = vpop.f32.mrf.mxu0  ;;  %7983 = vmatmul.mubr.msk.f32.gmra.mxu0 %vm411_vm0, %v9513_v38  ;;  %7881 = vmatprep.mubr.msk.f32.mxu1 %vm411_vm0, %v9003_v48  ;;  %v9539_v0 = vld [vmem:[#allocation2 + $0x120] sm:$0xff]  ;;  %v9549_v48 = vld [vmem:[#allocation2 + $0x128] sm:$0xff] }
 0x11a   : > { %11293 = vst [vmem:[#allocation26_spill] sm:$0xff] %v9525_v40  ;;  %7985 = vmatprep.mubr.msk.f32.mxu0 %vm411_vm0, %v9519_v8  ;;  %v9535_v36 = vpop.f32.mrf.mxu1  ;;  %11296 = vst [vmem:[#allocation29_spill] sm:$0xff] %v9539_v0 }
 0x11b   : > { %11295 = vst [vmem:[#allocation28_spill] sm:$0xff] %v9535_v36  ;;  %v9537_v27 = vpop.f32.mrf.mxu0  ;;  %11297 = vst [vmem:[#allocation30_spill] sm:$0xff] %v9549_v48 }
 0x11c   : > { %v7637_v44 = vpop.f32.mrf.mxu1  ;;  %7882 = vmatmul.mubr.msk.f32.gmra.mxu1 %vm411_vm0, %v9015_v52 }
 0x11d   : > { %v7595_v50 = vpop.f32.mrf.mxu0  ;;  %7986 = vmatmul.mubr.msk.f32.gmra.mxu0 %vm411_vm0, %v9533_v42  ;;  %7884 = vmatprep.mubr.msk.f32.mxu1 %vm411_vm0, %v9503_v10  ;;  %v9555_v44 = vld [vmem:[#allocation2 + $0x130] sm:$0xff]  ;;  %v9569_v10 = vld [vmem:[#allocation2 + $0x140] sm:$0xff] }
 0x11e   : > { %7988 = vmatprep.mubr.msk.f32.mxu0 %vm411_vm0, %v9539_v0  ;;  %v9551_v36 = vpop.f32.mrf.mxu1  ;;  %11299 = vst [vmem:[#allocation32_spill] sm:$0xff] %v9555_v44  ;;  %11302 = vst [vmem:[#allocation35_spill] sm:$0xff] %v9569_v10 }
 0x11f   : > { %11298 = vst [vmem:[#allocation31_spill] sm:$0xff] %v9551_v36  ;;  %v9553_v32 = vpop.f32.mrf.mxu0 }
 0x120   : > { %v9557_v61 = vpop.f32.mrf.mxu1  ;;  %7885 = vmatmul.mubr.msk.f32.gmra.mxu1 %vm411_vm0, %v9513_v38 }
 0x121   : > { %11300 = vst [vmem:[#allocation33_spill] sm:$0xff] %v9557_v61  ;;  %v7746_v52 = vpop.f32.mrf.mxu0  ;;  %7989 = vmatmul.mubr.msk.f32.gmra.mxu0 %vm411_vm0, %v9549_v48  ;;  %7887 = vmatprep.mubr.msk.f32.mxu1 %vm411_vm0, %v9519_v8 }
 0x122   : > { %7991 = vmatprep.mubr.msk.f32.mxu0 %vm411_vm0, %v9555_v44  ;;  %v9567_v50 = vpop.f32.mrf.mxu1  ;;  %v2113_v38 = vrot.slane %v7746_v52, 2 }
 0x123   : > { %11301 = vst [vmem:[#allocation34_spill] sm:$0xff] %v9567_v50  ;;  %v1761_v36 = vpop.f32.mrf.mxu0  ;;  %v9579_v50 = vld [vmem:[#allocation2 + $0x148] sm:$0xff] }
 0x124   : > { %v7643_v1 = vpop.f32.mrf.mxu1  ;;  %7888 = vmatmul.mubr.msk.f32.gmra.mxu1 %vm411_vm0, %v9533_v42 }
 0x125   : > { %v7749_v61 = vpop.f32.mrf.mxu0  ;;  %7992 = vmatmul.mubr.msk.f32.gmra.mxu0 %vm411_vm0, %v8833_v22  ;;  %7890 = vmatprep.mubr.msk.f32.mxu1 %vm411_vm0, %v9539_v0 }
 0x126   : > { %v2116_v21 = vrot.slane %v7749_v61, 2  ;;  %7994 = vmatprep.mubr.msk.f32.mxu0 %vm411_vm0, %v9569_v10  ;;  %v9581_v36 = vpop.f32.mrf.mxu1 }
 0x127   : > { %11303 = vst [vmem:[#allocation36_spill] sm:$0xff] %v9581_v36  ;;  %v1770_v1 = vpop.f32.mrf.mxu0 }
 0x128   : > { %v2114_v8 = vrot.slane %v1770_v1, 2  ;;  %v7648_v42 = vpop.f32.mrf.mxu1  ;;  %7891 = vmatmul.mubr.msk.f32.gmra.mxu1 %vm411_vm0, %v9549_v48 }
 0x129   : > { %v7752_v6 = vpop.f32.mrf.mxu0  ;;  %7995 = vmatmul.mubr.msk.f32.gmra.mxu0 %vm411_vm0, %v9579_v50  ;;  %v1549_v61 = vrot.slane %v7648_v42, 1  ;;  %7893 = vmatprep.mubr.msk.f32.mxu1 %vm411_vm0, %v9555_v44 }
 0x12a   : > { %7997 = vmatprep.mubr.msk.f32.mxu0 %vm411_vm0, %v8869_v49  ;;  %v2115_v52 = vsel %vm2112_vm2, %v2113_v38, %v2114_v8  ;;  %v2117_v36 = vsel %vm2112_vm2, %v2114_v8, %v2116_v21  ;;  %v1229_v1 = vpop.f32.mrf.mxu1  ;;  %v2118_v21 = vrot.slane %v7752_v6, 2 }
 0x12b   : > { %v1780_v0 = vpop.f32.mrf.mxu0  ;;  %v1645_v25 = vadd.f32 %v1549_v61, %v9313_v45 }
 0x12c   : > { %v7651_v48 = vpop.f32.mrf.mxu1  ;;  %7894 = vmatmul.mubr.msk.f32.gmra.mxu1 %vm411_vm0, %v8833_v22 }
 0x12d   : > { %v7755_v40 = vpop.f32.mrf.mxu0  ;;  %7998 = vmatmul.mubr.msk.f32.gmra.mxu0 %vm411_vm0, %v8884_v53  ;;  %7896 = vmatprep.mubr.msk.f32.mxu1 %vm411_vm0, %v9569_v10  ;;  %v9602_v42 = vadd.f32 %v2113_v38, %v1645_v25 }
 0x12e   : > { %8000 = vmatprep.mubr.msk.f32.mxu0 %vm411_vm0, %v8889_v57  ;;  %v2121_v0 = vrot.slane %v7755_v40, 2  ;;  %v1238_v8 = vpop.f32.mrf.mxu1 }
 0x12f   : > { %11304 = vst [vmem:[#allocation37_spill] sm:$0xff] %v9602_v42  ;;  %v1789_v45 = vpop.f32.mrf.mxu0  ;;  %v1550_v48 = vrot.slane %v1238_v8, 1 }
 0x130   : > { %v2119_v1 = vrot.slane %v1789_v45, 2  ;;  %v7654_v22 = vpop.f32.mrf.mxu1  ;;  %7897 = vmatmul.mubr.msk.f32.gmra.mxu1 %vm411_vm0, %v9579_v50 }
 0x131   : > { %v7758_v44 = vpop.f32.mrf.mxu0  ;;  %8001 = vmatmul.mubr.msk.f32.gmra.mxu0 %vm411_vm0, %v8901_v59  ;;  %v1647_v10 = vadd.f32 %v1550_v48, %v9328_v17  ;;  %v1552_v35 = vrot.slane %v7654_v22, 1  ;;  %7899 = vmatprep.mubr.msk.f32.mxu1 %vm411_vm0, %v8869_v49  ;;  %v1551_v25 = vsel %vm1548_vm3, %v1549_v61, %v1550_v48 }
 0x132   : > { %8003 = vmatprep.mubr.msk.f32.mxu0 %vm411_vm0, %v8905_v63  ;;  %v1247_v6 = vpop.f32.mrf.mxu1  ;;  %v1646_v40 = vadd.f32 %v9311_v30, %v1551_v25  ;;  %v2120_v8 = vsel %vm2112_vm2, %v2118_v21, %v2119_v1  ;;  %v2122_v45 = vsel %vm2112_vm2, %v2119_v1, %v2121_v0 }
 0x133   : > { %v1799_v38 = vpop.f32.mrf.mxu0  ;;  %v1648_v42 = vadd.f32 %v1552_v35, %v9352_v29  ;;  %v9618_v17 = vadd.f32 %v2117_v36, %v1647_v10  ;;  %v2123_v29 = vrot.slane %v7758_v44, 2 }
 0x134   : > { %v7657_v22 = vpop.f32.mrf.mxu1  ;;  %7900 = vmatmul.mubr.msk.f32.gmra.mxu1 %vm411_vm0, %v8884_v53  ;;  %v9624_v61 = vadd.f32 %v2115_v52, %v1646_v40 }
 0x135   : > { %v7761_v49 = vpop.f32.mrf.mxu0  ;;  %8004 = vmatmul.mubr.msk.f32.gmra.mxu0 %vm411_vm0, %v8917_v2  ;;  %7902 = vmatprep.mubr.msk.f32.mxu1 %vm411_vm0, %v8889_v57  ;;  %v9630_v30 = vadd.f32 %v2118_v21, %v1648_v42 }
 0x136   : > { %8006 = vmatprep.mubr.msk.f32.mxu0 %vm411_vm0, %v8921_v7  ;;  %v2126_v10 = vrot.slane %v7761_v49, 2  ;;  %v1256_v36 = vpop.f32.mrf.mxu1 }
 0x137   : > { %v1808_v0 = vpop.f32.mrf.mxu0  ;;  %v1553_v48 = vrot.slane %v1256_v36, 1 }
 0x138   : > { %v2124_v53 = vrot.slane %v1808_v0, 2  ;;  %v7660_v1 = vpop.f32.mrf.mxu1  ;;  %7903 = vmatmul.mubr.msk.f32.gmra.mxu1 %vm411_vm0, %v8901_v59 }
 0x139   : > { %v7764_v52 = vpop.f32.mrf.mxu0  ;;  %8007 = vmatmul.mubr.msk.f32.gmra.mxu0 %vm411_vm0, %v8933_v9  ;;  %v1650_v57 = vadd.f32 %v1553_v48, %v9372_v14  ;;  %v1555_v25 = vrot.slane %v7660_v1, 1  ;;  %7905 = vmatprep.mubr.msk.f32.mxu1 %vm411_vm0, %v8905_v63  ;;  %v1554_v44 = vsel %vm1548_vm3, %v1552_v35, %v1553_v48 }
 0x13a   : > { %8009 = vmatprep.mubr.msk.f32.mxu0 %vm411_vm0, %v8937_v11  ;;  %v1265_v42 = vpop.f32.mrf.mxu1  ;;  %v1649_v6 = vadd.f32 %v9338_v15, %v1554_v44  ;;  %v2125_v59 = vsel %vm2112_vm2, %v2123_v29, %v2124_v53  ;;  %v2127_v38 = vsel %vm2112_vm2, %v2124_v53, %v2126_v10 }
 0x13b   : > { %v1818_v21 = vpop.f32.mrf.mxu0  ;;  %v1651_v40 = vadd.f32 %v1555_v25, %v9389_v55  ;;  %v9646_v14 = vadd.f32 %v2122_v45, %v1650_v57  ;;  %v2128_v55 = vrot.slane %v7764_v52, 2 }
 0x13c   : > { %v7663_v22 = vpop.f32.mrf.mxu1  ;;  %7906 = vmatmul.mubr.msk.f32.gmra.mxu1 %vm411_vm0, %v8917_v2  ;;  %v9652_v35 = vadd.f32 %v2120_v8, %v1649_v6 }
 0x13d   : > { %v7767_v63 = vpop.f32.mrf.mxu0  ;;  %8010 = vmatmul.mubr.msk.f32.gmra.mxu0 %vm411_vm0, %v8949_v13  ;;  %7908 = vmatprep.mubr.msk.f32.mxu1 %vm411_vm0, %v8921_v7  ;;  %v9658_v15 = vadd.f32 %v2123_v29, %v1651_v40 }
 0x13e   : > { %8012 = vmatprep.mubr.msk.f32.mxu0 %vm411_vm0, %v8953_v24  ;;  %v2131_v45 = vrot.slane %v7767_v63, 2  ;;  %v1274_v49 = vpop.f32.mrf.mxu1 }
 0x13f   : > { %v1827_v10 = vpop.f32.mrf.mxu0  ;;  %v1556_v36 = vrot.slane %v1274_v49, 1 }
 0x140   : > { %v2129_v2 = vrot.slane %v1827_v10, 2  ;;  %v7666_v0 = vpop.f32.mrf.mxu1  ;;  %7909 = vmatmul.mubr.msk.f32.gmra.mxu1 %vm411_vm0, %v8933_v9 }
 0x141   : > { %v7770_v8 = vpop.f32.mrf.mxu0  ;;  %8013 = vmatmul.mubr.msk.f32.gmra.mxu0 %vm411_vm0, %v8965_v28  ;;  %v1653_v7 = vadd.f32 %v1556_v36, %v9401_v26  ;;  %v1558_v48 = vrot.slane %v7666_v0, 1  ;;  %7911 = vmatprep.mubr.msk.f32.mxu1 %vm411_vm0, %v8937_v11  ;;  %v1557_v29 = vsel %vm1548_vm3, %v1555_v25, %v1556_v36 }
 0x142   : > { %8015 = vmatprep.mubr.msk.f32.mxu0 %vm411_vm0, %v8969_v37  ;;  %v1283_v53 = vpop.f32.mrf.mxu1  ;;  %v1652_v52 = vadd.f32 %v9379_v33, %v1557_v29  ;;  %v2130_v9 = vsel %vm2112_vm2, %v2128_v55, %v2129_v2  ;;  %v2132_v57 = vsel %vm2112_vm2, %v2129_v2, %v2131_v45 }
 0x143   : > { %v1837_v1 = vpop.f32.mrf.mxu0  ;;  %v1654_v44 = vadd.f32 %v1558_v48, %v9417_v16  ;;  %v9674_v26 = vadd.f32 %v2127_v38, %v1653_v7  ;;  %v2133_v16 = vrot.slane %v7770_v8, 2 }
 0x144   : > { %v7669_v42 = vpop.f32.mrf.mxu1  ;;  %7912 = vmatmul.mubr.msk.f32.gmra.mxu1 %vm411_vm0, %v8949_v13  ;;  %v9680_v25 = vadd.f32 %v2125_v59, %v1652_v52 }
 0x145   : > { %v7773_v11 = vpop.f32.mrf.mxu0  ;;  %8016 = vmatmul.mubr.msk.f32.gmra.mxu0 %vm411_vm0, %v8981_v39  ;;  %7914 = vmatprep.mubr.msk.f32.mxu1 %vm411_vm0, %v8953_v24  ;;  %v9686_v33 = vadd.f32 %v2128_v55, %v1654_v44 }
 0x146   : > { %8018 = vmatprep.mubr.msk.f32.mxu0 %vm411_vm0, %v8985_v41  ;;  %v2136_v21 = vrot.slane %v7773_v11, 2  ;;  %v1292_v6 = vpop.f32.mrf.mxu1  ;;  %v9726_v11 = vld [vmem:[#allocation2 + $0x200] sm:$0xff] }
 0x147   : > { %v1846_v38 = vpop.f32.mrf.mxu0  ;;  %v1559_v40 = vrot.slane %v1292_v6, 1 }
 0x148   : > { %v2134_v13 = vrot.slane %v1846_v38, 2  ;;  %v7672_v22 = vpop.f32.mrf.mxu1  ;;  %7915 = vmatmul.mubr.msk.f32.gmra.mxu1 %vm411_vm0, %v8965_v28 }
 0x149   : > { %v7776_v59 = vpop.f32.mrf.mxu0  ;;  %8019 = vmatmul.mubr.msk.f32.gmra.mxu0 %vm411_vm0, %v11266_v19  ;;  %v1656_v24 = vadd.f32 %v1559_v40, %v9429_v47  ;;  %v1561_v63 = vrot.slane %v7672_v22, 1  ;;  %7917 = vmatprep.mubr.msk.f32.mxu1 %vm411_vm0, %v8969_v37  ;;  %v1560_v55 = vsel %vm1548_vm3, %v1558_v48, %v1559_v40 }
 0x14a   : > { %8021 = vmatprep.mubr.msk.f32.mxu0 %vm411_vm0, %v11267_v34  ;;  %v1301_v45 = vpop.f32.mrf.mxu1  ;;  %v1655_v10 = vadd.f32 %v9407_v23, %v1560_v55  ;;  %v2135_v28 = vsel %vm2112_vm2, %v2133_v16, %v2134_v13  ;;  %v2137_v36 = vsel %vm2112_vm2, %v2134_v13, %v2136_v21 }
 0x14b   : > { %v1856_v49 = vpop.f32.mrf.mxu0  ;;  %v1657_v2 = vadd.f32 %v1561_v63, %v9445_v56  ;;  %v9702_v47 = vadd.f32 %v2132_v57, %v1656_v24  ;;  %v2138_v56 = vrot.slane %v7776_v59, 2  ;;  %v9748_v24 = vld [vmem:[#allocation2 + $0x210] sm:$0xff] }
 0x14c   : > { %v7675_v0 = vpop.f32.mrf.mxu1  ;;  %7918 = vmatmul.mubr.msk.f32.gmra.mxu1 %vm411_vm0, %v8981_v39  ;;  %v9708_v8 = vadd.f32 %v2130_v9, %v1655_v10 }
 0x14d   : > { %v7779_v37 = vpop.f32.mrf.mxu0  ;;  %8022 = vmatmul.mubr.msk.f32.gmra.mxu0 %vm411_vm0, %v11268_v4  ;;  %7920 = vmatprep.mubr.msk.f32.mxu1 %vm411_vm0, %v8985_v41  ;;  %v9714_v23 = vadd.f32 %v2133_v16, %v1657_v2 }
 0x14e   : > { %8024 = vmatprep.mubr.msk.f32.mxu0 %vm411_vm0, %v9017_v5  ;;  %v2141_v7 = vrot.slane %v7779_v37, 2  ;;  %v1310_v48 = vpop.f32.mrf.mxu1 }
 0x14f   : > { %v1865_v29 = vpop.f32.mrf.mxu0  ;;  %v1562_v53 = vrot.slane %v1310_v48, 1 }
 0x150   : > { %v2139_v39 = vrot.slane %v1865_v29, 2  ;;  %v7678_v1 = vpop.f32.mrf.mxu1  ;;  %7921 = vmatmul.mubr.msk.f32.gmra.mxu1 %vm411_vm0, %v11266_v19 }
 0x151   : > { %v7782_v52 = vpop.f32.mrf.mxu0  ;;  %8025 = vmatmul.mubr.msk.f32.gmra.mxu0 %vm411_vm0, %v9025_v43  ;;  %v1659_v41 = vadd.f32 %v1562_v53, %v9457_v31  ;;  %v1564_v9 = vrot.slane %v7678_v1, 1  ;;  %7923 = vmatprep.mubr.msk.f32.mxu1 %vm411_vm0, %v11267_v34  ;;  %v1563_v57 = vsel %vm1548_vm3, %v1561_v63, %v1562_v53 }
 0x152   : > { %8027 = vmatprep.mubr.msk.f32.mxu0 %vm411_vm0, %v11269_v60  ;;  %v1319_v44 = vpop.f32.mrf.mxu1  ;;  %v1658_v19 = vadd.f32 %v9435_v54, %v1563_v57  ;;  %v2140_v16 = vsel %vm2112_vm2, %v2138_v56, %v2139_v39  ;;  %v2142_v21 = vsel %vm2112_vm2, %v2139_v39, %v2141_v7  ;;  %v9744_v54 = vld [vmem:[#allocation2 + $0x208] sm:$0xff]  ;;  %v2143_v13 = vrot.slane %v7782_v52, 2 }
 0x153   : > { %v1875_v42 = vpop.f32.mrf.mxu0  ;;  %v1660_v31 = vadd.f32 %v1564_v9, %v9473_v46  ;;  %v9732_v6 = vadd.f32 %v2137_v36, %v1659_v41 }
 0x154   : > { %v7681_v34 = vpop.f32.mrf.mxu1  ;;  %7924 = vmatmul.mubr.msk.f32.gmra.mxu1 %vm411_vm0, %v11268_v4  ;;  %v9738_v40 = vadd.f32 %v2135_v28, %v1658_v19  ;;  %v9759_v28 = vld [vmem:[#allocation2 + $0x218] sm:$0xff] }
 0x155   : > { %v7785_v38 = vpop.f32.mrf.mxu0  ;;  %8028 = vmatmul.mubr.msk.f32.gmra.mxu0 %vm411_vm0, %v9037_v51  ;;  %7926 = vmatprep.mubr.msk.f32.mxu1 %vm411_vm0, %v9017_v5  ;;  %v9746_v46 = vadd.f32 %v2138_v56, %v1660_v31 }
 0x156   : > { %8030 = vmatprep.mubr.msk.f32.mxu0 %vm411_vm0, %v9726_v11  ;;  %v2146_v22 = vrot.slane %v7785_v38, 2  ;;  %v1328_v59 = vpop.f32.mrf.mxu1 }
 0x157   : > { %v1884_v4 = vpop.f32.mrf.mxu0  ;;  %v1565_v63 = vrot.slane %v1328_v59, 1 }
 0x158   : > { %v2144_v55 = vrot.slane %v1884_v4, 2  ;;  %v7684_v45 = vpop.f32.mrf.mxu1  ;;  %7927 = vmatmul.mubr.msk.f32.gmra.mxu1 %vm411_vm0, %v9025_v43  ;;  %v4091_v43 = vld [vmem:[#allocation2 + $0x40] sm:$0xff] }
 0x159   : > { %v7788_v5 = vpop.f32.mrf.mxu0  ;;  %8031 = vmatmul.mubr.msk.f32.gmra.mxu0 %vm411_vm0, %v9744_v54  ;;  %v1662_v49 = vadd.f32 %v1565_v63, %v9485_v58  ;;  %v1567_v10 = vrot.slane %v7684_v45, 1  ;;  %7929 = vmatprep.mubr.msk.f32.mxu1 %vm411_vm0, %v11269_v60  ;;  %v1566_v36 = vsel %vm1548_vm3, %v1564_v9, %v1565_v63 }
 0x15a   : > { %8033 = vmatprep.mubr.msk.f32.mxu0 %vm411_vm0, %v9748_v24  ;;  %v1337_v2 = vpop.f32.mrf.mxu1  ;;  %v1661_v37 = vadd.f32 %v9463_v3, %v1566_v36  ;;  %v2145_v56 = vsel %vm2112_vm2, %v2143_v13, %v2144_v55  ;;  %v2147_v58 = vsel %vm2112_vm2, %v2144_v55, %v2146_v22  ;;  %v9777_v3 = vld [vmem:[#allocation2 + $0x48] sm:$0xff]  ;;  %v2148_v39 = vrot.slane %v7788_v5, 2  ;;  %v8439_v5 = vld [vmem:[#allocation2 + $0x20] sm:$0xff] }
 0x15b   : > { %v1894_v0 = vpop.f32.mrf.mxu0  ;;  %v1663_v7 = vadd.f32 %v1567_v10, %v9501_v62  ;;  %v9766_v48 = vadd.f32 %v2142_v21, %v1662_v49  ;;  %v9794_v21 = vld [vmem:[#allocation2 + $0x58] sm:$0xff] }
 0x15c   : > { %v7687_v60 = vpop.f32.mrf.mxu1  ;;  %7930 = vmatmul.mubr.msk.f32.gmra.mxu1 %vm411_vm0, %v9037_v51  ;;  %v9772_v53 = vadd.f32 %v2140_v16, %v1661_v37  ;;  %v9781_v51 = vld [vmem:[#allocation2 + $0x50] sm:$0xff] }
 0x15d   : > { %v7791_v29 = vpop.f32.mrf.mxu0  ;;  %8034 = vmatmul.mubr.msk.f32.gmra.mxu0 %vm411_vm0, %v9759_v28  ;;  %7932 = vmatprep.mubr.msk.f32.mxu1 %vm411_vm0, %v9726_v11  ;;  %v9779_v62 = vadd.f32 %v2143_v13, %v1663_v7  ;;  %v9798_v13 = vld [vmem:[#allocation2 + $0x60] sm:$0xff]  ;;  %v9820_v37 = vld [vmem:[#allocation2 + $0x70] sm:$0xff] }
 0x15e   : > { %8136 = vmatprep.mubr.msk.f32.mxu0 %vm411_vm0, %v4091_v43  ;;  %v2151_v1 = vrot.slane %v7791_v29, 2  ;;  %v1346_v52 = vpop.f32.mrf.mxu1 }
 0x15f   : > { %v1903_v41 = vpop.f32.mrf.mxu0  ;;  %v1568_v9 = vrot.slane %v1346_v52, 1  ;;  %v9830_v52 = vld [vmem:[#allocation2 + $0x78] sm:$0xff] }
 0x160   : > { %v2149_v57 = vrot.slane %v1903_v41, 2  ;;  %v7690_v44 = vpop.f32.mrf.mxu1  ;;  %7933 = vmatmul.mubr.msk.f32.gmra.mxu1 %vm411_vm0, %v9744_v54 }
 0x161   : > { %v9785_v42 = vpop.f32.mrf.mxu0  ;;  %8137 = vmatmul.mubr.msk.f32.vlgmr.msra.gmra.mxu0 %vm411_vm0, %v9777_v3  ;;  %v1665_v19 = vadd.f32 %v1568_v9, %v9517_v12  ;;  %v1570_v16 = vrot.slane %v7690_v44, 1  ;;  %7935 = vmatprep.mubr.msk.f32.mxu1 %vm411_vm0, %v9748_v24  ;;  %v1569_v31 = vsel %vm1548_vm3, %v1567_v10, %v1568_v9  ;;  %v9835_v44 = vld [vmem:[#allocation2 + $0x80] sm:$0xff] }
 0x162   : > { %8139 = vmatprep.mubr.msk.f32.mxu0 %vm411_vm0, %v9781_v51  ;;  %v1355_v34 = vpop.f32.mrf.mxu1  ;;  %8331 = vmatpush3.msra.mxu0 %v9360_v18  ;;  %v1664_v22 = vadd.f32 %v9491_v20, %v1569_v31  ;;  %v2150_v12 = vsel %vm2112_vm2, %v2148_v39, %v2149_v57  ;;  %v2152_v59 = vsel %vm2112_vm2, %v2149_v57, %v2151_v1  ;;  %v9815_v20 = vld [vmem:[#allocation2 + $0x68] sm:$0xff]  ;;  %v2153_v49 = vrot.slane %v9785_v42, 2  ;;  %v8441_v1 = vld [vmem:[#allocation2 + $0x30] sm:$0xff]  ;;  %v11306_v42 = vld [vmem:[#allocation26_spill] sm:$0xff] }
 0x163   : > { %v1913_v38 = vpop.f32.mrf.mxu0  ;;  %v1666_v4 = vadd.f32 %v1570_v16, %v9537_v27  ;;  %v9804_v63 = vadd.f32 %v2147_v58, %v1665_v19  ;;  %v8440_v58 = vld [vmem:[#allocation2 + $0x28] sm:$0xff]  ;;  %v11307_v34 = vld [vmem:[#allocation5_spill] sm:$0xff] }
 0x164   : > { %v7693_v55 = vpop.f32.mrf.mxu1  ;;  %7936 = vmatmul.mubr.msk.f32.gmra.mxu1 %vm411_vm0, %v9759_v28  ;;  %v9810_v18 = vadd.f32 %v2145_v56, %v1664_v22 }
 0x165   : > { %v7797_v45 = vpop.f32.mrf.mxu0  ;;  %8140 = vmatmul.mubr.msk.f32.gmra.mxu0 %vm411_vm0, %v9794_v21  ;;  %8038 = vmatprep.mubr.msk.f32.mxu1 %vm411_vm0, %v8439_v5  ;;  %v9817_v27 = vadd.f32 %v2148_v39, %v1666_v4  ;;  %v11305_v39 = vld [vmem:[#allocation4_spill] sm:$0xff]  ;;  %v8442_v55 = vld [vmem:[#allocation2 + $0x38] sm:$0xff]  ;;  %v8443_v5 = vld [vmem:[#allocation2 + $0x40] sm:$0xff] }
 0x166   : > { %8142 = vmatprep.mubr.msk.f32.mxu0 %vm411_vm0, %v9798_v13  ;;  %v2156_v10 = vrot.slane %v7797_v45, 2  ;;  %v1364_v36 = vpop.f32.mrf.mxu1 }
 0x167   : > { %v1922_v2 = vpop.f32.mrf.mxu0  ;;  %v1571_v0 = vrot.slane %v1364_v36, 1 }
 0x168   : > { %v2154_v43 = vrot.slane %v1922_v2, 2  ;;  %v7696_v56 = vpop.f32.mrf.mxu1  ;;  %8039 = vmatmul.mubr.msk.f32.vlgmr.msra.gmra.mxu1 %vm411_vm0, %v8440_v58 }
 0x169   : > { %v9823_v7 = vpop.f32.mrf.mxu0  ;;  %8143 = vmatmul.mubr.msk.f32.gmra.mxu0 %vm411_vm0, %v9815_v20  ;;  %v1668_v60 = vadd.f32 %v1571_v0, %v9553_v32  ;;  %v1573_v29 = vrot.slane %v7696_v56, 1  ;;  %8233 = vmatpush3.msra.mxu1 %v11305_v39  ;;  %v1572_v41 = vsel %vm1548_vm3, %v1570_v16, %v1571_v0  ;;  %v9856_v56 = vld [vmem:[#allocation2 + $0x90] sm:$0xff]  ;;  %v8444_v39 = vld [vmem:[#allocation2 + $0x48] sm:$0xff] }
 0x16a   : > { %8041 = vmatprep.mubr.msk.f32.mxu1 %vm411_vm0, %v8441_v1  ;;  %v1373_v9 = vpop.f32.mrf.mxu1  ;;  %8145 = vmatprep.mubr.msk.f32.mxu0 %vm411_vm0, %v9820_v37  ;;  %v1667_v19 = vadd.f32 %v11306_v42, %v1572_v41  ;;  %v2155_v32 = vsel %vm2112_vm2, %v2153_v49, %v2154_v43  ;;  %v2157_v31 = vsel %vm2112_vm2, %v2154_v43, %v2156_v10  ;;  %v9851_v10 = vld [vmem:[#allocation2 + $0x88] sm:$0xff]  ;;  %v2158_v36 = vrot.slane %v9823_v7, 2  ;;  %v8445_v7 = vld [vmem:[#allocation2 + $0x50] sm:$0xff] }
 0x16b   : > { %v1932_v57 = vpop.f32.mrf.mxu0  ;;  %v1669_v38 = vadd.f32 %v1573_v29, %v11307_v34  ;;  %v9841_v22 = vadd.f32 %v2152_v59, %v1668_v60  ;;  %11308 = vst [vmem:[#allocation4_spill] sm:$0xff] %v9851_v10  ;;  %11309 = vst [vmem:[#allocation26_spill] sm:$0xff] %v9856_v56 }
 0x16c   : > { %v7699_v4 = vpop.f32.mrf.mxu1  ;;  %8042 = vmatmul.mubr.msk.f32.gmra.mxu1 %vm411_vm0, %v8442_v55  ;;  %v9846_v45 = vadd.f32 %v2150_v12, %v1667_v19  ;;  %v9867_v57 = vld [vmem:[#allocation2 + $0x98] sm:$0xff] }
 0x16d   : > { %v7803_v16 = vpop.f32.mrf.mxu0  ;;  %8146 = vmatmul.mubr.msk.f32.gmra.mxu0 %vm411_vm0, %v9830_v52  ;;  %8044 = vmatprep.mubr.msk.f32.mxu1 %vm411_vm0, %v8443_v5  ;;  %v9853_v59 = vadd.f32 %v2153_v49, %v1669_v38  ;;  %v11310_v49 = vld [vmem:[#allocation6_spill] sm:$0xff]  ;;  %11311 = vst [vmem:[#allocation5_spill] sm:$0xff] %v9867_v57  ;;  %v9870_v38 = vld [vmem:[#allocation2 + $0xa0] sm:$0xff] }
 0x16e   : > { %8148 = vmatprep.mubr.msk.f32.mxu0 %vm411_vm0, %v9835_v44  ;;  %v2161_v2 = vrot.slane %v7803_v16, 2  ;;  %v1382_v0 = vpop.f32.mrf.mxu1  ;;  %11312 = vst [vmem:[#allocation6_spill] sm:$0xff] %v9870_v38  ;;  %v11313_v4 = vld [vmem:[#allocation3_spill] sm:$0xff] }
 0x16f   : > { %v1941_v43 = vpop.f32.mrf.mxu0  ;;  %v1574_v58 = vrot.slane %v1382_v0, 1  ;;  %v11314_v0 = vld [vmem:[#allocation8_spill] sm:$0xff] }
 0x170   : > { %v2159_v12 = vrot.slane %v1941_v43, 2  ;;  %v7702_v60 = vpop.f32.mrf.mxu1  ;;  %8045 = vmatmul.mubr.msk.f32.gmra.mxu1 %vm411_vm0, %v8444_v39 }
 0x171   : > { %v9859_v1 = vpop.f32.mrf.mxu0  ;;  %8149 = vmatmul.mubr.msk.f32.gmra.mxu0 %vm411_vm0, %v9851_v10  ;;  %v1671_v41 = vadd.f32 %v1574_v58, %v11310_v49  ;;  %v1576_v9 = vrot.slane %v7702_v60, 1  ;;  %8047 = vmatprep.mubr.msk.f32.mxu1 %vm411_vm0, %v8445_v7  ;;  %v1575_v42 = vsel %vm1548_vm3, %v1573_v29, %v1574_v58  ;;  %v8446_v49 = vld [vmem:[#allocation2 + $0x58] sm:$0xff]  ;;  %v8447_v58 = vld [vmem:[#allocation2 + $0x60] sm:$0xff] }
 0x172   : > { %8151 = vmatprep.mubr.msk.f32.mxu0 %vm411_vm0, %v9856_v56  ;;  %v1391_v19 = vpop.f32.mrf.mxu1  ;;  %v1670_v55 = vadd.f32 %v11313_v4, %v1575_v42  ;;  %v2160_v16 = vsel %vm2112_vm2, %v2158_v36, %v2159_v12  ;;  %v2162_v5 = vsel %vm2112_vm2, %v2159_v12, %v2161_v2  ;;  %v9886_v2 = vld [vmem:[#allocation2 + $0xa8] sm:$0xff]  ;;  %v2163_v12 = vrot.slane %v9859_v1, 2  ;;  %v8449_v1 = vld [vmem:[#allocation2 + $0x70] sm:$0xff] }
 0x173   : > { %v1951_v34 = vpop.f32.mrf.mxu0  ;;  %v1672_v43 = vadd.f32 %v1576_v9, %v11314_v0  ;;  %v9876_v60 = vadd.f32 %v2157_v31, %v1671_v41  ;;  %11315 = vst [vmem:[#allocation3_spill] sm:$0xff] %v9886_v2  ;;  %v8448_v0 = vld [vmem:[#allocation2 + $0x68] sm:$0xff] }
 0x174   : > { %v7705_v39 = vpop.f32.mrf.mxu1  ;;  %8048 = vmatmul.mubr.msk.f32.gmra.mxu1 %vm411_vm0, %v8446_v49  ;;  %v9881_v29 = vadd.f32 %v2155_v32, %v1670_v55  ;;  %v9891_v34 = vld [vmem:[#allocation2 + $0xb0] sm:$0xff] }
 0x175   : > { %v7809_v7 = vpop.f32.mrf.mxu0  ;;  %8152 = vmatmul.mubr.msk.f32.gmra.mxu0 %vm411_vm0, %v9867_v57  ;;  %8050 = vmatprep.mubr.msk.f32.mxu1 %vm411_vm0, %v8447_v58  ;;  %v9888_v31 = vadd.f32 %v2158_v36, %v1672_v43  ;;  %11317 = vst [vmem:[#allocation38_spill] sm:$0xff] %v9891_v34  ;;  %v11318_v36 = vld [vmem:[#allocation9_spill] sm:$0xff] }
 0x176   : > { %8154 = vmatprep.mubr.msk.f32.mxu0 %vm411_vm0, %v9870_v38  ;;  %v2166_v41 = vrot.slane %v7809_v7, 2  ;;  %v1400_v42 = vpop.f32.mrf.mxu1  ;;  %v9902_v7 = vld [vmem:[#allocation2 + $0xb8] sm:$0xff]  ;;  %v11321_v38 = vld [vmem:[#allocation7_spill] sm:$0xff] }
 0x177   : > { %11316 = vst [vmem:[#allocation8_spill] sm:$0xff] %v9888_v31  ;;  %v1960_v19 = vpop.f32.mrf.mxu0  ;;  %v1577_v4 = vrot.slane %v1400_v42, 1  ;;  %11319 = vst [vmem:[#allocation9_spill] sm:$0xff] %v9902_v7 }
 0x178   : > { %v2164_v32 = vrot.slane %v1960_v19, 2  ;;  %v7708_v55 = vpop.f32.mrf.mxu1  ;;  %8051 = vmatmul.mubr.msk.f32.gmra.mxu1 %vm411_vm0, %v8448_v0  ;;  %v9905_v0 = vld [vmem:[#allocation2 + $0xc0] sm:$0xff] }
 0x179   : > { %v9894_v39 = vpop.f32.mrf.mxu0  ;;  %8155 = vmatmul.mubr.msk.f32.gmra.mxu0 %vm411_vm0, %v9886_v2  ;;  %v1674_v43 = vadd.f32 %v1577_v4, %v11318_v36  ;;  %v1579_v49 = vrot.slane %v7708_v55, 1  ;;  %8053 = vmatprep.mubr.msk.f32.mxu1 %vm411_vm0, %v8449_v1  ;;  %v1578_v58 = vsel %vm1548_vm3, %v1576_v9, %v1577_v4  ;;  %11320 = vst [vmem:[#allocation39_spill] sm:$0xff] %v9905_v0  ;;  %v11322_v36 = vld [vmem:[#allocation11_spill] sm:$0xff] }
 0x17a   : > { %8157 = vmatprep.mubr.msk.f32.mxu0 %vm411_vm0, %v9891_v34  ;;  %v1409_v42 = vpop.f32.mrf.mxu1  ;;  %v1673_v57 = vadd.f32 %v11321_v38, %v1578_v58  ;;  %v2165_v2 = vsel %vm2112_vm2, %v2163_v12, %v2164_v32  ;;  %v2167_v55 = vsel %vm2112_vm2, %v2164_v32, %v2166_v41  ;;  %v8450_v34 = vld [vmem:[#allocation2 + $0x78] sm:$0xff]  ;;  %v8451_v4 = vld [vmem:[#allocation2 + $0x80] sm:$0xff]  ;;  %v9921_v38 = vld [vmem:[#allocation2 + $0xc8] sm:$0xff] }
 0x17b   : > { %v1970_v19 = vpop.f32.mrf.mxu0  ;;  %v1675_v31 = vadd.f32 %v1579_v49, %v11322_v36  ;;  %v9911_v1 = vadd.f32 %v2162_v5, %v1674_v43  ;;  %11325 = vst [vmem:[#allocation40_spill] sm:$0xff] %v9921_v38  ;;  %v9926_v43 = vld [vmem:[#allocation2 + $0xd0] sm:$0xff]  ;;  %v8452_v42 = vld [vmem:[#allocation2 + $0x88] sm:$0xff] }
 0x17c   : > { %v7711_v56 = vpop.f32.mrf.mxu1  ;;  %8054 = vmatmul.mubr.msk.f32.gmra.mxu1 %vm411_vm0, %v8450_v34  ;;  %v9916_v9 = vadd.f32 %v2160_v16, %v1673_v57  ;;  %11327 = vst [vmem:[#allocation42_spill] sm:$0xff] %v9926_v43 }
 0x17d   : > { %11323 = vst [vmem:[#allocation7_spill] sm:$0xff] %v9911_v1  ;;  %v7815_v10 = vpop.f32.mrf.mxu0  ;;  %8158 = vmatmul.mubr.msk.f32.gmra.mxu0 %vm411_vm0, %v9902_v7  ;;  %8056 = vmatprep.mubr.msk.f32.mxu1 %vm411_vm0, %v8451_v4  ;;  %v9923_v5 = vadd.f32 %v2163_v12, %v1675_v31  ;;  %v2168_v56 = vrot.slane %v9894_v39, 2  ;;  %v11328_v31 = vld [vmem:[#allocation12_spill] sm:$0xff]  ;;  %v8453_v39 = vld [vmem:[#allocation2 + $0x90] sm:$0xff] }
 0x17e   : > { %11324 = vst [vmem:[#allocation11_spill] sm:$0xff] %v9916_v9  ;;  %8160 = vmatprep.mubr.msk.f32.mxu0 %vm411_vm0, %v9905_v0  ;;  %v2171_v41 = vrot.slane %v7815_v10, 2  ;;  %v1418_v34 = vpop.f32.mrf.mxu1  ;;  %v9937_v10 = vld [vmem:[#allocation2 + $0xd8] sm:$0xff] }
 0x17f   : > { %11326 = vst [vmem:[#allocation41_spill] sm:$0xff] %v9923_v5  ;;  %v1979_v32 = vpop.f32.mrf.mxu0  ;;  %v1580_v58 = vrot.slane %v1418_v34, 1  ;;  %11329 = vst [vmem:[#allocation12_spill] sm:$0xff] %v9937_v10  ;;  %v11331_v0 = vld [vmem:[#allocation10_spill] sm:$0xff] }
 0x180   : > { %v2169_v57 = vrot.slane %v1979_v32, 2  ;;  %v7714_v16 = vpop.f32.mrf.mxu1  ;;  %8057 = vmatmul.mubr.msk.f32.gmra.mxu1 %vm411_vm0, %v8452_v42  ;;  %v9940_v42 = vld [vmem:[#allocation2 + $0xe0] sm:$0xff] }
 0x181   : > { %v9929_v19 = vpop.f32.mrf.mxu0  ;;  %8161 = vmatmul.mubr.msk.f32.gmra.mxu0 %vm411_vm0, %v9921_v38  ;;  %v1677_v12 = vadd.f32 %v1580_v58, %v11328_v31  ;;  %v1582_v36 = vrot.slane %v7714_v16, 1  ;;  %8059 = vmatprep.mubr.msk.f32.mxu1 %vm411_vm0, %v8453_v39  ;;  %v1581_v4 = vsel %vm1548_vm3, %v1579_v49, %v1580_v58  ;;  %11330 = vst [vmem:[#allocation43_spill] sm:$0xff] %v9940_v42  ;;  %v11332_v31 = vld [vmem:[#allocation14_spill] sm:$0xff]  ;;  %v8455_v58 = vld [vmem:[#allocation2 + $0xa0] sm:$0xff] }
 0x182   : > { %8163 = vmatprep.mubr.msk.f32.mxu0 %vm411_vm0, %v9926_v43  ;;  %v1427_v34 = vpop.f32.mrf.mxu1  ;;  %v1676_v7 = vadd.f32 %v11331_v0, %v1581_v4  ;;  %v2170_v38 = vsel %vm2112_vm2, %v2168_v56, %v2169_v57  ;;  %v2172_v16 = vsel %vm2112_vm2, %v2169_v57, %v2171_v41  ;;  %v8454_v43 = vld [vmem:[#allocation2 + $0x98] sm:$0xff]  ;;  %v9956_v0 = vld [vmem:[#allocation2 + $0xe8] sm:$0xff] }
 0x183   : > { %v1989_v32 = vpop.f32.mrf.mxu0  ;;  %v1678_v5 = vadd.f32 %v1582_v36, %v11332_v31  ;;  %v9946_v39 = vadd.f32 %v2167_v55, %v1677_v12  ;;  %11334 = vst [vmem:[#allocation14_spill] sm:$0xff] %v9956_v0  ;;  %v9961_v12 = vld [vmem:[#allocation2 + $0xf0] sm:$0xff]  ;;  %v8456_v34 = vld [vmem:[#allocation2 + $0xa8] sm:$0xff]  ;;  %v11337_v31 = vld [vmem:[#allocation15_spill] sm:$0xff] }
 0x184   : > { %v7717_v1 = vpop.f32.mrf.mxu1  ;;  %8060 = vmatmul.mubr.msk.f32.gmra.mxu1 %vm411_vm0, %v8454_v43  ;;  %v9951_v49 = vadd.f32 %v2165_v2, %v1676_v7  ;;  %11336 = vst [vmem:[#allocation45_spill] sm:$0xff] %v9961_v12 }
 0x185   : > { %11333 = vst [vmem:[#allocation10_spill] sm:$0xff] %v9946_v39  ;;  %v7821_v9 = vpop.f32.mrf.mxu0  ;;  %8164 = vmatmul.mubr.msk.f32.gmra.mxu0 %vm411_vm0, %v9937_v10  ;;  %8062 = vmatprep.mubr.msk.f32.mxu1 %vm411_vm0, %v8455_v58  ;;  %v9958_v55 = vadd.f32 %v2168_v56, %v1678_v5  ;;  %v2173_v1 = vrot.slane %v9929_v19, 2  ;;  %v8457_v58 = vld [vmem:[#allocation2 + $0xb0] sm:$0xff]  ;;  %v8458_v39 = vld [vmem:[#allocation2 + $0xb8] sm:$0xff] }
 0x186   : > { %8166 = vmatprep.mubr.msk.f32.mxu0 %vm411_vm0, %v9940_v42  ;;  %v2176_v41 = vrot.slane %v7821_v9, 2  ;;  %v1436_v43 = vpop.f32.mrf.mxu1  ;;  %v9970_v9 = vld [vmem:[#allocation2 + $0xf8] sm:$0xff] }
 0x187   : > { %11335 = vst [vmem:[#allocation44_spill] sm:$0xff] %v9958_v55  ;;  %v1998_v57 = vpop.f32.mrf.mxu0  ;;  %v1583_v4 = vrot.slane %v1436_v43, 1  ;;  %11338 = vst [vmem:[#allocation15_spill] sm:$0xff] %v9970_v9 }
 0x188   : > { %v2174_v2 = vrot.slane %v1998_v57, 2  ;;  %v7720_v7 = vpop.f32.mrf.mxu1  ;;  %8063 = vmatmul.mubr.msk.f32.gmra.mxu1 %vm411_vm0, %v8456_v34  ;;  %v11339_v34 = vld [vmem:[#allocation13_spill] sm:$0xff] }
 0x189   : > { %v7824_v32 = vpop.f32.mrf.mxu0  ;;  %8167 = vmatmul.mubr.msk.f32.gmra.mxu0 %vm411_vm0, %v9956_v0  ;;  %v1680_v5 = vadd.f32 %v1583_v4, %v11337_v31  ;;  %v1585_v56 = vrot.slane %v7720_v7, 1  ;;  %8065 = vmatprep.mubr.msk.f32.mxu1 %vm411_vm0, %v8457_v58  ;;  %v1584_v19 = vsel %vm1548_vm3, %v1582_v36, %v1583_v4  ;;  %v11340_v31 = vld [vmem:[#allocation17_spill] sm:$0xff]  ;;  %v8459_v4 = vld [vmem:[#allocation2 + $0xc0] sm:$0xff] }
 0x18a   : > { %8169 = vmatprep.mubr.msk.f32.mxu0 %vm411_vm0, %v9961_v12  ;;  %v1445_v43 = vpop.f32.mrf.mxu1  ;;  %v1679_v42 = vadd.f32 %v11339_v34, %v1584_v19  ;;  %v2175_v10 = vsel %vm2112_vm2, %v2173_v1, %v2174_v2  ;;  %v2177_v0 = vsel %vm2112_vm2, %v2174_v2, %v2176_v41  ;;  %v11343_v19 = vld [vmem:[#allocation21_spill] sm:$0xff] }
 0x18b   : > { %v2008_v57 = vpop.f32.mrf.mxu0  ;;  %v1681_v7 = vadd.f32 %v1585_v56, %v11340_v31  ;;  %v9977_v55 = vadd.f32 %v2172_v16, %v1680_v5  ;;  %v2178_v16 = vrot.slane %v7824_v32, 2  ;;  %v8460_v31 = vld [vmem:[#allocation2 + $0xc8] sm:$0xff] }
 0x18c   : > { %v7723_v58 = vpop.f32.mrf.mxu1  ;;  %8066 = vmatmul.mubr.msk.f32.gmra.mxu1 %vm411_vm0, %v8458_v39  ;;  %v9982_v36 = vadd.f32 %v2170_v38, %v1679_v42  ;;  %v11345_v42 = vld [vmem:[#allocation22_spill] sm:$0xff] }
 0x18d   : > { %11341 = vst [vmem:[#allocation13_spill] sm:$0xff] %v9977_v55  ;;  %v7827_v12 = vpop.f32.mrf.mxu0  ;;  %8170 = vmatmul.mubr.msk.f32.gmra.mxu0 %vm411_vm0, %v9970_v9  ;;  %8068 = vmatprep.mubr.msk.f32.mxu1 %vm411_vm0, %v8459_v4  ;;  %v9987_v41 = vadd.f32 %v2173_v1, %v1681_v7  ;;  %v11346_v58 = vld [vmem:[#allocation18_spill] sm:$0xff]  ;;  %v11347_v1 = vld [vmem:[#allocation24_spill] sm:$0xff] }
 0x18e   : > { %11342 = vst [vmem:[#allocation17_spill] sm:$0xff] %v9982_v36  ;;  %8172 = vmatprep.mubr.msk.f32.mxu0 %vm411_vm0, %v11343_v19  ;;  %v2181_v2 = vrot.slane %v7827_v12, 2  ;;  %v1454_v5 = vpop.f32.mrf.mxu1  ;;  %v8461_v19 = vld [vmem:[#allocation2 + $0xd0] sm:$0xff]  ;;  %v8462_v36 = vld [vmem:[#allocation2 + $0xd8] sm:$0xff] }
 0x18f   : > { %11344 = vst [vmem:[#allocation21_spill] sm:$0xff] %v9987_v41  ;;  %v2017_v43 = vpop.f32.mrf.mxu0  ;;  %v1586_v57 = vrot.slane %v1454_v5, 1  ;;  %v11348_v5 = vld [vmem:[#allocation16_spill] sm:$0xff] }
 0x190   : > { %v2179_v39 = vrot.slane %v2017_v43, 2  ;;  %v7726_v34 = vpop.f32.mrf.mxu1  ;;  %8069 = vmatmul.mubr.msk.f32.gmra.mxu1 %vm411_vm0, %v8460_v31 }
 0x191   : > { %v7830_v38 = vpop.f32.mrf.mxu0  ;;  %8173 = vmatmul.mubr.msk.f32.gmra.mxu0 %vm411_vm0, %v11345_v42  ;;  %v1683_v4 = vadd.f32 %v1586_v57, %v11346_v58  ;;  %v1588_v9 = vrot.slane %v7726_v34, 1  ;;  %8071 = vmatprep.mubr.msk.f32.mxu1 %vm411_vm0, %v8461_v19  ;;  %v1587_v12 = vsel %vm1548_vm3, %v1585_v56, %v1586_v57  ;;  %v11349_v42 = vld [vmem:[#allocation20_spill] sm:$0xff]  ;;  %v8463_v57 = vld [vmem:[#allocation2 + $0xe0] sm:$0xff] }
 0x192   : > { %8175 = vmatprep.mubr.msk.f32.mxu0 %vm411_vm0, %v11347_v1  ;;  %v1463_v32 = vpop.f32.mrf.mxu1  ;;  %v1682_v43 = vadd.f32 %v11348_v5, %v1587_v12  ;;  %v2180_v31 = vsel %vm2112_vm2, %v2178_v16, %v2179_v39  ;;  %v2182_v41 = vsel %vm2112_vm2, %v2179_v39, %v2181_v2  ;;  %v11351_v1 = vld [vmem:[#allocation27_spill] sm:$0xff]  ;;  %v11353_v12 = vld [vmem:[#allocation29_spill] sm:$0xff] }
 0x193   : > { %v2027_v7 = vpop.f32.mrf.mxu0  ;;  %v1684_v55 = vadd.f32 %v1588_v9, %v11349_v42  ;;  %v10001_v58 = vadd.f32 %v2177_v0, %v1683_v4  ;;  %v2183_v0 = vrot.slane %v7830_v38, 2  ;;  %v8464_v42 = vld [vmem:[#allocation2 + $0xe8] sm:$0xff]  ;;  %v10022_v38 = vld [vmem:[#allocation2 + $0x138] sm:$0xff] }
 0x194   : > { %v7729_v34 = vpop.f32.mrf.mxu1  ;;  %8072 = vmatmul.mubr.msk.f32.gmra.mxu1 %vm411_vm0, %v8462_v36  ;;  %v10006_v56 = vadd.f32 %v2175_v10, %v1682_v43  ;;  %v11355_v43 = vld [vmem:[#allocation30_spill] sm:$0xff]  ;;  %11358 = vst [vmem:[#allocation16_spill] sm:$0xff] %v10022_v38 }
 0x195   : > { %11350 = vst [vmem:[#allocation22_spill] sm:$0xff] %v10001_v58  ;;  %v7833_v19 = vpop.f32.mrf.mxu0  ;;  %8176 = vmatmul.mubr.msk.f32.gmra.mxu0 %vm411_vm0, %v11351_v1  ;;  %8074 = vmatprep.mubr.msk.f32.mxu1 %vm411_vm0, %v8463_v57  ;;  %v10011_v2 = vadd.f32 %v2178_v16, %v1684_v55  ;;  %v11356_v34 = vld [vmem:[#allocation23_spill] sm:$0xff]  ;;  %v8465_v55 = vld [vmem:[#allocation2 + $0xf0] sm:$0xff]  ;;  %v11357_v16 = vld [vmem:[#allocation32_spill] sm:$0xff] }
 0x196   : > { %11352 = vst [vmem:[#allocation18_spill] sm:$0xff] %v10006_v56  ;;  %8178 = vmatprep.mubr.msk.f32.mxu0 %vm411_vm0, %v11353_v12  ;;  %v2186_v39 = vrot.slane %v7833_v19, 2  ;;  %v1472_v4 = vpop.f32.mrf.mxu1  ;;  %v8466_v56 = vld [vmem:[#allocation2 + $0xf8] sm:$0xff] }
 0x197   : > { %11354 = vst [vmem:[#allocation24_spill] sm:$0xff] %v10011_v2  ;;  %v2036_v32 = vpop.f32.mrf.mxu0  ;;  %v1589_v7 = vrot.slane %v1472_v4, 1 }
 0x198   : > { %v2184_v36 = vrot.slane %v2036_v32, 2  ;;  %v7732_v5 = vpop.f32.mrf.mxu1  ;;  %8075 = vmatmul.mubr.msk.f32.gmra.mxu1 %vm411_vm0, %v8464_v42  ;;  %v11359_v32 = vld [vmem:[#allocation19_spill] sm:$0xff] }
 0x199   : > { %v10014_v10 = vpop.f32.mrf.mxu0  ;;  %8179 = vmatmul.mubr.msk.f32.gmra.mxu0 %vm411_vm0, %v11355_v43  ;;  %v1686_v1 = vadd.f32 %v1589_v7, %v11356_v34  ;;  %v1591_v57 = vrot.slane %v7732_v5, 1  ;;  %8077 = vmatprep.mubr.msk.f32.mxu1 %vm411_vm0, %v8465_v55  ;;  %v1590_v19 = vsel %vm1548_vm3, %v1588_v9, %v1589_v7  ;;  %v11360_v34 = vld [vmem:[#allocation28_spill] sm:$0xff]  ;;  %v10036_v7 = vld [vmem:[#allocation2 + $0x100] sm:$0xff] }
 0x19a   : > { %8181 = vmatprep.mubr.msk.f32.mxu0 %vm411_vm0, %v11357_v16  ;;  %v1481_v12 = vpop.f32.mrf.mxu1  ;;  %v1685_v42 = vadd.f32 %v11359_v32, %v1590_v19  ;;  %v2185_v2 = vsel %vm2112_vm2, %v2183_v0, %v2184_v36  ;;  %v2187_v43 = vsel %vm2112_vm2, %v2184_v36, %v2186_v39  ;;  %v11363_v39 = vld [vmem:[#allocation35_spill] sm:$0xff]  ;;  %v2188_v36 = vrot.slane %v10014_v10, 2 }
 0x19b   : > { %v2046_v4 = vpop.f32.mrf.mxu0  ;;  %v1687_v5 = vadd.f32 %v1591_v57, %v11360_v34  ;;  %v10029_v58 = vadd.f32 %v2182_v41, %v1686_v1  ;;  %v10045_v12 = vld [vmem:[#allocation2 + $0x150] sm:$0xff] }
 0x19c   : > { %v7735_v55 = vpop.f32.mrf.mxu1  ;;  %8078 = vmatmul.mubr.msk.f32.gmra.mxu1 %vm411_vm0, %v8466_v56  ;;  %v10034_v9 = vadd.f32 %v2180_v31, %v1685_v42  ;;  %11365 = vst [vmem:[#allocation30_spill] sm:$0xff] %v10045_v12  ;;  %v10047_v42 = vld [vmem:[#allocation2 + $0x108] sm:$0xff] }
 0x19d   : > { %11361 = vst [vmem:[#allocation20_spill] sm:$0xff] %v10029_v58  ;;  %v7839_v16 = vpop.f32.mrf.mxu0  ;;  %8182 = vmatmul.mubr.msk.f32.gmra.mxu0 %vm411_vm0, %v10022_v38  ;;  %8080 = vmatprep.mubr.msk.f32.mxu1 %vm411_vm0, %v10036_v7  ;;  %v10042_v41 = vadd.f32 %v2183_v0, %v1687_v5  ;;  %11366 = vst [vmem:[#allocation23_spill] sm:$0xff] %v10047_v42  ;;  %v11367_v0 = vld [vmem:[#allocation31_spill] sm:$0xff]  ;;  %v10054_v55 = vld [vmem:[#allocation2 + $0x110] sm:$0xff] }
 0x19e   : > { %11362 = vst [vmem:[#allocation27_spill] sm:$0xff] %v10034_v9  ;;  %8184 = vmatprep.mubr.msk.f32.mxu0 %vm411_vm0, %v11363_v39  ;;  %v2191_v1 = vrot.slane %v7839_v16, 2  ;;  %v1490_v56 = vpop.f32.mrf.mxu1  ;;  %11368 = vst [vmem:[#allocation32_spill] sm:$0xff] %v10054_v55  ;;  %v10060_v16 = vld [vmem:[#allocation2 + $0x158] sm:$0xff]  ;;  %v10063_v38 = vld [vmem:[#allocation2 + $0x160] sm:$0xff] }
 0x19f   : > { %11364 = vst [vmem:[#allocation29_spill] sm:$0xff] %v10042_v41  ;;  %v2055_v19 = vpop.f32.mrf.mxu0  ;;  %v1592_v4 = vrot.slane %v1490_v56, 1  ;;  %11369 = vst [vmem:[#allocation19_spill] sm:$0xff] %v10060_v16  ;;  %v11372_v58 = vld [vmem:[#allocation34_spill] sm:$0xff] }
 0x1a0   : > { %v2189_v31 = vrot.slane %v2055_v19, 2  ;;  %v7738_v32 = vpop.f32.mrf.mxu1  ;;  %8081 = vmatmul.mubr.msk.f32.gmra.mxu1 %vm411_vm0, %v10047_v42  ;;  %11370 = vst [vmem:[#allocation28_spill] sm:$0xff] %v10063_v38 }
 0x1a1   : > { %v7942_v34 = vpop.f32.mrf.mxu0  ;;  %8185 = vmatmul.mubr.msk.f32.gmra.mxu0 %vm411_vm0, %v9579_v50  ;;  %v1689_v5 = vadd.f32 %v1592_v4, %v11367_v0  ;;  %v1594_v10 = vrot.slane %v7738_v32, 1  ;;  %8083 = vmatprep.mubr.msk.f32.mxu1 %vm411_vm0, %v10054_v55  ;;  %v1593_v39 = vsel %vm1548_vm3, %v1591_v57, %v1592_v4  ;;  %v11371_v50 = vld [vmem:[#allocation25_spill] sm:$0xff] }
 0x1a2   : > { %8187 = vmatprep.mubr.msk.f32.mxu0 %vm411_vm0, %v10045_v12  ;;  %v1499_v56 = vpop.f32.mrf.mxu1  ;;  %v1688_v41 = vadd.f32 %v11371_v50, %v1593_v39  ;;  %v2190_v32 = vsel %vm2112_vm2, %v2188_v36, %v2189_v31  ;;  %v2192_v0 = vsel %vm2112_vm2, %v2189_v31, %v2191_v1  ;;  %v10071_v12 = vld [vmem:[#allocation2 + $0x118] sm:$0xff]  ;;  %v3351_v39 = vrot.slane %v7942_v34, 1  ;;  %v10091_v34 = vld [vmem:[#allocation2 + $0x128] sm:$0xff] }
 0x1a3   : > { %v3032_v19 = vpop.f32.mrf.mxu0  ;;  %v1690_v9 = vadd.f32 %v1594_v10, %v11372_v58  ;;  %v10069_v55 = vadd.f32 %v2187_v43, %v1689_v5  ;;  %11374 = vst [vmem:[#allocation31_spill] sm:$0xff] %v10071_v12  ;;  %v10079_v56 = vld [vmem:[#allocation2 + $0x120] sm:$0xff]  ;;  %v10085_v58 = vld [vmem:[#allocation2 + $0x168] sm:$0xff]  ;;  %11380 = vst [vmem:[#allocation49_spill] sm:$0xff] %v10091_v34 }
 0x1a4   : > { %v7741_v42 = vpop.f32.mrf.mxu1  ;;  %8084 = vmatmul.mubr.msk.f32.gmra.mxu1 %vm411_vm0, %v10071_v12  ;;  %v10077_v4 = vadd.f32 %v2185_v2, %v1688_v41  ;;  %11376 = vst [vmem:[#allocation34_spill] sm:$0xff] %v10079_v56  ;;  %11377 = vst [vmem:[#allocation46_spill] sm:$0xff] %v10085_v58  ;;  %v11381_v50 = vld [vmem:[#allocation36_spill] sm:$0xff] }
 0x1a5   : > { %11373 = vst [vmem:[#allocation35_spill] sm:$0xff] %v10069_v55  ;;  %v7945_v57 = vpop.f32.mrf.mxu0  ;;  %8188 = vmatmul.mubr.msk.f32.gmra.mxu0 %vm411_vm0, %v10060_v16  ;;  %8086 = vmatprep.mubr.msk.f32.mxu1 %vm411_vm0, %v10079_v56  ;;  %v10087_v43 = vadd.f32 %v2188_v36, %v1690_v9  ;;  %v10089_v42 = vld [vmem:[#allocation2 + $0x170] sm:$0xff]  ;;  %v8474_v56 = vld [vmem:[#allocation2 + $0x138] sm:$0xff] }
 0x1a6   : > { %11375 = vst [vmem:[#allocation25_spill] sm:$0xff] %v10077_v4  ;;  %8190 = vmatprep.mubr.msk.f32.mxu0 %vm411_vm0, %v10063_v38  ;;  %v1508_v1 = vpop.f32.mrf.mxu1  ;;  %11379 = vst [vmem:[#allocation48_spill] sm:$0xff] %v10089_v42  ;;  %v10100_v38 = vld [vmem:[#allocation2 + $0x130] sm:$0xff] }
 0x1a7   : > { %11378 = vst [vmem:[#allocation47_spill] sm:$0xff] %v10087_v43  ;;  %v3041_v31 = vpop.f32.mrf.mxu0  ;;  %v1595_v5 = vrot.slane %v1508_v1, 1  ;;  %11382 = vst [vmem:[#allocation36_spill] sm:$0xff] %v10100_v38  ;;  %v10106_v1 = vld [vmem:[#allocation2 + $0x178] sm:$0xff]  ;;  %v10108_v43 = vld [vmem:[#allocation2 + $0x180] sm:$0xff] }
 0x1a8   : > { %v3352_v2 = vrot.slane %v3041_v31, 1  ;;  %v7844_v41 = vpop.f32.mrf.mxu1  ;;  %8087 = vmatmul.mubr.msk.f32.gmra.mxu1 %vm411_vm0, %v10091_v34  ;;  %v11384_v55 = vld [vmem:[#allocation33_spill] sm:$0xff] }
 0x1a9   : > { %v7948_v19 = vpop.f32.mrf.mxu0  ;;  %8191 = vmatmul.mubr.msk.f32.gmra.mxu0 %vm411_vm0, %v10085_v58  ;;  %v1692_v57 = vadd.f32 %v1595_v5, %v11381_v50  ;;  %v2917_v9 = vadd.f32 %v7844_v41, %v9624_v61  ;;  %8089 = vmatprep.mubr.msk.f32.mxu1 %vm411_vm0, %v10100_v38  ;;  %v1596_v50 = vsel %vm1548_vm3, %v1594_v10, %v1595_v5  ;;  %v11383_v61 = vld [vmem:[#allocation37_spill] sm:$0xff]  ;;  %v10122_v10 = vld [vmem:[#allocation2 + $0x140] sm:$0xff] }
 0x1aa   : > { %v3353_v36 = vsel %vm1548_vm3, %v3351_v39, %v3352_v2  ;;  %8193 = vmatprep.mubr.msk.f32.mxu0 %vm411_vm0, %v10089_v42  ;;  %v2613_v31 = vpop.f32.mrf.mxu1  ;;  %v1691_v4 = vadd.f32 %v11384_v55, %v1596_v50  ;;  %v10128_v55 = vld [vmem:[#allocation2 + $0x188] sm:$0xff] }
 0x1ab   : > { %v3050_v16 = vpop.f32.mrf.mxu0  ;;  %v10111_v58 = vadd.f32 %v3353_v36, %v2917_v9  ;;  %v2916_v41 = vadd.f32 %v2613_v31, %v11383_v61  ;;  %v10115_v34 = vadd.f32 %v2192_v0, %v1692_v57  ;;  %v10135_v57 = vld [vmem:[#allocation2 + $0x148] sm:$0xff]  ;;  %v8477_v31 = vld [vmem:[#allocation2 + $0x150] sm:$0xff] }
 0x1ac   : > { %v7847_v38 = vpop.f32.mrf.mxu1  ;;  %8090 = vmatmul.mubr.msk.f32.gmra.mxu1 %vm411_vm0, %v8474_v56  ;;  %v3354_v16 = vrot.slane %v7948_v19, 1 }
 0x1ad   : > { %v7951_v42 = vpop.f32.mrf.mxu0  ;;  %8194 = vmatmul.mubr.msk.f32.gmra.mxu0 %vm411_vm0, %v10106_v1  ;;  %v10120_v12 = vadd.f32 %v3351_v39, %v2916_v41  ;;  %8092 = vmatprep.mubr.msk.f32.mxu1 %vm411_vm0, %v10122_v10  ;;  %v10130_v38 = vadd.f32 %v2190_v32, %v1691_v4  ;;  %v10150_v41 = vld [vmem:[#allocation2 + $0x1a0] sm:$0xff] }
 0x1ae   : > { %8196 = vmatprep.mubr.msk.f32.mxu0 %vm411_vm0, %v10108_v43  ;;  %v2623_v0 = vpop.f32.mrf.mxu1  ;;  %v10132_v42 = vld [vmem:[#allocation2 + $0x190] sm:$0xff]  ;;  %11386 = vst [vmem:[#allocation33_spill] sm:$0xff] %v10150_v41 }
 0x1af   : > { %v3059_v56 = vpop.f32.mrf.mxu0  ;;  %v2918_v5 = vadd.f32 %v2623_v0, %v9618_v17  ;;  %v10148_v17 = vld [vmem:[#allocation2 + $0x198] sm:$0xff] }
 0x1b0   : > { %v3355_v39 = vrot.slane %v3059_v56, 1  ;;  %v7850_v19 = vpop.f32.mrf.mxu1  ;;  %8093 = vmatmul.mubr.msk.f32.gmra.mxu1 %vm411_vm0, %v10135_v57 }
 0x1b1   : > { %v7954_v9 = vpop.f32.mrf.mxu0  ;;  %8197 = vmatmul.mubr.msk.f32.gmra.mxu0 %vm411_vm0, %v10128_v55  ;;  %v10141_v36 = vadd.f32 %v3352_v2, %v2918_v5  ;;  %v2920_v32 = vadd.f32 %v7850_v19, %v9652_v35  ;;  %8095 = vmatprep.mubr.msk.f32.mxu1 %vm411_vm0, %v8477_v31  ;;  %v8478_v35 = vld [vmem:[#allocation2 + $0x158] sm:$0xff] }
 0x1b2   : > { %v3356_v4 = vsel %vm1548_vm3, %v3354_v16, %v3355_v39  ;;  %8199 = vmatprep.mubr.msk.f32.mxu0 %vm411_vm0, %v10132_v42  ;;  %v2632_v50 = vpop.f32.mrf.mxu1  ;;  %v3357_v19 = vrot.slane %v7954_v9, 1 }
 0x1b3   : > { %11385 = vst [vmem:[#allocation37_spill] sm:$0xff] %v10141_v36  ;;  %v3068_v61 = vpop.f32.mrf.mxu0  ;;  %v10152_v0 = vadd.f32 %v3356_v4, %v2920_v32  ;;  %v2919_v2 = vadd.f32 %v2632_v50, %v9630_v30  ;;  %v8479_v36 = vld [vmem:[#allocation2 + $0x160] sm:$0xff]  ;;  %v10163_v32 = vld [vmem:[#allocation2 + $0x1a8] sm:$0xff]  ;;  %v10165_v50 = vld [vmem:[#allocation2 + $0x1b0] sm:$0xff] }
 0x1b4   : > { %v7853_v56 = vpop.f32.mrf.mxu1  ;;  %8096 = vmatmul.mubr.msk.f32.gmra.mxu1 %vm411_vm0, %v8478_v35  ;;  %11388 = vst [vmem:[#allocation51_spill] sm:$0xff] %v10165_v50 }
 0x1b5   : > { %11387 = vst [vmem:[#allocation50_spill] sm:$0xff] %v10152_v0  ;;  %v7957_v5 = vpop.f32.mrf.mxu0  ;;  %8200 = vmatmul.mubr.msk.f32.gmra.mxu0 %vm411_vm0, %v10148_v17  ;;  %v10158_v31 = vadd.f32 %v3354_v16, %v2919_v2  ;;  %8098 = vmatprep.mubr.msk.f32.mxu1 %vm411_vm0, %v8479_v36  ;;  %v8481_v0 = vld [vmem:[#allocation2 + $0x170] sm:$0xff] }
 0x1b6   : > { %8202 = vmatprep.mubr.msk.f32.mxu0 %vm411_vm0, %v10150_v41  ;;  %v2642_v30 = vpop.f32.mrf.mxu1  ;;  %v8480_v5 = vld [vmem:[#allocation2 + $0x168] sm:$0xff] }
 0x1b7   : > { %v3077_v4 = vpop.f32.mrf.mxu0  ;;  %v2921_v61 = vadd.f32 %v2642_v30, %v9646_v14  ;;  %v10178_v14 = vld [vmem:[#allocation2 + $0x1b8] sm:$0xff] }
 0x1b8   : > { %v3358_v56 = vrot.slane %v3077_v4, 1  ;;  %v7856_v35 = vpop.f32.mrf.mxu1  ;;  %8099 = vmatmul.mubr.msk.f32.gmra.mxu1 %vm411_vm0, %v8480_v5  ;;  %v10180_v5 = vld [vmem:[#allocation2 + $0x1c0] sm:$0xff] }
 0x1b9   : > { %v7960_v16 = vpop.f32.mrf.mxu0  ;;  %8203 = vmatmul.mubr.msk.f32.gmra.mxu0 %vm411_vm0, %v10163_v32  ;;  %v10171_v9 = vadd.f32 %v3355_v39, %v2921_v61  ;;  %v2923_v36 = vadd.f32 %v7856_v35, %v9680_v25  ;;  %8101 = vmatprep.mubr.msk.f32.mxu1 %vm411_vm0, %v8481_v0  ;;  %11390 = vst [vmem:[#allocation53_spill] sm:$0xff] %v10180_v5  ;;  %v8482_v25 = vld [vmem:[#allocation2 + $0x178] sm:$0xff] }
 0x1ba   : > { %v3359_v2 = vsel %vm1548_vm3, %v3357_v19, %v3358_v56  ;;  %8205 = vmatprep.mubr.msk.f32.mxu0 %vm411_vm0, %v10165_v50  ;;  %v2651_v30 = vpop.f32.mrf.mxu1  ;;  %v3360_v0 = vrot.slane %v7960_v16, 1  ;;  %v8483_v50 = vld [vmem:[#allocation2 + $0x180] sm:$0xff] }
 0x1bb   : > { %11389 = vst [vmem:[#allocation52_spill] sm:$0xff] %v10171_v9  ;;  %v3086_v4 = vpop.f32.mrf.mxu0  ;;  %v10182_v41 = vadd.f32 %v3359_v2, %v2923_v36  ;;  %v2922_v39 = vadd.f32 %v2651_v30, %v9658_v15  ;;  %v10193_v36 = vld [vmem:[#allocation2 + $0x1c8] sm:$0xff]  ;;  %v10195_v30 = vld [vmem:[#allocation2 + $0x1d0] sm:$0xff] }
 0x1bc   : > { %v7859_v61 = vpop.f32.mrf.mxu1  ;;  %8102 = vmatmul.mubr.msk.f32.gmra.mxu1 %vm411_vm0, %v8482_v25  ;;  %11392 = vst [vmem:[#allocation55_spill] sm:$0xff] %v10195_v30 }
 0x1bd   : > { %11391 = vst [vmem:[#allocation54_spill] sm:$0xff] %v10182_v41  ;;  %v7963_v35 = vpop.f32.mrf.mxu0  ;;  %8206 = vmatmul.mubr.msk.f32.gmra.mxu0 %vm411_vm0, %v10178_v14  ;;  %v10188_v9 = vadd.f32 %v3357_v19, %v2922_v39  ;;  %8104 = vmatprep.mubr.msk.f32.mxu1 %vm411_vm0, %v8483_v50  ;;  %v8485_v41 = vld [vmem:[#allocation2 + $0x190] sm:$0xff] }
 0x1be   : > { %8208 = vmatprep.mubr.msk.f32.mxu0 %vm411_vm0, %v10180_v5  ;;  %v2661_v15 = vpop.f32.mrf.mxu1  ;;  %v8484_v35 = vld [vmem:[#allocation2 + $0x188] sm:$0xff] }
 0x1bf   : > { %v3095_v2 = vpop.f32.mrf.mxu0  ;;  %v2924_v4 = vadd.f32 %v2661_v15, %v9674_v26  ;;  %v10208_v26 = vld [vmem:[#allocation2 + $0x1d8] sm:$0xff] }
 0x1c0   : > { %v3361_v61 = vrot.slane %v3095_v2, 1  ;;  %v7862_v25 = vpop.f32.mrf.mxu1  ;;  %8105 = vmatmul.mubr.msk.f32.gmra.mxu1 %vm411_vm0, %v8484_v35  ;;  %v10210_v35 = vld [vmem:[#allocation2 + $0x1e0] sm:$0xff] }
 0x1c1   : > { %v7966_v19 = vpop.f32.mrf.mxu0  ;;  %8209 = vmatmul.mubr.msk.f32.gmra.mxu0 %vm411_vm0, %v10193_v36  ;;  %v10201_v50 = vadd.f32 %v3358_v56, %v2924_v4  ;;  %v2926_v16 = vadd.f32 %v7862_v25, %v9708_v8  ;;  %8107 = vmatprep.mubr.msk.f32.mxu1 %vm411_vm0, %v8485_v41  ;;  %v8486_v8 = vld [vmem:[#allocation2 + $0x198] sm:$0xff] }
 0x1c2   : > { %v3362_v39 = vsel %vm1548_vm3, %v3360_v0, %v3361_v61  ;;  %8211 = vmatprep.mubr.msk.f32.mxu0 %vm411_vm0, %v10195_v30  ;;  %v2670_v15 = vpop.f32.mrf.mxu1  ;;  %v3363_v41 = vrot.slane %v7966_v19, 1  ;;  %v8487_v30 = vld [vmem:[#allocation2 + $0x1a0] sm:$0xff] }
 0x1c3   : > { %11393 = vst [vmem:[#allocation56_spill] sm:$0xff] %v10201_v50  ;;  %v3104_v2 = vpop.f32.mrf.mxu0  ;;  %v10212_v5 = vadd.f32 %v3362_v39, %v2926_v16  ;;  %v2925_v56 = vadd.f32 %v2670_v15, %v9686_v33  ;;  %v10223_v16 = vld [vmem:[#allocation2 + $0x1e8] sm:$0xff]  ;;  %v10225_v15 = vld [vmem:[#allocation2 + $0x1f0] sm:$0xff] }
 0x1c4   : > { %v7865_v4 = vpop.f32.mrf.mxu1  ;;  %8108 = vmatmul.mubr.msk.f32.gmra.mxu1 %vm411_vm0, %v8486_v8  ;;  %11395 = vst [vmem:[#allocation58_spill] sm:$0xff] %v10223_v16 }
 0x1c5   : > { %11394 = vst [vmem:[#allocation57_spill] sm:$0xff] %v10212_v5  ;;  %v7969_v25 = vpop.f32.mrf.mxu0  ;;  %8212 = vmatmul.mubr.msk.f32.gmra.mxu0 %vm411_vm0, %v10208_v26  ;;  %v10218_v50 = vadd.f32 %v3360_v0, %v2925_v56  ;;  %8110 = vmatprep.mubr.msk.f32.mxu1 %vm411_vm0, %v8487_v30  ;;  %v8489_v5 = vld [vmem:[#allocation2 + $0x1b0] sm:$0xff] }
 0x1c6   : > { %8214 = vmatprep.mubr.msk.f32.mxu0 %vm411_vm0, %v10210_v35  ;;  %v2680_v33 = vpop.f32.mrf.mxu1  ;;  %v8488_v25 = vld [vmem:[#allocation2 + $0x1a8] sm:$0xff] }
 0x1c7   : > { %v3113_v39 = vpop.f32.mrf.mxu0  ;;  %v2927_v2 = vadd.f32 %v2680_v33, %v9702_v47  ;;  %v10238_v47 = vld [vmem:[#allocation2 + $0x1f8] sm:$0xff] }
 0x1c8   : > { %v3364_v4 = vrot.slane %v3113_v39, 1  ;;  %v7868_v8 = vpop.f32.mrf.mxu1  ;;  %8111 = vmatmul.mubr.msk.f32.gmra.mxu1 %vm411_vm0, %v8488_v25 }
 0x1c9   : > { %v7972_v0 = vpop.f32.mrf.mxu0  ;;  %8215 = vmatmul.mubr.msk.f32.gmra.mxu0 %vm411_vm0, %v10223_v16  ;;  %v10231_v30 = vadd.f32 %v3361_v61, %v2927_v2  ;;  %v2929_v19 = vadd.f32 %v7868_v8, %v9738_v40  ;;  %8113 = vmatprep.mubr.msk.f32.mxu1 %vm411_vm0, %v8489_v5  ;;  %v8490_v2 = vld [vmem:[#allocation2 + $0x1b8] sm:$0xff] }
 0x1ca   : > { %v3365_v56 = vsel %vm1548_vm3, %v3363_v41, %v3364_v4  ;;  %8217 = vmatprep.mubr.msk.f32.mxu0 %vm411_vm0, %v10225_v15  ;;  %v2689_v33 = vpop.f32.mrf.mxu1  ;;  %v3366_v5 = vrot.slane %v7972_v0, 1 }
 0x1cb   : > { %11396 = vst [vmem:[#allocation59_spill] sm:$0xff] %v10231_v30  ;;  %v3122_v39 = vpop.f32.mrf.mxu0  ;;  %v10240_v25 = vadd.f32 %v3365_v56, %v2929_v19  ;;  %v2928_v16 = vadd.f32 %v2689_v33, %v9714_v23  ;;  %v8491_v30 = vld [vmem:[#allocation2 + $0x1c0] sm:$0xff] }
 0x1cc   : > { %v7871_v61 = vpop.f32.mrf.mxu1  ;;  %8114 = vmatmul.mubr.msk.f32.gmra.mxu1 %vm411_vm0, %v8490_v2 }
 0x1cd   : > { %v7975_v40 = vpop.f32.mrf.mxu0  ;;  %8218 = vmatmul.mubr.msk.f32.gmra.mxu0 %vm411_vm0, %v10238_v47  ;;  %v10246_v8 = vadd.f32 %v3363_v41, %v2928_v16  ;;  %8116 = vmatprep.mubr.msk.f32.mxu1 %vm411_vm0, %v8491_v30  ;;  %v8492_v61 = vld [vmem:[#allocation2 + $0x1c8] sm:$0xff] }
 0x1ce   : > { %8220 = vmatprep.mubr.msk.f32.mxu0 %vm411_vm0, %v9726_v11  ;;  %v2699_v19 = vpop.f32.mrf.mxu1  ;;  %v8493_v11 = vld [vmem:[#allocation2 + $0x1d0] sm:$0xff]  ;;  %v10262_v40 = vld [vmem:[#allocation2 + $0x220] sm:$0xff] }
 0x1cf   : > { %v3131_v56 = vpop.f32.mrf.mxu0  ;;  %v2930_v23 = vadd.f32 %v2699_v19, %v9732_v6 }
 0x1d0   : > { %v3367_v33 = vrot.slane %v3131_v56, 1  ;;  %v7874_v39 = vpop.f32.mrf.mxu1  ;;  %8117 = vmatmul.mubr.msk.f32.gmra.mxu1 %vm411_vm0, %v8492_v61  ;;  %v8494_v56 = vld [vmem:[#allocation2 + $0x1d8] sm:$0xff]  ;;  %v10275_v61 = vld [vmem:[#allocation2 + $0x228] sm:$0xff] }
 0x1d1   : > { %v7978_v2 = vpop.f32.mrf.mxu0  ;;  %8221 = vmatmul.mubr.msk.f32.gmra.mxu0 %vm411_vm0, %v9744_v54  ;;  %v10255_v41 = vadd.f32 %v3364_v4, %v2930_v23  ;;  %v2932_v16 = vadd.f32 %v7874_v39, %v9772_v53  ;;  %8119 = vmatprep.mubr.msk.f32.mxu1 %vm411_vm0, %v8493_v11 }
 0x1d2   : > { %v3368_v0 = vsel %vm1548_vm3, %v3366_v5, %v3367_v33  ;;  %8223 = vmatprep.mubr.msk.f32.mxu0 %vm411_vm0, %v9748_v24  ;;  %v2708_v6 = vpop.f32.mrf.mxu1  ;;  %v3369_v23 = vrot.slane %v7978_v2, 1  ;;  %v8495_v24 = vld [vmem:[#allocation2 + $0x1e0] sm:$0xff] }
 0x1d3   : > { %v3140_v30 = vpop.f32.mrf.mxu0  ;;  %v10264_v19 = vadd.f32 %v3368_v0, %v2932_v16  ;;  %v2931_v54 = vadd.f32 %v2708_v6, %v9746_v46  ;;  %v10277_v0 = vld [vmem:[#allocation2 + $0x230] sm:$0xff] }
 0x1d4   : > { %v7877_v4 = vpop.f32.mrf.mxu1  ;;  %8120 = vmatmul.mubr.msk.f32.gmra.mxu1 %vm411_vm0, %v8494_v56  ;;  %v8497_v56 = vld [vmem:[#allocation2 + $0x1f0] sm:$0xff] }
 0x1d5   : > { %v7981_v53 = vpop.f32.mrf.mxu0  ;;  %8224 = vmatmul.mubr.msk.f32.gmra.mxu0 %vm411_vm0, %v9759_v28  ;;  %v10270_v39 = vadd.f32 %v3366_v5, %v2931_v54  ;;  %8122 = vmatprep.mubr.msk.f32.mxu1 %vm411_vm0, %v8495_v24  ;;  %v8496_v28 = vld [vmem:[#allocation2 + $0x1e8] sm:$0xff] }
 0x1d6   : > { %8226 = vmatprep.mubr.msk.f32.mxu0 %vm411_vm0, %v10262_v40  ;;  %v2718_v46 = vpop.f32.mrf.mxu1 }
 0x1d7   : > { %v3149_v16 = vpop.f32.mrf.mxu0  ;;  %v2933_v11 = vadd.f32 %v2718_v46, %v9766_v48  ;;  %v10290_v48 = vld [vmem:[#allocation2 + $0x238] sm:$0xff] }
 0x1d8   : > { %v3370_v6 = vrot.slane %v3149_v16, 1  ;;  %v7880_v30 = vpop.f32.mrf.mxu1  ;;  %8123 = vmatmul.mubr.msk.f32.gmra.mxu1 %vm411_vm0, %v8496_v28 }
 0x1d9   : > { %v7984_v5 = vpop.f32.mrf.mxu0  ;;  %8227 = vmatmul.mubr.msk.f32.gmra.mxu0 %vm411_vm0, %v10275_v61  ;;  %v10283_v2 = vadd.f32 %v3367_v33, %v2933_v11  ;;  %v2935_v54 = vadd.f32 %v7880_v30, %v9810_v18  ;;  %8125 = vmatprep.mubr.msk.f32.mxu1 %vm411_vm0, %v8497_v56  ;;  %v8498_v11 = vld [vmem:[#allocation2 + $0x1f8] sm:$0xff]  ;;  %v10300_v56 = vld [vmem:[#allocation2 + $0x200] sm:$0xff] }
 0x1da   : > { %v3371_v4 = vsel %vm1548_vm3, %v3369_v23, %v3370_v6  ;;  %8229 = vmatprep.mubr.msk.f32.mxu0 %vm411_vm0, %v10277_v0  ;;  %v2727_v53 = vpop.f32.mrf.mxu1  ;;  %v3372_v30 = vrot.slane %v7984_v5, 1 }
 0x1db   : > { %v3158_v24 = vpop.f32.mrf.mxu0  ;;  %v10292_v46 = vadd.f32 %v3371_v4, %v2935_v54  ;;  %v2934_v16 = vadd.f32 %v2727_v53, %v9779_v62  ;;  %v8500_v54 = vld [vmem:[#allocation2 + $0x40] sm:$0xff] }
 0x1dc   : > { %v7883_v33 = vpop.f32.mrf.mxu1  ;;  %8126 = vmatmul.mubr.msk.f32.gmra.mxu1 %vm411_vm0, %v8498_v11  ;;  %v10306_v11 = vld [vmem:[#allocation2 + $0x208] sm:$0xff] }
 0x1dd   : > { %11397 = vst [vmem:[#allocation60_spill] sm:$0xff] %v10292_v46  ;;  %v7987_v18 = vpop.f32.mrf.mxu0  ;;  %8230 = vmatmul.mubr.msk.f32.gmra.mxu0 %vm411_vm0, %v10290_v48  ;;  %v10298_v28 = vadd.f32 %v3369_v23, %v2934_v16  ;;  %8128 = vmatprep.mubr.msk.f32.mxu1 %vm411_vm0, %v10300_v56  ;;  %v10316_v46 = vld [vmem:[#allocation2 + $0x210] sm:$0xff] }
 0x1de   : > { %8332 = vmatprep.mubr.msk.f32.mxu0 %vm411_vm0, %v8500_v54  ;;  %v2737_v62 = vpop.f32.mrf.mxu1 }
 0x1df   : > { %v3167_v4 = vpop.f32.mrf.mxu0  ;;  %v2936_v53 = vadd.f32 %v2737_v62, %v9804_v63 }
 0x1e0   : > { %v3373_v24 = vrot.slane %v3167_v4, 1  ;;  %v7886_v33 = vpop.f32.mrf.mxu1  ;;  %8129 = vmatmul.mubr.msk.f32.gmra.mxu1 %vm411_vm0, %v10306_v11 }
 0x1e1   : > { %v7990_v23 = vpop.f32.mrf.mxu0  ;;  %8333 = vmatmul.mubr.msk.f32.vlgmr.msra.gmra.mxu0 %vm411_vm0, %v9777_v3  ;;  %v10312_v5 = vadd.f32 %v3370_v6, %v2936_v53  ;;  %v2938_v16 = vadd.f32 %v7886_v33, %v9846_v45  ;;  %8131 = vmatprep.mubr.msk.f32.mxu1 %vm411_vm0, %v10316_v46  ;;  %v10325_v53 = vld [vmem:[#allocation2 + $0x218] sm:$0xff] }
 0x1e2   : > { %v3374_v18 = vsel %vm1548_vm3, %v3372_v30, %v3373_v24  ;;  %8335 = vmatprep.mubr.msk.f32.mxu0 %vm411_vm0, %v9781_v51  ;;  %v2746_v63 = vpop.f32.mrf.mxu1  ;;  %v3375_v33 = vrot.slane %v7990_v23, 1 }
 0x1e3   : > { %11398 = vst [vmem:[#allocation61_spill] sm:$0xff] %v10312_v5  ;;  %v3176_v62 = vpop.f32.mrf.mxu0  ;;  %v10322_v4 = vadd.f32 %v3374_v18, %v2938_v16  ;;  %v2937_v3 = vadd.f32 %v2746_v63, %v9817_v27 }
 0x1e4   : > { %v7889_v6 = vpop.f32.mrf.mxu1  ;;  %8132 = vmatmul.mubr.msk.f32.gmra.mxu1 %vm411_vm0, %v10325_v53  ;;  %v8504_v62 = vld [vmem:[#allocation2 + $0x48] sm:$0xff] }
 0x1e5   : > { %v7993_v45 = vpop.f32.mrf.mxu0  ;;  %8336 = vmatmul.mubr.msk.f32.gmra.mxu0 %vm411_vm0, %v9794_v21  ;;  %v10331_v5 = vadd.f32 %v3372_v30, %v2937_v3  ;;  %8234 = vmatprep.mubr.msk.f32.mxu1 %vm411_vm0, %v8500_v54 }
 0x1e6   : > { %8338 = vmatprep.mubr.msk.f32.mxu0 %vm411_vm0, %v9798_v13  ;;  %v2756_v51 = vpop.f32.mrf.mxu1  ;;  %v8505_v13 = vld [vmem:[#allocation2 + $0x50] sm:$0xff] }
 0x1e7   : > { %v3185_v27 = vpop.f32.mrf.mxu0  ;;  %v2939_v16 = vadd.f32 %v2756_v51, %v9841_v22 }
 0x1e8   : > { %v3376_v18 = vrot.slane %v3185_v27, 1  ;;  %v7892_v63 = vpop.f32.mrf.mxu1  ;;  %8235 = vmatmul.mubr.msk.f32.vlgmr.msra.gmra.mxu1 %vm411_vm0, %v8504_v62 }
 0x1e9   : > { %v7996_v6 = vpop.f32.mrf.mxu0  ;;  %8339 = vmatmul.mubr.msk.f32.gmra.mxu0 %vm411_vm0, %v9815_v20  ;;  %v10340_v21 = vadd.f32 %v3373_v24, %v2939_v16  ;;  %v2941_v30 = vadd.f32 %v7892_v63, %v9881_v29  ;;  %8237 = vmatprep.mubr.msk.f32.mxu1 %vm411_vm0, %v8505_v13  ;;  %v8506_v20 = vld [vmem:[#allocation2 + $0x58] sm:$0xff]  ;;  %v8507_v16 = vld [vmem:[#allocation2 + $0x60] sm:$0xff] }
 0x1ea   : > { %v3377_v54 = vsel %vm1548_vm3, %v3375_v33, %v3376_v18  ;;  %8341 = vmatprep.mubr.msk.f32.mxu0 %vm411_vm0, %v9820_v37  ;;  %v2765_v22 = vpop.f32.mrf.mxu1  ;;  %v3378_v29 = vrot.slane %v7996_v6, 1  ;;  %v11400_v6 = vld [vmem:[#allocation11_spill] sm:$0xff] }
 0x1eb   : > { %v3194_v23 = vpop.f32.mrf.mxu0  ;;  %v10347_v3 = vadd.f32 %v3377_v54, %v2941_v30  ;;  %v2940_v45 = vadd.f32 %v2765_v22, %v9853_v59  ;;  %v8508_v54 = vld [vmem:[#allocation2 + $0x68] sm:$0xff] }
 0x1ec   : > { %v7895_v51 = vpop.f32.mrf.mxu1  ;;  %8238 = vmatmul.mubr.msk.f32.gmra.mxu1 %vm411_vm0, %v8506_v20 }
 0x1ed   : > { %v7999_v24 = vpop.f32.mrf.mxu0  ;;  %8342 = vmatmul.mubr.msk.f32.gmra.mxu0 %vm411_vm0, %v9830_v52  ;;  %v10353_v27 = vadd.f32 %v3375_v33, %v2940_v45  ;;  %8240 = vmatprep.mubr.msk.f32.mxu1 %vm411_vm0, %v8507_v16  ;;  %v11399_v52 = vld [vmem:[#allocation4_spill] sm:$0xff]  ;;  %v11401_v45 = vld [vmem:[#allocation26_spill] sm:$0xff] }
 0x1ee   : > { %8344 = vmatprep.mubr.msk.f32.mxu0 %vm411_vm0, %v9835_v44  ;;  %v2775_v37 = vpop.f32.mrf.mxu1  ;;  %v8509_v44 = vld [vmem:[#allocation2 + $0x70] sm:$0xff]  ;;  %v11403_v24 = vld [vmem:[#allocation8_spill] sm:$0xff] }
 0x1ef   : > { %v3203_v63 = vpop.f32.mrf.mxu0  ;;  %v2942_v59 = vadd.f32 %v2775_v37, %v9876_v60 }
 0x1f0   : > { %v3379_v62 = vrot.slane %v3203_v63, 1  ;;  %v7898_v30 = vpop.f32.mrf.mxu1  ;;  %8241 = vmatmul.mubr.msk.f32.gmra.mxu1 %vm411_vm0, %v8508_v54  ;;  %v8510_v63 = vld [vmem:[#allocation2 + $0x78] sm:$0xff] }
 0x1f1   : > { %v8002_v13 = vpop.f32.mrf.mxu0  ;;  %8345 = vmatmul.mubr.msk.f32.gmra.mxu0 %vm411_vm0, %v11399_v52  ;;  %v10362_v33 = vadd.f32 %v3376_v18, %v2942_v59  ;;  %v2944_v22 = vadd.f32 %v7898_v30, %v11400_v6  ;;  %8243 = vmatprep.mubr.msk.f32.mxu1 %vm411_vm0, %v8509_v44  ;;  %v11404_v59 = vld [vmem:[#allocation5_spill] sm:$0xff]  ;;  %v8511_v52 = vld [vmem:[#allocation2 + $0x80] sm:$0xff]  ;;  %v11406_v6 = vld [vmem:[#allocation6_spill] sm:$0xff] }
 0x1f2   : > { %v3380_v23 = vsel %vm1548_vm3, %v3378_v29, %v3379_v62  ;;  %8347 = vmatprep.mubr.msk.f32.mxu0 %vm411_vm0, %v11401_v45  ;;  %v2784_v60 = vpop.f32.mrf.mxu1  ;;  %v3381_v30 = vrot.slane %v8002_v13, 1  ;;  %v11407_v44 = vld [vmem:[#allocation7_spill] sm:$0xff] }
 0x1f3   : > { %v3212_v51 = vpop.f32.mrf.mxu0  ;;  %v10369_v20 = vadd.f32 %v3380_v23, %v2944_v22  ;;  %v2943_v16 = vadd.f32 %v2784_v60, %v11403_v24  ;;  %v8512_v24 = vld [vmem:[#allocation2 + $0x88] sm:$0xff] }
 0x1f4   : > { %v7901_v37 = vpop.f32.mrf.mxu1  ;;  %8244 = vmatmul.mubr.msk.f32.gmra.mxu1 %vm411_vm0, %v8510_v63  ;;  %v11408_v63 = vld [vmem:[#allocation3_spill] sm:$0xff] }
 0x1f5   : > { %11402 = vst [vmem:[#allocation4_spill] sm:$0xff] %v10369_v20  ;;  %v8005_v18 = vpop.f32.mrf.mxu0  ;;  %8348 = vmatmul.mubr.msk.f32.gmra.mxu0 %vm411_vm0, %v11404_v59  ;;  %v10375_v54 = vadd.f32 %v3378_v29, %v2943_v16  ;;  %8246 = vmatprep.mubr.msk.f32.mxu1 %vm411_vm0, %v8511_v52  ;;  %v11410_v52 = vld [vmem:[#allocation38_spill] sm:$0xff] }
 0x1f6   : > { %8350 = vmatprep.mubr.msk.f32.mxu0 %vm411_vm0, %v11406_v6  ;;  %v2794_v22 = vpop.f32.mrf.mxu1  ;;  %v8513_v18 = vld [vmem:[#allocation2 + $0x90] sm:$0xff] }
 0x1f7   : > { %11405 = vst [vmem:[#allocation11_spill] sm:$0xff] %v10375_v54  ;;  %v3221_v23 = vpop.f32.mrf.mxu0  ;;  %v2945_v45 = vadd.f32 %v2794_v22, %v11407_v44 }
 0x1f8   : > { %v3382_v60 = vrot.slane %v3221_v23, 1  ;;  %v7904_v51 = vpop.f32.mrf.mxu1  ;;  %8247 = vmatmul.mubr.msk.f32.gmra.mxu1 %vm411_vm0, %v8512_v24  ;;  %v11412_v24 = vld [vmem:[#allocation41_spill] sm:$0xff] }
 0x1f9   : > { %v8008_v37 = vpop.f32.mrf.mxu0  ;;  %8351 = vmatmul.mubr.msk.f32.gmra.mxu0 %vm411_vm0, %v11408_v63  ;;  %v10384_v29 = vadd.f32 %v3379_v62, %v2945_v45  ;;  %v2947_v13 = vadd.f32 %v7904_v51, %v9951_v49  ;;  %8249 = vmatprep.mubr.msk.f32.mxu1 %vm411_vm0, %v8513_v18  ;;  %v11413_v49 = vld [vmem:[#allocation9_spill] sm:$0xff]  ;;  %v11415_v18 = vld [vmem:[#allocation39_spill] sm:$0xff] }
 0x1fa   : > { %v3383_v16 = vsel %vm1548_vm3, %v3381_v30, %v3382_v60  ;;  %8353 = vmatprep.mubr.msk.f32.mxu0 %vm411_vm0, %v11410_v52  ;;  %v2803_v22 = vpop.f32.mrf.mxu1  ;;  %v3384_v45 = vrot.slane %v8008_v37, 1 }
 0x1fb   : > { %11409 = vst [vmem:[#allocation26_spill] sm:$0xff] %v10384_v29  ;;  %v3230_v23 = vpop.f32.mrf.mxu0  ;;  %v10391_v44 = vadd.f32 %v3383_v16, %v2947_v13  ;;  %v2946_v20 = vadd.f32 %v2803_v22, %v11412_v24  ;;  %v11416_v22 = vld [vmem:[#allocation10_spill] sm:$0xff] }
 0x1fc   : > { %v7907_v54 = vpop.f32.mrf.mxu1  ;;  %8250 = vmatmul.mubr.msk.f32.gmra.mxu1 %vm411_vm0, %v11404_v59 }
 0x1fd   : > { %11411 = vst [vmem:[#allocation8_spill] sm:$0xff] %v10391_v44  ;;  %v8011_v62 = vpop.f32.mrf.mxu0  ;;  %8354 = vmatmul.mubr.msk.f32.gmra.mxu0 %vm411_vm0, %v11413_v49  ;;  %v10398_v51 = vadd.f32 %v3381_v30, %v2946_v20  ;;  %8252 = vmatprep.mubr.msk.f32.mxu1 %vm411_vm0, %v11406_v6  ;;  %v11419_v30 = vld [vmem:[#allocation17_spill] sm:$0xff]  ;;  %v11420_v44 = vld [vmem:[#allocation42_spill] sm:$0xff] }
 0x1fe   : > { %8356 = vmatprep.mubr.msk.f32.mxu0 %vm411_vm0, %v11415_v18  ;;  %v2813_v13 = vpop.f32.mrf.mxu1  ;;  %v11417_v62 = vld [vmem:[#allocation40_spill] sm:$0xff] }
 0x1ff   : > { %11414 = vst [vmem:[#allocation5_spill] sm:$0xff] %v10398_v51  ;;  %v3239_v16 = vpop.f32.mrf.mxu0  ;;  %v2948_v54 = vadd.f32 %v2813_v13, %v11416_v22 }
 0x200   : > { %v3385_v23 = vrot.slane %v3239_v16, 1  ;;  %v7910_v24 = vpop.f32.mrf.mxu1  ;;  %8253 = vmatmul.mubr.msk.f32.gmra.mxu1 %vm411_vm0, %v11408_v63  ;;  %v11422_v63 = vld [vmem:[#allocation44_spill] sm:$0xff] }
 0x201   : > { %v8014_v59 = vpop.f32.mrf.mxu0  ;;  %8357 = vmatmul.mubr.msk.f32.gmra.mxu0 %vm411_vm0, %v11417_v62  ;;  %v10409_v20 = vadd.f32 %v3382_v60, %v2948_v54  ;;  %v2950_v6 = vadd.f32 %v7910_v24, %v11419_v30  ;;  %8255 = vmatprep.mubr.msk.f32.mxu1 %vm411_vm0, %v11410_v52  ;;  %v11423_v54 = vld [vmem:[#allocation12_spill] sm:$0xff]  ;;  %v11425_v52 = vld [vmem:[#allocation43_spill] sm:$0xff] }
 0x202   : > { %v3386_v37 = vsel %vm1548_vm3, %v3384_v45, %v3385_v23  ;;  %8359 = vmatprep.mubr.msk.f32.mxu0 %vm411_vm0, %v11420_v44  ;;  %v2822_v13 = vpop.f32.mrf.mxu1  ;;  %v3387_v24 = vrot.slane %v8014_v59, 1 }
 0x203   : > { %11418 = vst [vmem:[#allocation6_spill] sm:$0xff] %v10409_v20  ;;  %v3248_v16 = vpop.f32.mrf.mxu0  ;;  %v10417_v22 = vadd.f32 %v3386_v37, %v2950_v6  ;;  %v2949_v51 = vadd.f32 %v2822_v13, %v11422_v63  ;;  %v11426_v13 = vld [vmem:[#allocation13_spill] sm:$0xff] }
 0x204   : > { %v7913_v29 = vpop.f32.mrf.mxu1  ;;  %8256 = vmatmul.mubr.msk.f32.gmra.mxu1 %vm411_vm0, %v11413_v49 }
 0x205   : > { %11421 = vst [vmem:[#allocation7_spill] sm:$0xff] %v10417_v22  ;;  %v8017_v60 = vpop.f32.mrf.mxu0  ;;  %8360 = vmatmul.mubr.msk.f32.gmra.mxu0 %vm411_vm0, %v11423_v54  ;;  %v10424_v30 = vadd.f32 %v3384_v45, %v2949_v51  ;;  %8258 = vmatprep.mubr.msk.f32.mxu1 %vm411_vm0, %v11415_v18  ;;  %v11428_v51 = vld [vmem:[#allocation18_spill] sm:$0xff]  ;;  %v11429_v22 = vld [vmem:[#allocation45_spill] sm:$0xff] }
 0x206   : > { %8362 = vmatprep.mubr.msk.f32.mxu0 %vm411_vm0, %v11425_v52  ;;  %v2832_v6 = vpop.f32.mrf.mxu1  ;;  %v11427_v60 = vld [vmem:[#allocation14_spill] sm:$0xff] }
 0x207   : > { %11424 = vst [vmem:[#allocation3_spill] sm:$0xff] %v10424_v30  ;;  %v3257_v37 = vpop.f32.mrf.mxu0  ;;  %v2951_v29 = vadd.f32 %v2832_v6, %v11426_v13 }
 0x208   : > { %v3388_v16 = vrot.slane %v3257_v37, 1  ;;  %v7916_v63 = vpop.f32.mrf.mxu1  ;;  %8259 = vmatmul.mubr.msk.f32.gmra.mxu1 %vm411_vm0, %v11417_v62  ;;  %v11431_v62 = vld [vmem:[#allocation21_spill] sm:$0xff] }
 0x209   : > { %v8020_v49 = vpop.f32.mrf.mxu0  ;;  %8363 = vmatmul.mubr.msk.f32.gmra.mxu0 %vm411_vm0, %v11427_v60  ;;  %v10435_v45 = vadd.f32 %v3385_v23, %v2951_v29  ;;  %v2953_v18 = vadd.f32 %v7916_v63, %v11428_v51  ;;  %8261 = vmatprep.mubr.msk.f32.mxu1 %vm411_vm0, %v11420_v44  ;;  %v11432_v29 = vld [vmem:[#allocation15_spill] sm:$0xff] }
 0x20a   : > { %v3389_v59 = vsel %vm1548_vm3, %v3387_v24, %v3388_v16  ;;  %8365 = vmatprep.mubr.msk.f32.mxu0 %vm411_vm0, %v11429_v22  ;;  %v2841_v6 = vpop.f32.mrf.mxu1  ;;  %v3390_v63 = vrot.slane %v8020_v49, 1 }
 0x20b   : > { %v3266_v37 = vpop.f32.mrf.mxu0  ;;  %v10443_v13 = vadd.f32 %v3389_v59, %v2953_v18  ;;  %v2952_v30 = vadd.f32 %v2841_v6, %v11431_v62  ;;  %v11434_v59 = vld [vmem:[#allocation22_spill] sm:$0xff]  ;;  %v11435_v62 = vld [vmem:[#allocation23_spill] sm:$0xff] }
 0x20c   : > { %v7919_v20 = vpop.f32.mrf.mxu1  ;;  %8262 = vmatmul.mubr.msk.f32.gmra.mxu1 %vm411_vm0, %v11423_v54 }
 0x20d   : > { %11430 = vst [vmem:[#allocation38_spill] sm:$0xff] %v10443_v13  ;;  %v8023_v23 = vpop.f32.mrf.mxu0  ;;  %8366 = vmatmul.mubr.msk.f32.gmra.mxu0 %vm411_vm0, %v11432_v29  ;;  %v10450_v51 = vadd.f32 %v3387_v24, %v2952_v30  ;;  %8264 = vmatprep.mubr.msk.f32.mxu1 %vm411_vm0, %v11425_v52  ;;  %v11437_v30 = vld [vmem:[#allocation27_spill] sm:$0xff] }
 0x20e   : > { %8368 = vmatprep.mubr.msk.f32.mxu0 %vm411_vm0, %v10036_v7  ;;  %v2851_v44 = vpop.f32.mrf.mxu1  ;;  %v11438_v23 = vld [vmem:[#allocation32_spill] sm:$0xff] }
 0x20f   : > { %11433 = vst [vmem:[#allocation41_spill] sm:$0xff] %v10450_v51  ;;  %v3275_v18 = vpop.f32.mrf.mxu0  ;;  %v2954_v20 = vadd.f32 %v2851_v44, %v11434_v59 }
 0x210   : > { %v3391_v6 = vrot.slane %v3275_v18, 1  ;;  %v7922_v37 = vpop.f32.mrf.mxu1  ;;  %8265 = vmatmul.mubr.msk.f32.gmra.mxu1 %vm411_vm0, %v11427_v60  ;;  %v11440_v60 = vld [vmem:[#allocation24_spill] sm:$0xff] }
 0x211   : > { %v8026_v54 = vpop.f32.mrf.mxu0  ;;  %8369 = vmatmul.mubr.msk.f32.gmra.mxu0 %vm411_vm0, %v11435_v62  ;;  %v10461_v24 = vadd.f32 %v3388_v16, %v2954_v20  ;;  %v2956_v52 = vadd.f32 %v7922_v37, %v11437_v30  ;;  %8267 = vmatprep.mubr.msk.f32.mxu1 %vm411_vm0, %v11429_v22  ;;  %v11441_v20 = vld [vmem:[#allocation31_spill] sm:$0xff]  ;;  %v11443_v22 = vld [vmem:[#allocation34_spill] sm:$0xff] }
 0x212   : > { %v3392_v49 = vsel %vm1548_vm3, %v3390_v63, %v3391_v6  ;;  %8371 = vmatprep.mubr.msk.f32.mxu0 %vm411_vm0, %v11438_v23  ;;  %v2860_v44 = vpop.f32.mrf.mxu1  ;;  %v3393_v37 = vrot.slane %v8026_v54, 1 }
 0x213   : > { %11436 = vst [vmem:[#allocation9_spill] sm:$0xff] %v10461_v24  ;;  %v3284_v18 = vpop.f32.mrf.mxu0  ;;  %v10469_v59 = vadd.f32 %v3392_v49, %v2956_v52  ;;  %v2955_v13 = vadd.f32 %v2860_v44, %v11440_v60  ;;  %v11444_v44 = vld [vmem:[#allocation20_spill] sm:$0xff] }
 0x214   : > { %v7925_v51 = vpop.f32.mrf.mxu1  ;;  %8268 = vmatmul.mubr.msk.f32.gmra.mxu1 %vm411_vm0, %v11432_v29 }
 0x215   : > { %11439 = vst [vmem:[#allocation39_spill] sm:$0xff] %v10469_v59  ;;  %v8029_v16 = vpop.f32.mrf.mxu0  ;;  %8372 = vmatmul.mubr.msk.f32.gmra.mxu0 %vm411_vm0, %v11441_v20  ;;  %v10476_v30 = vadd.f32 %v3390_v63, %v2955_v13  ;;  %8270 = vmatprep.mubr.msk.f32.mxu1 %vm411_vm0, %v10036_v7  ;;  %v11446_v63 = vld [vmem:[#allocation25_spill] sm:$0xff]  ;;  %v11447_v59 = vld [vmem:[#allocation36_spill] sm:$0xff] }
 0x216   : > { %8374 = vmatprep.mubr.msk.f32.mxu0 %vm411_vm0, %v11443_v22  ;;  %v2870_v52 = vpop.f32.mrf.mxu1  ;;  %v11445_v16 = vld [vmem:[#allocation49_spill] sm:$0xff] }
 0x217   : > { %11442 = vst [vmem:[#allocation10_spill] sm:$0xff] %v10476_v30  ;;  %v3293_v49 = vpop.f32.mrf.mxu0  ;;  %v2957_v51 = vadd.f32 %v2870_v52, %v11444_v44 }
 0x218   : > { %v3394_v18 = vrot.slane %v3293_v49, 1  ;;  %v7928_v60 = vpop.f32.mrf.mxu1  ;;  %8271 = vmatmul.mubr.msk.f32.gmra.mxu1 %vm411_vm0, %v11435_v62  ;;  %v11448_v62 = vld [vmem:[#allocation29_spill] sm:$0xff] }
 0x219   : > { %v8032_v29 = vpop.f32.mrf.mxu0  ;;  %8375 = vmatmul.mubr.msk.f32.gmra.mxu0 %vm411_vm0, %v11445_v16  ;;  %v10487_v13 = vadd.f32 %v3391_v6, %v2957_v51  ;;  %v2959_v7 = vadd.f32 %v7928_v60, %v11446_v63  ;;  %8273 = vmatprep.mubr.msk.f32.mxu1 %vm411_vm0, %v11438_v23  ;;  %v11449_v51 = vld [vmem:[#allocation16_spill] sm:$0xff] }
 0x21a   : > { %v3395_v54 = vsel %vm1548_vm3, %v3393_v37, %v3394_v18  ;;  %8377 = vmatprep.mubr.msk.f32.mxu0 %vm411_vm0, %v11447_v59  ;;  %v2879_v52 = vpop.f32.mrf.mxu1  ;;  %v3396_v60 = vrot.slane %v8032_v29, 1  ;;  %v11451_v29 = vld [vmem:[#allocation30_spill] sm:$0xff] }
 0x21b   : > { %v3302_v49 = vpop.f32.mrf.mxu0  ;;  %v10495_v44 = vadd.f32 %v3395_v54, %v2959_v7  ;;  %v2958_v30 = vadd.f32 %v2879_v52, %v11448_v62  ;;  %v11450_v54 = vld [vmem:[#allocation35_spill] sm:$0xff] }
 0x21c   : > { %v7931_v24 = vpop.f32.mrf.mxu1  ;;  %8274 = vmatmul.mubr.msk.f32.gmra.mxu1 %vm411_vm0, %v11441_v20 }
 0x21d   : > { %v8035_v6 = vpop.f32.mrf.mxu0  ;;  %8378 = vmatmul.mubr.msk.f32.gmra.mxu0 %vm411_vm0, %v11449_v51  ;;  %v10502_v63 = vadd.f32 %v3393_v37, %v2958_v30  ;;  %8276 = vmatprep.mubr.msk.f32.mxu1 %vm411_vm0, %v11443_v22 }
 0x21e   : > { %8380 = vmatprep.mubr.msk.f32.mxu0 %vm411_vm0, %v10122_v10  ;;  %v2889_v23 = vpop.f32.mrf.mxu1 }
 0x21f   : > { %v3311_v7 = vpop.f32.mrf.mxu0  ;;  %v2960_v24 = vadd.f32 %v2889_v23, %v11450_v54 }
 0x220   : > { %v3397_v52 = vrot.slane %v3311_v7, 1  ;;  %v7934_v49 = vpop.f32.mrf.mxu1  ;;  %8277 = vmatmul.mubr.msk.f32.gmra.mxu1 %vm411_vm0, %v11445_v16  ;;  %v11453_v16 = vld [vmem:[#allocation47_spill] sm:$0xff] }
 0x221   : > { %v8138_v20 = vpop.f32.mrf.mxu0  ;;  %8381 = vmatmul.mubr.msk.f32.gmra.mxu0 %vm411_vm0, %v10135_v57  ;;  %v10513_v37 = vadd.f32 %v3394_v18, %v2960_v24  ;;  %v2962_v30 = vadd.f32 %v7934_v49, %v10130_v38  ;;  %8279 = vmatprep.mubr.msk.f32.mxu1 %vm411_vm0, %v11447_v59  ;;  %v11454_v38 = vld [vmem:[#allocation19_spill] sm:$0xff]  ;;  %v11455_v59 = vld [vmem:[#allocation28_spill] sm:$0xff] }
 0x222   : > { %v3398_v22 = vsel %vm1548_vm3, %v3396_v60, %v3397_v52  ;;  %8383 = vmatprep.mubr.msk.f32.mxu0 %vm411_vm0, %v11451_v29  ;;  %v2898_v62 = vpop.f32.mrf.mxu1 }
 0x223   : > { %v4415_v6 = vpop.f32.mrf.mxu0  ;;  %v10521_v23 = vadd.f32 %v3398_v22, %v2962_v30  ;;  %v2961_v7 = vadd.f32 %v2898_v62, %v11453_v16  ;;  %v11456_v16 = vld [vmem:[#allocation46_spill] sm:$0xff] }
 0x224   : > { %v7937_v54 = vpop.f32.mrf.mxu1  ;;  %8280 = vmatmul.mubr.msk.f32.gmra.mxu1 %vm411_vm0, %v11449_v51 }
 0x225   : > { %11452 = vst [vmem:[#allocation40_spill] sm:$0xff] %v10521_v23  ;;  %v8141_v18 = vpop.f32.mrf.mxu0  ;;  %8384 = vmatmul.mubr.msk.f32.gmra.mxu0 %vm411_vm0, %v11454_v38  ;;  %v10528_v24 = vadd.f32 %v3396_v60, %v2961_v7  ;;  %8282 = vmatprep.mubr.msk.f32.mxu1 %vm411_vm0, %v10122_v10  ;;  %v11458_v10 = vld [vmem:[#allocation48_spill] sm:$0xff] }
 0x226   : > { %8386 = vmatprep.mubr.msk.f32.mxu0 %vm411_vm0, %v11455_v59  ;;  %v2908_v49 = vpop.f32.mrf.mxu1 }
 0x227   : > { %v4425_v30 = vpop.f32.mrf.mxu0  ;;  %v2963_v22 = vadd.f32 %v2908_v49, %v10115_v34 }
 0x228   : > { %v8040_v62 = vpop.f32.mrf.mxu1  ;;  %8283 = vmatmul.mubr.msk.f32.gmra.mxu1 %vm411_vm0, %v10135_v57 }
 0x229   : > { %v10537_v51 = vpop.f32.mrf.mxu0  ;;  %8387 = vmatmul.mubr.msk.f32.gmra.mxu0 %vm411_vm0, %v11456_v16  ;;  %v10541_v60 = vadd.f32 %v3397_v52, %v2963_v22  ;;  %v3914_v7 = vrot.slane %v8040_v62, 2  ;;  %8285 = vmatprep.mubr.msk.f32.mxu1 %vm411_vm0, %v11451_v29 }
 0x22a   : > { %8389 = vmatprep.mubr.msk.f32.mxu0 %vm411_vm0, %v11458_v10  ;;  %v3563_v54 = vpop.f32.mrf.mxu1 }
 0x22b   : > { %11457 = vst [vmem:[#allocation17_spill] sm:$0xff] %v10541_v60  ;;  %v4434_v34 = vpop.f32.mrf.mxu0  ;;  %v4042_v18 = vadd.f32 %v3914_v7, %v10120_v12 }
 0x22c   : > { %v8043_v49 = vpop.f32.mrf.mxu1  ;;  %8286 = vmatmul.mubr.msk.f32.gmra.mxu1 %vm411_vm0, %v11454_v38 }
 0x22d   : > { %v8147_v57 = vpop.f32.mrf.mxu0  ;;  %8390 = vmatmul.mubr.msk.f32.gmra.mxu0 %vm411_vm0, %v10106_v1  ;;  %8288 = vmatprep.mubr.msk.f32.mxu1 %vm411_vm0, %v11455_v59  ;;  %v10556_v52 = vadd.f32 %v4415_v6, %v4042_v18  ;;  %v3917_v62 = vrot.slane %v8043_v49, 2  ;;  %v11460_v49 = vld [vmem:[#allocation37_spill] sm:$0xff] }
 0x22e   : > { %8392 = vmatprep.mubr.msk.f32.mxu0 %vm411_vm0, %v10108_v43  ;;  %v3572_v29 = vpop.f32.mrf.mxu1 }
 0x22f   : > { %11459 = vst [vmem:[#allocation42_spill] sm:$0xff] %v10556_v52  ;;  %v4444_v22 = vpop.f32.mrf.mxu0  ;;  %v3915_v12 = vrot.slane %v3572_v29, 2 }
 0x230   : > { %v8046_v54 = vpop.f32.mrf.mxu1  ;;  %8289 = vmatmul.mubr.msk.f32.gmra.mxu1 %vm411_vm0, %v11456_v16 }
 0x231   : > { %v10560_v38 = vpop.f32.mrf.mxu0  ;;  %8393 = vmatmul.mubr.msk.f32.gmra.mxu0 %vm411_vm0, %v10128_v55  ;;  %v3916_v59 = vsel %vm2112_vm2, %v3914_v7, %v3915_v12  ;;  %v3918_v57 = vsel %vm2112_vm2, %v3915_v12, %v3917_v62  ;;  %v3919_v60 = vrot.slane %v8046_v54, 2  ;;  %8291 = vmatprep.mubr.msk.f32.mxu1 %vm411_vm0, %v11458_v10 }
 0x232   : > { %8395 = vmatprep.mubr.msk.f32.mxu0 %vm411_vm0, %v10132_v42  ;;  %v4043_v6 = vadd.f32 %v3916_v59, %v10111_v58  ;;  %v3582_v18 = vpop.f32.mrf.mxu1  ;;  %v4044_v29 = vadd.f32 %v3918_v57, %v11460_v49  ;;  %v11461_v58 = vld [vmem:[#allocation33_spill] sm:$0xff]  ;;  %v11464_v49 = vld [vmem:[#allocation52_spill] sm:$0xff] }
 0x233   : > { %v4453_v16 = vpop.f32.mrf.mxu0  ;;  %v4045_v52 = vadd.f32 %v3919_v60, %v10158_v31 }
 0x234   : > { %v8049_v23 = vpop.f32.mrf.mxu1  ;;  %8292 = vmatmul.mubr.msk.f32.gmra.mxu1 %vm411_vm0, %v10106_v1  ;;  %v10577_v10 = vadd.f32 %v8138_v20, %v4043_v6  ;;  %v10579_v62 = vadd.f32 %v4425_v30, %v4044_v29 }
 0x235   : > { %v8153_v7 = vpop.f32.mrf.mxu0  ;;  %8396 = vmatmul.mubr.msk.f32.gmra.mxu0 %vm411_vm0, %v10148_v17  ;;  %8294 = vmatprep.mubr.msk.f32.mxu1 %vm411_vm0, %v10108_v43  ;;  %v10585_v12 = vadd.f32 %v4434_v34, %v4045_v52  ;;  %v3922_v59 = vrot.slane %v8049_v23, 2  ;;  %v11462_v34 = vld [vmem:[#allocation51_spill] sm:$0xff]  ;;  %v11463_v23 = vld [vmem:[#allocation50_spill] sm:$0xff] }
 0x236   : > { %8398 = vmatprep.mubr.msk.f32.mxu0 %vm411_vm0, %v11461_v58  ;;  %v3591_v31 = vpop.f32.mrf.mxu1 }
 0x237   : > { %v4463_v54 = vpop.f32.mrf.mxu0  ;;  %v3920_v1 = vrot.slane %v3591_v31, 2 }
 0x238   : > { %v8052_v57 = vpop.f32.mrf.mxu1  ;;  %8295 = vmatmul.mubr.msk.f32.gmra.mxu1 %vm411_vm0, %v10128_v55 }
 0x239   : > { %v10589_v20 = vpop.f32.mrf.mxu0  ;;  %8399 = vmatmul.mubr.msk.f32.gmra.mxu0 %vm411_vm0, %v10163_v32  ;;  %v3921_v43 = vsel %vm2112_vm2, %v3919_v60, %v3920_v1  ;;  %v3923_v30 = vsel %vm2112_vm2, %v3920_v1, %v3922_v59  ;;  %v3924_v6 = vrot.slane %v8052_v57, 2  ;;  %8297 = vmatprep.mubr.msk.f32.mxu1 %vm411_vm0, %v10132_v42  ;;  %v11465_v1 = vld [vmem:[#allocation53_spill] sm:$0xff] }
 0x23a   : > { %8401 = vmatprep.mubr.msk.f32.mxu0 %vm411_vm0, %v11462_v34  ;;  %v4046_v52 = vadd.f32 %v3921_v43, %v11463_v23  ;;  %v3601_v18 = vpop.f32.mrf.mxu1  ;;  %v4047_v29 = vadd.f32 %v3923_v30, %v11464_v49 }
 0x23b   : > { %v4472_v55 = vpop.f32.mrf.mxu0  ;;  %v4048_v7 = vadd.f32 %v3924_v6, %v10188_v9  ;;  %v11467_v18 = vld [vmem:[#allocation54_spill] sm:$0xff] }
 0x23c   : > { %v8055_v31 = vpop.f32.mrf.mxu1  ;;  %8298 = vmatmul.mubr.msk.f32.gmra.mxu1 %vm411_vm0, %v10148_v17  ;;  %v10607_v42 = vadd.f32 %v10537_v51, %v4046_v52  ;;  %v10609_v59 = vadd.f32 %v4444_v22, %v4047_v29 }
 0x23d   : > { %v8159_v60 = vpop.f32.mrf.mxu0  ;;  %8402 = vmatmul.mubr.msk.f32.gmra.mxu0 %vm411_vm0, %v10178_v14  ;;  %8300 = vmatprep.mubr.msk.f32.mxu1 %vm411_vm0, %v11461_v58  ;;  %v10615_v9 = vadd.f32 %v4453_v16, %v4048_v7  ;;  %v3927_v17 = vrot.slane %v8055_v31, 2  ;;  %v11466_v16 = vld [vmem:[#allocation55_spill] sm:$0xff]  ;;  %v11468_v7 = vld [vmem:[#allocation56_spill] sm:$0xff] }
 0x23e   : > { %8404 = vmatprep.mubr.msk.f32.mxu0 %vm411_vm0, %v11465_v1  ;;  %v3610_v57 = vpop.f32.mrf.mxu1 }
 0x23f   : > { %v4482_v43 = vpop.f32.mrf.mxu0  ;;  %v3925_v30 = vrot.slane %v3610_v57, 2 }
 0x240   : > { %v8058_v23 = vpop.f32.mrf.mxu1  ;;  %8301 = vmatmul.mubr.msk.f32.gmra.mxu1 %vm411_vm0, %v10163_v32 }
 0x241   : > { %v10619_v51 = vpop.f32.mrf.mxu0  ;;  %8405 = vmatmul.mubr.msk.f32.gmra.mxu0 %vm411_vm0, %v10193_v36  ;;  %v3926_v22 = vsel %vm2112_vm2, %v3924_v6, %v3925_v30  ;;  %v3928_v58 = vsel %vm2112_vm2, %v3925_v30, %v3927_v17  ;;  %v3929_v52 = vrot.slane %v8058_v23, 2  ;;  %8303 = vmatprep.mubr.msk.f32.mxu1 %vm411_vm0, %v11462_v34 }
 0x242   : > { %8407 = vmatprep.mubr.msk.f32.mxu0 %vm411_vm0, %v11466_v16  ;;  %v4049_v49 = vadd.f32 %v3926_v22, %v11467_v18  ;;  %v3620_v29 = vpop.f32.mrf.mxu1  ;;  %v4050_v31 = vadd.f32 %v3928_v58, %v11468_v7 }
 0x243   : > { %v4491_v32 = vpop.f32.mrf.mxu0  ;;  %v4051_v60 = vadd.f32 %v3929_v52, %v10218_v50 }
 0x244   : > { %v8061_v57 = vpop.f32.mrf.mxu1  ;;  %8304 = vmatmul.mubr.msk.f32.gmra.mxu1 %vm411_vm0, %v10178_v14  ;;  %v10637_v34 = vadd.f32 %v10560_v38, %v4049_v49  ;;  %v10639_v17 = vadd.f32 %v4463_v54, %v4050_v31  ;;  %v11469_v54 = vld [vmem:[#allocation58_spill] sm:$0xff]  ;;  %v11471_v31 = vld [vmem:[#allocation59_spill] sm:$0xff] }
 0x245   : > { %v8165_v6 = vpop.f32.mrf.mxu0  ;;  %8408 = vmatmul.mubr.msk.f32.gmra.mxu0 %vm411_vm0, %v10208_v26  ;;  %8306 = vmatprep.mubr.msk.f32.mxu1 %vm411_vm0, %v11465_v1  ;;  %v10645_v50 = vadd.f32 %v4472_v55, %v4051_v60  ;;  %v3932_v14 = vrot.slane %v8061_v57, 2  ;;  %v11470_v55 = vld [vmem:[#allocation57_spill] sm:$0xff] }
 0x246   : > { %8410 = vmatprep.mubr.msk.f32.mxu0 %vm411_vm0, %v10210_v35  ;;  %v3629_v30 = vpop.f32.mrf.mxu1 }
 0x247   : > { %v4501_v23 = vpop.f32.mrf.mxu0  ;;  %v3930_v22 = vrot.slane %v3629_v30, 2 }
 0x248   : > { %v8064_v58 = vpop.f32.mrf.mxu1  ;;  %8307 = vmatmul.mubr.msk.f32.gmra.mxu1 %vm411_vm0, %v10193_v36 }
 0x249   : > { %v10649_v38 = vpop.f32.mrf.mxu0  ;;  %8411 = vmatmul.mubr.msk.f32.gmra.mxu0 %vm411_vm0, %v11469_v54  ;;  %v3931_v1 = vsel %vm2112_vm2, %v3929_v52, %v3930_v22  ;;  %v3933_v18 = vsel %vm2112_vm2, %v3930_v22, %v3932_v14  ;;  %v3934_v49 = vrot.slane %v8064_v58, 2  ;;  %8309 = vmatprep.mubr.msk.f32.mxu1 %vm411_vm0, %v11466_v16 }
 0x24a   : > { %8413 = vmatprep.mubr.msk.f32.mxu0 %vm411_vm0, %v10225_v15  ;;  %v4052_v29 = vadd.f32 %v3931_v1, %v11470_v55  ;;  %v3639_v7 = vpop.f32.mrf.mxu1  ;;  %v4053_v60 = vadd.f32 %v3933_v18, %v11471_v31 }
 0x24b   : > { %v4510_v36 = vpop.f32.mrf.mxu0  ;;  %v4054_v57 = vadd.f32 %v3934_v49, %v10246_v8 }
 0x24c   : > { %v8067_v6 = vpop.f32.mrf.mxu1  ;;  %8310 = vmatmul.mubr.msk.f32.gmra.mxu1 %vm411_vm0, %v10208_v26  ;;  %v10667_v16 = vadd.f32 %v10589_v20, %v4052_v29  ;;  %v10669_v30 = vadd.f32 %v4482_v43, %v4053_v60 }
 0x24d   : > { %v8171_v52 = vpop.f32.mrf.mxu0  ;;  %8414 = vmatmul.mubr.msk.f32.gmra.mxu0 %vm411_vm0, %v10238_v47  ;;  %8312 = vmatprep.mubr.msk.f32.mxu1 %vm411_vm0, %v10210_v35  ;;  %v10675_v8 = vadd.f32 %v4491_v32, %v4054_v57  ;;  %v3937_v26 = vrot.slane %v8067_v6, 2 }
 0x24e   : > { %8416 = vmatprep.mubr.msk.f32.mxu0 %vm411_vm0, %v10300_v56  ;;  %v3648_v14 = vpop.f32.mrf.mxu1 }
 0x24f   : > { %v4520_v22 = vpop.f32.mrf.mxu0  ;;  %v3935_v58 = vrot.slane %v3648_v14, 2 }
 0x250   : > { %v8070_v1 = vpop.f32.mrf.mxu1  ;;  %8313 = vmatmul.mubr.msk.f32.gmra.mxu1 %vm411_vm0, %v11469_v54 }
 0x251   : > { %v10679_v20 = vpop.f32.mrf.mxu0  ;;  %8417 = vmatmul.mubr.msk.f32.gmra.mxu0 %vm411_vm0, %v10306_v11  ;;  %v3936_v35 = vsel %vm2112_vm2, %v3934_v49, %v3935_v58  ;;  %v3938_v43 = vsel %vm2112_vm2, %v3935_v58, %v3937_v26  ;;  %v3939_v18 = vrot.slane %v8070_v1, 2  ;;  %8315 = vmatprep.mubr.msk.f32.mxu1 %vm411_vm0, %v10225_v15 }
 0x252   : > { %8419 = vmatprep.mubr.msk.f32.mxu0 %vm411_vm0, %v10316_v46  ;;  %v4055_v32 = vadd.f32 %v3936_v35, %v10240_v25  ;;  %v4056_v54 = vadd.f32 %v3938_v43, %v10255_v41  ;;  %v3658_v55 = vpop.f32.mrf.mxu1 }
 0x253   : > { %v4529_v29 = vpop.f32.mrf.mxu0  ;;  %v4057_v7 = vadd.f32 %v3939_v18, %v10270_v39 }
 0x254   : > { %v8073_v31 = vpop.f32.mrf.mxu1  ;;  %8316 = vmatmul.mubr.msk.f32.gmra.mxu1 %vm411_vm0, %v10238_v47  ;;  %v10697_v15 = vadd.f32 %v10619_v51, %v4055_v32  ;;  %v10699_v60 = vadd.f32 %v4501_v23, %v4056_v54 }
 0x255   : > { %v8177_v49 = vpop.f32.mrf.mxu0  ;;  %8420 = vmatmul.mubr.msk.f32.gmra.mxu0 %vm411_vm0, %v10325_v53  ;;  %8318 = vmatprep.mubr.msk.f32.mxu1 %vm411_vm0, %v10300_v56  ;;  %v10705_v25 = vadd.f32 %v4510_v36, %v4057_v7  ;;  %v3942_v47 = vrot.slane %v8073_v31, 2  ;;  %v11473_v7 = vld [vmem:[#allocation61_spill] sm:$0xff] }
 0x256   : > { %8422 = vmatprep.mubr.msk.f32.mxu0 %vm411_vm0, %v10262_v40  ;;  %v3667_v41 = vpop.f32.mrf.mxu1 }
 0x257   : > { %v4539_v39 = vpop.f32.mrf.mxu0  ;;  %v3940_v57 = vrot.slane %v3667_v41, 2 }
 0x258   : > { %v8076_v6 = vpop.f32.mrf.mxu1  ;;  %8319 = vmatmul.mubr.msk.f32.gmra.mxu1 %vm411_vm0, %v10306_v11 }
 0x259   : > { %v8180_v51 = vpop.f32.mrf.mxu0  ;;  %8423 = vmatmul.mubr.msk.f32.gmra.mxu0 %vm411_vm0, %v10275_v61  ;;  %v3941_v23 = vsel %vm2112_vm2, %v3939_v18, %v3940_v57  ;;  %v3943_v56 = vsel %vm2112_vm2, %v3940_v57, %v3942_v47  ;;  %v3944_v52 = vrot.slane %v8076_v6, 2  ;;  %8321 = vmatprep.mubr.msk.f32.mxu1 %vm411_vm0, %v10316_v46 }
 0x25a   : > { %8425 = vmatprep.mubr.msk.f32.mxu0 %vm411_vm0, %v10277_v0  ;;  %v4058_v36 = vadd.f32 %v3941_v23, %v10264_v19  ;;  %v4059_v14 = vadd.f32 %v3943_v56, %v10283_v2  ;;  %v3677_v11 = vpop.f32.mrf.mxu1 }
 0x25b   : > { %v4548_v26 = vpop.f32.mrf.mxu0  ;;  %v4060_v58 = vadd.f32 %v3944_v52, %v10298_v28 }
 0x25c   : > { %v8079_v1 = vpop.f32.mrf.mxu1  ;;  %8322 = vmatmul.mubr.msk.f32.gmra.mxu1 %vm411_vm0, %v10325_v53  ;;  %v10725_v46 = vadd.f32 %v10649_v38, %v4058_v36  ;;  %v10727_v43 = vadd.f32 %v4520_v22, %v4059_v14 }
 0x25d   : > { %v8183_v35 = vpop.f32.mrf.mxu0  ;;  %8426 = vmatmul.mubr.msk.f32.gmra.mxu0 %vm411_vm0, %v10290_v48  ;;  %8324 = vmatprep.mubr.msk.f32.mxu1 %vm411_vm0, %v10262_v40  ;;  %v10731_v19 = vadd.f32 %v4529_v29, %v4060_v58  ;;  %v3947_v18 = vrot.slane %v8079_v1, 2  ;;  %v11472_v40 = vld [vmem:[#allocation60_spill] sm:$0xff] }
 0x25e   : > { %v3686_v2 = vpop.f32.mrf.mxu1 }
 0x25f   : > { %v4558_v28 = vpop.f32.mrf.mxu0  ;;  %v3945_v32 = vrot.slane %v3686_v2, 2 }
 0x260   : > { %v8082_v54 = vpop.f32.mrf.mxu1  ;;  %8325 = vmatmul.mubr.msk.f32.gmra.mxu1 %vm411_vm0, %v10275_v61 }
 0x261   : > { %v8186_v53 = vpop.f32.mrf.mxu0  ;;  %v3946_v55 = vsel %vm2112_vm2, %v3944_v52, %v3945_v32  ;;  %v3948_v38 = vsel %vm2112_vm2, %v3945_v32, %v3947_v18  ;;  %v3949_v22 = vrot.slane %v8082_v54, 2  ;;  %8327 = vmatprep.mubr.msk.f32.mxu1 %vm411_vm0, %v10277_v0 }
 0x262   : > { %v4061_v29 = vadd.f32 %v3946_v55, %v11472_v40  ;;  %v4062_v31 = vadd.f32 %v3948_v38, %v11473_v7  ;;  %v3696_v49 = vpop.f32.mrf.mxu1 }
 0x263   : > { %v4567_v41 = vpop.f32.mrf.mxu0  ;;  %v4063_v47 = vadd.f32 %v3949_v22, %v10331_v5 }
 0x264   : > { %v8085_v57 = vpop.f32.mrf.mxu1  ;;  %8328 = vmatmul.mubr.msk.f32.gmra.mxu1 %vm411_vm0, %v10290_v48  ;;  %v10745_v6 = vadd.f32 %v10679_v20, %v4061_v29  ;;  %v10747_v23 = vadd.f32 %v4539_v39, %v4062_v31 }
 0x265   : > { %v8189_v61 = vpop.f32.mrf.mxu0  ;;  %v10749_v56 = vadd.f32 %v4548_v26, %v4063_v47  ;;  %v3952_v36 = vrot.slane %v8085_v57, 2 }
 0x266   : > { %v3705_v0 = vpop.f32.mrf.mxu1  ;;  %v11474_v61 = vld [vmem:[#allocation11_spill] sm:$0xff] }
 0x267   : > { %v4577_v52 = vpop.f32.mrf.mxu0  ;;  %v3950_v14 = vrot.slane %v3705_v0, 2 }
 0x268   : > { %v8088_v11 = vpop.f32.mrf.mxu1 }
 0x269   : > { %v8192_v58 = vpop.f32.mrf.mxu0  ;;  %v3951_v5 = vsel %vm2112_vm2, %v3949_v22, %v3950_v14  ;;  %v3953_v1 = vsel %vm2112_vm2, %v3950_v14, %v3952_v36  ;;  %v3954_v35 = vrot.slane %v8088_v11, 2 }
 0x26a   : > { %v4064_v48 = vadd.f32 %v3951_v5, %v10322_v4  ;;  %v4065_v20 = vadd.f32 %v3953_v1, %v10340_v21  ;;  %v3715_v2 = vpop.f32.mrf.mxu1 }
 0x26b   : > { %v4586_v39 = vpop.f32.mrf.mxu0  ;;  %v4066_v26 = vadd.f32 %v3954_v35, %v10353_v27 }
 0x26c   : > { %v8091_v18 = vpop.f32.mrf.mxu1  ;;  %v10756_v54 = vadd.f32 %v8180_v51, %v4064_v48  ;;  %v10758_v55 = vadd.f32 %v4558_v28, %v4065_v20 }
 0x26d   : > { %v8195_v32 = vpop.f32.mrf.mxu0  ;;  %v10760_v38 = vadd.f32 %v4567_v41, %v4066_v26  ;;  %v3957_v29 = vrot.slane %v8091_v18, 2 }
 0x26e   : > { %v3724_v22 = vpop.f32.mrf.mxu1  ;;  %v11475_v32 = vld [vmem:[#allocation4_spill] sm:$0xff] }
 0x26f   : > { %v4596_v40 = vpop.f32.mrf.mxu0  ;;  %v3955_v7 = vrot.slane %v3724_v22, 2 }
 0x270   : > { %v8094_v31 = vpop.f32.mrf.mxu1 }
 0x271   : > { %v8198_v4 = vpop.f32.mrf.mxu0  ;;  %v3956_v21 = vsel %vm2112_vm2, %v3954_v35, %v3955_v7  ;;  %v3958_v49 = vsel %vm2112_vm2, %v3955_v7, %v3957_v29  ;;  %v3959_v47 = vrot.slane %v8094_v31, 2  ;;  %v11476_v29 = vld [vmem:[#allocation26_spill] sm:$0xff]  ;;  %v11477_v31 = vld [vmem:[#allocation5_spill] sm:$0xff] }
 0x272   : > { %v4067_v27 = vadd.f32 %v3956_v21, %v10347_v3  ;;  %v4068_v51 = vadd.f32 %v3958_v49, %v10362_v33  ;;  %v3734_v57 = vpop.f32.mrf.mxu1 }
 0x273   : > { %v4605_v28 = vpop.f32.mrf.mxu0  ;;  %v4069_v41 = vadd.f32 %v3959_v47, %v11474_v61 }
 0x274   : > { %v8097_v0 = vpop.f32.mrf.mxu1  ;;  %v10767_v14 = vadd.f32 %v8186_v53, %v4067_v27  ;;  %v10769_v11 = vadd.f32 %v4577_v52, %v4068_v51 }
 0x275   : > { %v8201_v36 = vpop.f32.mrf.mxu0  ;;  %v10771_v5 = vadd.f32 %v4586_v39, %v4069_v41  ;;  %v3962_v48 = vrot.slane %v8097_v0, 2 }
 0x276   : > { %v3743_v1 = vpop.f32.mrf.mxu1 }
 0x277   : > { %v4615_v35 = vpop.f32.mrf.mxu0  ;;  %v3960_v20 = vrot.slane %v3743_v1, 2 }
 0x278   : > { %v8100_v2 = vpop.f32.mrf.mxu1 }
 0x279   : > { %v8204_v3 = vpop.f32.mrf.mxu0  ;;  %v3961_v33 = vsel %vm2112_vm2, %v3959_v47, %v3960_v20  ;;  %v3963_v26 = vsel %vm2112_vm2, %v3960_v20, %v3962_v48  ;;  %v3964_v18 = vrot.slane %v8100_v2, 2 }
 0x27a   : > { %v4070_v22 = vadd.f32 %v3961_v33, %v11475_v32  ;;  %v4071_v53 = vadd.f32 %v3963_v26, %v11476_v29  ;;  %v3753_v7 = vpop.f32.mrf.mxu1  ;;  %v11478_v33 = vld [vmem:[#allocation8_spill] sm:$0xff]  ;;  %v11479_v32 = vld [vmem:[#allocation6_spill] sm:$0xff]  ;;  %v11480_v29 = vld [vmem:[#allocation3_spill] sm:$0xff] }
 0x27b   : > { %v4624_v52 = vpop.f32.mrf.mxu0  ;;  %v4072_v39 = vadd.f32 %v3964_v18, %v11477_v31 }
 0x27c   : > { %v8103_v21 = vpop.f32.mrf.mxu1  ;;  %v10778_v27 = vadd.f32 %v8192_v58, %v4070_v22  ;;  %v10780_v51 = vadd.f32 %v4596_v40, %v4071_v53 }
 0x27d   : > { %v8207_v49 = vpop.f32.mrf.mxu0  ;;  %v10782_v57 = vadd.f32 %v4605_v28, %v4072_v39  ;;  %v3967_v41 = vrot.slane %v8103_v21, 2 }
 0x27e   : > { %v3762_v47 = vpop.f32.mrf.mxu1 }
 0x27f   : > { %v4634_v61 = vpop.f32.mrf.mxu0  ;;  %v3965_v0 = vrot.slane %v3762_v47, 2 }
 0x280   : > { %v8106_v36 = vpop.f32.mrf.mxu1 }
 0x281   : > { %v8210_v1 = vpop.f32.mrf.mxu0  ;;  %v3966_v48 = vsel %vm2112_vm2, %v3964_v18, %v3965_v0  ;;  %v3968_v20 = vsel %vm2112_vm2, %v3965_v0, %v3967_v41  ;;  %v3969_v2 = vrot.slane %v8106_v36, 2 }
 0x282   : > { %v4073_v26 = vadd.f32 %v3966_v48, %v11478_v33  ;;  %v4074_v58 = vadd.f32 %v3968_v20, %v11479_v32  ;;  %v3772_v22 = vpop.f32.mrf.mxu1  ;;  %v11482_v32 = vld [vmem:[#allocation7_spill] sm:$0xff] }
 0x283   : > { %v4643_v40 = vpop.f32.mrf.mxu0  ;;  %v4075_v28 = vadd.f32 %v3969_v2, %v11480_v29 }
 0x284   : > { %v8109_v53 = vpop.f32.mrf.mxu1  ;;  %v10789_v31 = vadd.f32 %v8198_v4, %v4073_v26  ;;  %v10791_v39 = vadd.f32 %v4615_v35, %v4074_v58  ;;  %v11483_v58 = vld [vmem:[#allocation41_spill] sm:$0xff] }
 0x285   : > { %v8213_v7 = vpop.f32.mrf.mxu0  ;;  %v10793_v21 = vadd.f32 %v4624_v52, %v4075_v28  ;;  %v3972_v47 = vrot.slane %v8109_v53, 2 }
 0x286   : > { %v3781_v18 = vpop.f32.mrf.mxu1 }
 0x287   : > { %11481 = vst [vmem:[#allocation44_spill] sm:$0xff] %v10793_v21  ;;  %v4653_v49 = vpop.f32.mrf.mxu0  ;;  %v3970_v41 = vrot.slane %v3781_v18, 2 }
 0x288   : > { %v8112_v0 = vpop.f32.mrf.mxu1 }
 0x289   : > { %v8216_v36 = vpop.f32.mrf.mxu0  ;;  %v3971_v48 = vsel %vm2112_vm2, %v3969_v2, %v3970_v41  ;;  %v3973_v20 = vsel %vm2112_vm2, %v3970_v41, %v3972_v47  ;;  %v3974_v33 = vrot.slane %v8112_v0, 2 }
 0x28a   : > { %v4076_v22 = vadd.f32 %v3971_v48, %v11482_v32  ;;  %v4077_v4 = vadd.f32 %v3973_v20, %v10435_v45  ;;  %v3791_v26 = vpop.f32.mrf.mxu1 }
 0x28b   : > { %v4662_v35 = vpop.f32.mrf.mxu0  ;;  %v4078_v52 = vadd.f32 %v3974_v33, %v11483_v58  ;;  %v11487_v26 = vld [vmem:[#allocation38_spill] sm:$0xff] }
 0x28c   : > { %v8115_v29 = vpop.f32.mrf.mxu1  ;;  %v10800_v7 = vadd.f32 %v8204_v3, %v4076_v22  ;;  %v10802_v53 = vadd.f32 %v4634_v61, %v4077_v4  ;;  %v11489_v4 = vld [vmem:[#allocation10_spill] sm:$0xff] }
 0x28d   : > { %v8219_v28 = vpop.f32.mrf.mxu0  ;;  %v10804_v18 = vadd.f32 %v4643_v40, %v4078_v52  ;;  %v3977_v47 = vrot.slane %v8115_v29, 2 }
 0x28e   : > { %11484 = vst [vmem:[#allocation12_spill] sm:$0xff] %v10800_v7  ;;  %11485 = vst [vmem:[#allocation43_spill] sm:$0xff] %v10802_v53  ;;  %v3800_v2 = vpop.f32.mrf.mxu1  ;;  %v11488_v28 = vld [vmem:[#allocation9_spill] sm:$0xff] }
 0x28f   : > { %11486 = vst [vmem:[#allocation13_spill] sm:$0xff] %v10804_v18  ;;  %v4672_v21 = vpop.f32.mrf.mxu0  ;;  %v3975_v41 = vrot.slane %v3800_v2, 2 }
 0x290   : > { %v8118_v0 = vpop.f32.mrf.mxu1 }
 0x291   : > { %v8222_v48 = vpop.f32.mrf.mxu0  ;;  %v3976_v45 = vsel %vm2112_vm2, %v3974_v33, %v3975_v41  ;;  %v3978_v20 = vsel %vm2112_vm2, %v3975_v41, %v3977_v47  ;;  %v3979_v32 = vrot.slane %v8118_v0, 2 }
 0x292   : > { %v4079_v58 = vadd.f32 %v3976_v45, %v11487_v26  ;;  %v4080_v3 = vadd.f32 %v3978_v20, %v11488_v28  ;;  %v3810_v22 = vpop.f32.mrf.mxu1 }
 0x293   : > { %v4681_v61 = vpop.f32.mrf.mxu0  ;;  %v4081_v40 = vadd.f32 %v3979_v32, %v11489_v4  ;;  %v11491_v22 = vld [vmem:[#allocation39_spill] sm:$0xff] }
 0x294   : > { %v8121_v52 = vpop.f32.mrf.mxu1  ;;  %v10811_v7 = vadd.f32 %v8210_v1, %v4079_v58  ;;  %v10813_v29 = vadd.f32 %v4653_v49, %v4080_v3 }
 0x295   : > { %v8225_v18 = vpop.f32.mrf.mxu0  ;;  %v10815_v2 = vadd.f32 %v4662_v35, %v4081_v40  ;;  %v3982_v47 = vrot.slane %v8121_v52, 2 }
 0x296   : > { %v3819_v33 = vpop.f32.mrf.mxu1 }
 0x297   : > { %11490 = vst [vmem:[#allocation14_spill] sm:$0xff] %v10815_v2  ;;  %v4691_v53 = vpop.f32.mrf.mxu0  ;;  %v3980_v41 = vrot.slane %v3819_v33, 2 }
 0x298   : > { %v8124_v0 = vpop.f32.mrf.mxu1 }
 0x299   : > { %v8228_v45 = vpop.f32.mrf.mxu0  ;;  %v3981_v20 = vsel %vm2112_vm2, %v3979_v32, %v3980_v41  ;;  %v3983_v26 = vsel %vm2112_vm2, %v3980_v41, %v3982_v47  ;;  %v3984_v28 = vrot.slane %v8124_v0, 2 }
 0x29a   : > { %v4082_v4 = vadd.f32 %v3981_v20, %v11491_v22  ;;  %v4083_v1 = vadd.f32 %v3983_v26, %v10487_v13  ;;  %v3829_v18 = vpop.f32.mrf.mxu1 }
 0x29b   : > { %v4700_v49 = vpop.f32.mrf.mxu0  ;;  %v4084_v35 = vadd.f32 %v3984_v28, %v10502_v63 }
 0x29c   : > { %v8127_v58 = vpop.f32.mrf.mxu1  ;;  %v10822_v40 = vadd.f32 %v8216_v36, %v4082_v4  ;;  %v10824_v52 = vadd.f32 %v4672_v21, %v4083_v1 }
 0x29d   : > { %v8231_v3 = vpop.f32.mrf.mxu0  ;;  %v10826_v33 = vadd.f32 %v4681_v61, %v4084_v35  ;;  %v3987_v47 = vrot.slane %v8127_v58, 2 }
 0x29e   : > { %v3838_v32 = vpop.f32.mrf.mxu1 }
 0x29f   : > { %11492 = vst [vmem:[#allocation18_spill] sm:$0xff] %v10826_v33  ;;  %v4710_v2 = vpop.f32.mrf.mxu0  ;;  %v3985_v41 = vrot.slane %v3838_v32, 2 }
 0x2a0   : > { %v8130_v0 = vpop.f32.mrf.mxu1 }
 0x2a1   : > { %v8334_v20 = vpop.f32.mrf.mxu0  ;;  %v3986_v13 = vsel %vm2112_vm2, %v3984_v28, %v3985_v41  ;;  %v3988_v26 = vsel %vm2112_vm2, %v3985_v41, %v3987_v47  ;;  %v3989_v22 = vrot.slane %v8130_v0, 2 }
 0x2a2   : > { %v4085_v63 = vadd.f32 %v3986_v13, %v10495_v44  ;;  %v4086_v36 = vadd.f32 %v3988_v26, %v10513_v37  ;;  %v3848_v4 = vpop.f32.mrf.mxu1 }
 0x2a3   : > { %v5365_v21 = vpop.f32.mrf.mxu0  ;;  %v4087_v61 = vadd.f32 %v3989_v22, %v10528_v24  ;;  %v11496_v24 = vld [vmem:[#allocation40_spill] sm:$0xff] }
 0x2a4   : > { %v8133_v1 = vpop.f32.mrf.mxu1  ;;  %v10833_v35 = vadd.f32 %v8222_v48, %v4085_v63  ;;  %v10835_v58 = vadd.f32 %v4691_v53, %v4086_v36  ;;  %v11497_v53 = vld [vmem:[#allocation17_spill] sm:$0xff] }
 0x2a5   : > { %v8337_v18 = vpop.f32.mrf.mxu0  ;;  %v10837_v3 = vadd.f32 %v4700_v49, %v4087_v61  ;;  %v3992_v47 = vrot.slane %v8133_v1, 2 }
 0x2a6   : > { %11493 = vst [vmem:[#allocation45_spill] sm:$0xff] %v10833_v35  ;;  %11494 = vst [vmem:[#allocation21_spill] sm:$0xff] %v10835_v58  ;;  %v3857_v28 = vpop.f32.mrf.mxu1  ;;  %v5719_v49 = vrot.slane %v8337_v18, 2  ;;  %v11498_v35 = vld [vmem:[#allocation42_spill] sm:$0xff] }
 0x2a7   : > { %11495 = vst [vmem:[#allocation15_spill] sm:$0xff] %v10837_v3  ;;  %v5374_v32 = vpop.f32.mrf.mxu0  ;;  %v3990_v41 = vrot.slane %v3857_v28, 2  ;;  %v5716_v28 = vrot.slane %v8334_v20, 2 }
 0x2a8   : > { %v8236_v0 = vpop.f32.mrf.mxu1 }
 0x2a9   : > { %v10839_v44 = vpop.f32.mrf.mxu0  ;;  %v3991_v37 = vsel %vm2112_vm2, %v3989_v22, %v3990_v41  ;;  %v3993_v13 = vsel %vm2112_vm2, %v3990_v41, %v3992_v47  ;;  %v5153_v4 = vrot.slane %v8236_v0, 1  ;;  %v5717_v22 = vrot.slane %v5374_v32, 2 }
 0x2aa   : > { %v4088_v26 = vadd.f32 %v3991_v37, %v11496_v24  ;;  %v4834_v48 = vpop.f32.mrf.mxu1  ;;  %v4089_v36 = vadd.f32 %v3993_v13, %v11497_v53 }
 0x2ab   : > { %v5384_v63 = vpop.f32.mrf.mxu0  ;;  %v5249_v58 = vadd.f32 %v5153_v4, %v11498_v35  ;;  %v5720_v0 = vsel %vm2112_vm2, %v5717_v22, %v5719_v49  ;;  %v5718_v35 = vsel %vm2112_vm2, %v5716_v28, %v5717_v22 }
 0x2ac   : > { %v8239_v21 = vpop.f32.mrf.mxu1  ;;  %v10845_v3 = vadd.f32 %v8228_v45, %v4088_v26  ;;  %v10847_v1 = vadd.f32 %v4710_v2, %v4089_v36 }
 0x2ad   : > { %v8343_v61 = vpop.f32.mrf.mxu0  ;;  %v5844_v13 = vadd.f32 %v5716_v28, %v5249_v58 }
 0x2ae   : > { %v4843_v33 = vpop.f32.mrf.mxu1  ;;  %v5724_v63 = vrot.slane %v8343_v61, 2  ;;  %v5721_v61 = vrot.slane %v10839_v44, 2 }
 0x2af   : > { %v5393_v47 = vpop.f32.mrf.mxu0  ;;  %v5154_v41 = vrot.slane %v4843_v33, 1  ;;  %v5941_v21 = vrot.slane %v5844_v13, 7 }
 0x2b0   : > { %v8242_v37 = vpop.f32.mrf.mxu1 }
 0x2b1   : > { %v10851_v24 = vpop.f32.mrf.mxu0  ;;  %v5155_v18 = vsel %vm1548_vm3, %v5153_v4, %v5154_v41  ;;  %v5251_v45 = vadd.f32 %v5154_v41, %v10579_v62  ;;  %v5156_v48 = vrot.slane %v8242_v37, 1  ;;  %v5722_v62 = vrot.slane %v5393_v47, 2 }
 0x2b2   : > { %v5250_v2 = vadd.f32 %v5155_v18, %v10577_v10  ;;  %v4852_v20 = vpop.f32.mrf.mxu1 }
 0x2b3   : > { %v5403_v26 = vpop.f32.mrf.mxu0  ;;  %v5846_v32 = vadd.f32 %v5720_v0, %v5251_v45  ;;  %v5252_v28 = vadd.f32 %v5156_v48, %v10585_v12  ;;  %v5725_v37 = vsel %vm2112_vm2, %v5722_v62, %v5724_v63 }
 0x2b4   : > { %v5845_v33 = vadd.f32 %v5718_v35, %v5250_v2  ;;  %v8245_v53 = vpop.f32.mrf.mxu1 }
 0x2b5   : > { %v8349_v36 = vpop.f32.mrf.mxu0  ;;  %v5944_v49 = vrot.slane %v5846_v32, 7 }
 0x2b6   : > { %v5942_v10 = vrot.slane %v5845_v33, 7  ;;  %v4861_v58 = vpop.f32.mrf.mxu1 }
 0x2b7   : > { %v10864_v4 = vpop.f32.mrf.mxu0  ;;  %v5157_v22 = vrot.slane %v4861_v58, 1  ;;  %v5723_v58 = vsel %vm2112_vm2, %v5721_v61, %v5722_v62 }
 0x2b8   : > { %v5943_v41 = vsel %vm5940_vm4, %v5941_v21, %v5942_v10  ;;  %v5945_v0 = vsel %vm5940_vm4, %v5942_v10, %v5944_v49  ;;  %v8248_v18 = vpop.f32.mrf.mxu1  ;;  %v5847_v49 = vadd.f32 %v5721_v61, %v5252_v28 }
 0x2b9   : > { %v10871_v45 = vpop.f32.mrf.mxu0  ;;  %6053 = vst.msk [vmem:[%s10862_s7] sm:$0xff] %vm411_vm0, %v5943_v41  ;;  %6054 = vst.msk [vmem:[%s10862_s7 + $0x8] sm:$0xff] %vm411_vm0, %v5945_v0  ;;  %v6085_v47 = vsel %vm411_vm0, %v5943_v41, 0.0  ;;  %v6086_v44 = vsel %vm411_vm0, %v5945_v0, 0.0  ;;  %v6155_v13 = vmul.f32 %v5943_v41, %v5943_v41  ;;  %v6156_v12 = vmul.f32 %v5945_v0, %v5945_v0 }
 0x2ba   : > { %v6087_v2 = vadd.f32 %v6086_v44, %v6085_v47  ;;  %v5158_v20 = vsel %vm1548_vm3, %v5156_v48, %v5157_v22  ;;  %v5254_v26 = vadd.f32 %v5157_v22, %v10609_v59  ;;  %v5159_v35 = vrot.slane %v8248_v18, 1  ;;  %v4870_v32 = vpop.f32.mrf.mxu1 }
 0x2bb   : > { %v5422_v33 = vpop.f32.mrf.mxu0  ;;  %v6187_v63 = vsel %vm411_vm0, %v6155_v13, 0.0  ;;  %v6188_v53 = vsel %vm411_vm0, %v6156_v12, 0.0  ;;  %v5253_v21 = vadd.f32 %v5158_v20, %v10607_v42  ;;  %v5729_v0 = vrot.slane %v8349_v36, 2 }
 0x2bc   : > { %v6189_v10 = vadd.f32 %v6188_v53, %v6187_v63  ;;  %v5849_v41 = vadd.f32 %v5725_v37, %v5254_v26  ;;  %v8251_v47 = vpop.f32.mrf.mxu1  ;;  %v5726_v59 = vrot.slane %v10851_v24, 2  ;;  %v5255_v18 = vadd.f32 %v5159_v35, %v10615_v9 }
 0x2bd   : > { %v8355_v44 = vpop.f32.mrf.mxu0  ;;  %v5848_v48 = vadd.f32 %v5723_v58, %v5253_v21  ;;  %v5727_v13 = vrot.slane %v10864_v4, 2  ;;  %v5946_v42 = vrot.slane %v5847_v49, 7 }
 0x2be   : > { %v5949_v22 = vrot.slane %v5849_v41, 7  ;;  %v4879_v28 = vpop.f32.mrf.mxu1  ;;  %v5850_v53 = vadd.f32 %v5726_v59, %v5255_v18 }
 0x2bf   : > { %v5431_v12 = vpop.f32.mrf.mxu0  ;;  %v5947_v20 = vrot.slane %v5848_v48, 7  ;;  %v5160_v32 = vrot.slane %v4879_v28, 1  ;;  %v5730_v62 = vsel %vm2112_vm2, %v5727_v13, %v5729_v0  ;;  %v5728_v48 = vsel %vm2112_vm2, %v5726_v59, %v5727_v13 }
 0x2c0   : > { %v8254_v36 = vpop.f32.mrf.mxu1 }
 0x2c1   : > { %v10889_v61 = vpop.f32.mrf.mxu0  ;;  %v5948_v37 = vsel %vm5940_vm4, %v5946_v42, %v5947_v20  ;;  %v5950_v24 = vsel %vm5940_vm4, %v5947_v20, %v5949_v22  ;;  %v5161_v26 = vsel %vm1548_vm3, %v5159_v35, %v5160_v32  ;;  %v5257_v9 = vadd.f32 %v5160_v32, %v10639_v17 }
 0x2c2   : > { %6055 = vst.msk [vmem:[%s10862_s7 + $0x10] sm:$0xff] %vm411_vm0, %v5948_v37  ;;  %6056 = vst.msk [vmem:[%s10862_s7 + $0x18] sm:$0xff] %vm411_vm0, %v5950_v24  ;;  %v6088_v4 = vsel %vm411_vm0, %v5948_v37, 0.0  ;;  %v6157_v33 = vmul.f32 %v5948_v37, %v5948_v37  ;;  %v6158_v63 = vmul.f32 %v5950_v24, %v5950_v24  ;;  %v4888_v49 = vpop.f32.mrf.mxu1  ;;  %v5256_v41 = vadd.f32 %v5161_v26, %v10637_v34 }
 0x2c3   : > { %v5441_v21 = vpop.f32.mrf.mxu0  ;;  %v6089_v58 = vadd.f32 %v6088_v4, %v6087_v2  ;;  %v5852_v0 = vadd.f32 %v5730_v62, %v5257_v9  ;;  %v5162_v47 = vrot.slane %v8254_v36, 1  ;;  %v6090_v35 = vsel %vm411_vm0, %v5950_v24, 0.0 }
 0x2c4   : > { %v6190_v17 = vsel %vm411_vm0, %v6157_v33, 0.0  ;;  %v5734_v22 = vrot.slane %v8355_v44, 2  ;;  %v8257_v28 = vpop.f32.mrf.mxu1  ;;  %v5851_v37 = vadd.f32 %v5728_v48, %v5256_v41  ;;  %v6192_v49 = vsel %vm411_vm0, %v6158_v63, 0.0 }
 0x2c5   : > { %v8361_v42 = vpop.f32.mrf.mxu0  ;;  %v6091_v20 = vadd.f32 %v6090_v35, %v6089_v58  ;;  %v6191_v32 = vadd.f32 %v6190_v17, %v6189_v10  ;;  %v5954_v18 = vrot.slane %v5852_v0, 7  ;;  %v5951_v2 = vrot.slane %v5850_v53, 7 }
 0x2c6   : > { %v5731_v34 = vrot.slane %v10871_v45, 2  ;;  %v5732_v62 = vrot.slane %v5431_v12, 2  ;;  %v4897_v36 = vpop.f32.mrf.mxu1  ;;  %v5952_v9 = vrot.slane %v5851_v37, 7  ;;  %v5258_v44 = vadd.f32 %v5162_v47, %v10645_v50 }
 0x2c7   : > { %v5450_v24 = vpop.f32.mrf.mxu0  ;;  %v6193_v26 = vadd.f32 %v6192_v49, %v6191_v32  ;;  %v5163_v59 = vrot.slane %v4897_v36, 1  ;;  %v5739_v32 = vrot.slane %v8361_v42, 2 }
 0x2c8   : > { %v5735_v13 = vsel %vm2112_vm2, %v5732_v62, %v5734_v22  ;;  %v8260_v10 = vpop.f32.mrf.mxu1  ;;  %v5953_v33 = vsel %vm5940_vm4, %v5951_v2, %v5952_v9  ;;  %v5955_v63 = vsel %vm5940_vm4, %v5952_v9, %v5954_v18  ;;  %v5733_v58 = vsel %vm2112_vm2, %v5731_v34, %v5732_v62 }
 0x2c9   : > { %v10908_v4 = vpop.f32.mrf.mxu0  ;;  %v5164_v45 = vsel %vm1548_vm3, %v5162_v47, %v5163_v59  ;;  %v5260_v12 = vadd.f32 %v5163_v59, %v10669_v30  ;;  %6057 = vst.msk [vmem:[%s10862_s7 + $0x20] sm:$0xff] %vm411_vm0, %v5953_v33  ;;  %6058 = vst.msk [vmem:[%s10862_s7 + $0x28] sm:$0xff] %vm411_vm0, %v5955_v63  ;;  %v6092_v50 = vsel %vm411_vm0, %v5953_v33, 0.0  ;;  %v6159_v53 = vmul.f32 %v5953_v33, %v5953_v33 }
 0x2ca   : > { %v6160_v21 = vmul.f32 %v5955_v63, %v5955_v63  ;;  %v4906_v41 = vpop.f32.mrf.mxu1  ;;  %v6093_v35 = vadd.f32 %v6092_v50, %v6091_v20  ;;  %v5853_v17 = vadd.f32 %v5731_v34, %v5258_v44  ;;  %v5259_v48 = vadd.f32 %v5164_v45, %v10667_v16 }
 0x2cb   : > { %v5460_v0 = vpop.f32.mrf.mxu0  ;;  %v5855_v22 = vadd.f32 %v5735_v13, %v5260_v12  ;;  %v6094_v47 = vsel %vm411_vm0, %v5955_v63, 0.0  ;;  %v6194_v30 = vsel %vm411_vm0, %v6159_v53, 0.0  ;;  %v5165_v28 = vrot.slane %v8260_v10, 1 }
 0x2cc   : > { %v8263_v37 = vpop.f32.mrf.mxu1  ;;  %v6095_v49 = vadd.f32 %v6094_v47, %v6093_v35  ;;  %v6195_v2 = vadd.f32 %v6194_v30, %v6193_v26  ;;  %v5854_v36 = vadd.f32 %v5733_v58, %v5259_v48  ;;  %v6196_v62 = vsel %vm411_vm0, %v6160_v21, 0.0 }
 0x2cd   : > { %v8367_v18 = vpop.f32.mrf.mxu0  ;;  %v5959_v9 = vrot.slane %v5855_v22, 7  ;;  %v5736_v20 = vrot.slane %v10889_v61, 2  ;;  %v5261_v16 = vadd.f32 %v5165_v28, %v10675_v8  ;;  %v5737_v34 = vrot.slane %v5450_v24, 2 }
 0x2ce   : > { %v4915_v44 = vpop.f32.mrf.mxu1  ;;  %v6197_v13 = vadd.f32 %v6196_v62, %v6195_v2  ;;  %v5956_v10 = vrot.slane %v5853_v17, 7  ;;  %v5957_v42 = vrot.slane %v5854_v36, 7 }
 0x2cf   : > { %v5469_v59 = vpop.f32.mrf.mxu0  ;;  %v5166_v33 = vrot.slane %v4915_v44, 1  ;;  %v5740_v63 = vsel %vm2112_vm2, %v5737_v34, %v5739_v32  ;;  %v5856_v58 = vadd.f32 %v5736_v20, %v5261_v16  ;;  %v5738_v17 = vsel %vm2112_vm2, %v5736_v20, %v5737_v34 }
 0x2d0   : > { %v8266_v26 = vpop.f32.mrf.mxu1  ;;  %v5958_v12 = vsel %vm5940_vm4, %v5956_v10, %v5957_v42  ;;  %v5960_v61 = vsel %vm5940_vm4, %v5957_v42, %v5959_v9  ;;  %v5741_v20 = vrot.slane %v10908_v4, 2 }
 0x2d1   : > { %v10927_v45 = vpop.f32.mrf.mxu0  ;;  %v5167_v50 = vsel %vm1548_vm3, %v5165_v28, %v5166_v33  ;;  %v5263_v8 = vadd.f32 %v5166_v33, %v10699_v60  ;;  %6059 = vst.msk [vmem:[%s10862_s7 + $0x30] sm:$0xff] %vm411_vm0, %v5958_v12  ;;  %6060 = vst.msk [vmem:[%s10862_s7 + $0x38] sm:$0xff] %vm411_vm0, %v5960_v61  ;;  %v6096_v24 = vsel %vm411_vm0, %v5958_v12, 0.0  ;;  %v6161_v53 = vmul.f32 %v5958_v12, %v5958_v12 }
 0x2d2   : > { %v6162_v21 = vmul.f32 %v5960_v61, %v5960_v61  ;;  %v4924_v41 = vpop.f32.mrf.mxu1  ;;  %v6097_v35 = vadd.f32 %v6096_v24, %v6095_v49  ;;  %v5262_v48 = vadd.f32 %v5167_v50, %v10697_v15  ;;  %v6098_v47 = vsel %vm411_vm0, %v5960_v61, 0.0 }
 0x2d3   : > { %v5479_v0 = vpop.f32.mrf.mxu0  ;;  %v5858_v22 = vadd.f32 %v5740_v63, %v5263_v8  ;;  %v6198_v60 = vsel %vm411_vm0, %v6161_v53, 0.0  ;;  %v5168_v30 = vrot.slane %v8266_v26, 1  ;;  %v5744_v28 = vrot.slane %v8367_v18, 2 }
 0x2d4   : > { %v8269_v32 = vpop.f32.mrf.mxu1  ;;  %v6099_v2 = vadd.f32 %v6098_v47, %v6097_v35  ;;  %v6199_v36 = vadd.f32 %v6198_v60, %v6197_v13  ;;  %v5857_v9 = vadd.f32 %v5738_v17, %v5262_v48  ;;  %v6200_v16 = vsel %vm411_vm0, %v6162_v21, 0.0 }
 0x2d5   : > { %v8373_v37 = vpop.f32.mrf.mxu0  ;;  %v5964_v62 = vrot.slane %v5858_v22, 7  ;;  %v5961_v49 = vrot.slane %v5856_v58, 7  ;;  %v5742_v15 = vrot.slane %v5469_v59, 2  ;;  %v5264_v18 = vadd.f32 %v5168_v30, %v10705_v25 }
 0x2d6   : > { %v4933_v34 = vpop.f32.mrf.mxu1  ;;  %v6201_v10 = vadd.f32 %v6200_v16, %v6199_v36  ;;  %v5962_v42 = vrot.slane %v5857_v9, 7  ;;  %v5749_v22 = vrot.slane %v8373_v37, 2 }
 0x2d7   : > { %v5488_v44 = vpop.f32.mrf.mxu0  ;;  %v5169_v33 = vrot.slane %v4933_v34, 1  ;;  %v5745_v63 = vsel %vm2112_vm2, %v5742_v15, %v5744_v28  ;;  %v5743_v24 = vsel %vm2112_vm2, %v5741_v20, %v5742_v15  ;;  %v5859_v41 = vadd.f32 %v5741_v20, %v5264_v18 }
 0x2d8   : > { %v8272_v13 = vpop.f32.mrf.mxu1  ;;  %v5963_v12 = vsel %vm5940_vm4, %v5961_v49, %v5962_v42  ;;  %v5965_v61 = vsel %vm5940_vm4, %v5962_v42, %v5964_v62  ;;  %v5747_v62 = vrot.slane %v5488_v44, 2 }
 0x2d9   : > { %v10946_v26 = vpop.f32.mrf.mxu0  ;;  %v5170_v4 = vsel %vm1548_vm3, %v5168_v30, %v5169_v33  ;;  %v5266_v59 = vadd.f32 %v5169_v33, %v10727_v43  ;;  %6061 = vst.msk [vmem:[%s10862_s7 + $0x40] sm:$0xff] %vm411_vm0, %v5963_v12  ;;  %6062 = vst.msk [vmem:[%s10862_s7 + $0x48] sm:$0xff] %vm411_vm0, %v5965_v61  ;;  %v6100_v25 = vsel %vm411_vm0, %v5963_v12, 0.0  ;;  %v6163_v50 = vmul.f32 %v5963_v12, %v5963_v12 }
 0x2da   : > { %v6164_v8 = vmul.f32 %v5965_v61, %v5965_v61  ;;  %v4942_v53 = vpop.f32.mrf.mxu1  ;;  %v6101_v58 = vadd.f32 %v6100_v25, %v6099_v2  ;;  %v5265_v0 = vadd.f32 %v5170_v4, %v10725_v46  ;;  %v6102_v17 = vsel %vm411_vm0, %v5965_v61, 0.0 }
 0x2db   : > { %v5498_v21 = vpop.f32.mrf.mxu0  ;;  %v5861_v35 = vadd.f32 %v5745_v63, %v5266_v59  ;;  %v6202_v43 = vsel %vm411_vm0, %v6163_v50, 0.0  ;;  %v5171_v48 = vrot.slane %v8272_v13, 1  ;;  %v5746_v2 = vrot.slane %v10927_v45, 2 }
 0x2dc   : > { %v8275_v47 = vpop.f32.mrf.mxu1  ;;  %v6103_v30 = vadd.f32 %v6102_v17, %v6101_v58  ;;  %v6203_v28 = vadd.f32 %v6202_v43, %v6201_v10  ;;  %v5860_v32 = vadd.f32 %v5743_v24, %v5265_v0  ;;  %v6204_v9 = vsel %vm411_vm0, %v6164_v8, 0.0 }
 0x2dd   : > { %v8379_v60 = vpop.f32.mrf.mxu0  ;;  %v5969_v36 = vrot.slane %v5861_v35, 7  ;;  %v5267_v46 = vadd.f32 %v5171_v48, %v10731_v19  ;;  %v5966_v15 = vrot.slane %v5859_v41, 7  ;;  %v5750_v42 = vsel %vm2112_vm2, %v5747_v62, %v5749_v22 }
 0x2de   : > { %v4951_v16 = vpop.f32.mrf.mxu1  ;;  %v6205_v20 = vadd.f32 %v6204_v9, %v6203_v28  ;;  %v5967_v37 = vrot.slane %v5860_v32, 7  ;;  %v5748_v50 = vsel %vm2112_vm2, %v5746_v2, %v5747_v62  ;;  %v5754_v58 = vrot.slane %v8379_v60, 2 }
 0x2df   : > { %v5507_v49 = vpop.f32.mrf.mxu0  ;;  %v5172_v34 = vrot.slane %v4951_v16, 1  ;;  %v5862_v61 = vadd.f32 %v5746_v2, %v5267_v46 }
 0x2e0   : > { %v8278_v10 = vpop.f32.mrf.mxu1  ;;  %v5968_v33 = vsel %vm5940_vm4, %v5966_v15, %v5967_v37  ;;  %v5970_v45 = vsel %vm5940_vm4, %v5967_v37, %v5969_v36 }
 0x2e1   : > { %v10965_v18 = vpop.f32.mrf.mxu0  ;;  %v5173_v63 = vsel %vm1548_vm3, %v5171_v48, %v5172_v34  ;;  %v5269_v19 = vadd.f32 %v5172_v34, %v10747_v23  ;;  %6063 = vst.msk [vmem:[%s10862_s7 + $0x50] sm:$0xff] %vm411_vm0, %v5968_v33  ;;  %6064 = vst.msk [vmem:[%s10862_s7 + $0x58] sm:$0xff] %vm411_vm0, %v5970_v45  ;;  %v6104_v44 = vsel %vm411_vm0, %v5968_v33, 0.0  ;;  %v6165_v13 = vmul.f32 %v5968_v33, %v5968_v33 }
 0x2e2   : > { %v6166_v12 = vmul.f32 %v5970_v45, %v5970_v45  ;;  %v4960_v4 = vpop.f32.mrf.mxu1  ;;  %v6105_v25 = vadd.f32 %v6104_v44, %v6103_v30  ;;  %v5268_v8 = vadd.f32 %v5173_v63, %v10745_v6  ;;  %v6106_v53 = vsel %vm411_vm0, %v5970_v45, 0.0 }
 0x2e3   : > { %v5517_v59 = vpop.f32.mrf.mxu0  ;;  %v5864_v24 = vadd.f32 %v5750_v42, %v5269_v19  ;;  %v6206_v23 = vsel %vm411_vm0, %v6165_v13, 0.0  ;;  %v5174_v21 = vrot.slane %v8278_v10, 1  ;;  %v5971_v47 = vrot.slane %v5862_v61, 7 }
 0x2e4   : > { %v8281_v41 = vpop.f32.mrf.mxu1  ;;  %v6107_v35 = vadd.f32 %v6106_v53, %v6105_v25  ;;  %v6207_v17 = vadd.f32 %v6206_v23, %v6205_v20  ;;  %v5863_v43 = vadd.f32 %v5748_v50, %v5268_v8  ;;  %v6208_v22 = vsel %vm411_vm0, %v6166_v12, 0.0 }
 0x2e5   : > { %v8385_v0 = vpop.f32.mrf.mxu0  ;;  %v5974_v48 = vrot.slane %v5864_v24, 7  ;;  %v5751_v30 = vrot.slane %v10946_v26, 2  ;;  %v5752_v6 = vrot.slane %v5507_v49, 2  ;;  %v5270_v60 = vadd.f32 %v5174_v21, %v10749_v56 }
 0x2e6   : > { %v4969_v28 = vpop.f32.mrf.mxu1  ;;  %v6209_v36 = vadd.f32 %v6208_v22, %v6207_v17  ;;  %v5972_v9 = vrot.slane %v5863_v43, 7  ;;  %v5759_v61 = vrot.slane %v8385_v0, 2  ;;  %v5756_v23 = vrot.slane %v10965_v18, 2 }
 0x2e7   : > { %v5526_v32 = vpop.f32.mrf.mxu0  ;;  %v5175_v2 = vrot.slane %v4969_v28, 1  ;;  %v5755_v46 = vsel %vm2112_vm2, %v5752_v6, %v5754_v58  ;;  %v5753_v42 = vsel %vm2112_vm2, %v5751_v30, %v5752_v6  ;;  %v5865_v63 = vadd.f32 %v5751_v30, %v5270_v60 }
 0x2e8   : > { %v8284_v62 = vpop.f32.mrf.mxu1  ;;  %v5973_v20 = vsel %vm5940_vm4, %v5971_v47, %v5972_v9  ;;  %v5975_v15 = vsel %vm5940_vm4, %v5972_v9, %v5974_v48 }
 0x2e9   : > { %v10984_v16 = vpop.f32.mrf.mxu0  ;;  %v5176_v26 = vsel %vm1548_vm3, %v5174_v21, %v5175_v2  ;;  %v5272_v49 = vadd.f32 %v5175_v2, %v10758_v55  ;;  %6065 = vst.msk [vmem:[%s10862_s7 + $0x60] sm:$0xff] %vm411_vm0, %v5973_v20  ;;  %6066 = vst.msk [vmem:[%s10862_s7 + $0x68] sm:$0xff] %vm411_vm0, %v5975_v15  ;;  %v6108_v56 = vsel %vm411_vm0, %v5973_v20, 0.0  ;;  %v6167_v37 = vmul.f32 %v5973_v20, %v5973_v20 }
 0x2ea   : > { %v6168_v34 = vmul.f32 %v5975_v15, %v5975_v15  ;;  %v4978_v10 = vpop.f32.mrf.mxu1  ;;  %v6109_v45 = vadd.f32 %v6108_v56, %v6107_v35  ;;  %v5271_v19 = vadd.f32 %v5176_v26, %v10756_v54  ;;  %v6110_v13 = vsel %vm411_vm0, %v5975_v15, 0.0 }
 0x2eb   : > { %v5536_v33 = vpop.f32.mrf.mxu0  ;;  %v5867_v44 = vadd.f32 %v5755_v46, %v5272_v49  ;;  %v6210_v55 = vsel %vm411_vm0, %v6167_v37, 0.0  ;;  %v5177_v12 = vrot.slane %v8284_v62, 1  ;;  %v5757_v21 = vrot.slane %v5526_v32, 2 }
 0x2ec   : > { %v8287_v4 = vpop.f32.mrf.mxu1  ;;  %v6111_v25 = vadd.f32 %v6110_v13, %v6109_v45  ;;  %v6211_v50 = vadd.f32 %v6210_v55, %v6209_v36  ;;  %v5866_v8 = vadd.f32 %v5753_v42, %v5271_v19  ;;  %v6212_v53 = vsel %vm411_vm0, %v6168_v34, 0.0 }
 0x2ed   : > { %v8391_v59 = vpop.f32.mrf.mxu0  ;;  %v5979_v24 = vrot.slane %v5867_v44, 7  ;;  %v5273_v54 = vadd.f32 %v5177_v12, %v10760_v38  ;;  %v5976_v17 = vrot.slane %v5865_v63, 7  ;;  %v5760_v48 = vsel %vm2112_vm2, %v5757_v21, %v5759_v61 }
 0x2ee   : > { %v4987_v58 = vpop.f32.mrf.mxu1  ;;  %v6213_v35 = vadd.f32 %v6212_v53, %v6211_v50  ;;  %v5977_v0 = vrot.slane %v5866_v8, 7  ;;  %v5758_v62 = vsel %vm2112_vm2, %v5756_v23, %v5757_v21  ;;  %v5764_v56 = vrot.slane %v8391_v59, 2 }
 0x2ef   : > { %v5545_v41 = vpop.f32.mrf.mxu0  ;;  %v5178_v43 = vrot.slane %v4987_v58, 1  ;;  %v5868_v9 = vadd.f32 %v5756_v23, %v5273_v54  ;;  %v5761_v44 = vrot.slane %v10984_v16, 2 }
 0x2f0   : > { %v8290_v22 = vpop.f32.mrf.mxu1  ;;  %v5978_v30 = vsel %vm5940_vm4, %v5976_v17, %v5977_v0  ;;  %v5980_v18 = vsel %vm5940_vm4, %v5977_v0, %v5979_v24 }
 0x2f1   : > { %v11003_v47 = vpop.f32.mrf.mxu0  ;;  %v5179_v6 = vsel %vm1548_vm3, %v5177_v12, %v5178_v43  ;;  %v5275_v38 = vadd.f32 %v5178_v43, %v10769_v11  ;;  %6067 = vst.msk [vmem:[%s10862_s7 + $0x70] sm:$0xff] %vm411_vm0, %v5978_v30  ;;  %6068 = vst.msk [vmem:[%s10862_s7 + $0x78] sm:$0xff] %vm411_vm0, %v5980_v18  ;;  %v6112_v28 = vsel %vm411_vm0, %v5978_v30, 0.0  ;;  %v6169_v32 = vmul.f32 %v5978_v30, %v5978_v30 }
 0x2f2   : > { %v6170_v36 = vmul.f32 %v5980_v18, %v5980_v18  ;;  %v4996_v60 = vpop.f32.mrf.mxu1  ;;  %v6113_v46 = vadd.f32 %v6112_v28, %v6111_v25  ;;  %v5274_v20 = vadd.f32 %v5179_v6, %v10767_v14  ;;  %v6114_v26 = vsel %vm411_vm0, %v5980_v18, 0.0 }
 0x2f3   : > { %v5555_v2 = vpop.f32.mrf.mxu0  ;;  %v5870_v15 = vadd.f32 %v5760_v48, %v5275_v38  ;;  %v6214_v11 = vsel %vm411_vm0, %v6169_v32, 0.0  ;;  %v5180_v49 = vrot.slane %v8290_v22, 1  ;;  %v5981_v19 = vrot.slane %v5868_v9, 7 }
 0x2f4   : > { %v8293_v37 = vpop.f32.mrf.mxu1  ;;  %v6115_v42 = vadd.f32 %v6114_v26, %v6113_v46  ;;  %v6215_v10 = vadd.f32 %v6214_v11, %v6213_v35  ;;  %v5869_v33 = vadd.f32 %v5758_v62, %v5274_v20  ;;  %v6216_v63 = vsel %vm411_vm0, %v6170_v36, 0.0 }
 0x2f5   : > { %v8397_v34 = vpop.f32.mrf.mxu0  ;;  %v5984_v45 = vrot.slane %v5870_v15, 7  ;;  %v5762_v14 = vrot.slane %v5545_v41, 2  ;;  %v5276_v4 = vadd.f32 %v5180_v49, %v10771_v5  ;;  %v5766_v2 = vrot.slane %v11003_v47, 2 }
 0x2f6   : > { %v5005_v13 = vpop.f32.mrf.mxu1  ;;  %v6217_v12 = vadd.f32 %v6216_v63, %v6215_v10  ;;  %v5982_v61 = vrot.slane %v5869_v33, 7  ;;  %v5769_v18 = vrot.slane %v8397_v34, 2 }
 0x2f7   : > { %v5564_v55 = vpop.f32.mrf.mxu0  ;;  %v5181_v59 = vrot.slane %v5005_v13, 1  ;;  %v5765_v25 = vsel %vm2112_vm2, %v5762_v14, %v5764_v56  ;;  %v5763_v58 = vsel %vm2112_vm2, %v5761_v44, %v5762_v14  ;;  %v5871_v0 = vadd.f32 %v5761_v44, %v5276_v4 }
 0x2f8   : > { %v8296_v50 = vpop.f32.mrf.mxu1  ;;  %v5983_v24 = vsel %vm5940_vm4, %v5981_v19, %v5982_v61  ;;  %v5985_v53 = vsel %vm5940_vm4, %v5982_v61, %v5984_v45  ;;  %v5767_v46 = vrot.slane %v5564_v55, 2 }
 0x2f9   : > { %v11022_v8 = vpop.f32.mrf.mxu0  ;;  %v5182_v16 = vsel %vm1548_vm3, %v5180_v49, %v5181_v59  ;;  %v5278_v23 = vadd.f32 %v5181_v59, %v10780_v51  ;;  %6069 = vst.msk [vmem:[%s10862_s7 + $0x80] sm:$0xff] %vm411_vm0, %v5983_v24  ;;  %6070 = vst.msk [vmem:[%s10862_s7 + $0x88] sm:$0xff] %vm411_vm0, %v5985_v53  ;;  %v6116_v5 = vsel %vm411_vm0, %v5983_v24, 0.0  ;;  %v6171_v54 = vmul.f32 %v5983_v24, %v5983_v24 }
 0x2fa   : > { %v6172_v21 = vmul.f32 %v5985_v53, %v5985_v53  ;;  %v5014_v41 = vpop.f32.mrf.mxu1  ;;  %v6117_v17 = vadd.f32 %v6116_v5, %v6115_v42  ;;  %v5277_v43 = vadd.f32 %v5182_v16, %v10778_v27  ;;  %v6118_v22 = vsel %vm411_vm0, %v5985_v53, 0.0 }
 0x2fb   : > { %v5574_v35 = vpop.f32.mrf.mxu0  ;;  %v5873_v48 = vadd.f32 %v5765_v25, %v5278_v23  ;;  %v6218_v51 = vsel %vm411_vm0, %v6171_v54, 0.0  ;;  %v5183_v30 = vrot.slane %v8296_v50, 1  ;;  %v5986_v26 = vrot.slane %v5871_v0, 7 }
 0x2fc   : > { %v8299_v6 = vpop.f32.mrf.mxu1  ;;  %v6119_v28 = vadd.f32 %v6118_v22, %v6117_v17  ;;  %v6219_v32 = vadd.f32 %v6218_v51, %v6217_v12  ;;  %v5872_v36 = vadd.f32 %v5763_v58, %v5277_v43  ;;  %v6220_v60 = vsel %vm411_vm0, %v6172_v21, 0.0  ;;  %v11499_v43 = vld [vmem:[#allocation44_spill] sm:$0xff] }
 0x2fd   : > { %v8403_v38 = vpop.f32.mrf.mxu0  ;;  %v5989_v9 = vrot.slane %v5873_v48, 7  ;;  %v5279_v27 = vadd.f32 %v5183_v30, %v10782_v57  ;;  %v5770_v56 = vsel %vm2112_vm2, %v5767_v46, %v5769_v18  ;;  %v5768_v55 = vsel %vm2112_vm2, %v5766_v2, %v5767_v46 }
 0x2fe   : > { %v5023_v62 = vpop.f32.mrf.mxu1  ;;  %v6221_v15 = vadd.f32 %v6220_v60, %v6219_v32  ;;  %v5987_v11 = vrot.slane %v5872_v36, 7  ;;  %v5774_v25 = vrot.slane %v8403_v38, 2  ;;  %v5771_v58 = vrot.slane %v11022_v8, 2 }
 0x2ff   : > { %v5583_v20 = vpop.f32.mrf.mxu0  ;;  %v5184_v49 = vrot.slane %v5023_v62, 1  ;;  %v5874_v19 = vadd.f32 %v5766_v2, %v5279_v27 }
 0x300   : > { %v8302_v37 = vpop.f32.mrf.mxu1  ;;  %v5988_v42 = vsel %vm5940_vm4, %v5986_v26, %v5987_v11  ;;  %v5990_v47 = vsel %vm5940_vm4, %v5987_v11, %v5989_v9 }
 0x301   : > { %v11041_v34 = vpop.f32.mrf.mxu0  ;;  %v5185_v10 = vsel %vm1548_vm3, %v5183_v30, %v5184_v49  ;;  %v5281_v57 = vadd.f32 %v5184_v49, %v10791_v39  ;;  %6071 = vst.msk [vmem:[%s10862_s7 + $0x90] sm:$0xff] %vm411_vm0, %v5988_v42  ;;  %6072 = vst.msk [vmem:[%s10862_s7 + $0x98] sm:$0xff] %vm411_vm0, %v5990_v47  ;;  %v6120_v33 = vsel %vm411_vm0, %v5988_v42, 0.0  ;;  %v6173_v45 = vmul.f32 %v5988_v42, %v5988_v42 }
 0x302   : > { %v6174_v63 = vmul.f32 %v5990_v47, %v5990_v47  ;;  %v5032_v44 = vpop.f32.mrf.mxu1  ;;  %v6121_v13 = vadd.f32 %v6120_v33, %v6119_v28  ;;  %v5280_v12 = vadd.f32 %v5185_v10, %v10789_v31  ;;  %v6122_v4 = vsel %vm411_vm0, %v5990_v47, 0.0  ;;  %v11500_v28 = vld [vmem:[#allocation43_spill] sm:$0xff] }
 0x303   : > { %v5593_v14 = vpop.f32.mrf.mxu0  ;;  %v5876_v61 = vadd.f32 %v5770_v56, %v5281_v57  ;;  %v6222_v39 = vsel %vm411_vm0, %v6173_v45, 0.0  ;;  %v5186_v59 = vrot.slane %v8302_v37, 1  ;;  %v5991_v21 = vrot.slane %v5874_v19, 7 }
 0x304   : > { %v8305_v50 = vpop.f32.mrf.mxu1  ;;  %v6123_v53 = vadd.f32 %v6122_v4, %v6121_v13  ;;  %v6223_v16 = vadd.f32 %v6222_v39, %v6221_v15  ;;  %v5875_v23 = vadd.f32 %v5768_v55, %v5280_v12  ;;  %v6224_v54 = vsel %vm411_vm0, %v6174_v63, 0.0  ;;  %v11501_v15 = vld [vmem:[#allocation12_spill] sm:$0xff]  ;;  %v11502_v14 = vld [vmem:[#allocation13_spill] sm:$0xff] }
 0x305   : > { %v8409_v24 = vpop.f32.mrf.mxu0  ;;  %v5994_v5 = vrot.slane %v5876_v61, 7  ;;  %v5772_v31 = vrot.slane %v5583_v20, 2  ;;  %v5282_v48 = vadd.f32 %v5186_v59, %v11499_v43  ;;  %v5776_v44 = vrot.slane %v11041_v34, 2 }
 0x306   : > { %v5041_v41 = vpop.f32.mrf.mxu1  ;;  %v6225_v17 = vadd.f32 %v6224_v54, %v6223_v16  ;;  %v5992_v0 = vrot.slane %v5875_v23, 7  ;;  %v5779_v42 = vrot.slane %v8409_v24, 2 }
 0x307   : > { %v5602_v35 = vpop.f32.mrf.mxu0  ;;  %v5187_v22 = vrot.slane %v5041_v41, 1  ;;  %v5775_v51 = vsel %vm2112_vm2, %v5772_v31, %v5774_v25  ;;  %v5773_v2 = vsel %vm2112_vm2, %v5771_v58, %v5772_v31  ;;  %v5877_v20 = vadd.f32 %v5771_v58, %v5282_v48 }
 0x308   : > { %v8308_v30 = vpop.f32.mrf.mxu1  ;;  %v5993_v6 = vsel %vm5940_vm4, %v5991_v21, %v5992_v0  ;;  %v5995_v38 = vsel %vm5940_vm4, %v5992_v0, %v5994_v5  ;;  %v5777_v55 = vrot.slane %v5602_v35, 2 }
 0x309   : > { %v11060_v18 = vpop.f32.mrf.mxu0  ;;  %v5188_v8 = vsel %vm1548_vm3, %v5186_v59, %v5187_v22  ;;  %v5284_v32 = vadd.f32 %v5187_v22, %v11500_v28  ;;  %6073 = vst.msk [vmem:[%s10862_s7 + $0xa0] sm:$0xff] %vm411_vm0, %v5993_v6  ;;  %6074 = vst.msk [vmem:[%s10862_s7 + $0xa8] sm:$0xff] %vm411_vm0, %v5995_v38  ;;  %v6124_v36 = vsel %vm411_vm0, %v5993_v6, 0.0  ;;  %v6175_v9 = vmul.f32 %v5993_v6, %v5993_v6 }
 0x30a   : > { %v6176_v60 = vmul.f32 %v5995_v38, %v5995_v38  ;;  %v5050_v27 = vpop.f32.mrf.mxu1  ;;  %v6125_v62 = vadd.f32 %v6124_v36, %v6123_v53  ;;  %v5283_v26 = vadd.f32 %v5188_v8, %v11501_v15  ;;  %v6126_v49 = vsel %vm411_vm0, %v5995_v38, 0.0  ;;  %v11503_v15 = vld [vmem:[#allocation14_spill] sm:$0xff] }
 0x30b   : > { %v5612_v46 = vpop.f32.mrf.mxu0  ;;  %v5879_v11 = vadd.f32 %v5775_v51, %v5284_v32  ;;  %v6226_v56 = vsel %vm411_vm0, %v6175_v9, 0.0  ;;  %v5189_v37 = vrot.slane %v8308_v30, 1  ;;  %v5996_v39 = vrot.slane %v5877_v20, 7 }
 0x30c   : > { %v8311_v47 = vpop.f32.mrf.mxu1  ;;  %v6127_v57 = vadd.f32 %v6126_v49, %v6125_v62  ;;  %v6227_v33 = vadd.f32 %v6226_v56, %v6225_v17  ;;  %v5878_v45 = vadd.f32 %v5773_v2, %v5283_v26  ;;  %v6228_v19 = vsel %vm411_vm0, %v6176_v60, 0.0 }
 0x30d   : > { %v8415_v10 = vpop.f32.mrf.mxu0  ;;  %v5999_v63 = vrot.slane %v5879_v11, 7  ;;  %v5285_v13 = vadd.f32 %v5189_v37, %v11502_v14  ;;  %v5780_v50 = vsel %vm2112_vm2, %v5777_v55, %v5779_v42  ;;  %v5778_v0 = vsel %vm2112_vm2, %v5776_v44, %v5777_v55 }
 0x30e   : > { %v5059_v12 = vpop.f32.mrf.mxu1  ;;  %v6229_v4 = vadd.f32 %v6228_v19, %v6227_v33  ;;  %v5997_v59 = vrot.slane %v5878_v45, 7  ;;  %v5784_v30 = vrot.slane %v8415_v10, 2  ;;  %v5781_v2 = vrot.slane %v11060_v18, 2 }
 0x30f   : > { %v5621_v61 = vpop.f32.mrf.mxu0  ;;  %v5190_v25 = vrot.slane %v5059_v12, 1  ;;  %v5880_v31 = vadd.f32 %v5776_v44, %v5285_v13 }
 0x310   : > { %v8314_v24 = vpop.f32.mrf.mxu1  ;;  %v5998_v16 = vsel %vm5940_vm4, %v5996_v39, %v5997_v59  ;;  %v6000_v34 = vsel %vm5940_vm4, %v5997_v59, %v5999_v63 }
 0x311   : > { %v11079_v53 = vpop.f32.mrf.mxu0  ;;  %v5191_v23 = vsel %vm1548_vm3, %v5189_v37, %v5190_v25  ;;  %v5287_v5 = vadd.f32 %v5190_v25, %v10813_v29  ;;  %6075 = vst.msk [vmem:[%s10862_s7 + $0xb0] sm:$0xff] %vm411_vm0, %v5998_v16  ;;  %6076 = vst.msk [vmem:[%s10862_s7 + $0xb8] sm:$0xff] %vm411_vm0, %v6000_v34  ;;  %v6128_v54 = vsel %vm411_vm0, %v5998_v16, 0.0  ;;  %v6177_v21 = vmul.f32 %v5998_v16, %v5998_v16 }
 0x312   : > { %v6178_v58 = vmul.f32 %v6000_v34, %v6000_v34  ;;  %v5068_v41 = vpop.f32.mrf.mxu1  ;;  %v6129_v17 = vadd.f32 %v6128_v54, %v6127_v57  ;;  %v5286_v43 = vadd.f32 %v5191_v23, %v10811_v7  ;;  %v6130_v22 = vsel %vm411_vm0, %v6000_v34, 0.0 }
 0x313   : > { %v5631_v35 = vpop.f32.mrf.mxu0  ;;  %v5882_v48 = vadd.f32 %v5780_v50, %v5287_v5  ;;  %v6230_v29 = vsel %vm411_vm0, %v6177_v21, 0.0  ;;  %v5192_v51 = vrot.slane %v8314_v24, 1  ;;  %v6001_v60 = vrot.slane %v5880_v31, 7  ;;  %v11504_v5 = vld [vmem:[#allocation18_spill] sm:$0xff] }
 0x314   : > { %v8317_v6 = vpop.f32.mrf.mxu1  ;;  %v6131_v8 = vadd.f32 %v6130_v22, %v6129_v17  ;;  %v6231_v28 = vadd.f32 %v6230_v29, %v6229_v4  ;;  %v5881_v32 = vadd.f32 %v5778_v0, %v5286_v43  ;;  %v6232_v9 = vsel %vm411_vm0, %v6178_v58, 0.0 }
 0x315   : > { %v8421_v38 = vpop.f32.mrf.mxu0  ;;  %v6004_v36 = vrot.slane %v5882_v48, 7  ;;  %v5782_v7 = vrot.slane %v5621_v61, 2  ;;  %v5288_v26 = vadd.f32 %v5192_v51, %v11503_v15  ;;  %v5786_v23 = vrot.slane %v11079_v53, 2  ;;  %v11505_v53 = vld [vmem:[#allocation21_spill] sm:$0xff] }
 0x316   : > { %v5077_v27 = vpop.f32.mrf.mxu1  ;;  %v6233_v62 = vadd.f32 %v6232_v9, %v6231_v28  ;;  %v6002_v20 = vrot.slane %v5881_v32, 7  ;;  %v5789_v39 = vrot.slane %v8421_v38, 2  ;;  %v11506_v9 = vld [vmem:[#allocation45_spill] sm:$0xff] }
 0x317   : > { %v5640_v46 = vpop.f32.mrf.mxu0  ;;  %v5193_v11 = vrot.slane %v5077_v27, 1  ;;  %v5785_v49 = vsel %vm2112_vm2, %v5782_v7, %v5784_v30  ;;  %v5783_v63 = vsel %vm2112_vm2, %v5781_v2, %v5782_v7  ;;  %v5883_v13 = vadd.f32 %v5781_v2, %v5288_v26 }
 0x318   : > { %v8320_v56 = vpop.f32.mrf.mxu1  ;;  %v6003_v42 = vsel %vm5940_vm4, %v6001_v60, %v6002_v20  ;;  %v6005_v47 = vsel %vm5940_vm4, %v6002_v20, %v6004_v36  ;;  %v5787_v54 = vrot.slane %v5640_v46, 2 }
 0x319   : > { %v11098_v37 = vpop.f32.mrf.mxu0  ;;  %v5194_v18 = vsel %vm1548_vm3, %v5192_v51, %v5193_v11  ;;  %v5290_v10 = vadd.f32 %v5193_v11, %v10824_v52  ;;  %6077 = vst.msk [vmem:[%s10862_s7 + $0xc0] sm:$0xff] %vm411_vm0, %v6003_v42  ;;  %6078 = vst.msk [vmem:[%s10862_s7 + $0xc8] sm:$0xff] %vm411_vm0, %v6005_v47  ;;  %v6132_v57 = vsel %vm411_vm0, %v6003_v42, 0.0  ;;  %v6179_v33 = vmul.f32 %v6003_v42, %v6003_v42 }
 0x31a   : > { %v6180_v45 = vmul.f32 %v6005_v47, %v6005_v47  ;;  %v5086_v19 = vpop.f32.mrf.mxu1  ;;  %v6133_v14 = vadd.f32 %v6132_v57, %v6131_v8  ;;  %v5289_v55 = vadd.f32 %v5194_v18, %v10822_v40  ;;  %v6134_v61 = vsel %vm411_vm0, %v6005_v47, 0.0 }
 0x31b   : > { %v5650_v44 = vpop.f32.mrf.mxu0  ;;  %v5885_v12 = vadd.f32 %v5785_v49, %v5290_v10  ;;  %v6234_v52 = vsel %vm411_vm0, %v6179_v33, 0.0  ;;  %v5195_v4 = vrot.slane %v8320_v56, 1  ;;  %v6006_v31 = vrot.slane %v5883_v13, 7 }
 0x31c   : > { %v8323_v59 = vpop.f32.mrf.mxu1  ;;  %v6135_v25 = vadd.f32 %v6134_v61, %v6133_v14  ;;  %v6235_v50 = vadd.f32 %v6234_v52, %v6233_v62  ;;  %v5884_v24 = vadd.f32 %v5783_v63, %v5289_v55  ;;  %v6236_v34 = vsel %vm411_vm0, %v6180_v45, 0.0  ;;  %v11507_v63 = vld [vmem:[#allocation15_spill] sm:$0xff] }
 0x31d   : > { %v6009_v16 = vrot.slane %v5885_v12, 7  ;;  %v5291_v40 = vadd.f32 %v5195_v4, %v11504_v5  ;;  %v8427_v17 = vpop.f32.mrf.mxu0  ;;  %v5790_v0 = vsel %vm2112_vm2, %v5787_v54, %v5789_v39  ;;  %v5788_v36 = vsel %vm2112_vm2, %v5786_v23, %v5787_v54 }
 0x31e   : > { %v5095_v21 = vpop.f32.mrf.mxu1  ;;  %v6237_v58 = vadd.f32 %v6236_v34, %v6235_v50  ;;  %v6007_v41 = vrot.slane %v5884_v24, 7  ;;  %v5794_v20 = vrot.slane %v8427_v17, 2  ;;  %v5791_v18 = vrot.slane %v11098_v37, 2 }
 0x31f   : > { %v5196_v35 = vrot.slane %v5095_v21, 1  ;;  %v5886_v8 = vadd.f32 %v5786_v23, %v5291_v40  ;;  %v5659_v7 = vpop.f32.mrf.mxu0 }
 0x320   : > { %v8326_v43 = vpop.f32.mrf.mxu1  ;;  %v6008_v48 = vsel %vm5940_vm4, %v6006_v31, %v6007_v41  ;;  %v6010_v22 = vsel %vm5940_vm4, %v6007_v41, %v6009_v16  ;;  %v5792_v10 = vrot.slane %v5659_v7, 2 }
 0x321   : > { %v5197_v29 = vsel %vm1548_vm3, %v5195_v4, %v5196_v35  ;;  %v5293_v51 = vadd.f32 %v5196_v35, %v11505_v53  ;;  %6079 = vst.msk [vmem:[%s10862_s7 + $0xd0] sm:$0xff] %vm411_vm0, %v6008_v48  ;;  %6080 = vst.msk [vmem:[%s10862_s7 + $0xd8] sm:$0xff] %vm411_vm0, %v6010_v22  ;;  %v6136_v30 = vsel %vm411_vm0, %v6008_v48, 0.0  ;;  %v6181_v6 = vmul.f32 %v6008_v48, %v6008_v48 }
 0x322   : > { %v6182_v38 = vmul.f32 %v6010_v22, %v6010_v22  ;;  %v5104_v28 = vpop.f32.mrf.mxu1  ;;  %v6137_v32 = vadd.f32 %v6136_v30, %v6135_v25  ;;  %v5292_v60 = vadd.f32 %v5197_v29, %v11506_v9  ;;  %v6138_v27 = vsel %vm411_vm0, %v6010_v22, 0.0 }
 0x323   : > { %v5888_v2 = vadd.f32 %v5790_v0, %v5293_v51  ;;  %v6238_v46 = vsel %vm411_vm0, %v6181_v6, 0.0  ;;  %v5198_v62 = vrot.slane %v8326_v43, 1  ;;  %v6011_v47 = vrot.slane %v5886_v8, 7 }
 0x324   : > { %v8329_v15 = vpop.f32.mrf.mxu1  ;;  %v6139_v26 = vadd.f32 %v6138_v27, %v6137_v32  ;;  %v6239_v11 = vadd.f32 %v6238_v46, %v6237_v58  ;;  %v5887_v49 = vadd.f32 %v5788_v36, %v5292_v60  ;;  %v6240_v42 = vsel %vm411_vm0, %v6182_v38, 0.0 }
 0x325   : > { %v6014_v56 = vrot.slane %v5888_v2, 7  ;;  %v5294_v19 = vadd.f32 %v5198_v62, %v11507_v63  ;;  %v5795_v14 = vsel %vm2112_vm2, %v5792_v10, %v5794_v20 }
 0x326   : > { %v5113_v57 = vpop.f32.mrf.mxu1  ;;  %v6241_v33 = vadd.f32 %v6240_v42, %v6239_v11  ;;  %v6012_v45 = vrot.slane %v5887_v49, 7 }
 0x327   : > { %v5199_v44 = vrot.slane %v5113_v57, 1  ;;  %v5889_v59 = vadd.f32 %v5791_v18, %v5294_v19 }
 0x328   : > { %v6013_v13 = vsel %vm5940_vm4, %v6011_v47, %v6012_v45  ;;  %v6015_v55 = vsel %vm5940_vm4, %v6012_v45, %v6014_v56 }
 0x329   : > { %v5200_v12 = vsel %vm1548_vm3, %v5198_v62, %v5199_v44  ;;  %v5296_v61 = vadd.f32 %v5199_v44, %v10847_v1  ;;  %6081 = vst.msk [vmem:[%s10862_s7 + $0xe0] sm:$0xff] %vm411_vm0, %v6013_v13  ;;  %6082 = vst.msk [vmem:[%s10862_s7 + $0xe8] sm:$0xff] %vm411_vm0, %v6015_v55  ;;  %v6140_v37 = vsel %vm411_vm0, %v6013_v13, 0.0  ;;  %v6183_v52 = vmul.f32 %v6013_v13, %v6013_v13 }
 0x32a   : > { %v6184_v4 = vmul.f32 %v6015_v55, %v6015_v55  ;;  %v6141_v39 = vadd.f32 %v6140_v37, %v6139_v26  ;;  %v5295_v25 = vadd.f32 %v5200_v12, %v10845_v3  ;;  %v6142_v24 = vsel %vm411_vm0, %v6015_v55, 0.0 }
 0x32b   : > { %v5891_v50 = vadd.f32 %v5795_v14, %v5296_v61  ;;  %v6242_v16 = vsel %vm411_vm0, %v6183_v52, 0.0  ;;  %v5793_v1 = vsel %vm2112_vm2, %v5791_v18, %v5792_v10  ;;  %v6016_v58 = vrot.slane %v5889_v59, 7 }
 0x32c   : > { %v6143_v34 = vadd.f32 %v6142_v24, %v6141_v39  ;;  %v6243_v23 = vadd.f32 %v6242_v16, %v6241_v33  ;;  %v5890_v5 = vadd.f32 %v5793_v1, %v5295_v25  ;;  %v6244_v54 = vsel %vm411_vm0, %v6184_v4, 0.0 }
 0x32d   : > { %v6019_v40 = vrot.slane %v5891_v50, 7 }
 0x32e   : > { %v6245_v21 = vadd.f32 %v6244_v54, %v6243_v23  ;;  %v6017_v31 = vrot.slane %v5890_v5, 7 }
 0x330   : > { %v6018_v41 = vsel %vm5940_vm4, %v6016_v58, %v6017_v31  ;;  %v6020_v3 = vsel %vm5940_vm4, %v6017_v31, %v6019_v40 }
 0x331   : > { %6083 = vst.msk [vmem:[%s10862_s7 + $0xf0] sm:$0xff] %vm411_vm0, %v6018_v41  ;;  %6084 = vst.msk [vmem:[%s10862_s7 + $0xf8] sm:$0xff] %vm411_vm0, %v6020_v3  ;;  %v6144_v35 = vsel %vm411_vm0, %v6018_v41, 0.0  ;;  %v6185_v17 = vmul.f32 %v6018_v41, %v6018_v41  ;;  %v6186_v0 = vmul.f32 %v6020_v3, %v6020_v3  ;;  %v6146_v48 = vsel %vm411_vm0, %v6020_v3, 0.0 }
 0x332   : > { %v6145_v43 = vadd.f32 %v6144_v35, %v6143_v34 }
 0x333   : > { %v6246_v22 = vsel %vm411_vm0, %v6185_v17, 0.0  ;;  %v6248_v51 = vsel %vm411_vm0, %v6186_v0, 0.0 }
 0x334   : > { %v6147_v29 = vadd.f32 %v6146_v48, %v6145_v43  ;;  %v6247_v53 = vadd.f32 %v6246_v22, %v6245_v21 }
 0x336   : > { %v6148_v30 = vrot.slane %v6147_v29, 4  ;;  %v6249_v6 = vadd.f32 %v6248_v51, %v6247_v53 }
 0x338   : > { %v6149_v38 = vadd.f32 %v6148_v30, %v6147_v29  ;;  %v6250_v8 = vrot.slane %v6249_v6, 4 }
 0x33a   : > { %v6150_v28 = vrot.slane %v6149_v38, 2  ;;  %v6251_v32 = vadd.f32 %v6250_v8, %v6249_v6 }
 0x33c   : > { %v6151_v36 = vadd.f32 %v6150_v28, %v6149_v38  ;;  %v6252_v9 = vrot.slane %v6251_v32, 2 }
 0x33e   : > { %v6152_v60 = vrot.slane %v6151_v36, 1  ;;  %v6253_v2 = vadd.f32 %v6252_v9, %v6251_v32 }
 0x340   : > { %v6153_v7 = vadd.f32 %v6152_v60, %v6151_v36  ;;  %v6254_v27 = vrot.slane %v6253_v2, 1 }
 0x342   : > { %6154 = vst.msk [vmem:[%s265_s9] sm:$0x1] %vm422_vm1, %v6153_v7  ;;  %v6255_v46 = vadd.f32 %v6254_v27, %v6253_v2 }
 0x344   : > { %6256 = vst.msk [vmem:[%s268_s12] sm:$0x1] %vm422_vm1, %v6255_v46 }
 0x345 PF: > { %s17_s21 = sadd.s32 1, %s8520_s21  }
 0x346   : > { %p14_p4 = scmp.ge.s32.totalorder %s17_s21, 4  }
 0x348   :  { %16 = sbr.rel (!%p14_p4) target bundleno = 1 (0x1), region = 101 }

</bundles_post_ra>
